<compile_context>
chip_gen: v7x
topology: tpu7x:2x2x1
jax: 0.10.0
libtpu: 0.0.40
codegen_flags: <defaults>
</compile_context>

<pallas_src>
import math

import jax
import jax.numpy as jnp
from jax.experimental import pallas as pl
from jax.experimental.pallas import tpu as pltpu

_SQRT_HALF = 0.7071067811865476
_BN_EPS = 1e-5                      # PyTorch BatchNorm2d default
_VMEM_LIMIT = 48 * 1024 * 1024      # explicit budget: stays under v7x's 64 MiB


def _gelu_exact(x):
    # PyTorch nn.GELU() default: exact (erf-based) GELU, computed in f32.
    return 0.5 * x * (1.0 + jax.lax.erf(x * _SQRT_HALF))


# ----------------------------------------------------------------------------
# Fused ConvBlock kernel: 3x (conv + GELU) -> pool -> eval BN (-> Dropout=id)
# ----------------------------------------------------------------------------
def _make_fused_kernel(*, KH, KW, stride, Cin, C, pad,
                       OH1, OW1, OH2, OW2, OH3, OW3,
                       ph, pw, sp, POH, POW, pool_type):
    """Builds the per-batch-element fused kernel with all shapes baked in."""
    inv_pool = 1.0 / float(ph * pw)

    def _win(ref, kh, kw, oh, ow, s):
        # Static-offset window read; strided pl.ds only when the stride is > 1.
        if s == 1:
            return ref[pl.ds(kh, oh), pl.ds(kw, ow), :]
        return ref[pl.ds(kh, oh, stride=s), pl.ds(kw, ow, stride=s), :]

    def _conv_gelu(src_ref, w_ref, b_ref, oh, ow, cin):
        # KH*KW accumulated MXU dots (bf16 operands, f32 accumulate); the
        # per-tap windows are formed from the VMEM-resident slab (no HBM
        # im2col), then bias + exact GELU in f32.
        acc = jnp.zeros((oh * ow, C), jnp.float32)
        for kh in range(KH):
            for kw in range(KW):
                win = _win(src_ref, kh, kw, oh, ow, stride)        # (oh, ow, cin)
                lhs = win.reshape(oh * ow, cin)
                acc = acc + jnp.dot(lhs, w_ref[kh * KW + kw],
                                    preferred_element_type=jnp.float32)
        return _gelu_exact(acc + b_ref[...])                        # (oh*ow, C) f32

    def kernel(x_ref, w1_ref, b1_ref, w2_ref, b2_ref, w3_ref, b3_ref,
               scale_ref, shift_ref, o_ref, s1_ref, s2_ref, s3_ref):
        # Zero the inter-conv scratch each step so the padding ring is zero
        # (cheap: VMEM-only, and safe under "parallel" megacore splitting).
        s1_ref[...] = jnp.zeros(s1_ref.shape, s1_ref.dtype)
        s2_ref[...] = jnp.zeros(s2_ref.shape, s2_ref.dtype)

        # conv1 + GELU (reads the pre-padded bf16 input block)
        h1 = _conv_gelu(x_ref, w1_ref, b1_ref, OH1, OW1, Cin)
        s1_ref[pl.ds(pad, OH1), pl.ds(pad, OW1), :] = (
            h1.astype(s1_ref.dtype).reshape(OH1, OW1, C))

        # conv2 + GELU (reads bf16 VMEM scratch)
        h2 = _conv_gelu(s1_ref, w2_ref, b2_ref, OH2, OW2, C)
        s2_ref[pl.ds(pad, OH2), pl.ds(pad, OW2), :] = (
            h2.astype(s2_ref.dtype).reshape(OH2, OW2, C))

        # conv3 + GELU (kept f32 for the pool/BN epilogue)
        h3 = _conv_gelu(s2_ref, w3_ref, b3_ref, OH3, OW3, C)
        s3_ref[...] = h3.reshape(OH3, OW3, C)

        # pool (+ eval BatchNorm; Dropout = identity in eval mode)
        red = None
        for i in range(ph):
            for j in range(pw):
                tap = _win(s3_ref, i, j, POH, POW, sp)              # (POH, POW, C)
                if red is None:
                    red = tap
                elif pool_type == 'max':
                    red = jnp.maximum(red, tap)
                else:
                    red = red + tap
        if pool_type != 'max':
            red = red * inv_pool
        o_ref[...] = (red * scale_ref[...] + shift_ref[...]).astype(o_ref.dtype)

    return kernel


def conv_block_forward(x_nhwc, w1, b1, w2, b2, w3, b3, bn_scale, bn_shift, *,
                       kernel_size, stride, pool, pool_type):
    """Fused ConvBlock forward. x_nhwc: (N, H, W, Cin) f32 -> (N, POH, POW, C) f32."""
    N, H, W, Cin = x_nhwc.shape
    k, s, p = kernel_size, stride, kernel_size // 2
    C = w1.shape[-1]

    def out_dim(d):
        return (d + 2 * p - k) // s + 1

    OH1, OW1 = out_dim(H), out_dim(W)
    OH2, OW2 = out_dim(OH1), out_dim(OW1)
    OH3, OW3 = out_dim(OH2), out_dim(OW2)
    ph, pw = pool
    sp = pool[1]                       # module passes stride=pool[1] (int -> both dims)
    POH = (OH3 - ph) // sp + 1
    POW = (OW3 - pw) // sp + 1

    # The only wrapper-side data prep: spatial zero-pad + bf16 cast of the input.
    x_pad = jnp.pad(x_nhwc, ((0, 0), (p, p), (p, p), (0, 0))).astype(jnp.bfloat16)
    Hp, Wp = H + 2 * p, W + 2 * p

    kernel = _make_fused_kernel(
        KH=k, KW=k, stride=s, Cin=Cin, C=C, pad=p,
        OH1=OH1, OW1=OW1, OH2=OH2, OW2=OW2, OH3=OH3, OW3=OW3,
        ph=ph, pw=pw, sp=sp, POH=POH, POW=POW, pool_type=pool_type)

    flops = 2 * N * C * k * k * (OH1 * OW1 * Cin + (OH2 * OW2 + OH3 * OW3) * C)
    cost = pl.CostEstimate(
        flops=flops,
        transcendentals=N * C * (OH1 * OW1 + OH2 * OW2 + OH3 * OW3),
        bytes_accessed=(x_pad.size * 2
                        + (w1.size + w2.size + w3.size) * 2
                        + (b1.size + b2.size + b3.size) * 4
                        + 2 * bn_scale.size * 4
                        + N * POH * POW * C * 4))

    return pl.pallas_call(
        kernel,
        out_shape=jax.ShapeDtypeStruct((N, POH, POW, C), jnp.float32),
        grid_spec=pltpu.PrefetchScalarGridSpec(
            num_scalar_prefetch=0,
            grid=(N,),
            in_specs=[
                pl.BlockSpec((None, Hp, Wp, Cin), lambda n: (n, 0, 0, 0)),
                pl.BlockSpec(w1.shape, lambda n: (0, 0, 0)),
                pl.BlockSpec(b1.shape, lambda n: (0, 0)),
                pl.BlockSpec(w2.shape, lambda n: (0, 0, 0)),
                pl.BlockSpec(b2.shape, lambda n: (0, 0)),
                pl.BlockSpec(w3.shape, lambda n: (0, 0, 0)),
                pl.BlockSpec(b3.shape, lambda n: (0, 0)),
                pl.BlockSpec(bn_scale.shape, lambda n: (0, 0, 0)),
                pl.BlockSpec(bn_shift.shape, lambda n: (0, 0, 0)),
            ],
            out_specs=pl.BlockSpec((None, POH, POW, C), lambda n: (n, 0, 0, 0)),
            scratch_shapes=[
                pltpu.VMEM((OH1 + 2 * p, OW1 + 2 * p, C), jnp.bfloat16),
                pltpu.VMEM((OH2 + 2 * p, OW2 + 2 * p, C), jnp.bfloat16),
                pltpu.VMEM((OH3, OW3, C), jnp.float32),
            ]),
        compiler_params=pltpu.CompilerParams(
            dimension_semantics=("parallel",),
            vmem_limit_bytes=_VMEM_LIMIT),
        cost_estimate=cost,
    )(x_pad, w1, b1, w2, b2, w3, b3, bn_scale, bn_shift)


# ----------------------------------------------------------------------------
# ConvBlock wrapper (NCHW public interface, NHWC internally)
# ----------------------------------------------------------------------------
class ConvBlock:
    """JAX/Pallas port of sleep_model_v2.model2.ConvBlock (eval-mode forward)."""

    def __init__(self, in_channels, out_channels, kernel_size, stride, pool,
                 pool_type='max', dropout_prob=0.5, *, key):
        self.kernel_size = kernel_size
        self.stride = stride
        self.pool = pool
        self.pool_type = pool_type
        self.dropout_prob = dropout_prob  # TODO(synk): unused (eval Dropout = identity)

        k = kernel_size
        keys = jax.random.split(key, 6)

        def conv_init(kw_key, kb_key, cin, cout):
            # PyTorch Conv2d default init: U(-1/sqrt(fan_in), 1/sqrt(fan_in)).
            fan_in = cin * k * k
            bound = 1.0 / math.sqrt(fan_in)
            w = jax.random.uniform(kw_key, (k, k, cin, cout), jnp.float32,
                                   minval=-bound, maxval=bound)      # HWIO
            b = jax.random.uniform(kb_key, (cout,), jnp.float32,
                                   minval=-bound, maxval=bound)
            # Tap-major packing (kh*KW + kw, cin, cout) in bf16 for the MXU.
            w_taps = w.reshape(k * k, cin, cout).astype(jnp.bfloat16)
            return w_taps, b.reshape(1, cout)

        self.w1, self.b1 = conv_init(keys[0], keys[1], in_channels, out_channels)
        self.w2, self.b2 = conv_init(keys[2], keys[3], out_channels, out_channels)
        self.w3, self.b3 = conv_init(keys[4], keys[5], out_channels, out_channels)

        # BatchNorm2d params / running stats at PyTorch init values, pre-folded
        # (eval mode) to a single scale/shift pair consumed in the kernel epilogue.
        gamma = jnp.ones((out_channels,), jnp.float32)
        beta = jnp.zeros((out_channels,), jnp.float32)
        run_mean = jnp.zeros((out_channels,), jnp.float32)
        run_var = jnp.ones((out_channels,), jnp.float32)
        scale = gamma * jax.lax.rsqrt(run_var + _BN_EPS)
        self.bn_scale = scale.reshape(1, 1, out_channels)
        self.bn_shift = (beta - run_mean * scale).reshape(1, 1, out_channels)

    def __call__(self, x_nchw):
        # NCHW (PyTorch) -> NHWC (kernel layout)
        x = jnp.transpose(x_nchw, (0, 2, 3, 1)).astype(jnp.float32)
        y = conv_block_forward(
            x, self.w1, self.b1, self.w2, self.b2, self.w3, self.b3,
            self.bn_scale, self.bn_shift,
            kernel_size=self.kernel_size, stride=self.stride,
            pool=self.pool, pool_type=self.pool_type)
        # NHWC -> NCHW to match the PyTorch output convention.
        return jnp.transpose(y, (0, 3, 1, 2))


# ----------------------------------------------------------------------------
# Pure-JAX f32 reference (for a tolerance check of the bf16 fused kernel)
# ----------------------------------------------------------------------------
def _reference_forward(x_nchw, block):
    k, s, p = block.kernel_size, block.stride, block.kernel_size // 2
    x = jnp.transpose(x_nchw, (0, 2, 3, 1)).astype(jnp.float32)

    def conv_gelu(h, w_taps, b):
        cin, cout = w_taps.shape[1], w_taps.shape[2]
        w = w_taps.astype(jnp.float32).reshape(k, k, cin, cout)
        y = jax.lax.conv_general_dilated(
            h, w, window_strides=(s, s), padding=[(p, p), (p, p)],
            dimension_numbers=('NHWC', 'HWIO', 'NHWC'))
        return _gelu_exact(y + b.reshape(1, 1, 1, cout))

    h = conv_gelu(x, block.w1, block.b1)
    h = conv_gelu(h, block.w2, block.b2)
    h = conv_gelu(h, block.w3, block.b3)
    ph, pw = block.pool
    sp = block.pool[1]
    if block.pool_type == 'max':
        h = jax.lax.reduce_window(h, -jnp.inf, jax.lax.max,
                                  (1, ph, pw, 1), (1, sp, sp, 1), 'VALID')
    else:
        h = jax.lax.reduce_window(h, 0.0, jax.lax.add,
                                  (1, ph, pw, 1), (1, sp, sp, 1), 'VALID') / (ph * pw)
    h = h * block.bn_scale + block.bn_shift
    return jnp.transpose(h, (0, 3, 1, 2))


if __name__ == "__main__":
    key = jax.random.PRNGKey(0)
    k_x, k_p = jax.random.split(key)

    # ConvBlock(in_channels=4, out_channels=8, kernel_size=3, stride=1, pool=(2,2))
    x = jax.random.normal(k_x, (2, 4, 16, 16), jnp.float32)   # NCHW, like PyTorch
    block = ConvBlock(in_channels=4, out_channels=8, kernel_size=3, stride=1,
                      pool=(2, 2), pool_type='max', dropout_prob=0.5, key=k_p)

    fwd = jax.jit(lambda v: block(v))
    out = jax.block_until_ready(fwd(x))
    assert out.shape == (2, 8, 8, 8), out.shape
    assert bool(jnp.all(jnp.isfinite(out)))

    # Tolerance check vs. pure-JAX f32 reference (bf16 MXU operands in kernel).
    ref = jax.block_until_ready(_reference_forward(x, block))
    max_err = float(jnp.max(jnp.abs(out - ref)))
    assert max_err < 5e-2, max_err

    print("KERNEL_OK")
</pallas_src>

<mosaic_0001>
module attributes {stable_mosaic.version = 11 : i64} {
  func.func @kernel(%arg0: i32, %arg1: memref<1x18x18x4xbf16, #tpu.memory_space<vmem>>, %arg2: memref<9x4x8xbf16, #tpu.memory_space<vmem>>, %arg3: memref<1x8xf32, #tpu.memory_space<vmem>>, %arg4: memref<9x8x8xbf16, #tpu.memory_space<vmem>>, %arg5: memref<1x8xf32, #tpu.memory_space<vmem>>, %arg6: memref<9x8x8xbf16, #tpu.memory_space<vmem>>, %arg7: memref<1x8xf32, #tpu.memory_space<vmem>>, %arg8: memref<1x1x8xf32, #tpu.memory_space<vmem>>, %arg9: memref<1x1x8xf32, #tpu.memory_space<vmem>>, %arg10: memref<1x8x8x8xf32, #tpu.memory_space<vmem>>, %arg11: memref<18x18x8xbf16, #tpu.memory_space<vmem>>, %arg12: memref<18x18x8xbf16, #tpu.memory_space<vmem>>, %arg13: memref<16x16x8xf32, #tpu.memory_space<vmem>>) attributes {dimension_semantics = [#tpu.dimension_semantics<parallel>], iteration_bounds = array<i64: 2>, scalar_prefetch = 0 : i64, scratch_operands = 3 : i64, tpu.core_type = #tpu.core_type<tc>, window_params = [{transform_indices = @transform_0, window_bounds = array<i64: 1, 18, 18, 4>}, {pipeline_mode = #tpu.pipeline_mode<synchronous>, transform_indices = @transform_1, window_bounds = array<i64: 9, 4, 8>}, {pipeline_mode = #tpu.pipeline_mode<synchronous>, transform_indices = @transform_2, window_bounds = array<i64: 1, 8>}, {pipeline_mode = #tpu.pipeline_mode<synchronous>, transform_indices = @transform_3, window_bounds = array<i64: 9, 8, 8>}, {pipeline_mode = #tpu.pipeline_mode<synchronous>, transform_indices = @transform_4, window_bounds = array<i64: 1, 8>}, {pipeline_mode = #tpu.pipeline_mode<synchronous>, transform_indices = @transform_5, window_bounds = array<i64: 9, 8, 8>}, {pipeline_mode = #tpu.pipeline_mode<synchronous>, transform_indices = @transform_6, window_bounds = array<i64: 1, 8>}, {pipeline_mode = #tpu.pipeline_mode<synchronous>, transform_indices = @transform_7, window_bounds = array<i64: 1, 1, 8>}, {pipeline_mode = #tpu.pipeline_mode<synchronous>, transform_indices = @transform_8, window_bounds = array<i64: 1, 1, 8>}, {transform_indices = @transform_9, window_bounds = array<i64: 1, 8, 8, 8>}]} {
    %cst = arith.constant 0.000000e+00 : bf16
    %0 = vector.broadcast %cst : bf16 to vector<18x18x8xbf16>
    %c0 = arith.constant 0 : index
    %c0_0 = arith.constant 0 : index
    %c0_1 = arith.constant 0 : index
    %1 = vector.load %arg11[%c0, %c0_0, %c0_1] : memref<18x18x8xbf16, #tpu.memory_space<vmem>>, vector<18x18x8xbf16>
    tpu.vector_store %arg11[%c0, %c0_0, %c0_1], %0 {strides = array<i32>} : memref<18x18x8xbf16, #tpu.memory_space<vmem>>, vector<18x18x8xbf16>,
    %cst_2 = arith.constant 0.000000e+00 : bf16
    %2 = vector.broadcast %cst_2 : bf16 to vector<18x18x8xbf16>
    %c0_3 = arith.constant 0 : index
    %c0_4 = arith.constant 0 : index
    %c0_5 = arith.constant 0 : index
    %3 = vector.load %arg12[%c0_3, %c0_4, %c0_5] : memref<18x18x8xbf16, #tpu.memory_space<vmem>>, vector<18x18x8xbf16>
    tpu.vector_store %arg12[%c0_3, %c0_4, %c0_5], %2 {strides = array<i32>} : memref<18x18x8xbf16, #tpu.memory_space<vmem>>, vector<18x18x8xbf16>,
    %cst_6 = arith.constant 0.000000e+00 : f32
    %4 = vector.broadcast %cst_6 : f32 to vector<256x8xf32>
    %c0_7 = arith.constant 0 : index
    %c0_8 = arith.constant 0 : index
    %c0_9 = arith.constant 0 : index
    %c0_10 = arith.constant 0 : index
    %5 = vector.load %arg1[%c0_7, %c0_8, %c0_9, %c0_10] : memref<1x18x18x4xbf16, #tpu.memory_space<vmem>>, vector<1x16x16x4xbf16>
    %6 = vector.shape_cast %5 : vector<1x16x16x4xbf16> to vector<16x16x4xbf16>
    %7 = vector.shape_cast %6 : vector<16x16x4xbf16> to vector<256x4xbf16>
    %c0_11 = arith.constant 0 : index
    %c0_12 = arith.constant 0 : index
    %c0_13 = arith.constant 0 : index
    %8 = vector.load %arg2[%c0_11, %c0_12, %c0_13] : memref<9x4x8xbf16, #tpu.memory_space<vmem>>, vector<1x4x8xbf16>
    %9 = vector.shape_cast %8 : vector<1x4x8xbf16> to vector<4x8xbf16>
    %cst_14 = arith.constant dense<0.000000e+00> : vector<256x8xf32>
    %10 = tpu.matmul %7, %9, %cst_14 {dimension_numbers = #tpu.dot_dimension_numbers<[1], [0], [0], [1], [0, 0, 1, 1], [], []>} : vector<256x4xbf16>, vector<4x8xbf16>, vector<256x8xf32> -> vector<256x8xf32>
    %11 = arith.addf %4, %10 : vector<256x8xf32>
    %c0_15 = arith.constant 0 : index
    %c0_16 = arith.constant 0 : index
    %c1 = arith.constant 1 : index
    %c0_17 = arith.constant 0 : index
    %12 = vector.load %arg1[%c0_15, %c0_16, %c1, %c0_17] : memref<1x18x18x4xbf16, #tpu.memory_space<vmem>>, vector<1x16x16x4xbf16>
    %13 = vector.shape_cast %12 : vector<1x16x16x4xbf16> to vector<16x16x4xbf16>
    %14 = vector.shape_cast %13 : vector<16x16x4xbf16> to vector<256x4xbf16>
    %c1_18 = arith.constant 1 : index
    %c0_19 = arith.constant 0 : index
    %c0_20 = arith.constant 0 : index
    %15 = vector.load %arg2[%c1_18, %c0_19, %c0_20] : memref<9x4x8xbf16, #tpu.memory_space<vmem>>, vector<1x4x8xbf16>
    %16 = vector.shape_cast %15 : vector<1x4x8xbf16> to vector<4x8xbf16>
    %cst_21 = arith.constant dense<0.000000e+00> : vector<256x8xf32>
    %17 = tpu.matmul %14, %16, %cst_21 {dimension_numbers = #tpu.dot_dimension_numbers<[1], [0], [0], [1], [0, 0, 1, 1], [], []>} : vector<256x4xbf16>, vector<4x8xbf16>, vector<256x8xf32> -> vector<256x8xf32>
    %18 = arith.addf %11, %17 : vector<256x8xf32>
    %c0_22 = arith.constant 0 : index
    %c0_23 = arith.constant 0 : index
    %c2 = arith.constant 2 : index
    %c0_24 = arith.constant 0 : index
    %19 = vector.load %arg1[%c0_22, %c0_23, %c2, %c0_24] : memref<1x18x18x4xbf16, #tpu.memory_space<vmem>>, vector<1x16x16x4xbf16>
    %20 = vector.shape_cast %19 : vector<1x16x16x4xbf16> to vector<16x16x4xbf16>
    %21 = vector.shape_cast %20 : vector<16x16x4xbf16> to vector<256x4xbf16>
    %c2_25 = arith.constant 2 : index
    %c0_26 = arith.constant 0 : index
    %c0_27 = arith.constant 0 : index
    %22 = vector.load %arg2[%c2_25, %c0_26, %c0_27] : memref<9x4x8xbf16, #tpu.memory_space<vmem>>, vector<1x4x8xbf16>
    %23 = vector.shape_cast %22 : vector<1x4x8xbf16> to vector<4x8xbf16>
    %cst_28 = arith.constant dense<0.000000e+00> : vector<256x8xf32>
    %24 = tpu.matmul %21, %23, %cst_28 {dimension_numbers = #tpu.dot_dimension_numbers<[1], [0], [0], [1], [0, 0, 1, 1], [], []>} : vector<256x4xbf16>, vector<4x8xbf16>, vector<256x8xf32> -> vector<256x8xf32>
    %25 = arith.addf %18, %24 : vector<256x8xf32>
    %c0_29 = arith.constant 0 : index
    %c1_30 = arith.constant 1 : index
    %c0_31 = arith.constant 0 : index
    %c0_32 = arith.constant 0 : index
    %26 = vector.load %arg1[%c0_29, %c1_30, %c0_31, %c0_32] : memref<1x18x18x4xbf16, #tpu.memory_space<vmem>>, vector<1x16x16x4xbf16>
    %27 = vector.shape_cast %26 : vector<1x16x16x4xbf16> to vector<16x16x4xbf16>
    %28 = vector.shape_cast %27 : vector<16x16x4xbf16> to vector<256x4xbf16>
    %c3 = arith.constant 3 : index
    %c0_33 = arith.constant 0 : index
    %c0_34 = arith.constant 0 : index
    %29 = vector.load %arg2[%c3, %c0_33, %c0_34] : memref<9x4x8xbf16, #tpu.memory_space<vmem>>, vector<1x4x8xbf16>
    %30 = vector.shape_cast %29 : vector<1x4x8xbf16> to vector<4x8xbf16>
    %cst_35 = arith.constant dense<0.000000e+00> : vector<256x8xf32>
    %31 = tpu.matmul %28, %30, %cst_35 {dimension_numbers = #tpu.dot_dimension_numbers<[1], [0], [0], [1], [0, 0, 1, 1], [], []>} : vector<256x4xbf16>, vector<4x8xbf16>, vector<256x8xf32> -> vector<256x8xf32>
    %32 = arith.addf %25, %31 : vector<256x8xf32>
    %c0_36 = arith.constant 0 : index
    %c1_37 = arith.constant 1 : index
    %c1_38 = arith.constant 1 : index
    %c0_39 = arith.constant 0 : index
    %33 = vector.load %arg1[%c0_36, %c1_37, %c1_38, %c0_39] : memref<1x18x18x4xbf16, #tpu.memory_space<vmem>>, vector<1x16x16x4xbf16>
    %34 = vector.shape_cast %33 : vector<1x16x16x4xbf16> to vector<16x16x4xbf16>
    %35 = vector.shape_cast %34 : vector<16x16x4xbf16> to vector<256x4xbf16>
    %c4 = arith.constant 4 : index
    %c0_40 = arith.constant 0 : index
    %c0_41 = arith.constant 0 : index
    %36 = vector.load %arg2[%c4, %c0_40, %c0_41] : memref<9x4x8xbf16, #tpu.memory_space<vmem>>, vector<1x4x8xbf16>
    %37 = vector.shape_cast %36 : vector<1x4x8xbf16> to vector<4x8xbf16>
    %cst_42 = arith.constant dense<0.000000e+00> : vector<256x8xf32>
    %38 = tpu.matmul %35, %37, %cst_42 {dimension_numbers = #tpu.dot_dimension_numbers<[1], [0], [0], [1], [0, 0, 1, 1], [], []>} : vector<256x4xbf16>, vector<4x8xbf16>, vector<256x8xf32> -> vector<256x8xf32>
    %39 = arith.addf %32, %38 : vector<256x8xf32>
    %c0_43 = arith.constant 0 : index
    %c1_44 = arith.constant 1 : index
    %c2_45 = arith.constant 2 : index
    %c0_46 = arith.constant 0 : index
    %40 = vector.load %arg1[%c0_43, %c1_44, %c2_45, %c0_46] : memref<1x18x18x4xbf16, #tpu.memory_space<vmem>>, vector<1x16x16x4xbf16>
    %41 = vector.shape_cast %40 : vector<1x16x16x4xbf16> to vector<16x16x4xbf16>
    %42 = vector.shape_cast %41 : vector<16x16x4xbf16> to vector<256x4xbf16>
    %c5 = arith.constant 5 : index
    %c0_47 = arith.constant 0 : index
    %c0_48 = arith.constant 0 : index
    %43 = vector.load %arg2[%c5, %c0_47, %c0_48] : memref<9x4x8xbf16, #tpu.memory_space<vmem>>, vector<1x4x8xbf16>
    %44 = vector.shape_cast %43 : vector<1x4x8xbf16> to vector<4x8xbf16>
    %cst_49 = arith.constant dense<0.000000e+00> : vector<256x8xf32>
    %45 = tpu.matmul %42, %44, %cst_49 {dimension_numbers = #tpu.dot_dimension_numbers<[1], [0], [0], [1], [0, 0, 1, 1], [], []>} : vector<256x4xbf16>, vector<4x8xbf16>, vector<256x8xf32> -> vector<256x8xf32>
    %46 = arith.addf %39, %45 : vector<256x8xf32>
    %c0_50 = arith.constant 0 : index
    %c2_51 = arith.constant 2 : index
    %c0_52 = arith.constant 0 : index
    %c0_53 = arith.constant 0 : index
    %47 = vector.load %arg1[%c0_50, %c2_51, %c0_52, %c0_53] : memref<1x18x18x4xbf16, #tpu.memory_space<vmem>>, vector<1x16x16x4xbf16>
    %48 = vector.shape_cast %47 : vector<1x16x16x4xbf16> to vector<16x16x4xbf16>
    %49 = vector.shape_cast %48 : vector<16x16x4xbf16> to vector<256x4xbf16>
    %c6 = arith.constant 6 : index
    %c0_54 = arith.constant 0 : index
    %c0_55 = arith.constant 0 : index
    %50 = vector.load %arg2[%c6, %c0_54, %c0_55] : memref<9x4x8xbf16, #tpu.memory_space<vmem>>, vector<1x4x8xbf16>
    %51 = vector.shape_cast %50 : vector<1x4x8xbf16> to vector<4x8xbf16>
    %cst_56 = arith.constant dense<0.000000e+00> : vector<256x8xf32>
    %52 = tpu.matmul %49, %51, %cst_56 {dimension_numbers = #tpu.dot_dimension_numbers<[1], [0], [0], [1], [0, 0, 1, 1], [], []>} : vector<256x4xbf16>, vector<4x8xbf16>, vector<256x8xf32> -> vector<256x8xf32>
    %53 = arith.addf %46, %52 : vector<256x8xf32>
    %c0_57 = arith.constant 0 : index
    %c2_58 = arith.constant 2 : index
    %c1_59 = arith.constant 1 : index
    %c0_60 = arith.constant 0 : index
    %54 = vector.load %arg1[%c0_57, %c2_58, %c1_59, %c0_60] : memref<1x18x18x4xbf16, #tpu.memory_space<vmem>>, vector<1x16x16x4xbf16>
    %55 = vector.shape_cast %54 : vector<1x16x16x4xbf16> to vector<16x16x4xbf16>
    %56 = vector.shape_cast %55 : vector<16x16x4xbf16> to vector<256x4xbf16>
    %c7 = arith.constant 7 : index
    %c0_61 = arith.constant 0 : index
    %c0_62 = arith.constant 0 : index
    %57 = vector.load %arg2[%c7, %c0_61, %c0_62] : memref<9x4x8xbf16, #tpu.memory_space<vmem>>, vector<1x4x8xbf16>
    %58 = vector.shape_cast %57 : vector<1x4x8xbf16> to vector<4x8xbf16>
    %cst_63 = arith.constant dense<0.000000e+00> : vector<256x8xf32>
    %59 = tpu.matmul %56, %58, %cst_63 {dimension_numbers = #tpu.dot_dimension_numbers<[1], [0], [0], [1], [0, 0, 1, 1], [], []>} : vector<256x4xbf16>, vector<4x8xbf16>, vector<256x8xf32> -> vector<256x8xf32>
    %60 = arith.addf %53, %59 : vector<256x8xf32>
    %c0_64 = arith.constant 0 : index
    %c2_65 = arith.constant 2 : index
    %c2_66 = arith.constant 2 : index
    %c0_67 = arith.constant 0 : index
    %61 = vector.load %arg1[%c0_64, %c2_65, %c2_66, %c0_67] : memref<1x18x18x4xbf16, #tpu.memory_space<vmem>>, vector<1x16x16x4xbf16>
    %62 = vector.shape_cast %61 : vector<1x16x16x4xbf16> to vector<16x16x4xbf16>
    %63 = vector.shape_cast %62 : vector<16x16x4xbf16> to vector<256x4xbf16>
    %c8 = arith.constant 8 : index
    %c0_68 = arith.constant 0 : index
    %c0_69 = arith.constant 0 : index
    %64 = vector.load %arg2[%c8, %c0_68, %c0_69] : memref<9x4x8xbf16, #tpu.memory_space<vmem>>, vector<1x4x8xbf16>
    %65 = vector.shape_cast %64 : vector<1x4x8xbf16> to vector<4x8xbf16>
    %cst_70 = arith.constant dense<0.000000e+00> : vector<256x8xf32>
    %66 = tpu.matmul %63, %65, %cst_70 {dimension_numbers = #tpu.dot_dimension_numbers<[1], [0], [0], [1], [0, 0, 1, 1], [], []>} : vector<256x4xbf16>, vector<4x8xbf16>, vector<256x8xf32> -> vector<256x8xf32>
    %67 = arith.addf %60, %66 : vector<256x8xf32>
    %c0_71 = arith.constant 0 : index
    %c0_72 = arith.constant 0 : index
    %68 = vector.load %arg3[%c0_71, %c0_72] : memref<1x8xf32, #tpu.memory_space<vmem>>, vector<1x8xf32>
    %69 = vector.broadcast %68 : vector<1x8xf32> to vector<256x8xf32>
    %70 = arith.addf %67, %69 : vector<256x8xf32>
    %cst_73 = arith.constant 5.000000e-01 : f32
    %71 = vector.broadcast %cst_73 : f32 to vector<256x8xf32>
    %72 = arith.mulf %71, %70 : vector<256x8xf32>
    %cst_74 = arith.constant 0.707106769 : f32
    %73 = vector.broadcast %cst_74 : f32 to vector<256x8xf32>
    %74 = arith.mulf %70, %73 : vector<256x8xf32>
    %75 = math.erf %74 : vector<256x8xf32>
    %cst_75 = arith.constant 1.000000e+00 : f32
    %76 = vector.broadcast %cst_75 : f32 to vector<256x8xf32>
    %77 = arith.addf %76, %75 : vector<256x8xf32>
    %78 = arith.mulf %72, %77 : vector<256x8xf32>
    %79 = arith.truncf %78 : vector<256x8xf32> to vector<256x8xbf16>
    %80 = vector.shape_cast %79 : vector<256x8xbf16> to vector<16x16x8xbf16>
    %c1_76 = arith.constant 1 : index
    %c1_77 = arith.constant 1 : index
    %c0_78 = arith.constant 0 : index
    %81 = vector.load %arg11[%c1_76, %c1_77, %c0_78] : memref<18x18x8xbf16, #tpu.memory_space<vmem>>, vector<16x16x8xbf16>
    tpu.vector_store %arg11[%c1_76, %c1_77, %c0_78], %80 {strides = array<i32>} : memref<18x18x8xbf16, #tpu.memory_space<vmem>>, vector<16x16x8xbf16>,
    %cst_79 = arith.constant 0.000000e+00 : f32
    %82 = vector.broadcast %cst_79 : f32 to vector<256x8xf32>
    %c0_80 = arith.constant 0 : index
    %c0_81 = arith.constant 0 : index
    %c0_82 = arith.constant 0 : index
    %83 = vector.load %arg11[%c0_80, %c0_81, %c0_82] : memref<18x18x8xbf16, #tpu.memory_space<vmem>>, vector<16x16x8xbf16>
    %84 = vector.shape_cast %83 : vector<16x16x8xbf16> to vector<256x8xbf16>
    %c0_83 = arith.constant 0 : index
    %c0_84 = arith.constant 0 : index
    %c0_85 = arith.constant 0 : index
    %85 = vector.load %arg4[%c0_83, %c0_84, %c0_85] : memref<9x8x8xbf16, #tpu.memory_space<vmem>>, vector<1x8x8xbf16>
    %86 = vector.shape_cast %85 : vector<1x8x8xbf16> to vector<8x8xbf16>
    %cst_86 = arith.constant dense<0.000000e+00> : vector<256x8xf32>
    %87 = tpu.matmul %84, %86, %cst_86 {dimension_numbers = #tpu.dot_dimension_numbers<[1], [0], [0], [1], [0, 0, 1, 1], [], []>} : vector<256x8xbf16>, vector<8x8xbf16>, vector<256x8xf32> -> vector<256x8xf32>
    %88 = arith.addf %82, %87 : vector<256x8xf32>
    %c0_87 = arith.constant 0 : index
    %c1_88 = arith.constant 1 : index
    %c0_89 = arith.constant 0 : index
    %89 = vector.load %arg11[%c0_87, %c1_88, %c0_89] : memref<18x18x8xbf16, #tpu.memory_space<vmem>>, vector<16x16x8xbf16>
    %90 = vector.shape_cast %89 : vector<16x16x8xbf16> to vector<256x8xbf16>
    %c1_90 = arith.constant 1 : index
    %c0_91 = arith.constant 0 : index
    %c0_92 = arith.constant 0 : index
    %91 = vector.load %arg4[%c1_90, %c0_91, %c0_92] : memref<9x8x8xbf16, #tpu.memory_space<vmem>>, vector<1x8x8xbf16>
    %92 = vector.shape_cast %91 : vector<1x8x8xbf16> to vector<8x8xbf16>
    %cst_93 = arith.constant dense<0.000000e+00> : vector<256x8xf32>
    %93 = tpu.matmul %90, %92, %cst_93 {dimension_numbers = #tpu.dot_dimension_numbers<[1], [0], [0], [1], [0, 0, 1, 1], [], []>} : vector<256x8xbf16>, vector<8x8xbf16>, vector<256x8xf32> -> vector<256x8xf32>
    %94 = arith.addf %88, %93 : vector<256x8xf32>
    %c0_94 = arith.constant 0 : index
    %c2_95 = arith.constant 2 : index
    %c0_96 = arith.constant 0 : index
    %95 = vector.load %arg11[%c0_94, %c2_95, %c0_96] : memref<18x18x8xbf16, #tpu.memory_space<vmem>>, vector<16x16x8xbf16>
    %96 = vector.shape_cast %95 : vector<16x16x8xbf16> to vector<256x8xbf16>
    %c2_97 = arith.constant 2 : index
    %c0_98 = arith.constant 0 : index
    %c0_99 = arith.constant 0 : index
    %97 = vector.load %arg4[%c2_97, %c0_98, %c0_99] : memref<9x8x8xbf16, #tpu.memory_space<vmem>>, vector<1x8x8xbf16>
    %98 = vector.shape_cast %97 : vector<1x8x8xbf16> to vector<8x8xbf16>
    %cst_100 = arith.constant dense<0.000000e+00> : vector<256x8xf32>
    %99 = tpu.matmul %96, %98, %cst_100 {dimension_numbers = #tpu.dot_dimension_numbers<[1], [0], [0], [1], [0, 0, 1, 1], [], []>} : vector<256x8xbf16>, vector<8x8xbf16>, vector<256x8xf32> -> vector<256x8xf32>
    %100 = arith.addf %94, %99 : vector<256x8xf32>
    %c1_101 = arith.constant 1 : index
    %c0_102 = arith.constant 0 : index
    %c0_103 = arith.constant 0 : index
    %101 = vector.load %arg11[%c1_101, %c0_102, %c0_103] : memref<18x18x8xbf16, #tpu.memory_space<vmem>>, vector<16x16x8xbf16>
    %102 = vector.shape_cast %101 : vector<16x16x8xbf16> to vector<256x8xbf16>
    %c3_104 = arith.constant 3 : index
    %c0_105 = arith.constant 0 : index
    %c0_106 = arith.constant 0 : index
    %103 = vector.load %arg4[%c3_104, %c0_105, %c0_106] : memref<9x8x8xbf16, #tpu.memory_space<vmem>>, vector<1x8x8xbf16>
    %104 = vector.shape_cast %103 : vector<1x8x8xbf16> to vector<8x8xbf16>
    %cst_107 = arith.constant dense<0.000000e+00> : vector<256x8xf32>
    %105 = tpu.matmul %102, %104, %cst_107 {dimension_numbers = #tpu.dot_dimension_numbers<[1], [0], [0], [1], [0, 0, 1, 1], [], []>} : vector<256x8xbf16>, vector<8x8xbf16>, vector<256x8xf32> -> vector<256x8xf32>
    %106 = arith.addf %100, %105 : vector<256x8xf32>
    %c1_108 = arith.constant 1 : index
    %c1_109 = arith.constant 1 : index
    %c0_110 = arith.constant 0 : index
    %107 = vector.load %arg11[%c1_108, %c1_109, %c0_110] : memref<18x18x8xbf16, #tpu.memory_space<vmem>>, vector<16x16x8xbf16>
    %108 = vector.shape_cast %107 : vector<16x16x8xbf16> to vector<256x8xbf16>
    %c4_111 = arith.constant 4 : index
    %c0_112 = arith.constant 0 : index
    %c0_113 = arith.constant 0 : index
    %109 = vector.load %arg4[%c4_111, %c0_112, %c0_113] : memref<9x8x8xbf16, #tpu.memory_space<vmem>>, vector<1x8x8xbf16>
    %110 = vector.shape_cast %109 : vector<1x8x8xbf16> to vector<8x8xbf16>
    %cst_114 = arith.constant dense<0.000000e+00> : vector<256x8xf32>
    %111 = tpu.matmul %108, %110, %cst_114 {dimension_numbers = #tpu.dot_dimension_numbers<[1], [0], [0], [1], [0, 0, 1, 1], [], []>} : vector<256x8xbf16>, vector<8x8xbf16>, vector<256x8xf32> -> vector<256x8xf32>
    %112 = arith.addf %106, %111 : vector<256x8xf32>
    %c1_115 = arith.constant 1 : index
    %c2_116 = arith.constant 2 : index
    %c0_117 = arith.constant 0 : index
    %113 = vector.load %arg11[%c1_115, %c2_116, %c0_117] : memref<18x18x8xbf16, #tpu.memory_space<vmem>>, vector<16x16x8xbf16>
    %114 = vector.shape_cast %113 : vector<16x16x8xbf16> to vector<256x8xbf16>
    %c5_118 = arith.constant 5 : index
    %c0_119 = arith.constant 0 : index
    %c0_120 = arith.constant 0 : index
    %115 = vector.load %arg4[%c5_118, %c0_119, %c0_120] : memref<9x8x8xbf16, #tpu.memory_space<vmem>>, vector<1x8x8xbf16>
    %116 = vector.shape_cast %115 : vector<1x8x8xbf16> to vector<8x8xbf16>
    %cst_121 = arith.constant dense<0.000000e+00> : vector<256x8xf32>
    %117 = tpu.matmul %114, %116, %cst_121 {dimension_numbers = #tpu.dot_dimension_numbers<[1], [0], [0], [1], [0, 0, 1, 1], [], []>} : vector<256x8xbf16>, vector<8x8xbf16>, vector<256x8xf32> -> vector<256x8xf32>
    %118 = arith.addf %112, %117 : vector<256x8xf32>
    %c2_122 = arith.constant 2 : index
    %c0_123 = arith.constant 0 : index
    %c0_124 = arith.constant 0 : index
    %119 = vector.load %arg11[%c2_122, %c0_123, %c0_124] : memref<18x18x8xbf16, #tpu.memory_space<vmem>>, vector<16x16x8xbf16>
    %120 = vector.shape_cast %119 : vector<16x16x8xbf16> to vector<256x8xbf16>
    %c6_125 = arith.constant 6 : index
    %c0_126 = arith.constant 0 : index
    %c0_127 = arith.constant 0 : index
    %121 = vector.load %arg4[%c6_125, %c0_126, %c0_127] : memref<9x8x8xbf16, #tpu.memory_space<vmem>>, vector<1x8x8xbf16>
    %122 = vector.shape_cast %121 : vector<1x8x8xbf16> to vector<8x8xbf16>
    %cst_128 = arith.constant dense<0.000000e+00> : vector<256x8xf32>
    %123 = tpu.matmul %120, %122, %cst_128 {dimension_numbers = #tpu.dot_dimension_numbers<[1], [0], [0], [1], [0, 0, 1, 1], [], []>} : vector<256x8xbf16>, vector<8x8xbf16>, vector<256x8xf32> -> vector<256x8xf32>
    %124 = arith.addf %118, %123 : vector<256x8xf32>
    %c2_129 = arith.constant 2 : index
    %c1_130 = arith.constant 1 : index
    %c0_131 = arith.constant 0 : index
    %125 = vector.load %arg11[%c2_129, %c1_130, %c0_131] : memref<18x18x8xbf16, #tpu.memory_space<vmem>>, vector<16x16x8xbf16>
    %126 = vector.shape_cast %125 : vector<16x16x8xbf16> to vector<256x8xbf16>
    %c7_132 = arith.constant 7 : index
    %c0_133 = arith.constant 0 : index
    %c0_134 = arith.constant 0 : index
    %127 = vector.load %arg4[%c7_132, %c0_133, %c0_134] : memref<9x8x8xbf16, #tpu.memory_space<vmem>>, vector<1x8x8xbf16>
    %128 = vector.shape_cast %127 : vector<1x8x8xbf16> to vector<8x8xbf16>
    %cst_135 = arith.constant dense<0.000000e+00> : vector<256x8xf32>
    %129 = tpu.matmul %126, %128, %cst_135 {dimension_numbers = #tpu.dot_dimension_numbers<[1], [0], [0], [1], [0, 0, 1, 1], [], []>} : vector<256x8xbf16>, vector<8x8xbf16>, vector<256x8xf32> -> vector<256x8xf32>
    %130 = arith.addf %124, %129 : vector<256x8xf32>
    %c2_136 = arith.constant 2 : index
    %c2_137 = arith.constant 2 : index
    %c0_138 = arith.constant 0 : index
    %131 = vector.load %arg11[%c2_136, %c2_137, %c0_138] : memref<18x18x8xbf16, #tpu.memory_space<vmem>>, vector<16x16x8xbf16>
    %132 = vector.shape_cast %131 : vector<16x16x8xbf16> to vector<256x8xbf16>
    %c8_139 = arith.constant 8 : index
    %c0_140 = arith.constant 0 : index
    %c0_141 = arith.constant 0 : index
    %133 = vector.load %arg4[%c8_139, %c0_140, %c0_141] : memref<9x8x8xbf16, #tpu.memory_space<vmem>>, vector<1x8x8xbf16>
    %134 = vector.shape_cast %133 : vector<1x8x8xbf16> to vector<8x8xbf16>
    %cst_142 = arith.constant dense<0.000000e+00> : vector<256x8xf32>
    %135 = tpu.matmul %132, %134, %cst_142 {dimension_numbers = #tpu.dot_dimension_numbers<[1], [0], [0], [1], [0, 0, 1, 1], [], []>} : vector<256x8xbf16>, vector<8x8xbf16>, vector<256x8xf32> -> vector<256x8xf32>
    %136 = arith.addf %130, %135 : vector<256x8xf32>
    %c0_143 = arith.constant 0 : index
    %c0_144 = arith.constant 0 : index
    %137 = vector.load %arg5[%c0_143, %c0_144] : memref<1x8xf32, #tpu.memory_space<vmem>>, vector<1x8xf32>
    %138 = vector.broadcast %137 : vector<1x8xf32> to vector<256x8xf32>
    %139 = arith.addf %136, %138 : vector<256x8xf32>
    %cst_145 = arith.constant 5.000000e-01 : f32
    %140 = vector.broadcast %cst_145 : f32 to vector<256x8xf32>
    %141 = arith.mulf %140, %139 : vector<256x8xf32>
    %cst_146 = arith.constant 0.707106769 : f32
    %142 = vector.broadcast %cst_146 : f32 to vector<256x8xf32>
    %143 = arith.mulf %139, %142 : vector<256x8xf32>
    %144 = math.erf %143 : vector<256x8xf32>
    %cst_147 = arith.constant 1.000000e+00 : f32
    %145 = vector.broadcast %cst_147 : f32 to vector<256x8xf32>
    %146 = arith.addf %145, %144 : vector<256x8xf32>
    %147 = arith.mulf %141, %146 : vector<256x8xf32>
    %148 = arith.truncf %147 : vector<256x8xf32> to vector<256x8xbf16>
    %149 = vector.shape_cast %148 : vector<256x8xbf16> to vector<16x16x8xbf16>
    %c1_148 = arith.constant 1 : index
    %c1_149 = arith.constant 1 : index
    %c0_150 = arith.constant 0 : index
    %150 = vector.load %arg12[%c1_148, %c1_149, %c0_150] : memref<18x18x8xbf16, #tpu.memory_space<vmem>>, vector<16x16x8xbf16>
    tpu.vector_store %arg12[%c1_148, %c1_149, %c0_150], %149 {strides = array<i32>} : memref<18x18x8xbf16, #tpu.memory_space<vmem>>, vector<16x16x8xbf16>,
    %cst_151 = arith.constant 0.000000e+00 : f32
    %151 = vector.broadcast %cst_151 : f32 to vector<256x8xf32>
    %c0_152 = arith.constant 0 : index
    %c0_153 = arith.constant 0 : index
    %c0_154 = arith.constant 0 : index
    %152 = vector.load %arg12[%c0_152, %c0_153, %c0_154] : memref<18x18x8xbf16, #tpu.memory_space<vmem>>, vector<16x16x8xbf16>
    %153 = vector.shape_cast %152 : vector<16x16x8xbf16> to vector<256x8xbf16>
    %c0_155 = arith.constant 0 : index
    %c0_156 = arith.constant 0 : index
    %c0_157 = arith.constant 0 : index
    %154 = vector.load %arg6[%c0_155, %c0_156, %c0_157] : memref<9x8x8xbf16, #tpu.memory_space<vmem>>, vector<1x8x8xbf16>
    %155 = vector.shape_cast %154 : vector<1x8x8xbf16> to vector<8x8xbf16>
    %cst_158 = arith.constant dense<0.000000e+00> : vector<256x8xf32>
    %156 = tpu.matmul %153, %155, %cst_158 {dimension_numbers = #tpu.dot_dimension_numbers<[1], [0], [0], [1], [0, 0, 1, 1], [], []>} : vector<256x8xbf16>, vector<8x8xbf16>, vector<256x8xf32> -> vector<256x8xf32>
    %157 = arith.addf %151, %156 : vector<256x8xf32>
    %c0_159 = arith.constant 0 : index
    %c1_160 = arith.constant 1 : index
    %c0_161 = arith.constant 0 : index
    %158 = vector.load %arg12[%c0_159, %c1_160, %c0_161] : memref<18x18x8xbf16, #tpu.memory_space<vmem>>, vector<16x16x8xbf16>
    %159 = vector.shape_cast %158 : vector<16x16x8xbf16> to vector<256x8xbf16>
    %c1_162 = arith.constant 1 : index
    %c0_163 = arith.constant 0 : index
    %c0_164 = arith.constant 0 : index
    %160 = vector.load %arg6[%c1_162, %c0_163, %c0_164] : memref<9x8x8xbf16, #tpu.memory_space<vmem>>, vector<1x8x8xbf16>
    %161 = vector.shape_cast %160 : vector<1x8x8xbf16> to vector<8x8xbf16>
    %cst_165 = arith.constant dense<0.000000e+00> : vector<256x8xf32>
    %162 = tpu.matmul %159, %161, %cst_165 {dimension_numbers = #tpu.dot_dimension_numbers<[1], [0], [0], [1], [0, 0, 1, 1], [], []>} : vector<256x8xbf16>, vector<8x8xbf16>, vector<256x8xf32> -> vector<256x8xf32>
    %163 = arith.addf %157, %162 : vector<256x8xf32>
    %c0_166 = arith.constant 0 : index
    %c2_167 = arith.constant 2 : index
    %c0_168 = arith.constant 0 : index
    %164 = vector.load %arg12[%c0_166, %c2_167, %c0_168] : memref<18x18x8xbf16, #tpu.memory_space<vmem>>, vector<16x16x8xbf16>
    %165 = vector.shape_cast %164 : vector<16x16x8xbf16> to vector<256x8xbf16>
    %c2_169 = arith.constant 2 : index
    %c0_170 = arith.constant 0 : index
    %c0_171 = arith.constant 0 : index
    %166 = vector.load %arg6[%c2_169, %c0_170, %c0_171] : memref<9x8x8xbf16, #tpu.memory_space<vmem>>, vector<1x8x8xbf16>
    %167 = vector.shape_cast %166 : vector<1x8x8xbf16> to vector<8x8xbf16>
    %cst_172 = arith.constant dense<0.000000e+00> : vector<256x8xf32>
    %168 = tpu.matmul %165, %167, %cst_172 {dimension_numbers = #tpu.dot_dimension_numbers<[1], [0], [0], [1], [0, 0, 1, 1], [], []>} : vector<256x8xbf16>, vector<8x8xbf16>, vector<256x8xf32> -> vector<256x8xf32>
    %169 = arith.addf %163, %168 : vector<256x8xf32>
    %c1_173 = arith.constant 1 : index
    %c0_174 = arith.constant 0 : index
    %c0_175 = arith.constant 0 : index
    %170 = vector.load %arg12[%c1_173, %c0_174, %c0_175] : memref<18x18x8xbf16, #tpu.memory_space<vmem>>, vector<16x16x8xbf16>
    %171 = vector.shape_cast %170 : vector<16x16x8xbf16> to vector<256x8xbf16>
    %c3_176 = arith.constant 3 : index
    %c0_177 = arith.constant 0 : index
    %c0_178 = arith.constant 0 : index
    %172 = vector.load %arg6[%c3_176, %c0_177, %c0_178] : memref<9x8x8xbf16, #tpu.memory_space<vmem>>, vector<1x8x8xbf16>
    %173 = vector.shape_cast %172 : vector<1x8x8xbf16> to vector<8x8xbf16>
    %cst_179 = arith.constant dense<0.000000e+00> : vector<256x8xf32>
    %174 = tpu.matmul %171, %173, %cst_179 {dimension_numbers = #tpu.dot_dimension_numbers<[1], [0], [0], [1], [0, 0, 1, 1], [], []>} : vector<256x8xbf16>, vector<8x8xbf16>, vector<256x8xf32> -> vector<256x8xf32>
    %175 = arith.addf %169, %174 : vector<256x8xf32>
    %c1_180 = arith.constant 1 : index
    %c1_181 = arith.constant 1 : index
    %c0_182 = arith.constant 0 : index
    %176 = vector.load %arg12[%c1_180, %c1_181, %c0_182] : memref<18x18x8xbf16, #tpu.memory_space<vmem>>, vector<16x16x8xbf16>
    %177 = vector.shape_cast %176 : vector<16x16x8xbf16> to vector<256x8xbf16>
    %c4_183 = arith.constant 4 : index
    %c0_184 = arith.constant 0 : index
    %c0_185 = arith.constant 0 : index
    %178 = vector.load %arg6[%c4_183, %c0_184, %c0_185] : memref<9x8x8xbf16, #tpu.memory_space<vmem>>, vector<1x8x8xbf16>
    %179 = vector.shape_cast %178 : vector<1x8x8xbf16> to vector<8x8xbf16>
    %cst_186 = arith.constant dense<0.000000e+00> : vector<256x8xf32>
    %180 = tpu.matmul %177, %179, %cst_186 {dimension_numbers = #tpu.dot_dimension_numbers<[1], [0], [0], [1], [0, 0, 1, 1], [], []>} : vector<256x8xbf16>, vector<8x8xbf16>, vector<256x8xf32> -> vector<256x8xf32>
    %181 = arith.addf %175, %180 : vector<256x8xf32>
    %c1_187 = arith.constant 1 : index
    %c2_188 = arith.constant 2 : index
    %c0_189 = arith.constant 0 : index
    %182 = vector.load %arg12[%c1_187, %c2_188, %c0_189] : memref<18x18x8xbf16, #tpu.memory_space<vmem>>, vector<16x16x8xbf16>
    %183 = vector.shape_cast %182 : vector<16x16x8xbf16> to vector<256x8xbf16>
    %c5_190 = arith.constant 5 : index
    %c0_191 = arith.constant 0 : index
    %c0_192 = arith.constant 0 : index
    %184 = vector.load %arg6[%c5_190, %c0_191, %c0_192] : memref<9x8x8xbf16, #tpu.memory_space<vmem>>, vector<1x8x8xbf16>
    %185 = vector.shape_cast %184 : vector<1x8x8xbf16> to vector<8x8xbf16>
    %cst_193 = arith.constant dense<0.000000e+00> : vector<256x8xf32>
    %186 = tpu.matmul %183, %185, %cst_193 {dimension_numbers = #tpu.dot_dimension_numbers<[1], [0], [0], [1], [0, 0, 1, 1], [], []>} : vector<256x8xbf16>, vector<8x8xbf16>, vector<256x8xf32> -> vector<256x8xf32>
    %187 = arith.addf %181, %186 : vector<256x8xf32>
    %c2_194 = arith.constant 2 : index
    %c0_195 = arith.constant 0 : index
    %c0_196 = arith.constant 0 : index
    %188 = vector.load %arg12[%c2_194, %c0_195, %c0_196] : memref<18x18x8xbf16, #tpu.memory_space<vmem>>, vector<16x16x8xbf16>
    %189 = vector.shape_cast %188 : vector<16x16x8xbf16> to vector<256x8xbf16>
    %c6_197 = arith.constant 6 : index
    %c0_198 = arith.constant 0 : index
    %c0_199 = arith.constant 0 : index
    %190 = vector.load %arg6[%c6_197, %c0_198, %c0_199] : memref<9x8x8xbf16, #tpu.memory_space<vmem>>, vector<1x8x8xbf16>
    %191 = vector.shape_cast %190 : vector<1x8x8xbf16> to vector<8x8xbf16>
    %cst_200 = arith.constant dense<0.000000e+00> : vector<256x8xf32>
    %192 = tpu.matmul %189, %191, %cst_200 {dimension_numbers = #tpu.dot_dimension_numbers<[1], [0], [0], [1], [0, 0, 1, 1], [], []>} : vector<256x8xbf16>, vector<8x8xbf16>, vector<256x8xf32> -> vector<256x8xf32>
    %193 = arith.addf %187, %192 : vector<256x8xf32>
    %c2_201 = arith.constant 2 : index
    %c1_202 = arith.constant 1 : index
    %c0_203 = arith.constant 0 : index
    %194 = vector.load %arg12[%c2_201, %c1_202, %c0_203] : memref<18x18x8xbf16, #tpu.memory_space<vmem>>, vector<16x16x8xbf16>
    %195 = vector.shape_cast %194 : vector<16x16x8xbf16> to vector<256x8xbf16>
    %c7_204 = arith.constant 7 : index
    %c0_205 = arith.constant 0 : index
    %c0_206 = arith.constant 0 : index
    %196 = vector.load %arg6[%c7_204, %c0_205, %c0_206] : memref<9x8x8xbf16, #tpu.memory_space<vmem>>, vector<1x8x8xbf16>
    %197 = vector.shape_cast %196 : vector<1x8x8xbf16> to vector<8x8xbf16>
    %cst_207 = arith.constant dense<0.000000e+00> : vector<256x8xf32>
    %198 = tpu.matmul %195, %197, %cst_207 {dimension_numbers = #tpu.dot_dimension_numbers<[1], [0], [0], [1], [0, 0, 1, 1], [], []>} : vector<256x8xbf16>, vector<8x8xbf16>, vector<256x8xf32> -> vector<256x8xf32>
    %199 = arith.addf %193, %198 : vector<256x8xf32>
    %c2_208 = arith.constant 2 : index
    %c2_209 = arith.constant 2 : index
    %c0_210 = arith.constant 0 : index
    %200 = vector.load %arg12[%c2_208, %c2_209, %c0_210] : memref<18x18x8xbf16, #tpu.memory_space<vmem>>, vector<16x16x8xbf16>
    %201 = vector.shape_cast %200 : vector<16x16x8xbf16> to vector<256x8xbf16>
    %c8_211 = arith.constant 8 : index
    %c0_212 = arith.constant 0 : index
    %c0_213 = arith.constant 0 : index
    %202 = vector.load %arg6[%c8_211, %c0_212, %c0_213] : memref<9x8x8xbf16, #tpu.memory_space<vmem>>, vector<1x8x8xbf16>
    %203 = vector.shape_cast %202 : vector<1x8x8xbf16> to vector<8x8xbf16>
    %cst_214 = arith.constant dense<0.000000e+00> : vector<256x8xf32>
    %204 = tpu.matmul %201, %203, %cst_214 {dimension_numbers = #tpu.dot_dimension_numbers<[1], [0], [0], [1], [0, 0, 1, 1], [], []>} : vector<256x8xbf16>, vector<8x8xbf16>, vector<256x8xf32> -> vector<256x8xf32>
    %205 = arith.addf %199, %204 : vector<256x8xf32>
    %c0_215 = arith.constant 0 : index
    %c0_216 = arith.constant 0 : index
    %206 = vector.load %arg7[%c0_215, %c0_216] : memref<1x8xf32, #tpu.memory_space<vmem>>, vector<1x8xf32>
    %207 = vector.broadcast %206 : vector<1x8xf32> to vector<256x8xf32>
    %208 = arith.addf %205, %207 : vector<256x8xf32>
    %cst_217 = arith.constant 5.000000e-01 : f32
    %209 = vector.broadcast %cst_217 : f32 to vector<256x8xf32>
    %210 = arith.mulf %209, %208 : vector<256x8xf32>
    %cst_218 = arith.constant 0.707106769 : f32
    %211 = vector.broadcast %cst_218 : f32 to vector<256x8xf32>
    %212 = arith.mulf %208, %211 : vector<256x8xf32>
    %213 = math.erf %212 : vector<256x8xf32>
    %cst_219 = arith.constant 1.000000e+00 : f32
    %214 = vector.broadcast %cst_219 : f32 to vector<256x8xf32>
    %215 = arith.addf %214, %213 : vector<256x8xf32>
    %216 = arith.mulf %210, %215 : vector<256x8xf32>
    %217 = vector.shape_cast %216 : vector<256x8xf32> to vector<16x16x8xf32>
    %c0_220 = arith.constant 0 : index
    %c0_221 = arith.constant 0 : index
    %c0_222 = arith.constant 0 : index
    %218 = vector.load %arg13[%c0_220, %c0_221, %c0_222] : memref<16x16x8xf32, #tpu.memory_space<vmem>>, vector<16x16x8xf32>
    tpu.vector_store %arg13[%c0_220, %c0_221, %c0_222], %217 {strides = array<i32>} : memref<16x16x8xf32, #tpu.memory_space<vmem>>, vector<16x16x8xf32>,
    %c0_223 = arith.constant 0 : index
    %c0_224 = arith.constant 0 : index
    %c0_225 = arith.constant 0 : index
    %219 = tpu.strided_load %arg13[%c0_223, %c0_224, %c0_225] {strides = array<i32: 2, 2, 1>} : memref<16x16x8xf32, #tpu.memory_space<vmem>>, vector<8x8x8xf32>
    %c0_226 = arith.constant 0 : index
    %c1_227 = arith.constant 1 : index
    %c0_228 = arith.constant 0 : index
    %220 = tpu.strided_load %arg13[%c0_226, %c1_227, %c0_228] {strides = array<i32: 2, 2, 1>} : memref<16x16x8xf32, #tpu.memory_space<vmem>>, vector<8x8x8xf32>
    %221 = arith.maximumf %219, %220 : vector<8x8x8xf32>
    %c1_229 = arith.constant 1 : index
    %c0_230 = arith.constant 0 : index
    %c0_231 = arith.constant 0 : index
    %222 = tpu.strided_load %arg13[%c1_229, %c0_230, %c0_231] {strides = array<i32: 2, 2, 1>} : memref<16x16x8xf32, #tpu.memory_space<vmem>>, vector<8x8x8xf32>
    %223 = arith.maximumf %221, %222 : vector<8x8x8xf32>
    %c1_232 = arith.constant 1 : index
    %c1_233 = arith.constant 1 : index
    %c0_234 = arith.constant 0 : index
    %224 = tpu.strided_load %arg13[%c1_232, %c1_233, %c0_234] {strides = array<i32: 2, 2, 1>} : memref<16x16x8xf32, #tpu.memory_space<vmem>>, vector<8x8x8xf32>
    %225 = arith.maximumf %223, %224 : vector<8x8x8xf32>
    %c0_235 = arith.constant 0 : index
    %c0_236 = arith.constant 0 : index
    %c0_237 = arith.constant 0 : index
    %226 = vector.load %arg8[%c0_235, %c0_236, %c0_237] : memref<1x1x8xf32, #tpu.memory_space<vmem>>, vector<1x1x8xf32>
    %227 = vector.broadcast %226 : vector<1x1x8xf32> to vector<8x8x8xf32>
    %228 = arith.mulf %225, %227 : vector<8x8x8xf32>
    %c0_238 = arith.constant 0 : index
    %c0_239 = arith.constant 0 : index
    %c0_240 = arith.constant 0 : index
    %229 = vector.load %arg9[%c0_238, %c0_239, %c0_240] : memref<1x1x8xf32, #tpu.memory_space<vmem>>, vector<1x1x8xf32>
    %230 = vector.broadcast %229 : vector<1x1x8xf32> to vector<8x8x8xf32>
    %231 = arith.addf %228, %230 : vector<8x8x8xf32>
    %c0_241 = arith.constant 0 : index
    %c0_242 = arith.constant 0 : index
    %c0_243 = arith.constant 0 : index
    %c0_244 = arith.constant 0 : index
    %232 = vector.load %arg10[%c0_241, %c0_242, %c0_243, %c0_244] : memref<1x8x8x8xf32, #tpu.memory_space<vmem>>, vector<1x8x8x8xf32>
    %233 = vector.shape_cast %232 : vector<1x8x8x8xf32> to vector<8x8x8xf32>
    %234 = vector.shape_cast %231 : vector<8x8x8xf32> to vector<1x8x8x8xf32>
    tpu.vector_store %arg10[%c0_241, %c0_242, %c0_243, %c0_244], %234 {strides = array<i32>} : memref<1x8x8x8xf32, #tpu.memory_space<vmem>>, vector<1x8x8x8xf32>,
    return
  }
  func.func @transform_0(%arg0: i32) -> (i32, i32, i32, i32) {
    %c0_i32 = arith.constant 0 : i32
    %c0_i32_0 = arith.constant 0 : i32
    %c0_i32_1 = arith.constant 0 : i32
    %c0_i32_2 = arith.constant 0 : i32
    return %arg0, %c0_i32, %c0_i32_0, %c0_i32_1 : i32, i32, i32, i32
  }
  func.func @transform_1(%arg0: i32) -> (i32, i32, i32) {
    %c0_i32 = arith.constant 0 : i32
    %c0_i32_0 = arith.constant 0 : i32
    %c0_i32_1 = arith.constant 0 : i32
    %c0_i32_2 = arith.constant 0 : i32
    return %c0_i32, %c0_i32_0, %c0_i32_1 : i32, i32, i32
  }
  func.func @transform_2(%arg0: i32) -> (i32, i32) {
    %c0_i32 = arith.constant 0 : i32
    %c0_i32_0 = arith.constant 0 : i32
    %c0_i32_1 = arith.constant 0 : i32
    return %c0_i32, %c0_i32_0 : i32, i32
  }
  func.func @transform_3(%arg0: i32) -> (i32, i32, i32) {
    %c0_i32 = arith.constant 0 : i32
    %c0_i32_0 = arith.constant 0 : i32
    %c0_i32_1 = arith.constant 0 : i32
    %c0_i32_2 = arith.constant 0 : i32
    return %c0_i32, %c0_i32_0, %c0_i32_1 : i32, i32, i32
  }
  func.func @transform_4(%arg0: i32) -> (i32, i32) {
    %c0_i32 = arith.constant 0 : i32
    %c0_i32_0 = arith.constant 0 : i32
    %c0_i32_1 = arith.constant 0 : i32
    return %c0_i32, %c0_i32_0 : i32, i32
  }
  func.func @transform_5(%arg0: i32) -> (i32, i32, i32) {
    %c0_i32 = arith.constant 0 : i32
    %c0_i32_0 = arith.constant 0 : i32
    %c0_i32_1 = arith.constant 0 : i32
    %c0_i32_2 = arith.constant 0 : i32
    return %c0_i32, %c0_i32_0, %c0_i32_1 : i32, i32, i32
  }
  func.func @transform_6(%arg0: i32) -> (i32, i32) {
    %c0_i32 = arith.constant 0 : i32
    %c0_i32_0 = arith.constant 0 : i32
    %c0_i32_1 = arith.constant 0 : i32
    return %c0_i32, %c0_i32_0 : i32, i32
  }
  func.func @transform_7(%arg0: i32) -> (i32, i32, i32) {
    %c0_i32 = arith.constant 0 : i32
    %c0_i32_0 = arith.constant 0 : i32
    %c0_i32_1 = arith.constant 0 : i32
    %c0_i32_2 = arith.constant 0 : i32
    return %c0_i32, %c0_i32_0, %c0_i32_1 : i32, i32, i32
  }
  func.func @transform_8(%arg0: i32) -> (i32, i32, i32) {
    %c0_i32 = arith.constant 0 : i32
    %c0_i32_0 = arith.constant 0 : i32
    %c0_i32_1 = arith.constant 0 : i32
    %c0_i32_2 = arith.constant 0 : i32
    return %c0_i32, %c0_i32_0, %c0_i32_1 : i32, i32, i32
  }
  func.func @transform_9(%arg0: i32) -> (i32, i32, i32, i32) {
    %c0_i32 = arith.constant 0 : i32
    %c0_i32_0 = arith.constant 0 : i32
    %c0_i32_1 = arith.constant 0 : i32
    %c0_i32_2 = arith.constant 0 : i32
    return %arg0, %c0_i32, %c0_i32_0, %c0_i32_1 : i32, i32, i32, i32
  }
}

</mosaic_0001>

<bundles_post_ra>
// kernel: _lambda_.1
= control target key start
LH: loop header
LB: loop body
LE: loop exit
PB: predicated region body
PF: predicated region fallthrough
CT: control target
= control target key end

     0   :  { %s20017_s30 = smov 0   ;;  %s26223_s0 = inlined_call_operand.vmem [shape: bf16[2,18,18,4], index: 0, kind: input, shape index: {}]   ;;  %s26224_s1 = inlined_call_operand.vmem [shape: bf16[9,4,8], index: 1, kind: input, shape index: {}]   ;;  %s26225_s2 = inlined_call_operand.vmem [shape: f32[1,8], index: 2, kind: input, shape index: {}]   ;;  %s26226_s3 = inlined_call_operand.vmem [shape: bf16[9,8,8], index: 3, kind: input, shape index: {}]   ;;  %s26227_s4 = inlined_call_operand.vmem [shape: f32[1,8], index: 4, kind: input, shape index: {}]   ;;  %s26228_s5 = inlined_call_operand.vmem [shape: bf16[9,8,8], index: 5, kind: input, shape index: {}]   ;;  %s26229_s6 = inlined_call_operand.vmem [shape: f32[1,8], index: 6, kind: input, shape index: {}]   ;;  %s26230_s7 = inlined_call_operand.vmem [shape: f32[1,1,8], index: 7, kind: input, shape index: {}]   ;;  %s26231_s8 = inlined_call_operand.vmem [shape: f32[1,1,8], index: 8, kind: input, shape index: {}]   ;;  %s26232_s9 = inlined_call_operand.vmem [shape: f32[2,8,8,8], index: 9, kind: output, shape index: {}]  }
   0x1 LB: > { %s15995_s10 = sadd.s32 4294967295, %s19964_s30   ;;  %p15999_p0 = scmp.ge.s32.totalorder %s19964_s30, 1  ;;  %s19964_s30 = sphi %s20017_s30, %s19_s30  }
   0x2   : > { %p287_p1 = scmp.lt.s32.totalorder %s19964_s30, 3 }
   0x4   : > { %p288_p2 = pnand %p15999_p0, %p287_p1 }
   0x6   : > { %291 = sbr.rel (%p288_p2) target bundleno = 2339 (0x923), region = 56 }
   0xd   : > { %v16003_v0 = vld [vmem:[%s26224_s1 + $0x2] sm:$0x3]  ;;  %vm979_vm0 = vcmask 1041408   ;;  %v16230_v1 = vld [vmem:[%s26224_s1 + $0x8] sm:$0x3]  ;;  %p323_p3 = scmp.lt.s32.totalorder %s15995_s10, 1 }
   0xe   : > { %19510 = vmatprep.subr.msk.bf16.mxu1 %vm979_vm0, %v16003_v0  ;;  %19514 = vmatprep.subr.msk.bf16.mxu0 %vm979_vm0, %v16230_v1  ;;  %v981_v2 = vsel %vm979_vm0, %v16003_v0, 0  ;;  %v20035_v3 = vsel %vm979_vm0, %v16230_v1, 0  ;;  %v476_v4 = vld [vmem:[%s26224_s1] sm:$0x3]  ;;  %v16295_v5 = vld [vmem:[%s26224_s1 + $0xa] sm:$0x3] }
   0xf   : > { %26424 = vst [vmem:[#allocation5_spill] sm:$0xff] %v20035_v3  ;;  %17823 = vmatpush3.bf16.msra.mxu1 %v981_v2  ;;  %17959 = vmatpush3.bf16.msra.mxu0 %v20035_v3  ;;  %s26898_s10 = smov (!%p323_p3, %s15995_s10), 1  ;;  %vm493_vm1 = vsmask.f32 3328  ;;  %vm494_vm2 = vsmask.f32 7440 }
  0x10   : > { %19511 = vmatprep.subr.msk.bf16.mxu1 %vm979_vm0, %v476_v4  ;;  %19516 = vmatprep.subr.msk.bf16.mxu0 %vm979_vm0, %v16295_v5  ;;  %s19538_s19 = smul.u32 216, %s26898_s10  ;;  %vm930_vm3 = vcmask 31744   ;;  %v20065_v17 = vsel %vm979_vm0, %v476_v4, 0  ;;  %v20071_v26 = vld [vmem:[%s26224_s1 + $0xc] sm:$0x3]  ;;  %vm20078_vm4 = vmor %vm493_vm1, %vm494_vm2  ;;  %v20084_v37 = vsel %vm979_vm0, %v16295_v5, 0 }
  0x11   : > { %v20088_v41 = vsel %vm979_vm0, %v20071_v26, 0  ;;  %vm1484_vm5 = vcmask 1042432   ;;  %vm1485_vm6 = vcmask 1046532   ;;  %vm334_vm8 = vcmask 60416   ;;  %s17298_s28 = sshll.u32 %s26898_s10, 6 }
  0x12   : > { %s20052_s22 = scalar_lea.vmem %s26223_s0, %s19538_s19  ;;  %vm20304_vm7 = vmor %vm1484_vm5, %vm1485_vm6  ;;  %vm337_vm9 = vcmask 57344   ;;  %vm6271_vm10 = vcmask 1043456   ;;  %vm6222_vm11 = vcmask 64512   ;;  %vm5623_vm12 = vsmask.f32 7938  ;;  %s26095_s13 = scalar_lea.vmem %s26232_s9, %s17298_s28 }
  0x13   : > { %v444_v6 = vld [vmem:[%s20052_s22] sm:$0xf]  ;;  %v445_v7 = vld [vmem:[%s20052_s22 + $0x4] sm:$0xf]  ;;  %v477_v8 = vld [vmem:[%s20052_s22 + $0x8] sm:$0x1] }
  0x14   : > { %v497_v9 = vshrl.u32 %v444_v6, 16  ;;  %v500_v10 = vshll.u32 %v444_v6, 16  ;;  %v506_v11 = vshll.u32 %v445_v7, 16  ;;  %v510_v12 = vshrl.u32 %v445_v7, 16  ;;  %v16182_v13 = vld [vmem:[%s20052_s22 + $0xc] sm:$0xf]  ;;  %vm22021_vm15 = vmand %vm334_vm8, %vm5623_vm12 }
  0x15   : > { %v516_v14 = vshll.u32 %v477_v8, 16  ;;  %v20059_v15 = vld [vmem:[%s20052_s22 + $0x10] sm:$0xf]  ;;  %v20062_v16 = vld [vmem:[%s20052_s22 + $0x14] sm:$0x1]  ;;  %v2301_v23 = vshrl.u32 %v16182_v13, 16 }
  0x16   : > { %v499_v18 = vrot.slane %v497_v9, 4  ;;  %v502_v19 = vrot.slane %v500_v10, 5  ;;  %v508_v20 = vrot.slane %v506_v11, 5  ;;  %v512_v21 = vrot.slane %v510_v12, 4  ;;  %v446_v31 = vld [vmem:[%s20052_s22 + $0xc] sm:$0xf] }
  0x17   : > { %v518_v22 = vrot.slane %v516_v14, 5  ;;  %v2304_v24 = vshll.u32 %v16182_v13, 16  ;;  %v2310_v25 = vshll.u32 %v20059_v15, 16  ;;  %v2314_v29 = vshrl.u32 %v20059_v15, 16  ;;  %v447_v36 = vld [vmem:[%s20052_s22 + $0x10] sm:$0xf] }
  0x18   : > { %v503_v27 = vor.u32 %v502_v19, %v499_v18  ;;  %v513_v28 = vor.u32 %v512_v21, %v508_v20  ;;  %v2320_v30 = vshll.u32 %v20062_v16, 16  ;;  %v2303_v33 = vrot.slane %v2301_v23, 4  ;;  %v478_v44 = vld [vmem:[%s20052_s22 + $0x14] sm:$0x1]  ;;  %v16185_v55 = vld [vmem:[%s20052_s22 + $0x18] sm:$0xf] }
  0x19   : > { %v2306_v34 = vrot.slane %v2304_v24, 5  ;;  %v2312_v35 = vrot.slane %v2310_v25, 5  ;;  %v2316_v40 = vrot.slane %v2314_v29, 4  ;;  %v521_v45 = vshrl.u32 %v446_v31, 16  ;;  %v20097_v60 = vld [vmem:[%s20052_s22 + $0x1c] sm:$0xf] }
  0x1a   : > { %v504_v38 = vrot.slane %v503_v27, 4  ;;  %v514_v39 = vrot.slane %v513_v28, 4  ;;  %v2322_v43 = vrot.slane %v2320_v30, 5  ;;  %v524_v46 = vshll.u32 %v446_v31, 16  ;;  %v20105_v1 = vld [vmem:[%s20052_s22 + $0x20] sm:$0x1] }
  0x1b   : > { %v2307_v42 = vor.u32 %v2306_v34, %v2303_v33  ;;  %v2317_v49 = vor.u32 %v2316_v40, %v2312_v35  ;;  %v530_v50 = vshll.u32 %v447_v36, 16  ;;  %v523_v53 = vrot.slane %v521_v45, 4  ;;  %v448_v18 = vld [vmem:[%s20052_s22 + $0x18] sm:$0xf]  ;;  %v449_v23 = vld [vmem:[%s20052_s22 + $0x1c] sm:$0xf] }
  0x1c   : > { %v509_v47 = vsel %vm20078_vm4, %v504_v38, %v508_v20  ;;  %v519_v48 = vsel %vm20078_vm4, %v514_v39, %v518_v22  ;;  %v526_v54 = vrot.slane %v524_v46, 5  ;;  %v534_v58 = vshrl.u32 %v447_v36, 16  ;;  %v479_v31 = vld [vmem:[%s20052_s22 + $0x20] sm:$0x1]  ;;  %v16188_v40 = vld [vmem:[%s20052_s22 + $0x24] sm:$0xf] }
  0x1d   : > { %v16004_v51 = vcombine.low %v509_v47, %v519_v48  ;;  %v2308_v52 = vrot.slane %v2307_v42, 4  ;;  %v2318_v56 = vrot.slane %v2317_v49, 4  ;;  %v532_v57 = vrot.slane %v530_v50, 5  ;;  %v20128_v46 = vld [vmem:[%s20052_s22 + $0x28] sm:$0xf] }
  0x1e   : > { %v540_v59 = vshll.u32 %v478_v44, 16  ;;  %v3044_v62 = vrot.slane %v20059_v15, 5  ;;  %v3047_v63 = vrot.slane %v20062_v16, 5  ;;  %v527_v0 = vor.u32 %v526_v54, %v523_v53  ;;  %v20137_v54 = vld [vmem:[%s20052_s22 + $0x2c] sm:$0x1] }
  0x1f   : > { %17824 = vmatprep.mubr.msk.bf16.mxu1 %vm930_vm3, %v16004_v51  ;;  %v2313_v61 = vsel %vm20078_vm4, %v2308_v52, %v2312_v35  ;;  %v2323_v2 = vsel %vm20078_vm4, %v2318_v56, %v2322_v43  ;;  %v536_v4 = vrot.slane %v534_v58, 4  ;;  %v2325_v6 = vshrl.u32 %v16185_v55, 16  ;;  %v16084_v51 = vld [vmem:[%s26224_s1 + $0x4] sm:$0x3]  ;;  %v20337_v16 = vld [vmem:[%s20052_s22 + $0x7c] sm:$0xf] }
  0x20   : > { %v542_v5 = vrot.slane %v540_v59, 5  ;;  %v16231_v7 = vcombine.low %v2313_v61, %v2323_v2  ;;  %v528_v8 = vrot.slane %v527_v0, 4  ;;  %v2328_v9 = vshll.u32 %v16185_v55, 16  ;;  %v450_v0 = vld [vmem:[%s20052_s22 + $0x24] sm:$0xf] }
  0x21   : > { %v2334_v10 = vshll.u32 %v20097_v60, 16  ;;  %v537_v11 = vor.u32 %v536_v4, %v532_v57  ;;  %v2327_v12 = vrot.slane %v2325_v6, 4  ;;  %v2338_v13 = vshrl.u32 %v20097_v60, 16 }
  0x22   : > { %v2344_v14 = vshll.u32 %v20105_v1, 16  ;;  %17960 = vmatprep.mubr.msk.bf16.mxu0 %vm930_vm3, %v16231_v7  ;;  %v533_v19 = vsel %vm20078_vm4, %v528_v8, %v532_v57  ;;  %v2330_v20 = vrot.slane %v2328_v9, 5  ;;  %v3051_v22 = vrot.slane %v20097_v60, 5  ;;  %v451_v7 = vld [vmem:[%s20052_s22 + $0x28] sm:$0xf] }
  0x23   : > { %v2336_v21 = vrot.slane %v2334_v10, 5  ;;  %v538_v24 = vrot.slane %v537_v11, 4  ;;  %v2340_v25 = vrot.slane %v2338_v13, 4  ;;  %v3054_v28 = vrot.slane %v20105_v1, 5  ;;  %v480_v13 = vld [vmem:[%s20052_s22 + $0x2c] sm:$0x1] }
  0x24   : > { %v2346_v27 = vrot.slane %v2344_v14, 5  ;;  %v2331_v29 = vor.u32 %v2330_v20, %v2327_v12  ;;  %v20121_v30 = vrot.slane %v3051_v22, 4  ;;  %v545_v33 = vshrl.u32 %v448_v18, 16 }
  0x25   : > { %v548_v34 = vshll.u32 %v448_v18, 16  ;;  %v543_v35 = vsel %vm20078_vm4, %v538_v24, %v542_v5  ;;  %v2341_v36 = vor.u32 %v2340_v25, %v2336_v21  ;;  %v554_v38 = vshll.u32 %v449_v23, 16  ;;  %v16191_v24 = vld [vmem:[%s20052_s22 + $0x30] sm:$0xf] }
  0x26   : > { %v558_v39 = vshrl.u32 %v449_v23, 16  ;;  %v16005_v42 = vcombine.low %v533_v19, %v543_v35  ;;  %v2332_v43 = vrot.slane %v2331_v29, 4  ;;  %v547_v44 = vrot.slane %v545_v33, 4  ;;  %v20157_v33 = vld [vmem:[%s20052_s22 + $0x34] sm:$0xf] }
  0x27   : > { %v550_v45 = vrot.slane %v548_v34, 5  ;;  %v2342_v47 = vrot.slane %v2341_v36, 4  ;;  %v556_v48 = vrot.slane %v554_v38, 5  ;;  %v564_v50 = vshll.u32 %v479_v31, 16 }
  0x28   : > { %v560_v49 = vrot.slane %v558_v39, 4  ;;  %17825 = vmatmul.mubr.msk.bf16.vlgmr.msra.gmra.mrb[0].mxu1 %vm930_vm3, %v16005_v42  ;;  %v2337_v52 = vsel %vm20078_vm4, %v2332_v43, %v2336_v21  ;;  %v2349_v55 = vshrl.u32 %v16188_v40, 16  ;;  %v2352_v56 = vshll.u32 %v16188_v40, 16  ;;  %v20165_v40 = vld [vmem:[%s20052_s22 + $0x38] sm:$0x1] }
  0x29   : > { %v551_v53 = vor.u32 %v550_v45, %v547_v44  ;;  %17857 = vmatpush3.bf16.msra.mxu1 %v20065_v17  ;;  %v2347_v57 = vsel %vm20078_vm4, %v2342_v47, %v2346_v27  ;;  %v566_v59 = vrot.slane %v564_v50, 5  ;;  %v2358_v61 = vshll.u32 %v20128_v46, 16 }
  0x2a   : > { %v561_v58 = vor.u32 %v560_v49, %v556_v48  ;;  %v16232_v2 = vcombine.low %v2337_v52, %v2347_v57  ;;  %v2351_v5 = vrot.slane %v2349_v55, 4  ;;  %v2354_v6 = vrot.slane %v2352_v56, 5  ;;  %19512 = vmatprep.subr.msk.bf16.mxu1 %vm979_vm0, %v16084_v51  ;;  %v452_v52 = vld [vmem:[%s20052_s22 + $0x30] sm:$0xf] }
  0x2b   : > { %v552_v4 = vrot.slane %v551_v53, 4  ;;  %v2360_v9 = vrot.slane %v2358_v61, 5  ;;  %v2362_v17 = vshrl.u32 %v20128_v46, 16  ;;  %v2368_v10 = vshll.u32 %v20137_v54, 16 }
  0x2c   : > { %v562_v8 = vrot.slane %v561_v58, 4  ;;  %17961 = vmatmul.mubr.msk.bf16.vlgmr.msra.gmra.mrb[0].mxu0 %vm930_vm3, %v16232_v2  ;;  %v2355_v12 = vor.u32 %v2354_v6, %v2351_v5  ;;  %v569_v14 = vshrl.u32 %v450_v0, 16  ;;  %v572_v18 = vshll.u32 %v450_v0, 16  ;;  %v453_v58 = vld [vmem:[%s20052_s22 + $0x34] sm:$0xf] }
  0x2d   : > { %v557_v11 = vsel %vm20078_vm4, %v552_v4, %v556_v48  ;;  %17993 = vmatpush3.bf16.msra.mxu0 %v20084_v37  ;;  %v2364_v20 = vrot.slane %v2362_v17, 4  ;;  %v2370_v21 = vrot.slane %v2368_v10, 5  ;;  %v578_v23 = vshll.u32 %v451_v7, 16  ;;  %v481_v4 = vld [vmem:[%s20052_s22 + $0x38] sm:$0x1] }
  0x2e   : > { %v567_v19 = vsel %vm20078_vm4, %v562_v8, %v566_v59  ;;  %v2356_v27 = vrot.slane %v2355_v12, 4  ;;  %v571_v29 = vrot.slane %v569_v14, 4  ;;  %v574_v31 = vrot.slane %v572_v18, 5  ;;  %19517 = vmatprep.subr.msk.bf16.mxu0 %vm979_vm0, %v20071_v26  ;;  %v16194_v12 = vld [vmem:[%s20052_s22 + $0x3c] sm:$0xf] }
  0x2f   : > { %v16006_v25 = vcombine.low %v557_v11, %v567_v19  ;;  %v2365_v34 = vor.u32 %v2364_v20, %v2360_v9  ;;  %v580_v35 = vrot.slane %v578_v23, 5  ;;  %v582_v37 = vshrl.u32 %v451_v7, 16  ;;  %v20182_v20 = vld [vmem:[%s20052_s22 + $0x40] sm:$0xf] }
  0x30   : > { %v588_v36 = vshll.u32 %v480_v13, 16  ;;  %v2361_v38 = vsel %vm20078_vm4, %v2356_v27, %v2360_v9  ;;  %v575_v39 = vor.u32 %v574_v31, %v571_v29  ;;  %v2373_v42 = vshrl.u32 %v16191_v24, 16 }
  0x31   : > { %17828 = vmatprep.mubr.msk.bf16.mxu1 %vm930_vm3, %v16006_v25  ;;  %v2376_v43 = vshll.u32 %v16191_v24, 16  ;;  %v2366_v44 = vrot.slane %v2365_v34, 4  ;;  %v584_v45 = vrot.slane %v582_v37, 4  ;;  %v2382_v26 = vshll.u32 %v20157_v33, 16  ;;  %v20187_v34 = vld [vmem:[%s20052_s22 + $0x44] sm:$0x1] }
  0x32   : > { %v590_v47 = vrot.slane %v588_v36, 5  ;;  %v576_v48 = vrot.slane %v575_v39, 4  ;;  %v2375_v49 = vrot.slane %v2373_v42, 4  ;;  %v2386_v51 = vshrl.u32 %v20157_v33, 16  ;;  %v454_v42 = vld [vmem:[%s20052_s22 + $0x3c] sm:$0xf] }
  0x33   : > { %v2378_v50 = vrot.slane %v2376_v43, 5  ;;  %v2371_v53 = vsel %vm20078_vm4, %v2366_v44, %v2370_v21  ;;  %v585_v55 = vor.u32 %v584_v45, %v580_v35  ;;  %v2384_v56 = vrot.slane %v2382_v26, 5  ;;  %v455_v26 = vld [vmem:[%s20052_s22 + $0x40] sm:$0xf] }
  0x34   : > { %v2392_v57 = vshll.u32 %v20165_v40, 16  ;;  %v16233_v59 = vcombine.low %v2361_v38, %v2371_v53  ;;  %v581_v61 = vsel %vm20078_vm4, %v576_v48, %v580_v35  ;;  %v2388_v2 = vrot.slane %v2386_v51, 4 }
  0x35   : > { %v2379_v0 = vor.u32 %v2378_v50, %v2375_v49  ;;  %v586_v5 = vrot.slane %v585_v55, 4  ;;  %v593_v7 = vshrl.u32 %v452_v52, 16  ;;  %v596_v8 = vshll.u32 %v452_v52, 16 }
  0x36   : > { %v2394_v6 = vrot.slane %v2392_v57, 5  ;;  %17964 = vmatprep.mubr.msk.bf16.mxu0 %vm930_vm3, %v16233_v59  ;;  %v2389_v17 = vor.u32 %v2388_v2, %v2384_v56  ;;  %v602_v10 = vshll.u32 %v453_v58, 16  ;;  %v606_v11 = vshrl.u32 %v453_v58, 16  ;;  %v16197_v2 = vld [vmem:[%s20052_s22 + $0x48] sm:$0xf] }
  0x37   : > { %v2380_v9 = vrot.slane %v2379_v0, 4  ;;  %v591_v13 = vsel %vm20078_vm4, %v586_v5, %v590_v47  ;;  %v595_v14 = vrot.slane %v593_v7, 4  ;;  %v598_v18 = vrot.slane %v596_v8, 5  ;;  %v20205_v8 = vld [vmem:[%s20052_s22 + $0x4c] sm:$0xf] }
  0x38   : > { %v612_v19 = vshll.u32 %v481_v4, 16  ;;  %v16007_v21 = vcombine.low %v581_v61, %v591_v13  ;;  %v2390_v24 = vrot.slane %v2389_v17, 4  ;;  %v604_v25 = vrot.slane %v602_v10, 5  ;;  %v482_v61 = vld [vmem:[%s20052_s22 + $0x44] sm:$0x1] }
  0x39   : > { %v2385_v23 = vsel %vm20078_vm4, %v2380_v9, %v2384_v56  ;;  %v599_v27 = vor.u32 %v598_v18, %v595_v14  ;;  %v608_v29 = vrot.slane %v606_v11, 4  ;;  %v2397_v35 = vshrl.u32 %v16194_v12, 16 }
  0x3a   : > { %v614_v31 = vrot.slane %v612_v19, 5  ;;  %17829 = vmatmul.mubr.msk.bf16.gmra.mrb[4].mxu1 %vm930_vm3, %v16007_v21  ;;  %v2395_v37 = vsel %vm20078_vm4, %v2390_v24, %v2394_v6  ;;  %v2400_v36 = vshll.u32 %v16194_v12, 16  ;;  %v2406_v38 = vshll.u32 %v20182_v20, 16 }
  0x3b   : > { %v2410_v39 = vshrl.u32 %v20182_v20, 16  ;;  %v16234_v43 = vcombine.low %v2385_v23, %v2395_v37  ;;  %v600_v44 = vrot.slane %v599_v27, 4  ;;  %v609_v45 = vor.u32 %v608_v29, %v604_v25  ;;  %v20213_v23 = vld [vmem:[%s20052_s22 + $0x50] sm:$0x1]  ;;  %v20217_v27 = vld [vmem:[%s20052_s22 + $0x48] sm:$0xf] }
  0x3c   : > { %v2399_v47 = vrot.slane %v2397_v35, 4  ;;  %v2402_v48 = vrot.slane %v2400_v36, 5  ;;  %v2408_v49 = vrot.slane %v2406_v38, 5  ;;  %v2416_v51 = vshll.u32 %v20187_v34, 16  ;;  %v20220_v36 = vld [vmem:[%s20052_s22 + $0x4c] sm:$0xf] }
  0x3d   : > { %v2412_v50 = vrot.slane %v2410_v39, 4  ;;  %17965 = vmatmul.mubr.msk.bf16.gmra.mrb[4].mxu0 %vm930_vm3, %v16234_v43  ;;  %v605_v52 = vsel %vm20078_vm4, %v600_v44, %v604_v25  ;;  %v610_v53 = vrot.slane %v609_v45, 4  ;;  %v617_v55 = vshrl.u32 %v454_v42, 16 }
  0x3e   : > { %v620_v56 = vshll.u32 %v454_v42, 16  ;;  %v2403_v57 = vor.u32 %v2402_v48, %v2399_v47  ;;  %v2418_v59 = vrot.slane %v2416_v51, 5  ;;  %v626_v0 = vshll.u32 %v455_v26, 16 }
  0x3f   : > { %v2413_v58 = vor.u32 %v2412_v50, %v2408_v49  ;;  %v615_v4 = vsel %vm20078_vm4, %v610_v53, %v614_v31  ;;  %v619_v5 = vrot.slane %v617_v55, 4  ;;  %v630_v7 = vshrl.u32 %v455_v26, 16  ;;  %v483_v26 = vld [vmem:[%s20052_s22 + $0x50] sm:$0x1]  ;;  %v16200_v53 = vld [vmem:[%s20052_s22 + $0x54] sm:$0xf] }
  0x40   : > { %v622_v6 = vrot.slane %v620_v56, 5  ;;  %v16008_v9 = vcombine.low %v605_v52, %v615_v4  ;;  %v2404_v17 = vrot.slane %v2403_v57, 4  ;;  %v628_v11 = vrot.slane %v626_v0, 5  ;;  %v20236_v4 = vld [vmem:[%s20052_s22 + $0x58] sm:$0xf] }
  0x41   : > { %v2414_v10 = vrot.slane %v2413_v58, 4  ;;  %v632_v13 = vrot.slane %v630_v7, 4  ;;  %v636_v14 = vshll.u32 %v482_v61, 16  ;;  %v2421_v18 = vshrl.u32 %v16197_v2, 16 }
  0x42   : > { %v623_v12 = vor.u32 %v622_v6, %v619_v5  ;;  %17832 = vmatprep.mubr.msk.bf16.mxu1 %vm930_vm3, %v16008_v9  ;;  %v2409_v19 = vsel %vm20078_vm4, %v2404_v17, %v2408_v49  ;;  %v2424_v24 = vshll.u32 %v16197_v2, 16  ;;  %v2430_v25 = vshll.u32 %v20205_v8, 16 }
  0x43   : > { %v2419_v21 = vsel %vm20078_vm4, %v2414_v10, %v2418_v59  ;;  %v633_v35 = vor.u32 %v632_v13, %v628_v11  ;;  %v638_v37 = vrot.slane %v636_v14, 5  ;;  %v2423_v38 = vrot.slane %v2421_v18, 4 }
  0x44   : > { %v16235_v29 = vcombine.low %v2409_v19, %v2419_v21  ;;  %v624_v31 = vrot.slane %v623_v12, 4  ;;  %v2426_v39 = vrot.slane %v2424_v24, 5  ;;  %v2432_v42 = vrot.slane %v2430_v25, 5  ;;  %v20242_v12 = vld [vmem:[%s20052_s22 + $0x5c] sm:$0x1] }
  0x45   : > { %v2434_v43 = vshrl.u32 %v20205_v8, 16  ;;  %v634_v45 = vrot.slane %v633_v35, 4  ;;  %v2440_v47 = vshll.u32 %v20213_v23, 16  ;;  %v641_v48 = vshrl.u32 %v20217_v27, 16  ;;  %v20246_v24 = vld [vmem:[%s20052_s22 + $0x54] sm:$0xf] }
  0x46   : > { %17968 = vmatprep.mubr.msk.bf16.mxu0 %vm930_vm3, %v16235_v29  ;;  %v629_v44 = vsel %vm20078_vm4, %v624_v31, %v628_v11  ;;  %v2427_v49 = vor.u32 %v2426_v39, %v2423_v38  ;;  %v644_v51 = vshll.u32 %v20217_v27, 16  ;;  %v650_v52 = vshll.u32 %v20220_v36, 16 }
  0x47   : > { %v2436_v50 = vrot.slane %v2434_v43, 4  ;;  %v639_v55 = vsel %vm20078_vm4, %v634_v45, %v638_v37  ;;  %v2442_v56 = vrot.slane %v2440_v47, 5  ;;  %v643_v57 = vrot.slane %v641_v48, 4  ;;  %v20252_v37 = vld [vmem:[%s20052_s22 + $0x58] sm:$0xf] }
  0x48   : > { %v654_v58 = vshrl.u32 %v20220_v36, 16  ;;  %v16009_v59 = vcombine.low %v629_v44, %v639_v55  ;;  %v2428_v61 = vrot.slane %v2427_v49, 4  ;;  %v646_v2 = vrot.slane %v644_v51, 5 }
  0x49   : > { %v2437_v0 = vor.u32 %v2436_v50, %v2432_v42  ;;  %v652_v5 = vrot.slane %v650_v52, 5  ;;  %v660_v7 = vshll.u32 %v483_v26, 16  ;;  %v2445_v9 = vshrl.u32 %v16200_v53, 16  ;;  %v484_v26 = vld [vmem:[%s20052_s22 + $0x5c] sm:$0x1] }
  0x4a   : > { %v656_v6 = vrot.slane %v654_v58, 4  ;;  %17833 = vmatmul.mubr.msk.bf16.gmra.mrb[8].mxu1 %vm930_vm3, %v16009_v59  ;;  %v2433_v17 = vsel %vm20078_vm4, %v2428_v61, %v2432_v42  ;;  %v647_v11 = vor.u32 %v646_v2, %v643_v57  ;;  %v2448_v13 = vshll.u32 %v16200_v53, 16  ;;  %v16203_v53 = vld [vmem:[%s20052_s22 + $0x60] sm:$0xf]  ;;  %v20266_v59 = vld [vmem:[%s20052_s22 + $0x64] sm:$0xf] }
  0x4b   : > { %v2438_v10 = vrot.slane %v2437_v0, 4  ;;  %v662_v18 = vrot.slane %v660_v7, 5  ;;  %v2447_v19 = vrot.slane %v2445_v9, 4  ;;  %v2454_v21 = vshll.u32 %v20236_v4, 16  ;;  %v20273_v9 = vld [vmem:[%s20052_s22 + $0x68] sm:$0x1] }
  0x4c   : > { %v657_v14 = vor.u32 %v656_v6, %v652_v5  ;;  %v648_v29 = vrot.slane %v647_v11, 4  ;;  %v2450_v31 = vrot.slane %v2448_v13, 5  ;;  %v2458_v35 = vshrl.u32 %v20236_v4, 16 }
  0x4d   : > { %v2443_v25 = vsel %vm20078_vm4, %v2438_v10, %v2442_v56  ;;  %v2456_v42 = vrot.slane %v2454_v21, 5  ;;  %v2464_v43 = vshll.u32 %v20242_v12, 16  ;;  %v665_v48 = vshrl.u32 %v20246_v24, 16 }
  0x4e   : > { %v16236_v38 = vcombine.low %v2433_v17, %v2443_v25  ;;  %v658_v39 = vrot.slane %v657_v14, 4  ;;  %v653_v44 = vsel %vm20078_vm4, %v648_v29, %v652_v5  ;;  %v2451_v45 = vor.u32 %v2450_v31, %v2447_v19  ;;  %v20277_v19 = vld [vmem:[%s20052_s22 + $0x60] sm:$0xf] }
  0x4f   : > { %v2460_v47 = vrot.slane %v2458_v35, 4  ;;  %v2466_v50 = vrot.slane %v2464_v43, 5  ;;  %v668_v51 = vshll.u32 %v20246_v24, 16  ;;  %v674_v52 = vshll.u32 %v20252_v37, 16  ;;  %v20283_v35 = vld [vmem:[%s20052_s22 + $0x64] sm:$0xf] }
  0x50   : > { %17969 = vmatmul.mubr.msk.bf16.gmra.mrb[8].mxu0 %vm930_vm3, %v16236_v38  ;;  %v663_v49 = vsel %vm20078_vm4, %v658_v39, %v662_v18  ;;  %v2452_v56 = vrot.slane %v2451_v45, 4  ;;  %v667_v58 = vrot.slane %v665_v48, 4  ;;  %v678_v2 = vshrl.u32 %v20252_v37, 16 }
  0x51   : > { %v16010_v55 = vcombine.low %v653_v44, %v663_v49  ;;  %v2461_v57 = vor.u32 %v2460_v47, %v2456_v42  ;;  %v670_v61 = vrot.slane %v668_v51, 5  ;;  %v676_v0 = vrot.slane %v674_v52, 5 }
  0x52   : > { %v684_v5 = vshll.u32 %v484_v26, 16  ;;  %v2457_v6 = vsel %vm20078_vm4, %v2452_v56, %v2456_v42  ;;  %v2469_v17 = vshrl.u32 %v16203_v53, 16  ;;  %v2472_v10 = vshll.u32 %v16203_v53, 16 }
  0x53   : > { %17836 = vmatprep.mubr.msk.bf16.mxu1 %vm930_vm3, %v16010_v55  ;;  %v2462_v7 = vrot.slane %v2461_v57, 4  ;;  %v671_v11 = vor.u32 %v670_v61, %v667_v58  ;;  %v680_v13 = vrot.slane %v678_v2, 4  ;;  %v2478_v18 = vshll.u32 %v20266_v59, 16  ;;  %v16263_v58 = vld [vmem:[%s20052_s22 + $0xc] sm:$0xe] }
  0x54   : > { %v686_v14 = vrot.slane %v684_v5, 5  ;;  %v2471_v25 = vrot.slane %v2469_v17, 4  ;;  %v2474_v29 = vrot.slane %v2472_v10, 5  ;;  %v2482_v31 = vshrl.u32 %v20266_v59, 16 }
  0x55   : > { %v2467_v21 = vsel %vm20078_vm4, %v2462_v7, %v2466_v50  ;;  %v672_v39 = vrot.slane %v671_v11, 4  ;;  %v681_v42 = vor.u32 %v680_v13, %v676_v0  ;;  %v2480_v43 = vrot.slane %v2478_v18, 5  ;;  %v485_v50 = vld [vmem:[%s20052_s22 + $0x68] sm:$0x1] }
  0x56   : > { %v16237_v38 = vcombine.low %v2457_v6, %v2467_v21  ;;  %v2475_v44 = vor.u32 %v2474_v29, %v2471_v25  ;;  %v2484_v45 = vrot.slane %v2482_v31, 4  ;;  %v2488_v47 = vshll.u32 %v20273_v9, 16  ;;  %v20311_v29 = vld [vmem:[%s20052_s22 + $0x70] sm:$0xf] }
  0x57   : > { %v689_v26 = vshrl.u32 %v20277_v19, 16  ;;  %v677_v48 = vsel %vm20078_vm4, %v672_v39, %v676_v0  ;;  %v682_v49 = vrot.slane %v681_v42, 4  ;;  %v692_v51 = vshll.u32 %v20277_v19, 16  ;;  %v20298_v0 = vld [vmem:[%s20052_s22 + $0x6c] sm:$0xf] }
  0x58   : > { %17972 = vmatprep.mubr.msk.bf16.mxu0 %vm930_vm3, %v16237_v38  ;;  %v698_v52 = vshll.u32 %v20283_v35, 16  ;;  %v2476_v53 = vrot.slane %v2475_v44, 4  ;;  %v2485_v55 = vor.u32 %v2484_v45, %v2480_v43  ;;  %v2490_v56 = vrot.slane %v2488_v47, 5 }
  0x59   : > { %v691_v57 = vrot.slane %v689_v26, 4  ;;  %v687_v61 = vsel %vm20078_vm4, %v682_v49, %v686_v14  ;;  %v694_v2 = vrot.slane %v692_v51, 5  ;;  %v702_v6 = vshrl.u32 %v20283_v35, 16  ;;  %v486_v26 = vld [vmem:[%s20052_s22 + $0x74] sm:$0x1] }
  0x5a   : > { %v700_v5 = vrot.slane %v698_v52, 5  ;;  %v16011_v7 = vcombine.low %v677_v48, %v687_v61  ;;  %v2481_v17 = vsel %vm20078_vm4, %v2476_v53, %v2480_v43  ;;  %v2486_v10 = vrot.slane %v2485_v55, 4  ;;  %v16264_v48 = vld [vmem:[%s20052_s22 + $0x18] sm:$0xe] }
  0x5b   : > { %v708_v11 = vshll.u32 %v485_v50, 16  ;;  %v695_v14 = vor.u32 %v694_v2, %v691_v57  ;;  %v704_v18 = vrot.slane %v702_v6, 4  ;;  %v16279_v21 = vrot.slane %v16263_v58, 9  ;;  %v20330_v53 = vld [vmem:[%s20052_s22 + $0x78] sm:$0xf] }
  0x5c   : > { %v3046_v25 = vrot.slane %v3044_v62, 4  ;;  %17837 = vmatmul.mubr.msk.bf16.gmra.mrb[12].mxu1 %vm930_vm3, %v16011_v7  ;;  %v2491_v31 = vsel %vm20078_vm4, %v2486_v10, %v2490_v56  ;;  %v713_v39 = vshrl.u32 %v20298_v0, 16  ;;  %v716_v42 = vshll.u32 %v20298_v0, 16  ;;  %v487_v57 = vld [vmem:[%s20052_s22 + $0x80] sm:$0x1] }
  0x5d   : > { %v710_v38 = vrot.slane %v708_v11, 5  ;;  %v16238_v43 = vcombine.low %v2481_v17, %v2491_v31  ;;  %v696_v44 = vrot.slane %v695_v14, 4  ;;  %v705_v45 = vor.u32 %v704_v18, %v700_v5  ;;  %v16265_v10 = vld [vmem:[%s20052_s22 + $0x24] sm:$0xe] }
  0x5e   : > { %v3045_v47 = vsel %vm20304_vm7, %v16279_v21, %v3044_v62  ;;  %v3048_v49 = vsel %vm20304_vm7, %v3046_v25, %v3047_v63  ;;  %v715_v50 = vrot.slane %v713_v39, 4  ;;  %v718_v51 = vrot.slane %v716_v42, 5  ;;  %v20356_v39 = vld [vmem:[%s20052_s22 + $0x84] sm:$0xf] }
  0x5f   : > { %v722_v52 = vshll.u32 %v20311_v29, 16  ;;  %17973 = vmatmul.mubr.msk.bf16.gmra.mrb[12].mxu0 %vm930_vm3, %v16238_v43  ;;  %v701_v15 = vsel %vm20078_vm4, %v696_v44, %v700_v5  ;;  %v706_v62 = vrot.slane %v705_v45, 4  ;;  %v16296_v55 = vcombine.low %v3045_v47, %v3048_v49  ;;  %v20364_v43 = vld [vmem:[%s20052_s22 + $0x88] sm:$0xf] }
  0x60   : > { %v726_v56 = vshrl.u32 %v20311_v29, 16  ;;  %v719_v63 = vor.u32 %v718_v51, %v715_v50  ;;  %v732_v61 = vshll.u32 %v486_v26, 16  ;;  %v16280_v2 = vrot.slane %v16264_v48, 9 }
  0x61   : > { %v724_v58 = vrot.slane %v722_v52, 5  ;;  %v711_v6 = vsel %vm20078_vm4, %v706_v62, %v710_v38  ;;  %17994 = vmatprep.mubr.msk.bf16.mxu0 %vm930_vm3, %v16296_v55  ;;  %v3055_v5 = vsel %vm20304_vm7, %v20121_v30, %v3054_v28  ;;  %v737_v17 = vshrl.u32 %v20330_v53, 16  ;;  %v488_v52 = vld [vmem:[%s20052_s22 + $0x8c] sm:$0x1] }
  0x62   : > { %v728_v7 = vrot.slane %v726_v56, 4  ;;  %v16012_v11 = vcombine.low %v701_v15, %v711_v6  ;;  %v720_v14 = vrot.slane %v719_v63, 4  ;;  %v734_v18 = vrot.slane %v732_v61, 5 }
  0x63   : > { %v3052_v21 = vsel %vm20304_vm7, %v16280_v2, %v3051_v22  ;;  %v739_v38 = vrot.slane %v737_v17, 4  ;;  %v740_v1 = vshll.u32 %v20330_v53, 16  ;;  %v746_v30 = vshll.u32 %v20337_v16, 16  ;;  %v20369_v22 = vld [vmem:[%s26224_s1 + $0xe] sm:$0x3] }
  0x64   : > { %v729_v25 = vor.u32 %v728_v7, %v724_v58  ;;  %v16297_v31 = vcombine.low %v3052_v21, %v3055_v5  ;;  %17840 = vmatprep.mubr.msk.bf16.mxu1 %vm930_vm3, %v16012_v11  ;;  %v725_v28 = vsel %vm20078_vm4, %v720_v14, %v724_v58  ;;  %v750_v60 = vshrl.u32 %v20337_v16, 16  ;;  %v20388_v5 = vld [vmem:[%s20052_s22 + $0x90] sm:$0xf] }
  0x65   : > { %v756_v42 = vshll.u32 %v487_v57, 16  ;;  %v742_v45 = vrot.slane %v740_v1, 5  ;;  %v16281_v47 = vrot.slane %v16265_v10, 9  ;;  %v3058_v26 = vrot.slane %v20128_v46, 5  ;;  %v16266_v57 = vld [vmem:[%s20052_s22 + $0x30] sm:$0xe] }
  0x66   : > { %v730_v44 = vrot.slane %v729_v25, 4  ;;  %v748_v48 = vrot.slane %v746_v30, 5  ;;  %v752_v49 = vrot.slane %v750_v60, 4  ;;  %v3061_v51 = vrot.slane %v20137_v54, 5  ;;  %v20400_v30 = vld [vmem:[%s20052_s22 + $0x94] sm:$0xf] }
  0x67   : > { %v758_v50 = vrot.slane %v756_v42, 5  ;;  %17995 = vmatmul.mubr.msk.bf16.vlgmr.msra.gmra.mrb[0].mxu0 %vm930_vm3, %v16297_v31  ;;  %v743_v62 = vor.u32 %v742_v45, %v739_v38  ;;  %v3059_v55 = vsel %vm20304_vm7, %v16281_v47, %v3058_v26  ;;  %v3060_v56 = vrot.slane %v3058_v26, 4  ;;  %v489_v60 = vld [vmem:[%s20052_s22 + $0x98] sm:$0x1]  ;;  %v16267_v26 = vld [vmem:[%s20052_s22 + $0x3c] sm:$0xe] }
  0x68   : > { %v735_v15 = vsel %vm20078_vm4, %v730_v44, %v734_v18  ;;  %18027 = vmatpush3.bf16.msra.mxu0 %v20088_v41  ;;  %v753_v46 = vor.u32 %v752_v49, %v748_v48  ;;  %v761_v58 = vshrl.u32 %v20356_v39, 16  ;;  %v764_v54 = vshll.u32 %v20356_v39, 16 }
  0x69   : > { %v16013_v63 = vcombine.low %v725_v28, %v735_v15  ;;  %v744_v61 = vrot.slane %v743_v62, 4  ;;  %v3062_v2 = vsel %vm20304_vm7, %v3060_v56, %v3061_v51  ;;  %v770_v6 = vshll.u32 %v20364_v43, 16  ;;  %19518 = vmatprep.subr.msk.bf16.mxu0 %vm979_vm0, %v20369_v22 }
  0x6a   : > { %v774_v7 = vshrl.u32 %v20364_v43, 16  ;;  %v754_v41 = vrot.slane %v753_v46, 4  ;;  %v16298_v17 = vcombine.low %v3059_v55, %v3062_v2  ;;  %v763_v10 = vrot.slane %v761_v58, 4  ;;  %v20420_v46 = vld [vmem:[%s20052_s22 + $0xa0] sm:$0xf] }
  0x6b   : > { %17841 = vmatmul.mubr.msk.bf16.gmra.mrb[16].mxu1 %vm930_vm3, %v16013_v63  ;;  %v766_v11 = vrot.slane %v764_v54, 5  ;;  %v749_v14 = vsel %vm20078_vm4, %v744_v61, %v748_v48  ;;  %v772_v18 = vrot.slane %v770_v6, 5  ;;  %v780_v25 = vshll.u32 %v488_v52, 16  ;;  %v20409_v52 = vld [vmem:[%s20052_s22 + $0x9c] sm:$0xf] }
  0x6c   : > { %v776_v21 = vrot.slane %v774_v7, 4  ;;  %v759_v31 = vsel %vm20078_vm4, %v754_v41, %v758_v50  ;;  %17998 = vmatprep.mubr.msk.bf16.mxu0 %vm930_vm3, %v16298_v17  ;;  %v16282_v1 = vrot.slane %v16266_v57, 9  ;;  %v3065_v28 = vrot.slane %v20157_v33, 5 }
  0x6d   : > { %v767_v38 = vor.u32 %v766_v11, %v763_v10  ;;  %v16014_v42 = vcombine.low %v749_v14, %v759_v31  ;;  %v782_v45 = vrot.slane %v780_v25, 5  ;;  %v3068_v47 = vrot.slane %v20165_v40, 5  ;;  %v490_v10 = vld [vmem:[%s20052_s22 + $0xa4] sm:$0x1]  ;;  %v16268_v11 = vld [vmem:[%s20052_s22 + $0x48] sm:$0xe] }
  0x6e   : > { %v777_v44 = vor.u32 %v776_v21, %v772_v18  ;;  %v3066_v49 = vsel %vm20304_vm7, %v16282_v1, %v3065_v28  ;;  %v3067_v50 = vrot.slane %v3065_v28, 4  ;;  %v785_v51 = vshrl.u32 %v20388_v5, 16 }
  0x6f   : > { %v768_v48 = vrot.slane %v767_v38, 4  ;;  %17844 = vmatprep.mubr.msk.bf16.mxu1 %vm930_vm3, %v16014_v42  ;;  %v788_v15 = vshll.u32 %v20388_v5, 16  ;;  %v794_v62 = vshll.u32 %v20400_v30, 16  ;;  %v798_v40 = vshrl.u32 %v20400_v30, 16 }
  0x70   : > { %v778_v33 = vrot.slane %v777_v44, 4  ;;  %v3069_v56 = vsel %vm20304_vm7, %v3067_v50, %v3068_v47  ;;  %v787_v57 = vrot.slane %v785_v51, 4  ;;  %v804_v63 = vshll.u32 %v489_v60, 16 }
  0x71   : > { %v773_v55 = vsel %vm20078_vm4, %v768_v48, %v772_v18  ;;  %v16299_v54 = vcombine.low %v3066_v49, %v3069_v56  ;;  %v790_v61 = vrot.slane %v788_v15, 5  ;;  %v796_v2 = vrot.slane %v794_v62, 5  ;;  %v20446_v56 = vld [vmem:[%s20052_s22 + $0xac] sm:$0xf] }
  0x72   : > { %v783_v58 = vsel %vm20078_vm4, %v778_v33, %v782_v45  ;;  %v800_v7 = vrot.slane %v798_v40, 4  ;;  %v806_v41 = vrot.slane %v804_v63, 5  ;;  %v16283_v17 = vrot.slane %v16267_v26, 9  ;;  %v20441_v33 = vld [vmem:[%s20052_s22 + $0xa8] sm:$0xf] }
  0x73   : > { %v16015_v6 = vcombine.low %v773_v55, %v783_v58  ;;  %17999 = vmatmul.mubr.msk.bf16.gmra.mrb[4].mxu0 %vm930_vm3, %v16299_v54  ;;  %v791_v14 = vor.u32 %v790_v61, %v787_v57  ;;  %v3072_v18 = vrot.slane %v20182_v20, 5  ;;  %v3075_v21 = vrot.slane %v20187_v34, 5  ;;  %v491_v61 = vld [vmem:[%s20052_s22 + $0xb0] sm:$0x1] }
  0x74   : > { %v809_v25 = vshrl.u32 %v20409_v52, 16  ;;  %v801_v31 = vor.u32 %v800_v7, %v796_v2  ;;  %v812_v38 = vshll.u32 %v20409_v52, 16  ;;  %v818_v1 = vshll.u32 %v20420_v46, 16 }
  0x75   : > { %17845 = vmatmul.mubr.msk.bf16.gmra.mrb[20].mxu1 %vm930_vm3, %v16015_v6  ;;  %v822_v28 = vshrl.u32 %v20420_v46, 16  ;;  %v792_v60 = vrot.slane %v791_v14, 4  ;;  %v3073_v42 = vsel %vm20304_vm7, %v16283_v17, %v3072_v18  ;;  %v3074_v20 = vrot.slane %v3072_v18, 4  ;;  %v20461_v14 = vld [vmem:[%s20052_s22 + $0xb4] sm:$0xf] }
  0x76   : > { %v811_v44 = vrot.slane %v809_v25, 4  ;;  %v802_v34 = vrot.slane %v801_v31, 4  ;;  %v814_v45 = vrot.slane %v812_v38, 5  ;;  %v820_v47 = vrot.slane %v818_v1, 5 }
  0x77   : > { %v824_v26 = vrot.slane %v822_v28, 4  ;;  %v797_v48 = vsel %vm20078_vm4, %v792_v60, %v796_v2  ;;  %v3076_v49 = vsel %vm20304_vm7, %v3074_v20, %v3075_v21  ;;  %v828_v50 = vshll.u32 %v490_v10, 16  ;;  %v16269_v2 = vld [vmem:[%s20052_s22 + $0x54] sm:$0xe] }
  0x78   : > { %v16284_v51 = vrot.slane %v16268_v11, 9  ;;  %v807_v15 = vsel %vm20078_vm4, %v802_v34, %v806_v41  ;;  %v16300_v62 = vcombine.low %v3073_v42, %v3076_v49  ;;  %v815_v40 = vor.u32 %v814_v45, %v811_v44  ;;  %v20470_v42 = vld [vmem:[%s20052_s22 + $0xb8] sm:$0xf]  ;;  %v492_v49 = vld [vmem:[%s20052_s22 + $0xbc] sm:$0x1] }
  0x79   : > { %v825_v55 = vor.u32 %v824_v26, %v820_v47  ;;  %v16016_v57 = vcombine.low %v797_v48, %v807_v15  ;;  %v830_v63 = vrot.slane %v828_v50, 5  ;;  %v3079_v58 = vrot.slane %v20205_v8, 5 }
  0x7a   : > { %v3082_v54 = vrot.slane %v20213_v23, 5  ;;  %18002 = vmatprep.mubr.msk.bf16.mxu0 %vm930_vm3, %v16300_v62  ;;  %v816_v6 = vrot.slane %v815_v40, 4  ;;  %v833_v41 = vshrl.u32 %v20441_v33, 16  ;;  %v836_v17 = vshll.u32 %v20441_v33, 16 }
  0x7b   : > { %v826_v7 = vrot.slane %v825_v55, 4  ;;  %17848 = vmatprep.mubr.msk.bf16.mxu1 %vm930_vm3, %v16016_v57  ;;  %v3080_v10 = vsel %vm20304_vm7, %v16284_v51, %v3079_v58  ;;  %v3081_v11 = vrot.slane %v3079_v58, 4  ;;  %v842_v8 = vshll.u32 %v20446_v56, 16  ;;  %v16270_v55 = vld [vmem:[%s20052_s22 + $0x60] sm:$0xe] }
  0x7c   : > { %v846_v23 = vshrl.u32 %v20446_v56, 16  ;;  %v821_v18 = vsel %vm20078_vm4, %v816_v6, %v820_v47  ;;  %v835_v25 = vrot.slane %v833_v41, 4  ;;  %v838_v31 = vrot.slane %v836_v17, 5  ;;  %v16271_v6 = vld [vmem:[%s20052_s22 + $0x6c] sm:$0xe] }
  0x7d   : > { %v831_v21 = vsel %vm20078_vm4, %v826_v7, %v830_v63  ;;  %v3083_v1 = vsel %vm20304_vm7, %v3081_v11, %v3082_v54  ;;  %v844_v28 = vrot.slane %v842_v8, 5  ;;  %v852_v34 = vshll.u32 %v491_v61, 16  ;;  %v16207_v11 = vld [vmem:[%s20052_s22 + $0x70] sm:$0xf]  ;;  %v16208_v8 = vld [vmem:[%s20052_s22 + $0x74] sm:$0x1] }
  0x7e   : > { %v16017_v38 = vcombine.low %v821_v18, %v831_v21  ;;  %v848_v60 = vrot.slane %v846_v23, 4  ;;  %v16301_v20 = vcombine.low %v3080_v10, %v3083_v1  ;;  %v839_v44 = vor.u32 %v838_v31, %v835_v25 }
  0x7f   : > { %v16285_v45 = vrot.slane %v16269_v2, 9  ;;  %v3086_v26 = vrot.slane %v20236_v4, 5  ;;  %v3089_v48 = vrot.slane %v20242_v12, 5  ;;  %v857_v50 = vshrl.u32 %v20461_v14, 16 }
  0x80   : > { %17849 = vmatmul.mubr.msk.bf16.gmra.mrb[24].mxu1 %vm930_vm3, %v16017_v38  ;;  %v849_v47 = vor.u32 %v848_v60, %v844_v28  ;;  %18003 = vmatmul.mubr.msk.bf16.gmra.mrb[8].mxu0 %vm930_vm3, %v16301_v20  ;;  %v840_v51 = vrot.slane %v839_v44, 4  ;;  %v854_v15 = vrot.slane %v852_v34, 5  ;;  %v860_v62 = vshll.u32 %v20461_v14, 16 }
  0x81   : > { %v866_v40 = vshll.u32 %v20470_v42, 16  ;;  %v3087_v4 = vsel %vm20304_vm7, %v16285_v45, %v3086_v26  ;;  %v3088_v12 = vrot.slane %v3086_v26, 4  ;;  %v859_v63 = vrot.slane %v857_v50, 4 }
  0x82   : > { %v850_v57 = vrot.slane %v849_v47, 4  ;;  %v845_v58 = vsel %vm20078_vm4, %v840_v51, %v844_v28  ;;  %v862_v54 = vrot.slane %v860_v62, 5  ;;  %v870_v2 = vshrl.u32 %v20470_v42, 16  ;;  %v16272_v47 = vld [vmem:[%s20052_s22 + $0x78] sm:$0xe] }
  0x83   : > { %v868_v61 = vrot.slane %v866_v40, 5  ;;  %v3090_v41 = vsel %vm20304_vm7, %v3088_v12, %v3089_v48  ;;  %v876_v17 = vshll.u32 %v492_v49, 16  ;;  %v16286_v10 = vrot.slane %v16270_v55, 9  ;;  %v19878_v51 = vld [vmem:[%s20052_s22] sm:$0xf] }
  0x84   : > { %v855_v7 = vsel %vm20078_vm4, %v850_v57, %v854_v15  ;;  %v16302_v18 = vcombine.low %v3087_v4, %v3090_v41  ;;  %v863_v21 = vor.u32 %v862_v54, %v859_v63  ;;  %v872_v25 = vrot.slane %v870_v2, 4  ;;  %v20508_v15 = vld [vmem:[%s20052_s22 + $0x4] sm:$0xf]  ;;  %v20512_v40 = vld [vmem:[%s20052_s22 + $0x7c] sm:$0xf] }
  0x85   : > { %v16018_v23 = vcombine.low %v845_v58, %v855_v7  ;;  %v878_v31 = vrot.slane %v876_v17, 5  ;;  %v3093_v38 = vrot.slane %v20266_v59, 5  ;;  %v3096_v1 = vrot.slane %v20273_v9, 5  ;;  %v20515_v55 = vld [vmem:[%s20052_s22 + $0x80] sm:$0x1] }
  0x86   : > { %v16287_v28 = vrot.slane %v16271_v6, 9  ;;  %18006 = vmatprep.mubr.msk.bf16.mxu0 %vm930_vm3, %v16302_v18  ;;  %v864_v60 = vrot.slane %v863_v21, 4  ;;  %v873_v20 = vor.u32 %v872_v25, %v868_v61  ;;  %v3100_v44 = vrot.slane %v16207_v11, 5  ;;  %v16213_v57 = vld [vmem:[%s20052_s22 + $0x88] sm:$0xf] }
  0x87   : > { %17852 = vmatprep.mubr.msk.bf16.mxu1 %vm930_vm3, %v16018_v23  ;;  %v3103_v34 = vrot.slane %v16208_v8, 5  ;;  %v3094_v45 = vsel %vm20304_vm7, %v16286_v10, %v3093_v38  ;;  %v3095_v59 = vrot.slane %v3093_v38, 4  ;;  %v16036_v62 = vcombine.low %v19878_v51, %v20508_v15  ;;  %v16214_v54 = vld [vmem:[%s20052_s22 + $0x8c] sm:$0x1]  ;;  %v16216_v17 = vld [vmem:[%s20052_s22 + $0x94] sm:$0xf] }
  0x88   : > { %v869_v9 = vsel %vm20078_vm4, %v864_v60, %v868_v61  ;;  %v874_v26 = vrot.slane %v873_v20, 4  ;;  %v3101_v48 = vsel %vm20304_vm7, %v16287_v28, %v3100_v44  ;;  %v3102_v49 = vrot.slane %v3100_v44, 4  ;;  %v16273_v61 = vld [vmem:[%s20052_s22 + $0x84] sm:$0xe]  ;;  %v16274_v23 = vld [vmem:[%s20052_s22 + $0x90] sm:$0xe] }
  0x89   : > { %v3097_v50 = vsel %vm20304_vm7, %v3095_v59, %v3096_v1  ;;  %v16288_v58 = vrot.slane %v16272_v47, 9  ;;  %v3107_v7 = vrot.slane %v20512_v40, 5  ;;  %v3110_v41 = vrot.slane %v20515_v55, 5  ;;  %v16217_v25 = vld [vmem:[%s20052_s22 + $0x98] sm:$0x1] }
  0x8a   : > { %v879_v4 = vsel %vm20078_vm4, %v874_v26, %v878_v31  ;;  %v16303_v12 = vcombine.low %v3094_v45, %v3097_v50  ;;  %v3104_v63 = vsel %vm20304_vm7, %v3102_v49, %v3103_v34  ;;  %v16289_v10 = vrot.slane %v16273_v61, 9  ;;  %v16219_v31 = vld [vmem:[%s20052_s22 + $0xa0] sm:$0xf]  ;;  %v16220_v60 = vld [vmem:[%s20052_s22 + $0xa4] sm:$0x1] }
  0x8b   : > { %v16019_v2 = vcombine.low %v869_v9, %v879_v4  ;;  %v16304_v6 = vcombine.low %v3101_v48, %v3104_v63  ;;  %v3114_v11 = vrot.slane %v16213_v57, 5  ;;  %v3117_v8 = vrot.slane %v16214_v54, 5  ;;  %v16275_v20 = vld [vmem:[%s20052_s22 + $0x9c] sm:$0xe]  ;;  %v19880_v44 = vld [vmem:[%s20052_s22 + $0xc] sm:$0xf] }
  0x8c   : > { %18007 = vmatmul.mubr.msk.bf16.gmra.mrb[12].mxu0 %vm930_vm3, %v16303_v12  ;;  %v3108_v18 = vsel %vm20304_vm7, %v16288_v58, %v3107_v7  ;;  %v3109_v21 = vrot.slane %v3107_v7, 4  ;;  %v3121_v28 = vrot.slane %v16216_v17, 5  ;;  %v20542_v34 = vld [vmem:[%s20052_s22 + $0x10] sm:$0xf]  ;;  %v19882_v47 = vld [vmem:[%s20052_s22 + $0x18] sm:$0xf] }
  0x8d   : > { %17853 = vmatmul.mubr.msk.bf16.gmra.mrb[28].mxu1 %vm930_vm3, %v16019_v2  ;;  %18010 = vmatprep.mubr.msk.bf16.mxu0 %vm930_vm3, %v16304_v6  ;;  %v3115_v38 = vsel %vm20304_vm7, %v16289_v10, %v3114_v11  ;;  %v3116_v1 = vrot.slane %v3114_v11, 4  ;;  %v16037_v45 = vcombine.low %v19880_v44, %v20542_v34  ;;  %v20549_v9 = vld [vmem:[%s20052_s22 + $0x1c] sm:$0xf]  ;;  %v16290_v48 = vrot.slane %v16274_v23, 9  ;;  %v16222_v57 = vld [vmem:[%s20052_s22 + $0xac] sm:$0xf] }
  0x8e   : > { %17858 = vmatprep.mubr.msk.bf16.mxu1 %vm930_vm3, %v16036_v62  ;;  %v3111_v59 = vsel %vm20304_vm7, %v3109_v21, %v3110_v41  ;;  %v16038_v26 = vcombine.low %v19882_v47, %v20549_v9  ;;  %v3123_v51 = vrot.slane %v3121_v28, 4  ;;  %v3124_v62 = vrot.slane %v16217_v25, 5  ;;  %v19884_v54 = vld [vmem:[%s26224_s1 + $0x4] sm:$0x3]  ;;  %v16225_v2 = vld [vmem:[%s20052_s22 + $0xb8] sm:$0xf] }
  0x8f   : > { %v16305_v49 = vcombine.low %v3108_v18, %v3111_v59  ;;  %v3118_v50 = vsel %vm20304_vm7, %v3116_v1, %v3117_v8  ;;  %v16291_v12 = vrot.slane %v16275_v20, 9  ;;  %v3128_v63 = vrot.slane %v16219_v31, 5  ;;  %v20564_v7 = vld [vmem:[%s26224_s1 + $0x6] sm:$0x3]  ;;  %v16223_v10 = vld [vmem:[%s20052_s22 + $0xb0] sm:$0x1] }
  0x90   : > { %v16306_v4 = vcombine.low %v3115_v38, %v3118_v50  ;;  %v3131_v58 = vrot.slane %v16220_v60, 5  ;;  %v1698_v61 = vsel %vm979_vm0, %v19884_v54, 0  ;;  %v3122_v41 = vsel %vm20304_vm7, %v16290_v48, %v3121_v28  ;;  %v16276_v11 = vld [vmem:[%s20052_s22 + $0xa8] sm:$0xe]  ;;  %v16226_v25 = vld [vmem:[%s20052_s22 + $0xbc] sm:$0x1] }
  0x91   : > { %v3130_v6 = vrot.slane %v3128_v63, 4  ;;  %v3125_v17 = vsel %vm20304_vm7, %v3123_v51, %v3124_v62  ;;  %v3135_v8 = vrot.slane %v16222_v57, 5  ;;  %v3129_v23 = vsel %vm20304_vm7, %v16291_v12, %v3128_v63  ;;  %v16277_v31 = vld [vmem:[%s20052_s22 + $0xb4] sm:$0xe]  ;;  %v19885_v38 = vld [vmem:[%s20052_s22 + $0x24] sm:$0xf] }
  0x92   : > { %v3142_v21 = vrot.slane %v16225_v2, 5  ;;  %v20585_v1 = vld [vmem:[%s20052_s22 + $0x28] sm:$0xf]  ;;  %v16307_v60 = vcombine.low %v3122_v41, %v3125_v17  ;;  %v16292_v44 = vrot.slane %v16276_v11, 9  ;;  %v3138_v59 = vrot.slane %v16223_v10, 5 }
  0x93   : > { %v3132_v18 = vsel %vm20304_vm7, %v3130_v6, %v3131_v58  ;;  %v16039_v28 = vcombine.low %v19885_v38, %v20585_v1  ;;  %v19887_v47 = vld [vmem:[%s20052_s22 + $0x30] sm:$0xf]  ;;  %v3145_v51 = vrot.slane %v16226_v25, 5  ;;  %v16228_v62 = vld [vmem:[%s20052_s22 + $0xc4] sm:$0xf]  ;;  %v2530_v25 = vshrl.u32 %v20512_v40, 16 }
  0x94   : > { %18011 = vmatmul.mubr.msk.bf16.gmra.mrb[16].mxu0 %vm930_vm3, %v16305_v49  ;;  %v16308_v20 = vcombine.low %v3129_v23, %v3132_v18  ;;  %v16293_v49 = vrot.slane %v16277_v31, 9  ;;  %v3144_v50 = vrot.slane %v3142_v21, 4  ;;  %v3136_v57 = vsel %vm20304_vm7, %v16292_v44, %v3135_v8  ;;  %v16278_v12 = vld [vmem:[%s20052_s22 + $0xc0] sm:$0xe]  ;;  %v19889_v41 = vld [vmem:[%s20052_s22 + $0x3c] sm:$0xf] }
  0x95   : > { %17859 = vmatmul.mubr.msk.bf16.vlgmr.msra.gmra.mrb[0].mxu1 %vm930_vm3, %v16037_v45  ;;  %18014 = vmatprep.mubr.msk.bf16.mxu0 %vm930_vm3, %v16306_v4  ;;  %v3137_v45 = vrot.slane %v3135_v8, 4  ;;  %v3149_v63 = vrot.slane %v16228_v62, 5  ;;  %v16294_v6 = vrot.slane %v16278_v12, 9  ;;  %v20610_v17 = vld [vmem:[%s20052_s22 + $0x40] sm:$0xf]  ;;  %v16042_v18 = vcombine.low %v20217_v27, %v20220_v36  ;;  %v19559_v62 = vld [vmem:[%s20052_s22 + $0x24] sm:$0xff]  }
  0x96   : > { %17891 = vmatpush3.bf16.msra.mxu1 %v1698_v61  ;;  %17862 = vmatprep.mubr.msk.bf16.mxu1 %vm930_vm3, %v16038_v26  ;;  %v20590_v26 = vld [vmem:[%s20052_s22 + $0x34] sm:$0xf]  ;;  %v3143_v58 = vsel %vm20304_vm7, %v16293_v49, %v3142_v21  ;;  %v3146_v54 = vsel %vm20304_vm7, %v3144_v50, %v3145_v51  ;;  %v16229_v61 = vld [vmem:[%s20052_s22 + $0xc8] sm:$0x1]  ;;  %v16041_v10 = vcombine.low %v19889_v41, %v20610_v17  ;;  %v2526_v21 = vshll.u32 %v20512_v40, 16 }
  0x97   : > { %19513 = vmatprep.subr.msk.bf16.mxu1 %vm979_vm0, %v20564_v7  ;;  %v16040_v48 = vcombine.low %v19887_v47, %v20590_v26  ;;  %v3139_v4 = vsel %vm20304_vm7, %v3137_v45, %v3138_v59  ;;  %v16310_v11 = vcombine.low %v3143_v58, %v3146_v54  ;;  %v3151_v8 = vrot.slane %v3149_v63, 4  ;;  %v1436_v45 = vld [vmem:[%s20052_s22] sm:$0xe]  ;;  %v1437_v59 = vld [vmem:[%s20052_s22 + $0xc] sm:$0xe] }
  0x98   : > { %v16309_v2 = vcombine.low %v3136_v57, %v3139_v4  ;;  %v3152_v23 = vrot.slane %v16229_v61, 5  ;;  %v3150_v31 = vsel %vm20304_vm7, %v16294_v6, %v3149_v63  ;;  %v20625_v27 = vrot.slane %v2526_v21, 5  ;;  %v1440_v41 = vld [vmem:[%s20052_s22 + $0x30] sm:$0xe] }
  0x99   : > { %v2532_v36 = vrot.slane %v2530_v25, 4  ;;  %v16044_v44 = vcombine.low %v20277_v19, %v20283_v35  ;;  %v2536_v47 = vshll.u32 %v20515_v55, 16  ;;  %v16068_v19 = vrot.slane %v1436_v45, 9 }
  0x9a   : > { %v3153_v38 = vsel %vm20304_vm7, %v3151_v8, %v3152_v23  ;;  %26429 = vst [vmem:[#allocation6_spill] sm:$0xff] %v20625_v27  ;;  %v16069_v35 = vrot.slane %v1437_v59, 9  ;;  %v1503_v4 = vrot.slane %v20549_v9, 5  ;;  %v1510_v12 = vrot.slane %v20585_v1, 5  ;;  %v1441_v8 = vld [vmem:[%s20052_s22 + $0x3c] sm:$0xe] }
  0x9b   : > { %v16311_v40 = vcombine.low %v3150_v31, %v3153_v38  ;;  %v2533_v49 = vor.u32 %v2532_v36, %v20625_v27  ;;  %v20645_v51 = vrot.slane %v2536_v47, 5  ;;  %v16045_v58 = vcombine.low %v20298_v0, %v20311_v29  ;;  %v1442_v31 = vld [vmem:[%s20052_s22 + $0x48] sm:$0xe]  ;;  %v19895_v59 = vld [vmem:[%s20052_s22 + $0x38] sm:$0x1] }
  0x9c   : > { %18015 = vmatmul.mubr.msk.bf16.gmra.mrb[20].mxu0 %vm930_vm3, %v16307_v60  ;;  %v16043_v60 = vcombine.low %v20246_v24, %v20252_v37  ;;  %v19892_v24 = vld [vmem:[%s20052_s22 + $0x14] sm:$0x1]  ;;  %v4338_v54 = vsel %vm979_vm0, %v20369_v22, 0  ;;  %v16046_v61 = vcombine.low %v20330_v53, %v20337_v16  ;;  %v16047_v6 = vcombine.low %v20356_v39, %v20364_v43  ;;  %v19893_v16 = vld [vmem:[%s20052_s22 + $0x20] sm:$0x1] }
  0x9d   : > { %17863 = vmatmul.mubr.msk.bf16.gmra.mrb[4].mxu1 %vm930_vm3, %v16039_v28  ;;  %18018 = vmatprep.mubr.msk.bf16.mxu0 %vm930_vm3, %v16308_v20  ;;  %v1496_v28 = vrot.slane %v20542_v34, 5  ;;  %v19557_v20 = vld [vmem:[%s20052_s22 + $0x18] sm:$0xff]   ;;  %v19891_v34 = vld [vmem:[%s20052_s22 + $0x8] sm:$0x1]  ;;  %v1499_v37 = vrot.slane %v19892_v24, 5  ;;  %26430 = vst [vmem:[#allocation7_spill] sm:$0xff] %v20645_v51  ;;  %v16048_v9 = vcombine.low %v20388_v5, %v20400_v30 }
  0x9e   : > { %17866 = vmatprep.mubr.msk.bf16.mxu1 %vm930_vm3, %v16040_v48  ;;  %v1489_v48 = vrot.slane %v20508_v15, 5  ;;  %v1492_v50 = vrot.slane %v19891_v34, 5  ;;  %v1438_v15 = vld [vmem:[%s20052_s22 + $0x18] sm:$0xe]  ;;  %v20650_v63 = vrot.slane %v2533_v49, 4  ;;  %v1506_v22 = vrot.slane %v19893_v16, 5 }
  0x9f   : > { %v1498_v55 = vrot.slane %v1496_v28, 4  ;;  %v16070_v1 = vrot.slane %v1438_v15, 9  ;;  %v20672_v29 = vsel %vm20304_vm7, %v16069_v35, %v1496_v28  ;;  %v1512_v25 = vrot.slane %v1510_v12, 4  ;;  %v16393_v24 = vld [vmem:[%s20052_s22 + $0x18] sm:$0xf] }
  0xa0   : > { %v1491_v57 = vrot.slane %v1489_v48, 4  ;;  %26431 = vst [vmem:[#allocation8_spill] sm:$0xff] %v20650_v63  ;;  %v20668_v0 = vsel %vm20304_vm7, %v16068_v19, %v1489_v48  ;;  %v1520_v47 = vrot.slane %v19895_v59, 5  ;;  %v20709_v49 = vsel %vm979_vm0, %v20564_v7, 0  ;;  %v16394_v7 = vld [vmem:[%s20052_s22 + $0x1c] sm:$0xf] }
  0xa1   : > { %v20676_v53 = vsel %vm20304_vm7, %v1498_v55, %v1499_v37  ;;  %v20713_v34 = vsel %vm20304_vm7, %v16070_v1, %v1503_v4  ;;  %v19563_v37 = vld [vmem:[%s20052_s22 + $0x3c] sm:$0xff]   ;;  %v16073_v35 = vrot.slane %v1441_v8, 9  ;;  %v19896_v55 = vld [vmem:[%s20052_s22 + $0x44] sm:$0x1]  ;;  %v3859_v8 = vshll.u32 %v16393_v24, 16 }
  0xa2   : > { %v20687_v23 = vsel %vm20304_vm7, %v1491_v57, %v1492_v50  ;;  %v1443_v50 = vld [vmem:[%s20052_s22 + $0x54] sm:$0xe]  ;;  %v1527_v15 = vrot.slane %v19896_v55, 5  ;;  %v16397_v39 = vld [vmem:[%s20052_s22 + $0x28] sm:$0xf] }
  0xa3   : > { %v19903_v5 = vld [vmem:[%s20052_s22 + $0x70] sm:$0xf]  ;;  %vm5298_vm13 = vsmask.f32 256  ;;  %vm5299_vm14 = vsmask.f32 4368 }
  0xa4   : > { %18019 = vmatmul.mubr.msk.bf16.gmra.mrb[24].mxu0 %vm930_vm3, %v16309_v2  ;;  %v1439_v2 = vld [vmem:[%s20052_s22 + $0x24] sm:$0xe]  ;;  %v1552_v30 = vrot.slane %v19903_v5, 5  ;;  %vm22036_vm1 = vmand %vm337_vm9, %vm5298_vm13 }
  0xa5   : > { %17867 = vmatmul.mubr.msk.bf16.gmra.mrb[8].mxu1 %vm930_vm3, %v16041_v10  ;;  %18022 = vmatprep.mubr.msk.bf16.mxu0 %vm930_vm3, %v16310_v11  ;;  %v1517_v10 = vrot.slane %v20590_v26, 5  ;;  %v19561_v11 = vld [vmem:[%s20052_s22 + $0x30] sm:$0xff]   ;;  %v16071_v21 = vrot.slane %v1439_v2, 9 }
  0xa6   : > { %17870 = vmatprep.mubr.msk.bf16.mxu1 %vm930_vm3, %v16042_v18  ;;  %v20683_v26 = vld [vmem:[%s26224_s1 + $0x10] sm:$0x3]  ;;  %v1505_v18 = vrot.slane %v1503_v4, 4  ;;  %v1554_v48 = vrot.slane %v1552_v30, 4 }
  0xa7   : > { %v1519_v45 = vrot.slane %v1517_v10, 4  ;;  %v20720_v19 = vsel %vm20304_vm7, %v16071_v21, %v1510_v12  ;;  %v3869_v21 = vshrl.u32 %v16394_v7, 16 }
  0xa8   : > { %v20729_v4 = vsel %vm20304_vm7, %v1505_v18, %v1506_v22  ;;  %v3856_v22 = vshrl.u32 %v16393_v24, 16  ;;  %v3865_v18 = vshll.u32 %v16394_v7, 16  ;;  %v16396_v24 = vld [vmem:[%s20052_s22 + $0x24] sm:$0xf] }
  0xa9   : > { %v20742_v1 = vsel %vm20304_vm7, %v1519_v45, %v1520_v47 }
  0xaa   : > { %v3858_v43 = vrot.slane %v3856_v22, 4  ;;  %v20784_v7 = vrot.slane %v3865_v18, 5  ;;  %v3883_v22 = vshll.u32 %v16396_v24, 16  ;;  %v3893_v18 = vshrl.u32 %v16397_v39, 16 }
  0xac   : > { %18023 = vmatmul.mubr.msk.bf16.gmra.mrb[28].mxu0 %vm930_vm3, %v16311_v40  ;;  %v19894_v40 = vld [vmem:[%s20052_s22 + $0x2c] sm:$0x1]  ;;  %v3885_v27 = vrot.slane %v3883_v22, 5 }
  0xad   : > { %17871 = vmatmul.mubr.msk.bf16.gmra.mrb[12].mxu1 %vm930_vm3, %v16043_v60  ;;  %18028 = vmatprep.mubr.msk.bf16.mxu0 %vm930_vm3, %v19557_v20  ;;  %v1513_v28 = vrot.slane %v19894_v40, 5  ;;  %v1524_v60 = vrot.slane %v20610_v17, 5  ;;  %v19899_v40 = vld [vmem:[%s20052_s22 + $0x50] sm:$0x1]  ;;  %v19904_v17 = vld [vmem:[%s20052_s22 + $0x74] sm:$0x1] }
  0xae   : > { %17874 = vmatprep.mubr.msk.bf16.mxu1 %vm930_vm3, %v16044_v44  ;;  %v16072_v44 = vrot.slane %v1440_v41, 9  ;;  %v16075_v41 = vrot.slane %v1443_v50, 9  ;;  %v1444_v50 = vld [vmem:[%s20052_s22 + $0x60] sm:$0xe]  ;;  %v16398_v20 = vld [vmem:[%s20052_s22 + $0x2c] sm:$0x1] }
  0xaf   : > { %v1526_v12 = vrot.slane %v1524_v60, 4  ;;  %v20755_v45 = vsel %vm20304_vm7, %v16073_v35, %v1524_v60  ;;  %v19900_v35 = vld [vmem:[%s20052_s22 + $0x5c] sm:$0x1] }
  0xb0   : > { %v20738_v2 = vsel %vm20304_vm7, %v16072_v44, %v1517_v10  ;;  %v1541_v55 = vrot.slane %v19900_v35, 5  ;;  %v1445_v35 = vld [vmem:[%s20052_s22 + $0x6c] sm:$0xe] }
  0xb1   : > { %v20759_v59 = vsel %vm20304_vm7, %v1526_v12, %v1527_v15  ;;  %v19901_v15 = vld [vmem:[%s20052_s22 + $0x64] sm:$0xf]  ;;  %v3871_v12 = vrot.slane %v3869_v21, 4  ;;  %v16077_v5 = vrot.slane %v1445_v35, 9 }
  0xb2   : > { %v19569_v21 = vld [vmem:[%s20052_s22 + $0x60] sm:$0xff]  }
  0xb4   : > { %18029 = vmatmul.mubr.msk.bf16.vlgmr.msra.gmra.mrb[0].mxu0 %vm930_vm3, %v19559_v62  ;;  %v19897_v62 = vld [vmem:[%s20052_s22 + $0x4c] sm:$0xf] }
  0xb5   : > { %17875 = vmatmul.mubr.msk.bf16.gmra.mrb[16].mxu1 %vm930_vm3, %v16045_v58  ;;  %18061 = vmatpush3.bf16.msra.mxu0 %v4338_v54  ;;  %v1531_v57 = vrot.slane %v19897_v62, 5  ;;  %v20733_v58 = vsel %vm20304_vm7, %v1512_v25, %v1513_v28  ;;  %v16074_v54 = vrot.slane %v1442_v31, 9  ;;  %v1534_v28 = vrot.slane %v19899_v40, 5 }
  0xb6   : > { %17878 = vmatprep.mubr.msk.bf16.mxu1 %vm930_vm3, %v16046_v61  ;;  %18032 = vmatprep.mubr.msk.bf16.mxu0 %vm930_vm3, %v19561_v11  ;;  %v19565_v61 = vld [vmem:[%s20052_s22 + $0x48] sm:$0xff]   ;;  %v19898_v11 = vld [vmem:[%s20052_s22 + $0x58] sm:$0xf]  ;;  %v1545_v62 = vrot.slane %v19901_v15, 5  ;;  %v16400_v15 = vld [vmem:[%s20052_s22 + $0x34] sm:$0xf] }
  0xb7   : > { %19519 = vmatprep.subr.msk.bf16.mxu0 %vm979_vm0, %v20683_v26  ;;  %v1538_v16 = vrot.slane %v19898_v11, 5  ;;  %v1533_v31 = vrot.slane %v1531_v57, 4  ;;  %v20763_v47 = vsel %vm20304_vm7, %v16074_v54, %v1531_v57  ;;  %v16395_v57 = vld [vmem:[%s20052_s22 + $0x20] sm:$0x1]  ;;  %v16399_v54 = vld [vmem:[%s20052_s22 + $0x30] sm:$0xf] }
  0xb8   : > { %v16076_v11 = vrot.slane %v1444_v50, 9  ;;  %v3907_v50 = vshll.u32 %v16399_v54, 16  ;;  %v3875_v25 = vshll.u32 %v16395_v57, 16  ;;  %v3913_v36 = vshll.u32 %v16400_v15, 16 }
  0xb9   : > { %v20774_v60 = vsel %vm20304_vm7, %v16075_v41, %v1538_v16  ;;  %v20790_v41 = vsel %vm20304_vm7, %v1533_v31, %v1534_v28  ;;  %v1547_v31 = vrot.slane %v1545_v62, 4  ;;  %v3904_v28 = vshrl.u32 %v16399_v54, 16 }
  0xba   : > { %v20832_v35 = vrot.slane %v3913_v36, 5 }
  0xbc   : > { %18033 = vmatmul.mubr.msk.bf16.gmra.mrb[4].mxu0 %vm930_vm3, %v19563_v37  ;;  %v1540_v37 = vrot.slane %v1538_v16, 4  ;;  %v19902_v16 = vld [vmem:[%s20052_s22 + $0x68] sm:$0x1] }
  0xbd   : > { %17879 = vmatmul.mubr.msk.bf16.gmra.mrb[20].mxu1 %vm930_vm3, %v16047_v6  ;;  %18036 = vmatprep.mubr.msk.bf16.mxu0 %vm930_vm3, %v19565_v61  ;;  %v3861_v6 = vrot.slane %v3859_v8, 5  ;;  %v19567_v61 = vld [vmem:[%s20052_s22 + $0x54] sm:$0xff]   ;;  %v1548_v40 = vrot.slane %v19902_v16, 5  ;;  %v3889_v8 = vshll.u32 %v16397_v39, 16  ;;  %v3872_v16 = vor.u32 %v3871_v12, %v20784_v7 }
  0xbe   : > { %17882 = vmatprep.mubr.msk.bf16.mxu1 %vm930_vm3, %v16048_v9  ;;  %v3880_v9 = vshrl.u32 %v16396_v24, 16  ;;  %v20799_v44 = vsel %vm20304_vm7, %v1540_v37, %v1541_v55  ;;  %v1555_v24 = vrot.slane %v19904_v17, 5  ;;  %v3917_v39 = vshrl.u32 %v16400_v15, 16 }
  0xbf   : > { %v3862_v10 = vor.u32 %v3861_v6, %v3858_v43  ;;  %v20805_v37 = vrot.slane %v3889_v8, 5  ;;  %v3895_v55 = vrot.slane %v3893_v18, 4  ;;  %v26432_v43 = vcombine.low %v20409_v52, %v20420_v46  ;;  %v19905_v8 = vld [vmem:[%s20052_s22 + $0x7c] sm:$0xf]  ;;  %v20841_v18 = vld [vmem:[%s20052_s22 + $0x38] sm:$0x1] }
  0xc0   : > { %v3882_v38 = vrot.slane %v3880_v9, 4  ;;  %v20814_v17 = vsel %vm20304_vm7, %v16076_v11, %v1545_v62  ;;  %v20818_v57 = vsel %vm20304_vm7, %v1547_v31, %v1548_v40  ;;  %v3906_v6 = vrot.slane %v3904_v28, 4  ;;  %26434 = vst [vmem:[#allocation9_spill] sm:$0xff] %v20841_v18 }
  0xc1   : > { %v3909_v12 = vrot.slane %v3907_v50, 5  ;;  %v26433_v52 = vcombine.low %v20441_v33, %v20446_v56  ;;  %v3863_v46 = vrot.slane %v3862_v10, 4  ;;  %v3873_v54 = vrot.slane %v3872_v16, 4  ;;  %v19571_v33 = vld [vmem:[%s20052_s22 + $0x6c] sm:$0xff]   ;;  %v1447_v16 = vld [vmem:[%s20052_s22 + $0x84] sm:$0xe] }
  0xc2   : > { %v3899_v62 = vshll.u32 %v16398_v20, 16  ;;  %v20826_v11 = vsel %vm20304_vm7, %v16077_v5, %v1552_v30  ;;  %v20830_v40 = vsel %vm20304_vm7, %v1554_v48, %v1555_v24  ;;  %v3919_v9 = vrot.slane %v3917_v39, 4  ;;  %v19572_v48 = vld [vmem:[%s20052_s22 + $0x78] sm:$0xff]  }
  0xc3   : > { %v3886_v10 = vor.u32 %v3885_v27, %v3882_v38  ;;  %v3896_v20 = vor.u32 %v3895_v55, %v20805_v37  ;;  %v1559_v30 = vrot.slane %v19905_v8, 5  ;;  %v3910_v38 = vor.u32 %v3909_v12, %v3906_v6  ;;  %v16402_v5 = vld [vmem:[%s20052_s22 + $0x3c] sm:$0xf] }
  0xc4   : > { %18037 = vmatmul.mubr.msk.bf16.gmra.mrb[8].mxu0 %vm930_vm3, %v19567_v61  ;;  %v3877_v61 = vrot.slane %v3875_v25, 5  ;;  %v1446_v25 = vld [vmem:[%s20052_s22 + $0x78] sm:$0xe]  ;;  %v20857_v50 = vrot.slane %v3899_v62, 5  ;;  %v3920_v39 = vor.u32 %v3919_v9, %v20832_v35  ;;  %v3923_v55 = vshll.u32 %v20841_v18, 16 }
  0xc5   : > { %17883 = vmatmul.mubr.msk.bf16.gmra.mrb[24].mxu1 %vm930_vm3, %v26432_v43  ;;  %18040 = vmatprep.mubr.msk.bf16.mxu0 %vm930_vm3, %v19569_v21  ;;  %v3868_v21 = vsel %vm20078_vm4, %v3863_v46, %v20784_v7  ;;  %v16078_v24 = vrot.slane %v1446_v25, 9  ;;  %v19906_v43 = vld [vmem:[%s20052_s22 + $0x88] sm:$0xf]  ;;  %v20865_v7 = vld [vmem:[%s20052_s22 + $0x40] sm:$0xf]  ;;  %v3887_v12 = vrot.slane %v3886_v10, 4  ;;  %v26436_v62 = vcombine.low %v20461_v14, %v20470_v42 }
  0xc6   : > { %17886 = vmatprep.mubr.msk.bf16.mxu1 %vm930_vm3, %v26433_v52  ;;  %v3878_v31 = vsel %vm20078_vm4, %v3873_v54, %v3877_v61  ;;  %v1566_v6 = vrot.slane %v19906_v43, 5  ;;  %26435 = vst [vmem:[#allocation10_spill] sm:$0xff] %v20865_v7  ;;  %v3897_v52 = vrot.slane %v3896_v20, 4  ;;  %v1561_v46 = vrot.slane %v1559_v30, 4  ;;  %v19907_v54 = vld [vmem:[%s20052_s22 + $0x80] sm:$0x1] }
  0xc7   : > { %v1562_v61 = vrot.slane %v19907_v54, 5  ;;  %v3911_v9 = vrot.slane %v3910_v38, 4  ;;  %v16079_v25 = vrot.slane %v1447_v16, 9  ;;  %v3928_v8 = vshrl.u32 %v16402_v5, 16  ;;  %v19573_v10 = vld [vmem:[%s20052_s22 + $0x84] sm:$0xff]  }
  0xc8   : > { %v3931_v43 = vshll.u32 %v16402_v5, 16  ;;  %v20879_v20 = vcombine.low %v3868_v21, %v3878_v31  ;;  %v20883_v14 = vsel %vm979_vm0, %v20683_v26, 0  ;;  %v3941_v38 = vshrl.u32 %v20865_v7, 16  ;;  %v19574_v21 = vld [vmem:[%s20052_s22 + $0x90] sm:$0xff]   ;;  %v19912_v18 = vld [vmem:[%s20052_s22 + $0xa0] sm:$0xf] }
  0xc9   : > { %v3921_v16 = vrot.slane %v3920_v39, 4  ;;  %v3925_v5 = vrot.slane %v3923_v55, 5  ;;  %v1568_v54 = vrot.slane %v1566_v6, 4  ;;  %v3892_v31 = vsel %vm20078_vm4, %v3887_v12, %v20805_v37 }
  0xca   : > { %v3902_v26 = vsel %vm20078_vm4, %v3897_v52, %v20857_v50  ;;  %v20898_v39 = vsel %vm20304_vm7, %v16078_v24, %v1559_v30  ;;  %v20902_v55 = vsel %vm20304_vm7, %v1561_v46, %v1562_v61  ;;  %v3916_v37 = vsel %vm20078_vm4, %v3911_v9, %v20832_v35  ;;  %v16408_v30 = vld [vmem:[%s20052_s22 + $0x54] sm:$0xf]  ;;  %v20919_v24 = vld [vmem:[%s20052_s22 + $0x58] sm:$0xf]  ;;  %v20924_v61 = vld [vmem:[%s20052_s22 + $0x90] sm:$0xe] }
  0xcb   : > { %v20915_v12 = vsel %vm20304_vm7, %v16079_v25, %v1566_v6  ;;  %v3930_v50 = vrot.slane %v3928_v8, 4  ;;  %v3933_v52 = vrot.slane %v3931_v43, 5  ;;  %v3943_v46 = vrot.slane %v3941_v38, 4 }
  0xcc   : > { %18041 = vmatmul.mubr.msk.bf16.gmra.mrb[12].mxu0 %vm930_vm3, %v19571_v33  ;;  %v26437_v33 = vcombine.low %v20668_v0, %v20687_v23  ;;  %v19908_v0 = vld [vmem:[%s20052_s22 + $0x8c] sm:$0x1]  ;;  %v3926_v36 = vsel %vm20078_vm4, %v3921_v16, %v3925_v5  ;;  %v3976_v25 = vshrl.u32 %v16408_v30, 16  ;;  %v3979_v8 = vshll.u32 %v16408_v30, 16 }
  0xcd   : > { %17887 = vmatmul.mubr.msk.bf16.gmra.mrb[28].mxu1 %vm930_vm3, %v26436_v62  ;;  %18044 = vmatprep.mubr.msk.bf16.mxu0 %vm930_vm3, %v19572_v48  ;;  %v3937_v48 = vshll.u32 %v20865_v7, 16  ;;  %v1569_v23 = vrot.slane %v19908_v0, 5  ;;  %v16405_v62 = vld [vmem:[%s20052_s22 + $0x48] sm:$0xf]  ;;  %v20908_v0 = vld [vmem:[%s20052_s22 + $0x4c] sm:$0xf]  ;;  %v26439_v38 = vcombine.low %v20672_v29, %v20676_v53  ;;  %v20942_v16 = vcombine.low %v3892_v31, %v3902_v26 }
  0xce   : > { %17892 = vmatprep.mubr.msk.bf16.mxu1 %vm930_vm3, %v26437_v33  ;;  %v20905_v33 = vld [vmem:[%s20052_s22 + $0x44] sm:$0x1]  ;;  %v3952_v27 = vshrl.u32 %v16405_v62, 16  ;;  %v3955_v15 = vshll.u32 %v16405_v62, 16  ;;  %v3961_v6 = vshll.u32 %v20908_v0, 16  ;;  %v3965_v9 = vshrl.u32 %v20908_v0, 16 }
  0xcf   : > { %26438 = vst [vmem:[#allocation11_spill] sm:$0xff] %v20905_v33  ;;  %v20921_v28 = vrot.slane %v3937_v48, 5  ;;  %v20930_v35 = vsel %vm20304_vm7, %v1568_v54, %v1569_v23  ;;  %v3985_v43 = vshll.u32 %v20919_v24, 16  ;;  %v3989_v48 = vshrl.u32 %v20919_v24, 16  ;;  %v16411_v31 = vld [vmem:[%s20052_s22 + $0x60] sm:$0xf] }
  0xd0   : > { %v3947_v5 = vshll.u32 %v20905_v33, 16  ;;  %v16080_v54 = vrot.slane %v20924_v61, 9  ;;  %v26440_v23 = vcombine.low %v20713_v34, %v20729_v4  ;;  %v20953_v29 = vcombine.low %v3916_v37, %v3926_v36  ;;  %v19575_v26 = vld [vmem:[%s20052_s22 + $0x9c] sm:$0xff]   ;;  %v19576_v30 = vld [vmem:[%s20052_s22 + $0xa8] sm:$0xff]  }
  0xd1   : > { %v3934_v53 = vor.u32 %v3933_v52, %v3930_v50  ;;  %v3954_v62 = vrot.slane %v3952_v27, 4  ;;  %v20964_v34 = vrot.slane %v3961_v6, 5  ;;  %v3967_v4 = vrot.slane %v3965_v9, 4  ;;  %v19909_v36 = vld [vmem:[%s26224_s1 + $0x8] sm:$0x3] }
  0xd2   : > { %v3978_v27 = vrot.slane %v3976_v25, 4  ;;  %v3981_v37 = vrot.slane %v3979_v8, 5  ;;  %v20973_v50 = vrot.slane %v3985_v43, 5  ;;  %v3991_v52 = vrot.slane %v3989_v48, 4  ;;  %v19910_v6 = vld [vmem:[%s20052_s22 + $0x94] sm:$0xf] }
  0xd3   : > { %v20979_v9 = vld [vmem:[%s20052_s22 + $0x64] sm:$0xf]  ;;  %v4000_v61 = vshrl.u32 %v16411_v31, 16  ;;  %v20981_v22 = vrot.slane %v3934_v53, 4  ;;  %v1580_v25 = vrot.slane %v19912_v18, 5  ;;  %v3968_v43 = vor.u32 %v3967_v4, %v20964_v34 }
  0xd4   : > { %18045 = vmatmul.mubr.msk.bf16.gmra.mrb[16].mxu0 %vm930_vm3, %v19573_v10  ;;  %26441 = vst [vmem:[#allocation12_spill] sm:$0xff] %v20979_v9  ;;  %v4003_v10 = vshll.u32 %v16411_v31, 16  ;;  %v3982_v31 = vor.u32 %v3981_v37, %v3978_v27  ;;  %v3992_v53 = vor.u32 %v3991_v52, %v20973_v50  ;;  %v26442_v18 = vcombine.low %v20720_v19, %v20733_v58  ;;  %v19577_v37 = vld [vmem:[%s20052_s22 + $0xb4] sm:$0xff]  }
  0xd5   : > { %17893 = vmatmul.mubr.msk.bf16.vlgmr.msra.gmra.mrb[0].mxu1 %vm930_vm3, %v26439_v38  ;;  %18048 = vmatprep.mubr.msk.bf16.mxu0 %vm930_vm3, %v19574_v21  ;;  %v3957_v21 = vrot.slane %v3955_v15, 5  ;;  %v20962_v38 = vld [vmem:[%s20052_s22 + $0x50] sm:$0x1]  ;;  %v20971_v15 = vld [vmem:[%s20052_s22 + $0x5c] sm:$0x1]  ;;  %v26443_v27 = vcombine.low %v20738_v2, %v20742_v1  ;;  %v1582_v52 = vrot.slane %v1580_v25, 4 }
  0xd6   : > { %17925 = vmatpush3.bf16.msra.mxu1 %v20709_v49  ;;  %17896 = vmatprep.mubr.msk.bf16.mxu1 %vm930_vm3, %v26440_v23  ;;  %v3944_v49 = vor.u32 %v3943_v46, %v20921_v28  ;;  %v20975_v46 = vrot.slane %v3947_v5, 5  ;;  %v1573_v23 = vrot.slane %v19910_v6, 5  ;;  %v3971_v48 = vshll.u32 %v20962_v38, 16  ;;  %v1449_v5 = vld [vmem:[%s20052_s22 + $0x9c] sm:$0xe] }
  0xd7   : > { %19515 = vmatprep.subr.msk.bf16.mxu1 %vm979_vm0, %v19909_v36  ;;  %v19911_v36 = vld [vmem:[%s20052_s22 + $0x98] sm:$0x1]  ;;  %v3958_v7 = vor.u32 %v3957_v21, %v3954_v62  ;;  %v3995_v6 = vshll.u32 %v20971_v15, 16  ;;  %v4013_v62 = vshrl.u32 %v20979_v9, 16  ;;  %v4005_v4 = vrot.slane %v4003_v10, 5  ;;  %vm22029_vm0 = vmor %vm5298_vm13, %vm5299_vm14 }
  0xd8   : > { %v1576_v33 = vrot.slane %v19911_v36, 5  ;;  %v3945_v8 = vrot.slane %v3944_v49, 4  ;;  %v4009_v36 = vshll.u32 %v20979_v9, 16  ;;  %v21000_v21 = vsel %vm20304_vm7, %v16080_v54, %v1573_v23  ;;  %v21011_v2 = vld [vmem:[%s20052_s22 + $0x68] sm:$0x1] }
  0xd9   : > { %v4002_v49 = vrot.slane %v4000_v61, 4  ;;  %v3959_v19 = vrot.slane %v3958_v7, 4  ;;  %v16081_v58 = vrot.slane %v1449_v5, 9  ;;  %v3969_v3 = vrot.slane %v3968_v43, 4  ;;  %26444 = vst [vmem:[#allocation13_spill] sm:$0xff] %v21011_v2  ;;  %v19578_v5 = vld [vmem:[%s20052_s22 + $0xc0] sm:$0xff]  }
  0xda   : > { %v3973_v54 = vrot.slane %v3971_v48, 5  ;;  %v3997_v63 = vrot.slane %v3995_v6, 5  ;;  %v1587_v61 = vrot.slane %v20446_v56, 5  ;;  %v3983_v10 = vrot.slane %v3982_v31, 4  ;;  %v1451_v31 = vld [vmem:[%s20052_s22 + $0xb4] sm:$0xe] }
  0xdb   : > { %v3993_v51 = vrot.slane %v3992_v53, 4  ;;  %v21013_v1 = vrot.slane %v4009_v36, 5  ;;  %v4015_v7 = vrot.slane %v4013_v62, 4  ;;  %v3940_v43 = vsel %vm20078_vm4, %v20981_v22, %v20921_v28  ;;  %v19914_v62 = vld [vmem:[%s20052_s22 + $0xb0] sm:$0x1] }
  0xdc   : > { %18049 = vmatmul.mubr.msk.bf16.gmra.mrb[20].mxu0 %vm930_vm3, %v19575_v26  ;;  %v1575_v26 = vrot.slane %v1573_v23, 4  ;;  %v1450_v23 = vld [vmem:[%s20052_s22 + $0xa8] sm:$0xe]  ;;  %v3950_v48 = vsel %vm20078_vm4, %v3945_v8, %v20975_v46  ;;  %v4006_v6 = vor.u32 %v4005_v4, %v4002_v49  ;;  %v3964_v53 = vsel %vm20078_vm4, %v3959_v19, %v20964_v34  ;;  %v16414_v46 = vld [vmem:[%s20052_s22 + $0x6c] sm:$0xf] }
  0xdd   : > { %17897 = vmatmul.mubr.msk.bf16.gmra.mrb[4].mxu1 %vm930_vm3, %v26442_v18  ;;  %18052 = vmatprep.mubr.msk.bf16.mxu0 %vm930_vm3, %v19576_v30  ;;  %v19913_v18 = vld [vmem:[%s20052_s22 + $0xa4] sm:$0x1]  ;;  %v21033_v36 = vsel %vm20304_vm7, %v16081_v58, %v1580_v25  ;;  %v16082_v28 = vrot.slane %v1450_v23, 9  ;;  %v1589_v8 = vrot.slane %v1587_v61, 4  ;;  %v4019_v49 = vshll.u32 %v21011_v2, 16 }
  0xde   : > { %17900 = vmatprep.mubr.msk.bf16.mxu1 %vm930_vm3, %v26443_v27  ;;  %v1583_v30 = vrot.slane %v19913_v18, 5  ;;  %v21025_v56 = vsel %vm20304_vm7, %v1575_v26, %v1576_v33  ;;  %v3974_v33 = vsel %vm20078_vm4, %v3969_v3, %v3973_v54  ;;  %v1590_v26 = vrot.slane %v19914_v62, 5  ;;  %v16417_v18 = vld [vmem:[%s20052_s22 + $0x78] sm:$0xf]  ;;  %v21088_v54 = vld [vmem:[%s20052_s22 + $0xbc] sm:$0x1] }
  0xdf   : > { %v3988_v34 = vsel %vm20078_vm4, %v3983_v10, %v20973_v50  ;;  %v3998_v25 = vsel %vm20078_vm4, %v3993_v51, %v3997_v63  ;;  %v4016_v4 = vor.u32 %v4015_v7, %v21013_v1  ;;  %v16083_v27 = vrot.slane %v1451_v31, 9  ;;  %v21062_v51 = vld [vmem:[%s20052_s22 + $0x70] sm:$0xf]  ;;  %v21092_v10 = vld [vmem:[%s20052_s22 + $0x7c] sm:$0xf] }
  0xe0   : > { %v21037_v22 = vsel %vm20304_vm7, %v1582_v52, %v1583_v30  ;;  %v26446_v3 = vcombine.low %v20755_v45, %v20759_v59  ;;  %v21058_v19 = vrot.slane %v4006_v6, 4  ;;  %v1594_v50 = vrot.slane %v20470_v42, 5  ;;  %26447 = vst [vmem:[#allocation15_spill] sm:$0xff] %v21062_v51  ;;  %26449 = vst [vmem:[#allocation16_spill] sm:$0xff] %v21092_v10  ;;  %v16420_v7 = vld [vmem:[%s20052_s22 + $0x84] sm:$0xf] }
  0xe1   : > { %26445 = vst [vmem:[#allocation14_spill] sm:$0xff] %v21037_v22  ;;  %v4024_v63 = vshrl.u32 %v16414_v46, 16  ;;  %v26448_v45 = vcombine.low %v20763_v47, %v20790_v41  ;;  %v21070_v58 = vcombine.low %v3964_v53, %v3974_v33  ;;  %v21076_v42 = vsel %vm20304_vm7, %v16082_v28, %v1587_v61  ;;  %v19579_v61 = vld [vmem:[%s20052_s22 + $0xcc] sm:$0xff]   ;;  %v21104_v31 = vld [vmem:[%s20052_s22 + $0x88] sm:$0xf] }
  0xe2   : > { %v21079_v30 = vcombine.low %v3988_v34, %v3998_v25  ;;  %v21083_v47 = vsel %vm20304_vm7, %v1589_v8, %v1590_v26  ;;  %v21085_v41 = vrot.slane %v4019_v49, 5  ;;  %v4033_v6 = vshll.u32 %v21062_v51, 16  ;;  %26450 = vst [vmem:[#allocation17_spill] sm:$0xff] %v21104_v31  ;;  %v16423_v62 = vld [vmem:[%s20052_s22 + $0x90] sm:$0xf] }
  0xe3   : > { %v21110_v28 = vrot.slane %v1594_v50, 4  ;;  %v21112_v33 = vrot.slane %v4024_v63, 4  ;;  %v4037_v8 = vshrl.u32 %v21062_v51, 16  ;;  %v4048_v26 = vshrl.u32 %v16417_v18, 16  ;;  %v21119_v25 = vld [vmem:[%s20052_s22 + $0x94] sm:$0xf] }
  0xe4   : > { %18053 = vmatmul.mubr.msk.bf16.gmra.mrb[24].mxu0 %vm930_vm3, %v19577_v37  ;;  %v21056_v37 = vcombine.low %v3940_v43, %v3950_v48  ;;  %v21100_v43 = vsel %vm20304_vm7, %v16083_v27, %v1594_v50  ;;  %v4027_v48 = vshll.u32 %v16414_v46, 16  ;;  %v4051_v49 = vshll.u32 %v16417_v18, 16  ;;  %26451 = vst [vmem:[#allocation18_spill] sm:$0xff] %v21119_v25  ;;  %v21157_v2 = vld [vmem:[%s20052_s22 + $0x8c] sm:$0x1] }
  0xe5   : > { %17901 = vmatmul.mubr.msk.bf16.gmra.mrb[8].mxu1 %vm930_vm3, %v26446_v3  ;;  %18056 = vmatprep.mubr.msk.bf16.mxu0 %vm930_vm3, %v19578_v5  ;;  %v21096_v5 = vrot.slane %v4016_v4, 4  ;;  %v4057_v46 = vshll.u32 %v21092_v10, 16  ;;  %v4061_v34 = vshrl.u32 %v21092_v10, 16  ;;  %v4072_v4 = vshrl.u32 %v16420_v7, 16 }
  0xe6   : > { %17904 = vmatprep.mubr.msk.bf16.mxu1 %vm930_vm3, %v26448_v45  ;;  %v4075_v27 = vshll.u32 %v16420_v7, 16  ;;  %v4081_v3 = vshll.u32 %v21104_v31, 16  ;;  %v4085_v50 = vshrl.u32 %v21104_v31, 16  ;;  %v21129_v45 = vld [vmem:[%s20052_s22 + $0x74] sm:$0x1]  ;;  %v4029_v18 = vrot.slane %v4027_v48, 5 }
  0xe7   : > { %v4096_v52 = vshrl.u32 %v16423_v62, 16  ;;  %v4099_v53 = vshll.u32 %v16423_v62, 16  ;;  %v26452_v7 = vcombine.low %v20774_v60, %v20799_v44  ;;  %v4039_v59 = vrot.slane %v4037_v8, 4  ;;  %v16426_v48 = vld [vmem:[%s20052_s22 + $0x9c] sm:$0xf] }
  0xe8   : > { %v4105_v63 = vshll.u32 %v21119_v25, 16  ;;  %v4109_v23 = vshrl.u32 %v21119_v25, 16  ;;  %v26453_v62 = vcombine.low %v20814_v17, %v20818_v57  ;;  %v21147_v44 = vld [vmem:[%s20052_s22 + $0x80] sm:$0x1]  ;;  %v4050_v60 = vrot.slane %v4048_v26, 4 }
  0xe9   : > { %26454 = vst [vmem:[#allocation19_spill] sm:$0xff] %v21147_v44  ;;  %v4074_v31 = vrot.slane %v4072_v4, 4  ;;  %v4077_v8 = vrot.slane %v4075_v27, 5  ;;  %v21151_v10 = vrot.slane %v4081_v3, 5  ;;  %v4087_v51 = vrot.slane %v4085_v50, 4 }
  0xea   : > { %v21154_v25 = vld [vmem:[%s20052_s22 + $0xa0] sm:$0xf]  ;;  %v4098_v17 = vrot.slane %v4096_v52, 4  ;;  %v4101_v57 = vrot.slane %v4099_v53, 5  ;;  %v4123_v9 = vshll.u32 %v16426_v48, 16  ;;  %v4030_v26 = vor.u32 %v4029_v18, %v21112_v33 }
  0xeb   : > { %v4067_v27 = vshll.u32 %v21147_v44, 16  ;;  %v21166_v3 = vld [vmem:[%s20052_s22 + $0x98] sm:$0x1]  ;;  %v4129_v50 = vshll.u32 %v21154_v25, 16  ;;  %v4133_v52 = vshrl.u32 %v21154_v25, 16  ;;  %v4078_v22 = vor.u32 %v4077_v8, %v4074_v31 }
  0xec   : > { %18057 = vmatmul.mubr.msk.bf16.gmra.mrb[28].mxu0 %vm930_vm3, %v19579_v61  ;;  %v21137_v61 = vrot.slane %v4033_v6, 5  ;;  %v4063_v6 = vrot.slane %v4061_v34, 4  ;;  %v4111_v34 = vrot.slane %v4109_v23, 4  ;;  %v4091_v33 = vshll.u32 %v21157_v2, 16 }
  0xed   : > { %17905 = vmatmul.mubr.msk.bf16.gmra.mrb[12].mxu1 %vm930_vm3, %v26452_v7  ;;  %18062 = vmatprep.mubr.msk.bf16.mxu0 %vm930_vm3, %v20879_v20  ;;  %v4053_v7 = vrot.slane %v4051_v49, 5  ;;  %v21149_v20 = vrot.slane %v4057_v46, 5  ;;  %v4043_v49 = vshll.u32 %v21129_v45, 16  ;;  %v21161_v46 = vrot.slane %v4105_v63, 5 }
  0xee   : > { %17908 = vmatprep.mubr.msk.bf16.mxu1 %vm930_vm3, %v26453_v62  ;;  %v4120_v62 = vshrl.u32 %v16426_v48, 16  ;;  %v4040_v4 = vor.u32 %v4039_v59, %v21137_v61  ;;  %v4088_v23 = vor.u32 %v4087_v51, %v21151_v10  ;;  %v4102_v59 = vor.u32 %v4101_v57, %v4098_v17  ;;  %v21199_v57 = vld [vmem:[%s20052_s22 + $0xa4] sm:$0x1] }
  0xef   : > { %v4054_v53 = vor.u32 %v4053_v7, %v4050_v60  ;;  %v4064_v48 = vor.u32 %v4063_v6, %v21149_v20  ;;  %v4125_v18 = vrot.slane %v4123_v9, 5  ;;  %v26455_v44 = vcombine.low %v20826_v11, %v20830_v40 }
  0xf0   : > { %v4122_v63 = vrot.slane %v4120_v62, 4  ;;  %v26456_v31 = vrot.slane %v21088_v54, 5  ;;  %v4045_v51 = vrot.slane %v4043_v49, 5  ;;  %v4112_v60 = vor.u32 %v4111_v34, %v21161_v46  ;;  %v21202_v34 = vld [vmem:[%s20052_s22 + $0xac] sm:$0xf] }
  0xf1   : > { %v4115_v9 = vshll.u32 %v21166_v3, 16  ;;  %v26457_v11 = vcombine.low %v20898_v39, %v20902_v55  ;;  %v4031_v40 = vrot.slane %v4030_v26, 4  ;;  %v21195_v54 = vrot.slane %v4129_v50, 5 }
  0xf2   : > { %v4055_v7 = vrot.slane %v4054_v53, 4  ;;  %v4065_v6 = vrot.slane %v4064_v48, 4  ;;  %v4069_v8 = vrot.slane %v4067_v27, 5  ;;  %v4093_v17 = vrot.slane %v4091_v33, 5  ;;  %v21212_v48 = vld [vmem:[%s20052_s22 + $0xb0] sm:$0x1] }
  0xf3   : > { %v4079_v39 = vrot.slane %v4078_v22, 4  ;;  %v4089_v55 = vrot.slane %v4088_v23, 4  ;;  %v4103_v62 = vrot.slane %v4102_v59, 4  ;;  %v4126_v49 = vor.u32 %v4125_v18, %v4122_v63 }
  0xf4   : > { %18063 = vmatmul.mubr.msk.bf16.vlgmr.msra.gmra.mrb[0].mxu0 %vm930_vm3, %v20942_v16  ;;  %v21185_v16 = vsel %vm20304_vm7, %v21110_v28, %v26456_v31  ;;  %v4135_v28 = vrot.slane %v4133_v52, 4  ;;  %v4117_v26 = vrot.slane %v4115_v9, 5  ;;  %v4036_v52 = vsel %vm20078_vm4, %v4031_v40, %v21137_v61 }
  0xf5   : > { %17909 = vmatmul.mubr.msk.bf16.gmra.mrb[16].mxu1 %vm930_vm3, %v26455_v44  ;;  %18095 = vmatpush3.bf16.msra.mxu0 %v20883_v14  ;;  %v4041_v14 = vrot.slane %v4040_v4, 4  ;;  %v16429_v44 = vld [vmem:[%s20052_s22 + $0xa8] sm:$0xf]  ;;  %v4139_v22 = vshll.u32 %v21199_v57, 16  ;;  %v4060_v33 = vsel %vm20078_vm4, %v4055_v7, %v21149_v20  ;;  %v4070_v23 = vsel %vm20078_vm4, %v4065_v6, %v4069_v8 }
  0xf6   : > { %17912 = vmatprep.mubr.msk.bf16.mxu1 %vm930_vm3, %v26457_v11  ;;  %18066 = vmatprep.mubr.msk.bf16.mxu0 %vm930_vm3, %v20953_v29  ;;  %v4113_v29 = vrot.slane %v4112_v60, 4  ;;  %v4144_v4 = vshrl.u32 %v16429_v44, 16  ;;  %v4147_v50 = vshll.u32 %v16429_v44, 16  ;;  %v4136_v53 = vor.u32 %v4135_v28, %v21195_v54  ;;  %v16478_v11 = vld [vmem:[%s20052_s22 + $0x48] sm:$0xe] }
  0xf7   : > { %v4046_v27 = vsel %vm20078_vm4, %v4041_v14, %v4045_v51  ;;  %v4153_v59 = vshll.u32 %v21202_v34, 16  ;;  %v4157_v61 = vshrl.u32 %v21202_v34, 16  ;;  %v4084_v63 = vsel %vm20078_vm4, %v4079_v39, %v21151_v10  ;;  %v21277_v39 = vld [vmem:[%s20052_s22 + $0xb8] sm:$0xf] }
  0xf8   : > { %v4094_v18 = vsel %vm20078_vm4, %v4089_v55, %v4093_v17  ;;  %v4108_v20 = vsel %vm20078_vm4, %v4103_v62, %v21161_v46  ;;  %v4127_v31 = vrot.slane %v4126_v49, 4  ;;  %v26458_v51 = vcombine.low %v20915_v12, %v20930_v35 }
  0xf9   : > { %v4146_v10 = vrot.slane %v4144_v4, 4  ;;  %v4149_v60 = vrot.slane %v4147_v50, 5  ;;  %v4163_v9 = vshll.u32 %v21212_v48, 16  ;;  %v26459_v46 = vcombine.low %v21000_v21, %v21025_v56  ;;  %v16432_v21 = vld [vmem:[%s20052_s22 + $0xb4] sm:$0xf] }
  0xfa   : > { %v16099_v12 = vcombine.low %v21076_v42, %v21083_v47  ;;  %v26460_v35 = vsel %vm20078_vm4, %v21096_v5, %v21085_v41  ;;  %v4137_v14 = vrot.slane %v4136_v53, 4  ;;  %v4141_v28 = vrot.slane %v4139_v22, 5  ;;  %v16480_v4 = vld [vmem:[%s20052_s22 + $0x60] sm:$0xe]  ;;  %v16481_v53 = vld [vmem:[%s20052_s22 + $0x6c] sm:$0xe] }
  0xfb   : > { %v16100_v56 = vcombine.low %v21100_v43, %v21185_v16  ;;  %v21260_v44 = vcombine.low %v4036_v52, %v4046_v27  ;;  %v21262_v42 = vrot.slane %v4153_v59, 5  ;;  %v4159_v47 = vrot.slane %v4157_v61, 4  ;;  %v26469_v16 = vld [vmem:[#allocation7_spill] sm:$0xff] }
  0xfc   : > { %18067 = vmatmul.mubr.msk.bf16.gmra.mrb[4].mxu0 %vm930_vm3, %v21056_v37  ;;  %v4118_v37 = vsel %vm20078_vm4, %v4113_v29, %v4117_v26  ;;  %v21264_v41 = vcombine.low %v4060_v33, %v4070_v23  ;;  %v21266_v5 = vcombine.low %v4084_v63, %v4094_v18  ;;  %v4132_v6 = vsel %vm20078_vm4, %v4127_v31, %v21195_v54  ;;  %v26462_v23 = vld [vmem:[#allocation14_spill] sm:$0xff]  ;;  %v16435_v63 = vld [vmem:[%s20052_s22 + $0xc0] sm:$0xf]  ;;  %v26464_v18 = vld [vmem:[#allocation12_spill] sm:$0xff] }
  0xfd   : > { %17913 = vmatmul.mubr.msk.bf16.gmra.mrb[20].mxu1 %vm930_vm3, %v26458_v51  ;;  %18070 = vmatprep.mubr.msk.bf16.mxu0 %vm930_vm3, %v21070_v58  ;;  %v26461_v58 = vsel %vm20078_vm4, %v21058_v19, %v21013_v1  ;;  %v21268_v7 = vcombine.low %v4108_v20, %v4118_v37  ;;  %v16494_v1 = vrot.slane %v16478_v11, 9  ;;  %v16479_v19 = vld [vmem:[%s20052_s22 + $0x54] sm:$0xe]  ;;  %v4150_v8 = vor.u32 %v4149_v60, %v4146_v10 }
  0xfe   : > { %17916 = vmatprep.mubr.msk.bf16.mxu1 %vm930_vm3, %v26459_v46  ;;  %v16448_v40 = vcombine.low %v26461_v58, %v26460_v35  ;;  %v21274_v17 = vrot.slane %v4163_v9, 5  ;;  %v4168_v55 = vshrl.u32 %v16432_v21, 16  ;;  %v4142_v62 = vsel %vm20078_vm4, %v4137_v14, %v4141_v28  ;;  %v26465_v31 = vld [vmem:[#allocation13_spill] sm:$0xff]  ;;  %v26466_v9 = vld [vmem:[#allocation15_spill] sm:$0xff]  ;;  %v21326_v35 = vld [vmem:[%s20052_s22 + $0xbc] sm:$0x1] }
  0xff   : > { %v4171_v49 = vshll.u32 %v16432_v21, 16  ;;  %v4627_v29 = vrot.slane %v20908_v0, 5  ;;  %v4630_v26 = vrot.slane %v20962_v38, 5  ;;  %v4160_v50 = vor.u32 %v4159_v47, %v21262_v42  ;;  %v21329_v58 = vld [vmem:[%s20052_s22 + $0xc4] sm:$0xf] }
 0x100   : > { %v16495_v52 = vrot.slane %v16479_v19, 9  ;;  %v4634_v54 = vrot.slane %v20919_v24, 5  ;;  %v4637_v27 = vrot.slane %v20971_v15, 5  ;;  %v4177_v22 = vshll.u32 %v21277_v39, 16  ;;  %v16482_v19 = vld [vmem:[%s20052_s22 + $0x78] sm:$0xe] }
 0x101   : > { %v4181_v33 = vshrl.u32 %v21277_v39, 16  ;;  %v21294_v0 = vsel %vm20304_vm7, %v16494_v1, %v4627_v29  ;;  %v4629_v38 = vrot.slane %v4627_v29, 4  ;;  %v26463_v59 = vcombine.low %v21033_v36, %v26462_v23  ;;  %v26467_v23 = vld [vmem:[#allocation16_spill] sm:$0xff] }
 0x102   : > { %v21301_v24 = vcombine.low %v4132_v6, %v4142_v62  ;;  %v21305_v15 = vsel %vm20304_vm7, %v16495_v52, %v4634_v54  ;;  %v16496_v61 = vrot.slane %v16480_v4, 9  ;;  %v4641_v20 = vrot.slane %v26464_v18, 5  ;;  %v19580_v6 = vld [vmem:[%s20052_s22 + $0xc] sm:$0xff]  }
 0x103   : > { %v21311_v36 = vsel %vm20304_vm7, %v4629_v38, %v4630_v26  ;;  %v4644_v51 = vrot.slane %v26465_v31, 5  ;;  %v16497_v37 = vrot.slane %v16481_v53, 9  ;;  %v4648_v11 = vrot.slane %v26466_v9, 5 }
 0x104   : > { %18071 = vmatmul.mubr.msk.bf16.gmra.mrb[8].mxu0 %vm930_vm3, %v21079_v30  ;;  %v4636_v30 = vrot.slane %v4634_v54, 4  ;;  %v16511_v10 = vcombine.low %v21294_v0, %v21311_v36  ;;  %v4651_v46 = vrot.slane %v21129_v45, 5  ;;  %v21335_v14 = vsel %vm20304_vm7, %v16496_v61, %v4641_v20 }
 0x105   : > { %17917 = vmatmul.mubr.msk.bf16.gmra.mrb[24].mxu1 %vm930_vm3, %v26463_v59  ;;  %18074 = vmatprep.mubr.msk.bf16.mxu0 %vm930_vm3, %v16448_v40  ;;  %v4643_v28 = vrot.slane %v4641_v20, 4  ;;  %v21337_v21 = vrot.slane %v4168_v55, 4  ;;  %v4192_v47 = vshrl.u32 %v16435_v63, 16  ;;  %v21341_v45 = vsel %vm20304_vm7, %v16497_v37, %v4648_v11  ;;  %v16209_v55 = vld [vmem:[%s20052_s22 + $0x78] sm:$0xf]  ;;  %v26468_v59 = vld [vmem:[#allocation19_spill] sm:$0xff] }
 0x106   : > { %17920 = vmatprep.mubr.msk.bf16.mxu1 %vm930_vm3, %v16099_v12  ;;  %v21319_v60 = vsel %vm20304_vm7, %v4636_v30, %v4637_v27  ;;  %v21323_v12 = vrot.slane %v4150_v8, 4  ;;  %v4650_v1 = vrot.slane %v4648_v11, 4  ;;  %v21345_v8 = vrot.slane %v4160_v50, 4 }
 0x107   : > { %v16512_v40 = vcombine.low %v21305_v15, %v21319_v60  ;;  %v21347_v62 = vrot.slane %v4171_v49, 5  ;;  %v4195_v29 = vshll.u32 %v16435_v63, 16  ;;  %v21351_v26 = vsel %vm20304_vm7, %v4643_v28, %v4644_v51  ;;  %v26471_v28 = vld [vmem:[#allocation17_spill] sm:$0xff]  ;;  %v19925_v60 = vld [vmem:[%s20052_s22 + $0xa0] sm:$0xf] }
 0x108   : > { %v21354_v4 = vrot.slane %v4177_v22, 5  ;;  %v21356_v52 = vrot.slane %v4181_v33, 4  ;;  %v16513_v54 = vcombine.low %v21335_v14, %v21351_v26  ;;  %v21362_v27 = vsel %vm20304_vm7, %v4650_v1, %v4651_v46  ;;  %v16483_v33 = vld [vmem:[%s20052_s22 + $0x84] sm:$0xe]  ;;  %v19581_v1 = vld [vmem:[%s20052_s22 + $0x18] sm:$0xff]  }
 0x109   : > { %v4187_v49 = vshll.u32 %v21326_v35, 16  ;;  %v4201_v50 = vshll.u32 %v21329_v58, 16  ;;  %v16514_v53 = vcombine.low %v21341_v45, %v21362_v27  ;;  %v16498_v22 = vrot.slane %v16482_v19, 9  ;;  %v19929_v27 = vld [vmem:[%s20052_s22 + $0xac] sm:$0xf] }
 0x10a   : > { %v4194_v38 = vrot.slane %v4192_v47, 4  ;;  %v4658_v30 = vrot.slane %v26468_v59, 5  ;;  %v2517_v61 = vshrl.u32 %v16209_v55, 16  ;;  %v4197_v63 = vrot.slane %v4195_v29, 5  ;;  %v16438_v29 = vld [vmem:[%s20052_s22 + $0xcc] sm:$0xf] }
 0x10b   : > { %v4205_v18 = vshrl.u32 %v21329_v58, 16  ;;  %v2520_v43 = vshll.u32 %v16209_v55, 16  ;;  %v16499_v37 = vrot.slane %v16483_v33, 9  ;;  %v4156_v9 = vsel %vm20078_vm4, %v21323_v12, %v21262_v42  ;;  %v21405_v55 = vld [vmem:[%s20052_s22 + $0xd0] sm:$0xf] }
 0x10c   : > { %18075 = vmatmul.mubr.msk.bf16.gmra.mrb[12].mxu0 %vm930_vm3, %v21260_v44  ;;  %v4655_v44 = vrot.slane %v26467_v23, 5  ;;  %v2519_v51 = vrot.slane %v2517_v61, 4  ;;  %v4174_v11 = vor.u32 %v21347_v62, %v21337_v21  ;;  %v4662_v47 = vrot.slane %v26471_v28, 5  ;;  %v19582_v21 = vld [vmem:[%s20052_s22 + $0x24] sm:$0xff]  }
 0x10d   : > { %17921 = vmatmul.mubr.msk.bf16.gmra.mrb[28].mxu1 %vm930_vm3, %v16100_v56  ;;  %18078 = vmatprep.mubr.msk.bf16.mxu0 %vm930_vm3, %v21264_v41  ;;  %v26470_v56 = vld [vmem:[#allocation8_spill] sm:$0xff]  ;;  %v2522_v46 = vrot.slane %v2520_v43, 5  ;;  %v4166_v19 = vsel %vm20078_vm4, %v21345_v8, %v21274_v17  ;;  %v4665_v12 = vrot.slane %v21157_v2, 5  ;;  %v21413_v62 = vrot.slane %v4201_v50, 5  ;;  %v16484_v8 = vld [vmem:[%s20052_s22 + $0x90] sm:$0xe] }
 0x10e   : > { %17926 = vmatprep.mubr.msk.bf16.mxu1 %vm930_vm3, %v19580_v6  ;;  %v2539_v41 = vsel %vm20078_vm4, %v26470_v56, %v26469_v16  ;;  %v21387_v20 = vsel %vm20304_vm7, %v16498_v22, %v4655_v44  ;;  %v4657_v31 = vrot.slane %v4655_v44, 4  ;;  %v4184_v6 = vor.u32 %v21356_v52, %v21354_v4  ;;  %v21419_v52 = vld [vmem:[%s20052_s22 + $0xc8] sm:$0x1]  ;;  %v26473_v16 = vld [vmem:[#allocation5_spill] sm:$0xff] }
 0x10f   : > { %v4207_v22 = vrot.slane %v4205_v18, 4  ;;  %v2523_v17 = vor.u32 %v2522_v46, %v2519_v51  ;;  %v4189_v23 = vrot.slane %v4187_v49, 5  ;;  %v4198_v44 = vor.u32 %v4197_v63, %v4194_v38  ;;  %v26474_v51 = vld [vmem:[#allocation6_spill] sm:$0xff] }
 0x110   : > { %v21409_v42 = vsel %vm20304_vm7, %v4657_v31, %v4658_v30  ;;  %v21423_v59 = vsel %vm20304_vm7, %v16499_v37, %v4662_v47  ;;  %v4664_v30 = vrot.slane %v4662_v47, 4  ;;  %v4216_v2 = vshrl.u32 %v16438_v29, 16 }
 0x111   : > { %v16515_v33 = vcombine.low %v21387_v20, %v21409_v42  ;;  %v4219_v50 = vshll.u32 %v16438_v29, 16  ;;  %v4225_v61 = vshll.u32 %v21405_v55, 16  ;;  %v2524_v18 = vrot.slane %v2523_v17, 4  ;;  %v19583_v29 = vld [vmem:[%s20052_s22 + $0x30] sm:$0xff]  }
 0x112   : > { %v4229_v49 = vshrl.u32 %v21405_v55, 16  ;;  %v21434_v38 = vsel %vm20304_vm7, %v4664_v30, %v4665_v12  ;;  %v16500_v63 = vrot.slane %v16484_v8, 9  ;;  %v4208_v56 = vor.u32 %v4207_v22, %v21413_v62 }
 0x113   : > { %v4211_v31 = vshll.u32 %v21419_v52, 16  ;;  %v16516_v37 = vcombine.low %v21423_v59, %v21434_v38  ;;  %v16454_v46 = vcombine.low %v4156_v9, %v4166_v19  ;;  %v4175_v28 = vrot.slane %v4174_v11, 4  ;;  %v16485_v11 = vld [vmem:[%s20052_s22 + $0x9c] sm:$0xe] }
 0x114   : > { %18079 = vmatmul.mubr.msk.bf16.gmra.mrb[16].mxu0 %vm930_vm3, %v21266_v5  ;;  %v26472_v5 = vld [vmem:[#allocation18_spill] sm:$0xff]  ;;  %v4185_v47 = vrot.slane %v4184_v6, 4  ;;  %v4199_v12 = vrot.slane %v4198_v44, 4  ;;  %v4672_v8 = vrot.slane %v21166_v3, 5  ;;  %v4218_v30 = vrot.slane %v4216_v2, 4 }
 0x115   : > { %17927 = vmatmul.mubr.msk.bf16.vlgmr.msra.gmra.mrb[0].mxu1 %vm930_vm3, %v19581_v1  ;;  %18082 = vmatprep.mubr.msk.bf16.mxu0 %vm930_vm3, %v21268_v7  ;;  %v4669_v43 = vrot.slane %v26472_v5, 5  ;;  %v2529_v7 = vsel %vm20078_vm4, %v2524_v18, %v26474_v51  ;;  %v4221_v18 = vrot.slane %v4219_v50, 5  ;;  %v21457_v5 = vrot.slane %v4225_v61, 5  ;;  %v19584_v19 = vld [vmem:[%s20052_s22 + $0x3c] sm:$0xff]  }
 0x116   : > { %18741 = vmatpush3.bf16.msra.mxu1 %v26473_v16  ;;  %17930 = vmatprep.mubr.msk.bf16.mxu1 %vm930_vm3, %v19582_v21  ;;  %v21446_v1 = vcombine.low %v2529_v7, %v2539_v41  ;;  %v21450_v21 = vld [vmem:[%s20052_s22 + $0xd4] sm:$0x1]  ;;  %v4231_v9 = vrot.slane %v4229_v49, 4  ;;  %v4209_v41 = vrot.slane %v4208_v56, 4  ;;  %v4213_v6 = vrot.slane %v4211_v31, 5 }
 0x117   : > { %v21454_v22 = vsel %vm20304_vm7, %v16500_v63, %v4669_v43  ;;  %v4671_v17 = vrot.slane %v4669_v43, 4  ;;  %v4180_v63 = vsel %vm20078_vm4, %v4175_v28, %v21354_v4  ;;  %v4190_v2 = vsel %vm20078_vm4, %v4185_v47, %v4189_v23  ;;  %v19916_v16 = vld [vmem:[%s20052_s22 + $0x1c] sm:$0xf]  ;;  %v16486_v28 = vld [vmem:[%s20052_s22 + $0xa8] sm:$0xe] }
 0x118   : > { %v4235_v50 = vshll.u32 %v21450_v21, 16  ;;  %v16501_v61 = vrot.slane %v16485_v11, 9  ;;  %v4676_v49 = vrot.slane %v21154_v25, 5  ;;  %v4204_v4 = vsel %vm20078_vm4, %v4199_v12, %v21413_v62  ;;  %v16474_v62 = vld [vmem:[%s20052_s22 + $0x18] sm:$0xe]  ;;  %v19585_v47 = vld [vmem:[%s20052_s22 + $0x48] sm:$0xff]  }
 0x119   : > { %v21463_v44 = vsel %vm20304_vm7, %v4671_v17, %v4672_v8  ;;  %v4232_v43 = vor.u32 %v4231_v9, %v21457_v5  ;;  %v4679_v23 = vrot.slane %v21199_v57, 5  ;;  %v4214_v25 = vsel %vm20078_vm4, %v4209_v41, %v4213_v6  ;;  %v19917_v11 = vld [vmem:[%s20052_s22 + $0x20] sm:$0x1] }
 0x11a   : > { %v16517_v3 = vcombine.low %v21454_v22, %v21463_v44  ;;  %v4599_v56 = vrot.slane %v19916_v16, 5  ;;  %v21489_v31 = vsel %vm20304_vm7, %v16501_v61, %v4676_v49  ;;  %v4678_v51 = vrot.slane %v4676_v49, 4  ;;  %v16487_v49 = vld [vmem:[%s20052_s22 + $0xb4] sm:$0xe] }
 0x11b   : > { %v16455_v7 = vcombine.low %v4180_v63, %v4190_v2  ;;  %v4233_v17 = vrot.slane %v4232_v43, 4  ;;  %v16502_v41 = vrot.slane %v16486_v28, 9  ;;  %v4683_v6 = vrot.slane %v21202_v34, 5  ;;  %v16475_v2 = vld [vmem:[%s20052_s22 + $0x24] sm:$0xe] }
 0x11c   : > { %18083 = vmatmul.mubr.msk.bf16.gmra.mrb[20].mxu0 %vm930_vm3, %v21301_v24  ;;  %v4222_v24 = vor.u32 %v4221_v18, %v4218_v30  ;;  %v21494_v57 = vsel %vm20304_vm7, %v4678_v51, %v4679_v23  ;;  %v19586_v30 = vld [vmem:[%s20052_s22 + $0x54] sm:$0xff]   ;;  %v16490_v18 = vrot.slane %v16474_v62, 9  ;;  %v4601_v9 = vrot.slane %v4599_v56, 4  ;;  %v19920_v28 = vld [vmem:[%s20052_s22 + $0x2c] sm:$0x1] }
 0x11d   : > { %17931 = vmatmul.mubr.msk.bf16.gmra.mrb[4].mxu1 %vm930_vm3, %v19583_v29  ;;  %18086 = vmatprep.mubr.msk.bf16.mxu0 %vm930_vm3, %v16454_v46  ;;  %v4237_v46 = vrot.slane %v4235_v50, 5  ;;  %v16456_v29 = vcombine.low %v4204_v4, %v4214_v25  ;;  %v16518_v8 = vcombine.low %v21489_v31, %v21494_v57  ;;  %v4686_v63 = vrot.slane %v21212_v48, 5  ;;  %v19918_v50 = vld [vmem:[%s20052_s22 + $0x28] sm:$0xf]  ;;  %v16476_v25 = vld [vmem:[%s20052_s22 + $0x30] sm:$0xe] }
 0x11e   : > { %17934 = vmatprep.mubr.msk.bf16.mxu1 %vm930_vm3, %v19584_v19  ;;  %v4223_v12 = vrot.slane %v4222_v24, 4  ;;  %v4602_v19 = vrot.slane %v19917_v11, 5  ;;  %v4606_v61 = vrot.slane %v19918_v50, 5  ;;  %v21517_v48 = vsel %vm20304_vm7, %v16502_v41, %v4683_v6  ;;  %v19588_v11 = vld [vmem:[%s20052_s22 + $0x6c] sm:$0xff]   ;;  %v16488_v50 = vld [vmem:[%s20052_s22 + $0xc0] sm:$0xe] }
 0x11f   : > { %v4238_v34 = vsel %vm20078_vm4, %v4233_v17, %v4237_v46  ;;  %v4685_v24 = vrot.slane %v4683_v6, 4  ;;  %v4600_v43 = vsel %vm20304_vm7, %v16490_v18, %v4599_v56  ;;  %v16491_v51 = vrot.slane %v16475_v2, 9  ;;  %v26475_v41 = vld [vmem:[#allocation9_spill] sm:$0xff]  ;;  %v19934_v31 = vld [vmem:[%s20052_s22 + $0xc8] sm:$0x1] }
 0x120   : > { %v4228_v4 = vsel %vm20078_vm4, %v4223_v12, %v21457_v5  ;;  %v4603_v23 = vsel %vm20304_vm7, %v4601_v9, %v4602_v19  ;;  %v19919_v5 = vld [vmem:[%s20052_s22 + $0x34] sm:$0xf]  ;;  %v19587_v12 = vld [vmem:[%s20052_s22 + $0x60] sm:$0xff]   ;;  %v16492_v18 = vrot.slane %v16476_v25, 9  ;;  %v4693_v9 = vrot.slane %v21326_v35, 5 }
 0x121   : > { %v4613_v16 = vrot.slane %v19919_v5, 5  ;;  %v21528_v62 = vsel %vm20304_vm7, %v4685_v24, %v4686_v63  ;;  %v16457_v46 = vcombine.low %v4228_v4, %v4238_v34  ;;  %v16507_v17 = vcombine.low %v4600_v43, %v4603_v23  ;;  %v16477_v24 = vld [vmem:[%s20052_s22 + $0x3c] sm:$0xe] }
 0x122   : > { %v16519_v56 = vcombine.low %v21517_v48, %v21528_v62  ;;  %v4616_v6 = vrot.slane %v26475_v41, 5  ;;  %v4607_v35 = vsel %vm20304_vm7, %v16491_v51, %v4606_v61  ;;  %v16504_v5 = vrot.slane %v16488_v50, 9 }
 0x123   : > { %v4615_v19 = vrot.slane %v4613_v16, 4  ;;  %v4614_v23 = vsel %vm20304_vm7, %v16492_v18, %v4613_v16  ;;  %v4700_v51 = vrot.slane %v21419_v52, 5  ;;  %v2680_v57 = vshll.u32 %v19934_v31, 16 }
 0x124   : > { %18087 = vmatmul.mubr.msk.bf16.gmra.mrb[24].mxu0 %vm930_vm3, %v16455_v7  ;;  %v16503_v7 = vrot.slane %v16487_v49, 9 }
 0x125   : > { %17935 = vmatmul.mubr.msk.bf16.gmra.mrb[8].mxu1 %vm930_vm3, %v19585_v47  ;;  %18090 = vmatprep.mubr.msk.bf16.mxu0 %vm930_vm3, %v16456_v29  ;;  %v4609_v47 = vrot.slane %v19920_v28, 5  ;;  %v4690_v29 = vrot.slane %v21277_v39, 5  ;;  %v26476_v39 = vld [vmem:[#allocation10_spill] sm:$0xff]  ;;  %v4617_v25 = vsel %vm20304_vm7, %v4615_v19, %v4616_v6  ;;  %v16493_v28 = vrot.slane %v16477_v24, 9 }
 0x126   : > { %17938 = vmatprep.mubr.msk.bf16.mxu1 %vm930_vm3, %v19586_v30  ;;  %v4608_v30 = vrot.slane %v4606_v61, 4  ;;  %v4620_v49 = vrot.slane %v26476_v39, 5  ;;  %v4697_v61 = vrot.slane %v21329_v58, 5  ;;  %v19921_v39 = vld [vmem:[%s20052_s22 + $0x70] sm:$0xf]  ;;  %v4704_v24 = vrot.slane %v21405_v55, 5 }
 0x127   : > { %v21540_v63 = vsel %vm20304_vm7, %v16503_v7, %v4690_v29  ;;  %v4692_v2 = vrot.slane %v4690_v29, 4  ;;  %v16206_v7 = vld [vmem:[%s20052_s22 + $0x6c] sm:$0xf]  ;;  %v26477_v29 = vld [vmem:[#allocation11_spill] sm:$0xff] }
 0x128   : > { %v4610_v34 = vsel %vm20304_vm7, %v4608_v30, %v4609_v47  ;;  %v4622_v47 = vrot.slane %v4620_v49, 4  ;;  %v19589_v30 = vld [vmem:[%s20052_s22 + $0x78] sm:$0xff]   ;;  %v21571_v16 = vsel %vm20304_vm7, %v16504_v5, %v4697_v61  ;;  %v4699_v18 = vrot.slane %v4697_v61, 4 }
 0x129   : > { %v21547_v4 = vsel %vm20304_vm7, %v4692_v2, %v4693_v9  ;;  %v16509_v9 = vcombine.low %v4614_v23, %v4617_v25  ;;  %v2493_v19 = vshrl.u32 %v16206_v7, 16  ;;  %v2496_v41 = vshll.u32 %v16206_v7, 16 }
 0x12a   : > { %v16520_v43 = vcombine.low %v21540_v63, %v21547_v4  ;;  %v21576_v58 = vsel %vm20304_vm7, %v4699_v18, %v4700_v51  ;;  %v4621_v6 = vsel %vm20304_vm7, %v16493_v28, %v4620_v49  ;;  %v4707_v49 = vrot.slane %v21450_v21, 5  ;;  %v19591_v51 = vld [vmem:[%s20052_s22 + $0x90] sm:$0xff]   ;;  %v19592_v21 = vld [vmem:[%s20052_s22 + $0x9c] sm:$0xff]   ;;  %v16572_v4 = vld [vmem:[%s26226_s3 + $0x4] sm:$0xf] }
 0x12b   : > { %v16521_v50 = vcombine.low %v21571_v16, %v21576_v58  ;;  %v2495_v23 = vrot.slane %v2493_v19, 4  ;;  %v2498_v25 = vrot.slane %v2496_v41, 5  ;;  %v4706_v7 = vrot.slane %v4704_v24, 4  ;;  %v19923_v19 = vld [vmem:[%s20052_s22 + $0x88] sm:$0xf]  ;;  %19520 = vmatprep.subr.msk.bf16.mxu1 %vm6271_vm10, %v16572_v4 }
 0x12c   : > { %18091 = vmatmul.mubr.msk.bf16.gmra.mrb[28].mxu0 %vm930_vm3, %v16457_v46  ;;  %v16508_v46 = vcombine.low %v4607_v35, %v4610_v34  ;;  %v2502_v35 = vshll.u32 %v19921_v39, 16  ;;  %v2506_v34 = vshrl.u32 %v19921_v39, 16  ;;  %v2550_v41 = vshll.u32 %v19923_v19, 16  ;;  %v19593_v39 = vld [vmem:[%s20052_s22 + $0xa8] sm:$0xff]  }
 0x12d   : > { %17939 = vmatmul.mubr.msk.bf16.gmra.mrb[12].mxu1 %vm930_vm3, %v19587_v12  ;;  %18096 = vmatprep.mubr.msk.bf16.mxu0 %vm930_vm3, %v16507_v17  ;;  %v4623_v12 = vrot.slane %v26477_v29, 5  ;;  %v16489_v17 = vld [vmem:[%s20052_s22 + $0xcc] sm:$0xe]  ;;  %v21598_v55 = vsel %vm20304_vm7, %v4706_v7, %v4707_v49  ;;  %v19966_v63 = vmov 0  }
 0x12e   : > { %17942 = vmatprep.mubr.msk.bf16.mxu1 %vm930_vm3, %v19588_v11  ;;  %v19590_v11 = vld [vmem:[%s20052_s22 + $0x84] sm:$0xff]   ;;  %v16505_v52 = vrot.slane %v16489_v17, 9  ;;  %v2508_v28 = vrot.slane %v2506_v34, 4  ;;  %v16218_v34 = vld [vmem:[%s20052_s22 + $0x9c] sm:$0xf]  ;;  %v21617_v49 = vrot.slane %v2550_v41, 5 }
 0x12f   : > { %v4624_v2 = vsel %vm20304_vm7, %v4622_v47, %v4623_v12  ;;  %v16212_v47 = vld [vmem:[%s20052_s22 + $0x84] sm:$0xf]  ;;  %v2499_v12 = vor.u32 %v2498_v25, %v2495_v23  ;;  %342 = vst.msk [vmem:[#allocation2 + $0x18] sm:$0xf] %vm334_vm8, %v19966_v63  ;;  %335 = vst.msk [vmem:[#allocation2] sm:$0xf] %vm334_vm8, %v19966_v63 }
 0x130   : > { %v21593_v5 = vsel %vm20304_vm7, %v16505_v52, %v4704_v24  ;;  %v16510_v61 = vcombine.low %v4621_v6, %v4624_v2  ;;  %v2541_v18 = vshrl.u32 %v16212_v47, 16  ;;  %v2554_v52 = vshrl.u32 %v19923_v19, 16  ;;  %v16215_v2 = vld [vmem:[%s20052_s22 + $0x90] sm:$0xf]  ;;  %v19594_v24 = vld [vmem:[%s20052_s22 + $0xb4] sm:$0xff]  }
 0x131   : > { %v16522_v29 = vcombine.low %v21593_v5, %v21598_v55  ;;  %v2500_v6 = vrot.slane %v2499_v12, 4  ;;  %v2565_v25 = vshrl.u32 %v16215_v2, 16  ;;  %v2568_v7 = vshll.u32 %v16215_v2, 16  ;;  %336 = vst.msk [vmem:[#allocation2 + $0x4] sm:$0xf] %vm334_vm8, %v19966_v63 }
 0x132   : > { %v2543_v36 = vrot.slane %v2541_v18, 4  ;;  %v2556_v23 = vrot.slane %v2554_v52, 4  ;;  %v2592_v12 = vshll.u32 %v16218_v34, 16  ;;  %v19595_v52 = vld [vmem:[%s20052_s22 + $0xc0] sm:$0xff]   ;;  %339 = vst.msk [vmem:[#allocation2 + $0xc] sm:$0xf] %vm334_vm8, %v19966_v63 }
 0x133   : > { %v2570_v14 = vrot.slane %v2568_v7, 5  ;;  %340 = vst.msk [vmem:[#allocation2 + $0x10] sm:$0xf] %vm334_vm8, %v19966_v63  ;;  %343 = vst.msk [vmem:[#allocation2 + $0x1c] sm:$0xf] %vm334_vm8, %v19966_v63 }
 0x134   : > { %18097 = vmatmul.mubr.msk.bf16.vlgmr.msra.gmra.mrb[0].mxu0 %vm930_vm3, %v16508_v46  ;;  %v2504_v46 = vrot.slane %v2502_v35, 5  ;;  %v2594_v41 = vrot.slane %v2592_v12, 5  ;;  %v2626_v12 = vshrl.u32 %v19929_v27, 16  ;;  %345 = vst.msk [vmem:[#allocation2 + $0x24] sm:$0xf] %vm334_vm8, %v19966_v63 }
 0x135   : > { %17943 = vmatmul.mubr.msk.bf16.gmra.mrb[16].mxu1 %vm930_vm3, %v19589_v30  ;;  %18100 = vmatprep.mubr.msk.bf16.mxu0 %vm930_vm3, %v16509_v9  ;;  %v19922_v30 = vld [vmem:[%s20052_s22 + $0x74] sm:$0x1]  ;;  %346 = vst.msk [vmem:[#allocation2 + $0x28] sm:$0xf] %vm334_vm8, %v19966_v63  ;;  %348 = vst.msk [vmem:[#allocation2 + $0x30] sm:$0xf] %vm334_vm8, %v19966_v63 }
 0x136   : > { %17946 = vmatprep.mubr.msk.bf16.mxu1 %vm930_vm3, %v19590_v11  ;;  %v2509_v17 = vor.u32 %v2508_v28, %v2504_v46  ;;  %v2512_v9 = vshll.u32 %v19922_v30, 16  ;;  %v2544_v11 = vshll.u32 %v16212_v47, 16  ;;  %v2589_v47 = vshrl.u32 %v16218_v34, 16  ;;  %349 = vst.msk [vmem:[#allocation2 + $0x34] sm:$0xf] %vm334_vm8, %v19966_v63 }
 0x137   : > { %v2557_v30 = vor.u32 %v2556_v23, %v21617_v49  ;;  %351 = vst.msk [vmem:[#allocation2 + $0x3c] sm:$0xf] %vm334_vm8, %v19966_v63  ;;  %352 = vst.msk [vmem:[#allocation2 + $0x40] sm:$0xf] %vm334_vm8, %v19966_v63  ;;  %v5739_v16 = vld [vmem:[#allocation2] sm:$0xf] }
 0x138   : > { %v2510_v35 = vrot.slane %v2509_v17, 4  ;;  %v2514_v0 = vrot.slane %v2512_v9, 5  ;;  %v2598_v17 = vshll.u32 %v19925_v60, 16  ;;  %v19926_v9 = vld [vmem:[%s20052_s22 + $0x8c] sm:$0x1]  ;;  %v2591_v19 = vrot.slane %v2589_v47, 4 }
 0x139   : > { %v2560_v18 = vshll.u32 %v19926_v9, 16  ;;  %354 = vst.msk [vmem:[#allocation2 + $0x48] sm:$0xf] %vm334_vm8, %v19966_v63  ;;  %355 = vst.msk [vmem:[#allocation2 + $0x4c] sm:$0xf] %vm334_vm8, %v19966_v63  ;;  %v5792_v5 = vshll.u32 %v5739_v16, 16 }
 0x13a   : > { %v2595_v7 = vor.u32 %v2594_v41, %v2591_v19  ;;  %357 = vst.msk [vmem:[#allocation2 + $0x54] sm:$0xf] %vm334_vm8, %v19966_v63  ;;  %358 = vst.msk [vmem:[#allocation2 + $0x58] sm:$0xf] %vm334_vm8, %v19966_v63  ;;  %v5740_v58 = vld [vmem:[#allocation2 + $0x4] sm:$0xf] }
 0x13b   : > { %360 = vst.msk [vmem:[#allocation2 + $0x60] sm:$0xf] %vm334_vm8, %v19966_v63  ;;  %361 = vst.msk [vmem:[#allocation2 + $0x64] sm:$0xf] %vm334_vm8, %v19966_v63  ;;  %v5798_v55 = vshll.u32 %v5740_v58, 16 }
 0x13c   : > { %18101 = vmatmul.mubr.msk.bf16.gmra.mrb[4].mxu0 %vm930_vm3, %v16510_v61  ;;  %v2505_v61 = vsel %vm20078_vm4, %v2500_v6, %v2504_v46  ;;  %v2515_v46 = vsel %vm20078_vm4, %v2510_v35, %v2514_v0  ;;  %v16221_v0 = vld [vmem:[%s20052_s22 + $0xa8] sm:$0xf]  ;;  %363 = vst.msk [vmem:[#allocation2 + $0x6c] sm:$0xf] %vm334_vm8, %v19966_v63  ;;  %364 = vst.msk [vmem:[#allocation2 + $0x70] sm:$0xf] %vm334_vm8, %v19966_v63 }
 0x13d   : > { %17947 = vmatmul.mubr.msk.bf16.gmra.mrb[20].mxu1 %vm930_vm3, %v19591_v51  ;;  %18104 = vmatprep.mubr.msk.bf16.mxu0 %vm930_vm3, %v16511_v10  ;;  %v2546_v10 = vrot.slane %v2544_v11, 5  ;;  %v19924_v51 = vld [vmem:[%s20052_s22 + $0x94] sm:$0xf]  ;;  %v2567_v11 = vrot.slane %v2565_v25, 4  ;;  %v16239_v6 = vcombine.low %v2505_v61, %v2515_v46  ;;  %v19928_v61 = vld [vmem:[%s20052_s22 + $0xa4] sm:$0x1] }
 0x13e   : > { %17950 = vmatprep.mubr.msk.bf16.mxu1 %vm930_vm3, %v19592_v21  ;;  %v2574_v28 = vshll.u32 %v19924_v51, 16  ;;  %v2578_v21 = vshrl.u32 %v19924_v51, 16  ;;  %v2608_v51 = vshll.u32 %v19928_v61, 16  ;;  %v2616_v45 = vshll.u32 %v16221_v0, 16  ;;  %366 = vst.msk [vmem:[#allocation2 + $0x78] sm:$0xf] %vm334_vm8, %v19966_v63 }
 0x13f   : > { %v2547_v15 = vor.u32 %v2546_v10, %v2543_v36  ;;  %v2558_v36 = vrot.slane %v2557_v30, 4  ;;  %v2562_v10 = vrot.slane %v2560_v18, 5  ;;  %v2571_v34 = vor.u32 %v2570_v14, %v2567_v11  ;;  %367 = vst.msk [vmem:[#allocation2 + $0x7c] sm:$0xf] %vm334_vm8, %v19966_v63  ;;  %369 = vst.msk [vmem:[#allocation2 + $0x84] sm:$0xf] %vm334_vm8, %v19966_v63 }
 0x140   : > { %v21637_v26 = vrot.slane %v2574_v28, 5  ;;  %v2613_v28 = vshrl.u32 %v16221_v0, 16  ;;  %v2596_v18 = vrot.slane %v2595_v7, 4  ;;  %v2610_v11 = vrot.slane %v2608_v51, 5  ;;  %v19932_v7 = vld [vmem:[%s20052_s22 + $0xc4] sm:$0xf] }
 0x141   : > { %v2548_v2 = vrot.slane %v2547_v15, 4  ;;  %v2563_v15 = vsel %vm20078_vm4, %v2558_v36, %v2562_v10  ;;  %v2618_v19 = vrot.slane %v2616_v45, 5  ;;  %v16227_v36 = vld [vmem:[%s20052_s22 + $0xc0] sm:$0xf]  ;;  %v2670_v61 = vshll.u32 %v19932_v7, 16 }
 0x142   : > { %v2615_v14 = vrot.slane %v2613_v28, 4  ;;  %v2674_v51 = vshrl.u32 %v19932_v7, 16  ;;  %370 = vst.msk [vmem:[#allocation2 + $0x88] sm:$0xf] %vm334_vm8, %v19966_v63  ;;  %372 = vst.msk [vmem:[#allocation2 + $0x90] sm:$0xf] %vm334_vm8, %v19966_v63 }
 0x143   : > { %v2553_v46 = vsel %vm20078_vm4, %v2548_v2, %v21617_v49  ;;  %373 = vst.msk [vmem:[#allocation2 + $0x94] sm:$0xf] %vm334_vm8, %v19966_v63  ;;  %375 = vst.msk [vmem:[#allocation2 + $0x9c] sm:$0xf] %vm334_vm8, %v19966_v63 }
 0x144   : > { %18105 = vmatmul.mubr.msk.bf16.gmra.mrb[8].mxu0 %vm930_vm3, %v16512_v40  ;;  %v2602_v40 = vshrl.u32 %v19925_v60, 16  ;;  %v2572_v60 = vrot.slane %v2571_v34, 4  ;;  %v16241_v49 = vcombine.low %v2553_v46, %v2563_v15  ;;  %v2619_v38 = vor.u32 %v2618_v19, %v2615_v14  ;;  %376 = vst.msk [vmem:[#allocation2 + $0xa0] sm:$0xf] %vm334_vm8, %v19966_v63  ;;  %378 = vst.msk [vmem:[#allocation2 + $0xa8] sm:$0xf] %vm334_vm8, %v19966_v63 }
 0x145   : > { %17951 = vmatmul.mubr.msk.bf16.gmra.mrb[24].mxu1 %vm930_vm3, %v19593_v39  ;;  %18108 = vmatprep.mubr.msk.bf16.mxu0 %vm930_vm3, %v16513_v54  ;;  %v2580_v54 = vrot.slane %v2578_v21, 4  ;;  %v21640_v39 = vrot.slane %v2598_v17, 5  ;;  %v16224_v21 = vld [vmem:[%s20052_s22 + $0xb4] sm:$0xf]  ;;  %v2672_v46 = vrot.slane %v2670_v61, 5  ;;  %v2676_v15 = vrot.slane %v2674_v51, 4 }
 0x146   : > { %17954 = vmatprep.mubr.msk.bf16.mxu1 %vm930_vm3, %v19594_v24  ;;  %v2604_v35 = vrot.slane %v2602_v40, 4  ;;  %v19927_v24 = vld [vmem:[%s20052_s22 + $0x98] sm:$0x1]  ;;  %v2637_v20 = vshrl.u32 %v16224_v21, 16  ;;  %v2640_v42 = vshll.u32 %v16224_v21, 16  ;;  %v2577_v10 = vsel %vm20078_vm4, %v2572_v60, %v21637_v26 }
 0x147   : > { %v2584_v23 = vshll.u32 %v19927_v24, 16  ;;  %v2581_v25 = vor.u32 %v2580_v54, %v21637_v26  ;;  %v2601_v24 = vsel %vm20078_vm4, %v2596_v18, %v21640_v39  ;;  %v19931_v26 = vld [vmem:[%s20052_s22 + $0xb0] sm:$0x1]  ;;  %v19933_v21 = vld [vmem:[%s20052_s22 + $0xbc] sm:$0x1] }
 0x148   : > { %v2605_v47 = vor.u32 %v2604_v35, %v21640_v39  ;;  %v2642_v2 = vrot.slane %v2640_v42, 5  ;;  %v2664_v39 = vshll.u32 %v16227_v36, 16  ;;  %v2656_v22 = vshll.u32 %v19933_v21, 16  ;;  %379 = vst.msk [vmem:[#allocation2 + $0xac] sm:$0xf] %vm334_vm8, %v19966_v63 }
 0x149   : > { %v2586_v17 = vrot.slane %v2584_v23, 5  ;;  %v2582_v9 = vrot.slane %v2581_v25, 4  ;;  %v2632_v23 = vshll.u32 %v19931_v26, 16  ;;  %v2661_v25 = vshrl.u32 %v16227_v36, 16  ;;  %381 = vst.msk [vmem:[#allocation2 + $0xb4] sm:$0xf] %vm334_vm8, %v19966_v63 }
 0x14a   : > { %v2606_v54 = vrot.slane %v2605_v47, 4  ;;  %v2620_v47 = vrot.slane %v2619_v38, 4  ;;  %382 = vst.msk [vmem:[#allocation2 + $0xb8] sm:$0xf] %vm334_vm8, %v19966_v63  ;;  %384 = vst.msk [vmem:[#allocation2 + $0xc0] sm:$0xf] %vm334_vm8, %v19966_v63 }
 0x14b   : > { %v2587_v34 = vsel %vm20078_vm4, %v2582_v9, %v2586_v17  ;;  %385 = vst.msk [vmem:[#allocation2 + $0xc4] sm:$0xf] %vm334_vm8, %v19966_v63  ;;  %387 = vst.msk [vmem:[#allocation2 + $0xcc] sm:$0xf] %vm334_vm8, %v19966_v63 }
 0x14c   : > { %18109 = vmatmul.mubr.msk.bf16.gmra.mrb[12].mxu0 %vm930_vm3, %v16514_v53  ;;  %v2622_v53 = vshll.u32 %v19929_v27, 16  ;;  %v2611_v59 = vsel %vm20078_vm4, %v2606_v54, %v2610_v11  ;;  %v16242_v44 = vcombine.low %v2577_v10, %v2587_v34  ;;  %v2634_v27 = vrot.slane %v2632_v23, 5  ;;  %388 = vst.msk [vmem:[#allocation2 + $0xd0] sm:$0xf] %vm334_vm8, %v19966_v63  ;;  %390 = vst.msk [vmem:[#allocation3] sm:$0xf] %vm334_vm8, %v19966_v63 }
 0x14d   : > { %17955 = vmatmul.mubr.msk.bf16.gmra.mrb[28].mxu1 %vm930_vm3, %v19595_v52  ;;  %18112 = vmatprep.mubr.msk.bf16.mxu0 %vm930_vm3, %v16515_v33  ;;  %v19930_v33 = vld [vmem:[%s20052_s22 + $0xb8] sm:$0xf]  ;;  %v2628_v52 = vrot.slane %v2626_v12, 4  ;;  %v2666_v12 = vrot.slane %v2664_v39, 5  ;;  %v2682_v11 = vrot.slane %v2680_v57, 5 }
 0x14e   : > { %17976 = vmatprep.mubr.msk.bf16.mxu1 %vm930_vm3, %v16239_v6  ;;  %v2646_v40 = vshll.u32 %v19930_v33, 16  ;;  %v2650_v30 = vshrl.u32 %v19930_v33, 16  ;;  %v2624_v41 = vrot.slane %v2622_v53, 5  ;;  %v2639_v6 = vrot.slane %v2637_v20, 4  ;;  %391 = vst.msk [vmem:[#allocation3 + $0x4] sm:$0xf] %vm334_vm8, %v19966_v63 }
 0x14f   : > { %v2663_v53 = vrot.slane %v2661_v25, 4  ;;  %v2658_v20 = vrot.slane %v2656_v22, 5  ;;  %393 = vst.msk [vmem:[#allocation3 + $0xc] sm:$0xf] %vm334_vm8, %v19966_v63  ;;  %394 = vst.msk [vmem:[#allocation3 + $0x10] sm:$0xf] %vm334_vm8, %v19966_v63 }
 0x150   : > { %v2648_v35 = vrot.slane %v2646_v40, 5  ;;  %v2652_v0 = vrot.slane %v2650_v30, 4  ;;  %v2625_v42 = vsel %vm20078_vm4, %v2620_v47, %v2624_v41  ;;  %v2677_v30 = vor.u32 %v2676_v15, %v2672_v46  ;;  %396 = vst.msk [vmem:[#allocation3 + $0x18] sm:$0xf] %vm334_vm8, %v19966_v63  ;;  %397 = vst.msk [vmem:[#allocation3 + $0x1c] sm:$0xf] %vm334_vm8, %v19966_v63 }
 0x151   : > { %v2667_v40 = vor.u32 %v2666_v12, %v2663_v53  ;;  %399 = vst.msk [vmem:[#allocation3 + $0x24] sm:$0xf] %vm334_vm8, %v19966_v63  ;;  %400 = vst.msk [vmem:[#allocation3 + $0x28] sm:$0xf] %vm334_vm8, %v19966_v63  ;;  %v5771_v53 = vld [vmem:[%s26226_s3] sm:$0xf] }
 0x152   : > { %v2653_v28 = vor.u32 %v2652_v0, %v2648_v35  ;;  %v2678_v18 = vrot.slane %v2677_v30, 4  ;;  %402 = vst.msk [vmem:[#allocation3 + $0x30] sm:$0xf] %vm334_vm8, %v19966_v63  ;;  %403 = vst.msk [vmem:[#allocation3 + $0x34] sm:$0xf] %vm334_vm8, %v19966_v63 }
 0x153   : > { %v2668_v9 = vrot.slane %v2667_v40, 4  ;;  %405 = vst.msk [vmem:[#allocation3 + $0x3c] sm:$0xf] %vm334_vm8, %v19966_v63  ;;  %406 = vst.msk [vmem:[#allocation3 + $0x40] sm:$0xf] %vm334_vm8, %v19966_v63 }
 0x154   : > { %18113 = vmatmul.mubr.msk.bf16.gmra.mrb[16].mxu0 %vm930_vm3, %v16516_v37  ;;  %v2629_v37 = vor.u32 %v2628_v52, %v2624_v41  ;;  %v2654_v17 = vrot.slane %v2653_v28, 4  ;;  %v2683_v54 = vsel %vm20078_vm4, %v2678_v18, %v2682_v11  ;;  %408 = vst.msk [vmem:[#allocation3 + $0x48] sm:$0xf] %vm334_vm8, %v19966_v63  ;;  %409 = vst.msk [vmem:[#allocation3 + $0x4c] sm:$0xf] %vm334_vm8, %v19966_v63  ;;  %v5794_v52 = vrot.slane %v5792_v5, 5 }
 0x155   : > { %17977 = vmatmul.mubr.msk.bf16.vlgmr.msra.gmra.mrb[16].mxu1 %vm930_vm3, %v21446_v1  ;;  %18116 = vmatprep.mubr.msk.bf16.mxu0 %vm930_vm3, %v16517_v3  ;;  %v2643_v1 = vor.u32 %v2642_v2, %v2639_v6  ;;  %v16243_v3 = vcombine.low %v2601_v24, %v2611_v59  ;;  %v2673_v14 = vsel %vm20078_vm4, %v2668_v9, %v2672_v46  ;;  %v21975_v46 = vld [vmem:[%s26225_s2] ss:$0 sm:$0xff] }
 0x156   : > { %17980 = vmatprep.mubr.msk.bf16.mxu1 %vm930_vm3, %v16241_v49  ;;  %v2630_v45 = vrot.slane %v2629_v37, 4  ;;  %v2659_v48 = vsel %vm20078_vm4, %v2654_v17, %v2658_v20  ;;  %v16246_v19 = vcombine.low %v2673_v14, %v2683_v54  ;;  %411 = vst.msk [vmem:[#allocation3 + $0x54] sm:$0xf] %vm334_vm8, %v19966_v63  ;;  %412 = vst.msk [vmem:[#allocation3 + $0x58] sm:$0xf] %vm334_vm8, %v19966_v63  ;;  %v5800_v49 = vrot.slane %v5798_v55, 5 }
 0x157   : > { %v2644_v60 = vrot.slane %v2643_v1, 4  ;;  %414 = vst.msk [vmem:[#allocation3 + $0x60] sm:$0xf] %vm334_vm8, %v19966_v63  ;;  %415 = vst.msk [vmem:[#allocation3 + $0x64] sm:$0xf] %vm334_vm8, %v19966_v63 }
 0x158   : > { %v2635_v33 = vsel %vm20078_vm4, %v2630_v45, %v2634_v27  ;;  %417 = vst.msk [vmem:[#allocation3 + $0x6c] sm:$0xf] %vm334_vm8, %v19966_v63  ;;  %418 = vst.msk [vmem:[#allocation3 + $0x70] sm:$0xf] %vm334_vm8, %v19966_v63 }
 0x159   : > { %v16244_v62 = vcombine.low %v2625_v42, %v2635_v33  ;;  %420 = vst.msk [vmem:[#allocation3 + $0x78] sm:$0xf] %vm334_vm8, %v19966_v63  ;;  %421 = vst.msk [vmem:[#allocation3 + $0x7c] sm:$0xf] %vm334_vm8, %v19966_v63 }
 0x15a   : > { %423 = vst.msk [vmem:[#allocation3 + $0x84] sm:$0xf] %vm334_vm8, %v19966_v63  ;;  %424 = vst.msk [vmem:[#allocation3 + $0x88] sm:$0xf] %vm334_vm8, %v19966_v63 }
 0x15b   : > { %426 = vst.msk [vmem:[#allocation3 + $0x90] sm:$0xf] %vm334_vm8, %v19966_v63  ;;  %427 = vst.msk [vmem:[#allocation3 + $0x94] sm:$0xf] %vm334_vm8, %v19966_v63 }
 0x15c   : > { %18117 = vmatmul.mubr.msk.bf16.gmra.mrb[20].mxu0 %vm930_vm3, %v16518_v8  ;;  %v2649_v8 = vsel %vm20078_vm4, %v2644_v60, %v2648_v35  ;;  %429 = vst.msk [vmem:[#allocation3 + $0x9c] sm:$0xf] %vm334_vm8, %v19966_v63  ;;  %430 = vst.msk [vmem:[#allocation3 + $0xa0] sm:$0xf] %vm334_vm8, %v19966_v63 }
 0x15d   : > { %17981 = vmatmul.mubr.msk.bf16.gmra.mrb[20].mxu1 %vm930_vm3, %v16242_v44  ;;  %18120 = vmatprep.mubr.msk.bf16.mxu0 %vm930_vm3, %v16519_v56  ;;  %v16245_v56 = vcombine.low %v2649_v8, %v2659_v48  ;;  %432 = vst.msk [vmem:[#allocation3 + $0xa8] sm:$0xf] %vm334_vm8, %v19966_v63  ;;  %433 = vst.msk [vmem:[#allocation3 + $0xac] sm:$0xf] %vm334_vm8, %v19966_v63 }
 0x15e   : > { %17984 = vmatprep.mubr.msk.bf16.mxu1 %vm930_vm3, %v16243_v3  ;;  %435 = vst.msk [vmem:[#allocation3 + $0xb4] sm:$0xf] %vm334_vm8, %v19966_v63  ;;  %436 = vst.msk [vmem:[#allocation3 + $0xb8] sm:$0xf] %vm334_vm8, %v19966_v63 }
 0x15f   : > { %438 = vst.msk [vmem:[#allocation3 + $0xc0] sm:$0xf] %vm334_vm8, %v19966_v63  ;;  %439 = vst.msk [vmem:[#allocation3 + $0xc4] sm:$0xf] %vm334_vm8, %v19966_v63 }
 0x160   : > { %441 = vst.msk [vmem:[#allocation3 + $0xcc] sm:$0xf] %vm334_vm8, %v19966_v63  ;;  %442 = vst.msk [vmem:[#allocation3 + $0xd0] sm:$0xf] %vm334_vm8, %v19966_v63 }
 0x161   : > { %344 = vst.msk [vmem:[#allocation2 + $0x20] sm:$0x1] %vm337_vm9, %v19966_v63  ;;  %338 = vst.msk [vmem:[#allocation2 + $0x8] sm:$0x1] %vm337_vm9, %v19966_v63 }
 0x162   : > { %341 = vst.msk [vmem:[#allocation2 + $0x14] sm:$0x1] %vm337_vm9, %v19966_v63  ;;  %347 = vst.msk [vmem:[#allocation2 + $0x2c] sm:$0x1] %vm337_vm9, %v19966_v63 }
 0x163   : > { %350 = vst.msk [vmem:[#allocation2 + $0x38] sm:$0x1] %vm337_vm9, %v19966_v63  ;;  %353 = vst.msk [vmem:[#allocation2 + $0x44] sm:$0x1] %vm337_vm9, %v19966_v63 }
 0x164   : > { %18121 = vmatmul.mubr.msk.bf16.gmra.mrb[24].mxu0 %vm930_vm3, %v16520_v43  ;;  %356 = vst.msk [vmem:[#allocation2 + $0x50] sm:$0x1] %vm337_vm9, %v19966_v63  ;;  %359 = vst.msk [vmem:[#allocation2 + $0x5c] sm:$0x1] %vm337_vm9, %v19966_v63  ;;  %v6273_v43 = vsel %vm6271_vm10, %v16572_v4, 0 }
 0x165   : > { %17985 = vmatmul.mubr.msk.bf16.gmra.mrb[24].mxu1 %vm930_vm3, %v16244_v62  ;;  %18124 = vmatprep.mubr.msk.bf16.mxu0 %vm930_vm3, %v16521_v50  ;;  %362 = vst.msk [vmem:[#allocation2 + $0x68] sm:$0x1] %vm337_vm9, %v19966_v63  ;;  %365 = vst.msk [vmem:[#allocation2 + $0x74] sm:$0x1] %vm337_vm9, %v19966_v63  ;;  %v5789_v50 = vshrl.u32 %v5739_v16, 16 }
 0x166   : > { %17988 = vmatprep.mubr.msk.bf16.mxu1 %vm930_vm3, %v16245_v56  ;;  %368 = vst.msk [vmem:[#allocation2 + $0x80] sm:$0x1] %vm337_vm9, %v19966_v63  ;;  %371 = vst.msk [vmem:[#allocation2 + $0x8c] sm:$0x1] %vm337_vm9, %v19966_v63  ;;  %18129 = vmatpush3.bf16.msra.mxu1 %v6273_v43 }
 0x167   : > { %374 = vst.msk [vmem:[#allocation2 + $0x98] sm:$0x1] %vm337_vm9, %v19966_v63  ;;  %377 = vst.msk [vmem:[#allocation2 + $0xa4] sm:$0x1] %vm337_vm9, %v19966_v63  ;;  %v5791_v41 = vrot.slane %v5789_v50, 4  ;;  %19521 = vmatprep.subr.msk.bf16.mxu1 %vm6271_vm10, %v5771_v53 }
 0x168   : > { %380 = vst.msk [vmem:[#allocation2 + $0xb0] sm:$0x1] %vm337_vm9, %v19966_v63  ;;  %383 = vst.msk [vmem:[#allocation2 + $0xbc] sm:$0x1] %vm337_vm9, %v19966_v63  ;;  %v5772_v2 = vld [vmem:[#allocation2 + $0x8] sm:$0x1] }
 0x169   : > { %386 = vst.msk [vmem:[#allocation2 + $0xc8] sm:$0x1] %vm337_vm9, %v19966_v63  ;;  %389 = vst.msk [vmem:[#allocation2 + $0xd4] sm:$0x1] %vm337_vm9, %v19966_v63  ;;  %v5795_v35 = vor.u32 %v5794_v52, %v5791_v41  ;;  %v5808_v36 = vshll.u32 %v5772_v2, 16  ;;  %v21986_v41 = vsel %vm6271_vm10, %v5771_v53, 0 }
 0x16a   : > { %392 = vst.msk [vmem:[#allocation3 + $0x8] sm:$0x1] %vm337_vm9, %v19966_v63  ;;  %395 = vst.msk [vmem:[#allocation3 + $0x14] sm:$0x1] %vm337_vm9, %v19966_v63 }
 0x16b   : > { %398 = vst.msk [vmem:[#allocation3 + $0x20] sm:$0x1] %vm337_vm9, %v19966_v63  ;;  %401 = vst.msk [vmem:[#allocation3 + $0x2c] sm:$0x1] %vm337_vm9, %v19966_v63  ;;  %v5796_v10 = vrot.slane %v5795_v35, 4  ;;  %v5810_v24 = vrot.slane %v5808_v36, 5 }
 0x16c   : > { %18125 = vmatmul.mubr.msk.bf16.gmra.mrb[28].mxu0 %vm930_vm3, %v16522_v29  ;;  %404 = vst.msk [vmem:[#allocation3 + $0x38] sm:$0x1] %vm337_vm9, %v19966_v63  ;;  %407 = vst.msk [vmem:[#allocation3 + $0x44] sm:$0x1] %vm337_vm9, %v19966_v63  ;;  %v5802_v29 = vshrl.u32 %v5740_v58, 16 }
 0x16d   : > { %17989 = vmatmul.mubr.msk.bf16.gmra.mrb[28].mxu1 %vm930_vm3, %v16246_v19  ;;  %410 = vst.msk [vmem:[#allocation3 + $0x50] sm:$0x1] %vm337_vm9, %v19966_v63  ;;  %413 = vst.msk [vmem:[#allocation3 + $0x5c] sm:$0x1] %vm337_vm9, %v19966_v63  ;;  %v5801_v59 = vsel %vm20078_vm4, %v5796_v10, %v5800_v49 }
 0x16e   : > { %416 = vst.msk [vmem:[#allocation3 + $0x68] sm:$0x1] %vm337_vm9, %v19966_v63  ;;  %419 = vst.msk [vmem:[#allocation3 + $0x74] sm:$0x1] %vm337_vm9, %v19966_v63  ;;  %v5804_v6 = vrot.slane %v5802_v29, 4 }
 0x16f   : > { %422 = vst.msk [vmem:[#allocation3 + $0x80] sm:$0x1] %vm337_vm9, %v19966_v63  ;;  %425 = vst.msk [vmem:[#allocation3 + $0x8c] sm:$0x1] %vm337_vm9, %v19966_v63 }
 0x170   : > { %428 = vst.msk [vmem:[#allocation3 + $0x98] sm:$0x1] %vm337_vm9, %v19966_v63  ;;  %431 = vst.msk [vmem:[#allocation3 + $0xa4] sm:$0x1] %vm337_vm9, %v19966_v63  ;;  %v5805_v0 = vor.u32 %v5804_v6, %v5800_v49 }
 0x171   : > { %434 = vst.msk [vmem:[#allocation3 + $0xb0] sm:$0x1] %vm337_vm9, %v19966_v63  ;;  %437 = vst.msk [vmem:[#allocation3 + $0xbc] sm:$0x1] %vm337_vm9, %v19966_v63 }
 0x172   : > { %440 = vst.msk [vmem:[#allocation3 + $0xc8] sm:$0x1] %vm337_vm9, %v19966_v63  ;;  %443 = vst.msk [vmem:[#allocation3 + $0xd4] sm:$0x1] %vm337_vm9, %v19966_v63  ;;  %v5806_v34 = vrot.slane %v5805_v0, 4 }
 0x174   : > { %v5811_v38 = vsel %vm20078_vm4, %v5806_v34, %v5810_v24 }
 0x175   : > { %v16573_v37 = vcombine.low %v5801_v59, %v5811_v38 }
 0x177   : > { %18130 = vmatprep.mubr.msk.bf16.mxu1 %vm6222_vm11, %v16573_v37 }
 0x1e8   : > { %v17928_v26 = vpop.f32.mrb[0].mxu1 }
 0x1e9   : > { %v2093_v23 = vpop.f32.mrb[1].mxu1 }
 0x1ea   : > { %v17929_v25 = vpop.f32.mrb[2].mxu1 }
 0x1eb   : > { %v2096_v39 = vpop.f32.mrb[3].mxu1 }
 0x1f0   : > { %v17932_v7 = vpop.f32.mrb[4].mxu1 }
 0x1f1   : > { %v2109_v61 = vpop.f32.mrb[5].mxu1 }
 0x1f2   : > { %v17933_v51 = vpop.f32.mrb[6].mxu1 }
 0x1f3   : > { %v2112_v1 = vpop.f32.mrb[7].mxu1 }
 0x1f8   : > { %v17936_v28 = vpop.f32.mrb[8].mxu1 }
 0x1f9   : > { %v21954_v21 = vpop.f32.mrb[9].mxu1 }
 0x1fa   : > { %v21956_v22 = vpop.f32.mrb[10].mxu1 }
 0x1fb   : > { %v21958_v44 = vpop.f32.mrb[11].mxu1 }
 0x200   : > { %v21960_v3 = vpop.f32.mrb[12].mxu1 }
 0x201   : > { %v21962_v47 = vpop.f32.mrb[13].mxu1 }
 0x202   : > { %v21964_v45 = vpop.f32.mrb[14].mxu1 }
 0x203   : > { %v21966_v27 = vpop.f32.mrb[15].mxu1 }
 0x207   : > { %v18098_v12 = vpop.f32.mrb[0].mxu0 }
 0x208   : > { %v18742_v15 = vadd.f32 %v18098_v12, %v17928_v26  ;;  %v4844_v60 = vpop.f32.mrb[1].mxu0 }
 0x209   : > { %v18743_v17 = vadd.f32 %v4844_v60, %v2093_v23  ;;  %v18099_v20 = vpop.f32.mrb[2].mxu0 }
 0x20a   : > { %v5012_v42 = vadd.f32 %v18742_v15, %v21975_v46  ;;  %v18744_v33 = vadd.f32 %v18099_v20, %v17929_v25  ;;  %v4847_v40 = vpop.f32.mrb[3].mxu0 }
 0x20b   : > { %v5010_v30 = vadd.f32 %v18743_v17, %v21975_v46  ;;  %v18745_v31 = vadd.f32 %v4847_v40, %v2096_v39 }
 0x20c   : > { %v5076_v57 = vmul.f32 0.70710677, %v5012_v42  ;;  %v5013_v8 = vadd.f32 %v18744_v33, %v21975_v46  ;;  %v5044_v52 = vmul.f32 0.5, %v5012_v42 }
 0x20d   : > { %v5074_v48 = vmul.f32 0.70710677, %v5010_v30  ;;  %v5011_v62 = vadd.f32 %v18745_v31, %v21975_v46  ;;  %v5042_v49 = vmul.f32 0.5, %v5010_v30 }
 0x20e   : > { %19686 = verf.f32 %v5076_v57  ;;  %v5077_v56 = vmul.f32 0.70710677, %v5013_v8  ;;  %v5045_v2 = vmul.f32 0.5, %v5013_v8 }
 0x20f   : > { %19688 = verf.f32 %v5074_v48  ;;  %v5075_v9 = vmul.f32 0.70710677, %v5011_v62  ;;  %v18102_v18 = vpop.f32.mrb[4].mxu0  ;;  %v5043_v35 = vmul.f32 0.5, %v5011_v62 }
 0x210   : > { %19690 = verf.f32 %v5077_v56  ;;  %v18746_v11 = vadd.f32 %v18102_v18, %v17932_v7  ;;  %v4860_v14 = vpop.f32.mrb[5].mxu0 }
 0x211   : > { %19692 = verf.f32 %v5075_v9  ;;  %v18747_v54 = vadd.f32 %v4860_v14, %v2109_v61  ;;  %v18103_v19 = vpop.f32.mrb[6].mxu0  ;;  %v5634_v14 = vld [vmem:[#allocation2 + $0x18] sm:$0xf] }
 0x212   : > { %v5016_v63 = vadd.f32 %v18746_v11, %v21975_v46  ;;  %v18748_v4 = vadd.f32 %v18103_v19, %v17933_v51  ;;  %v4863_v43 = vpop.f32.mrb[7].mxu0 }
 0x213   : > { %v5014_v16 = vadd.f32 %v18747_v54, %v21975_v46  ;;  %v18749_v58 = vadd.f32 %v4863_v43, %v2112_v1 }
 0x214   : > { %v5080_v50 = vmul.f32 0.70710677, %v5016_v63  ;;  %v5017_v5 = vadd.f32 %v18748_v4, %v21975_v46  ;;  %v21988_v34 = vmul.f32 0.5, %v5016_v63 }
 0x215   : > { %v5078_v55 = vmul.f32 0.70710677, %v5014_v16  ;;  %v5015_v29 = vadd.f32 %v18749_v58, %v21975_v46  ;;  %v21990_v24 = vmul.f32 0.5, %v5014_v16 }
 0x216   : > { %19694 = verf.f32 %v5080_v50  ;;  %v5081_v6 = vmul.f32 0.70710677, %v5017_v5  ;;  %v21992_v59 = vmul.f32 0.5, %v5017_v5 }
 0x217   : > { %19696 = verf.f32 %v5078_v55  ;;  %v5079_v0 = vmul.f32 0.70710677, %v5015_v29  ;;  %v18106_v36 = vpop.f32.mrb[8].mxu0  ;;  %v21994_v25 = vmul.f32 0.5, %v5015_v29 }
 0x218   : > { %v19687_v10 = vpop.eup %19686  ;;  %v18750_v38 = vadd.f32 %v18106_v36, %v17936_v28  ;;  %v4876_v37 = vpop.f32.mrb[9].mxu0  ;;  %19698 = verf.f32 %v5081_v6 }
 0x219   : > { %v19689_v26 = vpop.eup %19688  ;;  %v5140_v23 = vadd.f32 1.0, %v19687_v10  ;;  %v18751_v39 = vadd.f32 %v4876_v37, %v21954_v21  ;;  %v18107_v7 = vpop.f32.mrb[10].mxu0  ;;  %19700 = verf.f32 %v5079_v0  ;;  %v5625_v37 = vld [vmem:[#allocation2 + $0xc] sm:$0xf] }
 0x21a   : > { %v19691_v61 = vpop.eup %19690  ;;  %v5138_v51 = vadd.f32 1.0, %v19689_v26  ;;  %v5020_v1 = vadd.f32 %v18750_v38, %v21975_v46  ;;  %v18752_v53 = vadd.f32 %v18107_v7, %v21956_v22  ;;  %v4879_v12 = vpop.f32.mrb[11].mxu0  ;;  %v26481_v26 = vmov 0 }
 0x21b   : > { %v19693_v15 = vpop.eup %19692  ;;  %v5172_v60 = vmul.f32 %v5140_v23, %v5044_v52  ;;  %v5141_v28 = vadd.f32 1.0, %v19691_v61  ;;  %v5018_v17 = vadd.f32 %v18751_v39, %v21975_v46  ;;  %v22001_v20 = vadd.f32 %v4879_v12, %v21958_v44 }
 0x21c   : > { %v5170_v42 = vmul.f32 %v5138_v51, %v5042_v49  ;;  %v5139_v33 = vadd.f32 1.0, %v19693_v15  ;;  %v22003_v21 = vmul.f32 0.5, %v5020_v1  ;;  %v5084_v40 = vmul.f32 0.70710677, %v5020_v1 }
 0x21d   : > { %v17301_v30 = vpack.c.bf16 %v5172_v60, %v5172_v60  ;;  %v5173_v31 = vmul.f32 %v5141_v28, %v5045_v2  ;;  %v22005_v57 = vmul.f32 0.5, %v5018_v17  ;;  %v5082_v8 = vmul.f32 0.70710677, %v5018_v17 }
 0x21e   : > { %v17299_v22 = vpack.c.bf16 %v5170_v42, %v5170_v42  ;;  %v5171_v48 = vmul.f32 %v5139_v33, %v5043_v35  ;;  %19702 = verf.f32 %v5084_v40  ;;  %v22008_v62 = vadd.f32 %v18752_v53, %v21975_v46  ;;  %v5638_v53 = vld [vmem:[#allocation2 + $0x20] sm:$0x1]  ;;  %v5631_v42 = vld [vmem:[#allocation2 + $0x14] sm:$0x1] }
 0x21f   : > { %v5319_v56 = vshrl.u32 %v17301_v30, 16  ;;  %v5322_v9 = vshll.u32 %v17301_v30, 16  ;;  %v17302_v44 = vpack.c.bf16 %v5173_v31, %v5173_v31  ;;  %19704 = verf.f32 %v5082_v8  ;;  %v22010_v18 = vpop.f32.mrb[12].mxu0 }
 0x220   : > { %v19695_v11 = vpop.eup %19694  ;;  %v5302_v54 = vshrl.u32 %v17299_v22, 16  ;;  %v5305_v19 = vshll.u32 %v17299_v22, 16  ;;  %v17300_v63 = vpack.c.bf16 %v5171_v48, %v5171_v48  ;;  %v22013_v4 = vmul.f32 0.5, %v22008_v62  ;;  %v22015_v43 = vpop.f32.mrb[13].mxu0 }
 0x221   : > { %v19697_v16 = vpop.eup %19696  ;;  %v5321_v58 = vrot.slane %v5319_v56, 7  ;;  %v5327_v50 = vshrl.u32 %v17302_v44, 16  ;;  %v5330_v5 = vshll.u32 %v17302_v44, 16  ;;  %v5144_v55 = vadd.f32 1.0, %v19695_v11  ;;  %v22017_v29 = vpop.f32.mrb[14].mxu0 }
 0x222   : > { %v26478_v52 = vmov 0  ;;  %v5304_v49 = vrot.slane %v5302_v54, 7  ;;  %v5310_v6 = vshrl.u32 %v17300_v63, 16  ;;  %v5313_v2 = vshll.u32 %v17300_v63, 16  ;;  %v22025_v0 = vpop.f32.mrb[15].mxu0  ;;  %v19699_v36 = vpop.eup %19698 }
 0x223   : > { %v26479_v52 = vsel %vm22021_vm15, 4294967295, %v26478_v52  ;;  %v5142_v35 = vadd.f32 1.0, %v19697_v16  ;;  %v5324_v10 = vor.u32 %v5322_v9, %v5321_v58  ;;  %v5325_v38 = vrot.slane %v5321_v58, 4  ;;  %v19701_v7 = vpop.eup %19700 }
 0x224   : > { %26480 = vst [vmem:[#allocation14_spill] sm:$0xff] %v26479_v52  ;;  %v26482_v26 = vsel %vm22029_vm0, 4294967295, %v26481_v26  ;;  %v5329_v23 = vrot.slane %v5327_v50, 7  ;;  %v5176_v39 = vmul.f32 %v5144_v55, %v21988_v34  ;;  %v5307_v61 = vor.u32 %v5305_v19, %v5304_v49 }
 0x225   : > { %26483 = vst [vmem:[#allocation12_spill] sm:$0xff] %v26482_v26  ;;  %v5308_v51 = vrot.slane %v5304_v49, 4  ;;  %v26484_v1 = vmov 0  ;;  %v5312_v12 = vrot.slane %v5310_v6, 7  ;;  %v5174_v15 = vmul.f32 %v5142_v35, %v21990_v24 }
 0x226   : > { %v26485_v1 = vsel %vm22036_vm1, 4294967295, %v26484_v1  ;;  %v5635_v60 = vsel %vm22021_vm15, %v5324_v10, %v5634_v14  ;;  %v5332_v28 = vor.u32 %v5330_v5, %v5329_v23  ;;  %v5334_v17 = vrot.slane %v5329_v23, 4  ;;  %v5648_v14 = vld [vmem:[#allocation2 + $0x30] sm:$0xf] }
 0x227   : > { %26486 = vst [vmem:[#allocation13_spill] sm:$0xff] %v26485_v1  ;;  %v17305_v34 = vpack.c.bf16 %v5176_v39, %v5176_v39  ;;  %5636 = vst [vmem:[#allocation2 + $0x18] sm:$0xf] %v5635_v60  ;;  %v5626_v33 = vsel %vm22021_vm15, %v5307_v61, %v5625_v37  ;;  %v5315_v40 = vor.u32 %v5313_v2, %v5312_v12  ;;  %v5317_v30 = vrot.slane %v5312_v12, 4  ;;  %v22049_v56 = vpop.f32.mrb[16].mxu0 }
 0x228   : > { %v17303_v31 = vpack.c.bf16 %v5174_v15, %v5174_v15  ;;  %5627 = vst [vmem:[#allocation2 + $0xc] sm:$0xf] %v5626_v33  ;;  %v5333_v8 = vsel %vm22029_vm0, %v5325_v38, %v5332_v28  ;;  %v5639_v24 = vsel %vm22036_vm1, %v5334_v17, %v5638_v53  ;;  %v19703_v9 = vpop.eup %19702  ;;  %v22056_v63 = vpop.f32.mrb[16].mxu1  ;;  %v5145_v5 = vadd.f32 1.0, %v19699_v36  ;;  %v5641_v61 = vld [vmem:[#allocation2 + $0x24] sm:$0xf] }
 0x229   : > { %v5353_v22 = vshrl.u32 %v17305_v34, 16  ;;  %v5356_v48 = vshll.u32 %v17305_v34, 16  ;;  %5637 = vst.msk [vmem:[#allocation2 + $0x1c] sm:$0xf] %vm334_vm8, %v5333_v8  ;;  %5640 = vst [vmem:[#allocation2 + $0x20] sm:$0x1] %v5639_v24  ;;  %v5316_v44 = vsel %vm22029_vm0, %v5308_v51, %v5315_v40  ;;  %v5632_v11 = vsel %vm22036_vm1, %v5317_v30, %v5631_v42  ;;  %v19705_v58 = vpop.eup %19704 }
 0x22a   : > { %v5336_v54 = vshrl.u32 %v17303_v31, 16  ;;  %v5339_v19 = vshll.u32 %v17303_v31, 16  ;;  %v22058_v16 = vpop.f32.mrb[17].mxu0  ;;  %5628 = vst.msk [vmem:[#allocation2 + $0x10] sm:$0xf] %vm334_vm8, %v5316_v44  ;;  %v5143_v55 = vadd.f32 1.0, %v19701_v7  ;;  %v5019_v37 = vadd.f32 %v22001_v20, %v21975_v46 }
 0x22b   : > { %5633 = vst [vmem:[#allocation2 + $0x14] sm:$0x1] %v5632_v11  ;;  %v22061_v50 = vrot.slane %v5353_v22, 7  ;;  %v5148_v49 = vadd.f32 1.0, %v19703_v9  ;;  %v22063_v6 = vpop.f32.mrb[17].mxu1  ;;  %v22065_v2 = vpop.f32.mrb[18].mxu0  ;;  %v5177_v51 = vmul.f32 %v5145_v5, %v21992_v59 }
 0x22c   : > { %v22067_v35 = vrot.slane %v5336_v54, 7  ;;  %v5146_v10 = vadd.f32 1.0, %v19705_v58  ;;  %v5085_v38 = vmul.f32 0.70710677, %v22008_v62  ;;  %v22072_v23 = vpop.f32.mrb[18].mxu1  ;;  %v22074_v39 = vpop.f32.mrb[19].mxu0  ;;  %v5175_v53 = vmul.f32 %v5143_v55, %v21994_v25 }
 0x22d   : > { %v5358_v36 = vor.u32 %v5356_v48, %v22061_v50  ;;  %v5359_v7 = vrot.slane %v22061_v50, 4  ;;  %v22080_v12 = vpop.f32.mrb[19].mxu1  ;;  %v5180_v20 = vmul.f32 %v5148_v49, %v22003_v21  ;;  %v17306_v17 = vpack.c.bf16 %v5177_v51, %v5177_v51  ;;  %v5652_v8 = vld [vmem:[#allocation2 + $0x38] sm:$0x1]  ;;  %v5645_v24 = vld [vmem:[#allocation2 + $0x2c] sm:$0x1] }
 0x22e   : > { %v5341_v62 = vor.u32 %v5339_v19, %v22067_v35  ;;  %v5342_v15 = vrot.slane %v22067_v35, 4  ;;  %v5178_v60 = vmul.f32 %v5146_v10, %v22005_v57  ;;  %v17304_v42 = vpack.c.bf16 %v5175_v53, %v5175_v53  ;;  %v5662_v35 = vld [vmem:[#allocation2 + $0x48] sm:$0xf] }
 0x22f   : > { %v5649_v28 = vsel %vm22021_vm15, %v5358_v36, %v5648_v14  ;;  %19706 = verf.f32 %v5085_v38  ;;  %v17309_v25 = vpack.c.bf16 %v5180_v20, %v5180_v20  ;;  %v22090_v33 = vmul.f32 0.5, %v5019_v37  ;;  %v22092_v57 = vpop.f32.mrb[20].mxu0 }
 0x230   : > { %5650 = vst [vmem:[#allocation2 + $0x30] sm:$0xf] %v5649_v28  ;;  %v5642_v59 = vsel %vm22021_vm15, %v5341_v62, %v5641_v61  ;;  %v17307_v34 = vpack.c.bf16 %v5178_v60, %v5178_v60  ;;  %v5361_v40 = vshrl.u32 %v17306_v17, 16  ;;  %v5364_v30 = vshll.u32 %v17306_v17, 16  ;;  %v22094_v11 = vpop.f32.mrb[20].mxu1  ;;  %v22096_v14 = vpop.f32.mrb[21].mxu0 }
 0x231   : > { %5643 = vst [vmem:[#allocation2 + $0x24] sm:$0xf] %v5642_v59  ;;  %v5344_v21 = vshrl.u32 %v17304_v42, 16  ;;  %v5347_v31 = vshll.u32 %v17304_v42, 16  ;;  %v5387_v22 = vshrl.u32 %v17309_v25, 16  ;;  %v5390_v48 = vshll.u32 %v17309_v25, 16 }
 0x232   : > { %v5370_v9 = vshrl.u32 %v17307_v34, 16  ;;  %v5373_v44 = vshll.u32 %v17307_v34, 16  ;;  %v5363_v54 = vrot.slane %v5361_v40, 7  ;;  %v5083_v58 = vmul.f32 0.70710677, %v5019_v37  ;;  %v22100_v5 = vpop.f32.mrb[21].mxu1 }
 0x233   : > { %v5346_v19 = vrot.slane %v5344_v21, 7  ;;  %v18754_v50 = vadd.f32 %v22010_v18, %v21960_v3  ;;  %v22102_v55 = vpop.f32.mrb[22].mxu0  ;;  %v22104_v49 = vrot.slane %v5387_v22, 7  ;;  %v18755_v38 = vadd.f32 %v22015_v43, %v21962_v47  ;;  %v22112_v61 = vpop.f32.mrb[22].mxu1  ;;  %v5655_v62 = vld [vmem:[#allocation2 + $0x3c] sm:$0xf] }
 0x234   : > { %v22106_v10 = vrot.slane %v5370_v9, 7  ;;  %v18756_v36 = vadd.f32 %v22017_v29, %v21964_v45  ;;  %v22114_v37 = vpop.f32.mrb[23].mxu0  ;;  %v5366_v3 = vor.u32 %v5364_v30, %v5363_v54  ;;  %v5368_v18 = vrot.slane %v5363_v54, 4  ;;  %v22116_v20 = vpop.f32.mrb[23].mxu1 }
 0x235   : > { %v5349_v51 = vor.u32 %v5347_v31, %v5346_v19  ;;  %v5351_v53 = vrot.slane %v5346_v19, 4  ;;  %v5392_v60 = vor.u32 %v5390_v48, %v22104_v49  ;;  %v5393_v28 = vrot.slane %v22104_v49, 4 }
 0x236   : > { %v5375_v47 = vor.u32 %v5373_v44, %v22106_v10  ;;  %v5376_v43 = vrot.slane %v22106_v10, 4  ;;  %v5367_v45 = vsel %vm22029_vm0, %v5359_v7, %v5366_v3  ;;  %v5653_v29 = vsel %vm22036_vm1, %v5368_v18, %v5652_v8 }
 0x237   : > { %v5350_v17 = vsel %vm22029_vm0, %v5342_v15, %v5349_v51  ;;  %v5646_v42 = vsel %vm22036_vm1, %v5351_v53, %v5645_v24  ;;  %5651 = vst.msk [vmem:[#allocation2 + $0x34] sm:$0xf] %vm334_vm8, %v5367_v45  ;;  %5654 = vst [vmem:[#allocation2 + $0x38] sm:$0x1] %v5653_v29  ;;  %v5663_v59 = vsel %vm22021_vm15, %v5392_v60, %v5662_v35  ;;  %19708 = verf.f32 %v5083_v58  ;;  %v22143_v31 = vpop.f32.mrb[24].mxu0 }
 0x238   : > { %5644 = vst.msk [vmem:[#allocation2 + $0x28] sm:$0xf] %vm334_vm8, %v5350_v17  ;;  %5647 = vst [vmem:[#allocation2 + $0x2c] sm:$0x1] %v5646_v42  ;;  %v5656_v7 = vsel %vm22021_vm15, %v5375_v47, %v5655_v62  ;;  %v5024_v25 = vadd.f32 %v18754_v50, %v21975_v46  ;;  %v5022_v15 = vadd.f32 %v18755_v38, %v21975_v46  ;;  %v22149_v9 = vpop.f32.mrb[24].mxu1  ;;  %v22151_v44 = vpop.f32.mrb[25].mxu0 }
 0x239   : > { %v19707_v34 = vpop.eup %19706  ;;  %5664 = vst [vmem:[#allocation2 + $0x48] sm:$0xf] %v5663_v59  ;;  %5657 = vst [vmem:[#allocation2 + $0x3c] sm:$0xf] %v5656_v7  ;;  %v5025_v40 = vadd.f32 %v18756_v36, %v21975_v46  ;;  %v18757_v30 = vadd.f32 %v22025_v0, %v21966_v27  ;;  %v18758_v21 = vadd.f32 %v22049_v56, %v22056_v63  ;;  %v22160_v50 = vpop.f32.mrb[25].mxu1 }
 0x23a   : > { %v5149_v8 = vadd.f32 1.0, %v19707_v34  ;;  %v22145_v24 = vmul.f32 0.5, %v5024_v25  ;;  %v5088_v22 = vmul.f32 0.70710677, %v5024_v25  ;;  %v18759_v48 = vadd.f32 %v22058_v16, %v22063_v6  ;;  %v22162_v16 = vpop.f32.mrb[26].mxu0  ;;  %v22169_v36 = vpop.f32.mrb[26].mxu1 }
 0x23b   : > { %v22153_v54 = vmul.f32 0.5, %v5022_v15  ;;  %v5086_v19 = vmul.f32 0.70710677, %v5022_v15  ;;  %v22155_v27 = vmul.f32 0.5, %v5025_v40  ;;  %v5089_v0 = vmul.f32 0.70710677, %v5025_v40 }
 0x23c   : > { %v5181_v56 = vmul.f32 %v5149_v8, %v22013_v4  ;;  %19710 = verf.f32 %v5088_v22  ;;  %v5023_v63 = vadd.f32 %v18757_v30, %v21975_v46  ;;  %v5028_v58 = vadd.f32 %v18758_v21, %v21975_v46  ;;  %v22171_v4 = vpop.f32.mrb[27].mxu0  ;;  %v22175_v53 = vpop.f32.mrb[27].mxu1 }
 0x23d   : > { %19712 = verf.f32 %v5086_v19  ;;  %v5026_v6 = vadd.f32 %v18759_v48, %v21975_v46  ;;  %v18760_v35 = vadd.f32 %v22065_v2, %v22072_v23  ;;  %v18761_v38 = vadd.f32 %v22074_v39, %v22080_v12  ;;  %v5666_v12 = vld [vmem:[#allocation2 + $0x50] sm:$0x1] }
 0x23e   : > { %v17310_v3 = vpack.c.bf16 %v5181_v56, %v5181_v56  ;;  %19714 = verf.f32 %v5089_v0  ;;  %v22173_v18 = vmul.f32 0.5, %v5023_v63  ;;  %v5087_v51 = vmul.f32 0.70710677, %v5023_v63 }
 0x23f   : > { %v22177_v62 = vmul.f32 0.5, %v5028_v58  ;;  %v5092_v60 = vmul.f32 0.70710677, %v5028_v58  ;;  %v22179_v47 = vmul.f32 0.5, %v5026_v6  ;;  %v5090_v2 = vmul.f32 0.70710677, %v5026_v6 }
 0x240   : > { %v5395_v23 = vshrl.u32 %v17310_v3, 16  ;;  %v5398_v45 = vshll.u32 %v17310_v3, 16  ;;  %19716 = verf.f32 %v5087_v51  ;;  %v5029_v39 = vadd.f32 %v18760_v35, %v21975_v46  ;;  %v22187_v59 = vpop.f32.mrb[28].mxu0  ;;  %v22191_v40 = vpop.f32.mrb[28].mxu1 }
 0x241   : > { %19718 = verf.f32 %v5092_v60  ;;  %v5027_v29 = vadd.f32 %v18761_v38, %v21975_v46  ;;  %v18762_v17 = vadd.f32 %v22092_v57, %v22094_v11  ;;  %v18763_v42 = vadd.f32 %v22096_v14, %v22100_v5  ;;  %v19709_v7 = vpop.eup %19708  ;;  %v22193_v30 = vpop.f32.mrb[29].mxu0 }
 0x242   : > { %v5397_v25 = vrot.slane %v5395_v23, 7  ;;  %19720 = verf.f32 %v5090_v2  ;;  %v22189_v34 = vmul.f32 0.5, %v5029_v39  ;;  %v5093_v15 = vmul.f32 0.70710677, %v5029_v39  ;;  %v22198_v11 = vpop.f32.mrb[29].mxu1  ;;  %v22200_v14 = vpop.f32.mrb[30].mxu0 }
 0x243   : > { %v5147_v21 = vadd.f32 1.0, %v19709_v7  ;;  %v22195_v8 = vmul.f32 0.5, %v5027_v29  ;;  %v5091_v22 = vmul.f32 0.70710677, %v5027_v29  ;;  %v5032_v57 = vadd.f32 %v18762_v17, %v21975_v46  ;;  %v22203_v0 = vpop.f32.mrb[30].mxu1  ;;  %v22205_v56 = vpop.f32.mrb[31].mxu0 }
 0x244   : > { %v5400_v5 = vor.u32 %v5398_v45, %v5397_v25  ;;  %v5402_v48 = vrot.slane %v5397_v25, 4  ;;  %19722 = verf.f32 %v5093_v15  ;;  %v5030_v19 = vadd.f32 %v18763_v42, %v21975_v46  ;;  %v22210_v35 = vpop.f32.mrb[31].mxu1 }
 0x245   : > { %v5179_v63 = vmul.f32 %v5147_v21, %v22090_v33  ;;  %19724 = verf.f32 %v5091_v22  ;;  %v22208_v58 = vmul.f32 0.5, %v5032_v57  ;;  %v5096_v6 = vmul.f32 0.70710677, %v5032_v57 }
 0x246   : > { %v19711_v38 = vpop.eup %19710  ;;  %v5401_v3 = vsel %vm22029_vm0, %v5393_v28, %v5400_v5  ;;  %v5667_v51 = vsel %vm22036_vm1, %v5402_v48, %v5666_v12  ;;  %v22218_v60 = vmul.f32 0.5, %v5030_v19  ;;  %v5094_v2 = vmul.f32 0.70710677, %v5030_v19 }
 0x247   : > { %v19713_v23 = vpop.eup %19712  ;;  %5665 = vst.msk [vmem:[#allocation2 + $0x4c] sm:$0xf] %vm334_vm8, %v5401_v3  ;;  %5668 = vst [vmem:[#allocation2 + $0x50] sm:$0x1] %v5667_v51  ;;  %v17308_v33 = vpack.c.bf16 %v5179_v63, %v5179_v63  ;;  %v5152_v45 = vadd.f32 1.0, %v19711_v38  ;;  %19726 = verf.f32 %v5096_v6  ;;  %v18764_v39 = vadd.f32 %v22102_v55, %v22112_v61 }
 0x248   : > { %v19715_v49 = vpop.eup %19714  ;;  %v5150_v29 = vadd.f32 1.0, %v19713_v23  ;;  %19728 = verf.f32 %v5094_v2  ;;  %v18765_v28 = vadd.f32 %v22114_v37, %v22116_v20  ;;  %v18766_v12 = vadd.f32 %v22143_v31, %v22149_v9 }
 0x249   : > { %v5378_v17 = vshrl.u32 %v17308_v33, 16  ;;  %v5381_v42 = vshll.u32 %v17308_v33, 16  ;;  %v5184_v7 = vmul.f32 %v5152_v45, %v22145_v24  ;;  %v5153_v25 = vadd.f32 1.0, %v19715_v49  ;;  %v5659_v24 = vld [vmem:[#allocation2 + $0x44] sm:$0x1] }
 0x24a   : > { %v19717_v15 = vpop.eup %19716  ;;  %v5182_v21 = vmul.f32 %v5150_v29, %v22153_v54  ;;  %v5033_v22 = vadd.f32 %v18764_v39, %v21975_v46  ;;  %v22231_v55 = vadd.f32 %v18765_v28, %v21975_v46  ;;  %v22234_v61 = vadd.f32 %v18766_v12, %v21975_v46 }
 0x24b   : > { %v19719_v37 = vpop.eup %19718  ;;  %v5380_v20 = vrot.slane %v5378_v17, 7  ;;  %v17313_v57 = vpack.c.bf16 %v5184_v7, %v5184_v7  ;;  %v5185_v31 = vmul.f32 %v5153_v25, %v22155_v27  ;;  %v5151_v9 = vadd.f32 1.0, %v19717_v15  ;;  %v5676_v17 = vld [vmem:[#allocation2 + $0x60] sm:$0xf] }
 0x24c   : > { %v19721_v5 = vpop.eup %19720  ;;  %v17311_v48 = vpack.c.bf16 %v5182_v21, %v5182_v21  ;;  %v5156_v19 = vadd.f32 1.0, %v19719_v37  ;;  %v22237_v63 = vmul.f32 0.5, %v5033_v22  ;;  %v22239_v54 = vmul.f32 0.70710677, %v5033_v22  ;;  %v5669_v22 = vld [vmem:[#allocation2 + $0x54] sm:$0xf] }
 0x24d   : > { %v5383_v6 = vor.u32 %v5381_v42, %v5380_v20  ;;  %v5385_v38 = vrot.slane %v5380_v20, 4  ;;  %v5421_v3 = vshrl.u32 %v17313_v57, 16  ;;  %v5424_v51 = vshll.u32 %v17313_v57, 16 }
 0x24e   : > { %v19723_v2 = vpop.eup %19722  ;;  %v5404_v23 = vshrl.u32 %v17311_v48, 16  ;;  %v5407_v33 = vshll.u32 %v17311_v48, 16  ;;  %v17314_v45 = vpack.c.bf16 %v5185_v31, %v5185_v31  ;;  %v5183_v39 = vmul.f32 %v5151_v9, %v22173_v18  ;;  %v5680_v48 = vld [vmem:[#allocation2 + $0x68] sm:$0x1] }
 0x24f   : > { %v19725_v27 = vpop.eup %19724  ;;  %v5384_v49 = vsel %vm22029_vm0, %v5376_v43, %v5383_v6  ;;  %v5660_v29 = vsel %vm22036_vm1, %v5385_v38, %v5659_v24  ;;  %v5423_v28 = vrot.slane %v5421_v3, 7  ;;  %v5188_v12 = vmul.f32 %v5156_v19, %v22177_v62 }
 0x250   : > { %5658 = vst.msk [vmem:[#allocation2 + $0x40] sm:$0xf] %vm334_vm8, %v5384_v49  ;;  %5661 = vst [vmem:[#allocation2 + $0x44] sm:$0x1] %v5660_v29  ;;  %v5406_v42 = vrot.slane %v5404_v23, 7  ;;  %v5429_v7 = vshrl.u32 %v17314_v45, 16  ;;  %v17312_v18 = vpack.c.bf16 %v5183_v39, %v5183_v39  ;;  %19730 = verf.f32 %v22239_v54 }
 0x251   : > { %v5432_v25 = vshll.u32 %v17314_v45, 16  ;;  %v19727_v15 = vpop.eup %19726  ;;  %v5426_v21 = vor.u32 %v5424_v51, %v5423_v28  ;;  %v5427_v10 = vrot.slane %v5423_v28, 4  ;;  %v17317_v37 = vpack.c.bf16 %v5188_v12, %v5188_v12 }
 0x252   : > { %v5154_v43 = vadd.f32 1.0, %v19721_v5  ;;  %v19729_v20 = vpop.eup %19728  ;;  %v5409_v57 = vor.u32 %v5407_v33, %v5406_v42  ;;  %v5410_v31 = vrot.slane %v5406_v42, 4  ;;  %v5431_v9 = vrot.slane %v5429_v7, 7  ;;  %v5673_v5 = vld [vmem:[#allocation2 + $0x5c] sm:$0x1] }
 0x253   : > { %v5412_v24 = vshrl.u32 %v17312_v18, 16  ;;  %v5677_v62 = vsel %vm22021_vm15, %v5426_v21, %v5676_v17  ;;  %v5415_v19 = vshll.u32 %v17312_v18, 16  ;;  %v5455_v6 = vshrl.u32 %v17317_v37, 16  ;;  %v5690_v7 = vld [vmem:[#allocation2 + $0x78] sm:$0xf] }
 0x254   : > { %v5458_v38 = vshll.u32 %v17317_v37, 16  ;;  %5678 = vst [vmem:[#allocation2 + $0x60] sm:$0xf] %v5677_v62  ;;  %v5670_v3 = vsel %vm22021_vm15, %v5409_v57, %v5669_v22  ;;  %v5434_v51 = vor.u32 %v5432_v25, %v5431_v9  ;;  %v5436_v23 = vrot.slane %v5431_v9, 4 }
 0x255   : > { %v5414_v45 = vrot.slane %v5412_v24, 7  ;;  %5671 = vst [vmem:[#allocation2 + $0x54] sm:$0xf] %v5670_v3  ;;  %v5457_v33 = vrot.slane %v5455_v6, 7  ;;  %v5186_v39 = vmul.f32 %v5154_v43, %v22179_v47  ;;  %v5157_v49 = vadd.f32 1.0, %v19723_v2 }
 0x256   : > { %v5155_v29 = vadd.f32 1.0, %v19725_v27  ;;  %v5435_v28 = vsel %vm22029_vm0, %v5427_v10, %v5434_v51  ;;  %v5681_v12 = vsel %vm22036_vm1, %v5436_v23, %v5680_v48  ;;  %v5160_v10 = vadd.f32 1.0, %v19727_v15 }
 0x257   : > { %v5417_v17 = vor.u32 %v5415_v19, %v5414_v45  ;;  %v5419_v42 = vrot.slane %v5414_v45, 4  ;;  %5679 = vst.msk [vmem:[#allocation2 + $0x64] sm:$0xf] %vm334_vm8, %v5435_v28  ;;  %5682 = vst [vmem:[#allocation2 + $0x68] sm:$0x1] %v5681_v12  ;;  %v5460_v25 = vor.u32 %v5458_v38, %v5457_v33  ;;  %v5461_v18 = vrot.slane %v5457_v33, 4 }
 0x258   : > { %v17315_v21 = vpack.c.bf16 %v5186_v39, %v5186_v39  ;;  %v5189_v22 = vmul.f32 %v5157_v49, %v22189_v34  ;;  %v5187_v27 = vmul.f32 %v5155_v29, %v22195_v8  ;;  %v5192_v24 = vmul.f32 %v5160_v10, %v22208_v58  ;;  %v5683_v19 = vld [vmem:[#allocation2 + $0x6c] sm:$0xf] }
 0x259   : > { %v5418_v47 = vsel %vm22029_vm0, %v5410_v31, %v5417_v17  ;;  %v5674_v2 = vsel %vm22036_vm1, %v5419_v42, %v5673_v5  ;;  %v5691_v37 = vsel %vm22021_vm15, %v5460_v25, %v5690_v7  ;;  %v5158_v31 = vadd.f32 1.0, %v19729_v20  ;;  %v5694_v20 = vld [vmem:[#allocation2 + $0x80] sm:$0x1]  ;;  %v5687_v17 = vld [vmem:[#allocation2 + $0x74] sm:$0x1] }
 0x25a   : > { %5672 = vst.msk [vmem:[#allocation2 + $0x58] sm:$0xf] %vm334_vm8, %v5418_v47  ;;  %5675 = vst [vmem:[#allocation2 + $0x5c] sm:$0x1] %v5674_v2  ;;  %v5438_v43 = vshrl.u32 %v17315_v21, 16  ;;  %v5441_v57 = vshll.u32 %v17315_v21, 16  ;;  %v17318_v9 = vpack.c.bf16 %v5189_v22, %v5189_v22  ;;  %v17316_v34 = vpack.c.bf16 %v5187_v27, %v5187_v27 }
 0x25b   : > { %5692 = vst [vmem:[#allocation2 + $0x78] sm:$0xf] %v5691_v37  ;;  %v22272_v15 = vmul.f32 0.5, %v22231_v55  ;;  %v17321_v3 = vpack.c.bf16 %v5192_v24, %v5192_v24  ;;  %v5190_v51 = vmul.f32 %v5158_v31, %v22218_v60  ;;  %v5095_v58 = vmul.f32 0.70710677, %v22231_v55 }
 0x25c   : > { %v5440_v62 = vrot.slane %v5438_v43, 7  ;;  %v5463_v48 = vshrl.u32 %v17318_v9, 16  ;;  %v5466_v8 = vshll.u32 %v17318_v9, 16  ;;  %v5446_v6 = vshrl.u32 %v17316_v34, 16  ;;  %v5704_v22 = vld [vmem:[#allocation2 + $0x90] sm:$0xf] }
 0x25d   : > { %v5449_v38 = vshll.u32 %v17316_v34, 16  ;;  %v5489_v54 = vshrl.u32 %v17321_v3, 16  ;;  %v5492_v39 = vshll.u32 %v17321_v3, 16  ;;  %v17319_v49 = vpack.c.bf16 %v5190_v51, %v5190_v51  ;;  %v5741_v27 = vld [vmem:[#allocation2 + $0xc] sm:$0xf] }
 0x25e   : > { %v5443_v23 = vor.u32 %v5441_v57, %v5440_v62  ;;  %v5444_v45 = vrot.slane %v5440_v62, 4  ;;  %v5465_v5 = vrot.slane %v5463_v48, 7  ;;  %v5448_v33 = vrot.slane %v5446_v6, 7  ;;  %v5697_v57 = vld [vmem:[#allocation2 + $0x84] sm:$0xf]  ;;  %v19731_v48 = vpop.eup %19730 }
 0x25f   : > { %19732 = verf.f32 %v5095_v58  ;;  %v22278_v7 = vrot.slane %v5489_v54, 7  ;;  %v5472_v25 = vshrl.u32 %v17319_v49, 16  ;;  %v5475_v47 = vshll.u32 %v17319_v49, 16  ;;  %v5742_v62 = vld [vmem:[#allocation2 + $0x10] sm:$0xf] }
 0x260   : > { %v5684_v29 = vsel %vm22021_vm15, %v5443_v23, %v5683_v19  ;;  %v5468_v28 = vor.u32 %v5466_v8, %v5465_v5  ;;  %v5470_v12 = vrot.slane %v5465_v5, 4  ;;  %v5451_v42 = vor.u32 %v5449_v38, %v5448_v33 }
 0x261   : > { %5685 = vst [vmem:[#allocation2 + $0x6c] sm:$0xf] %v5684_v29  ;;  %v5453_v60 = vrot.slane %v5448_v33, 4  ;;  %v22285_v2 = vmul.f32 0.5, %v22234_v61  ;;  %v5495_v43 = vrot.slane %v22278_v7, 4  ;;  %v22295_v9 = vrot.slane %v5472_v25, 7 }
 0x262   : > { %v5469_v55 = vsel %vm22029_vm0, %v5461_v18, %v5468_v28  ;;  %v5695_v21 = vsel %vm22036_vm1, %v5470_v12, %v5694_v20  ;;  %v5452_v10 = vsel %vm22029_vm0, %v5444_v45, %v5451_v42  ;;  %v5494_v18 = vor.u32 %v5492_v39, %v22278_v7  ;;  %v5773_v29 = vld [vmem:[#allocation2 + $0x14] sm:$0x1]  ;;  %v22320_v42 = vld [vmem:[#allocation2 + $0x18] sm:$0xf] }
 0x263   : > { %5693 = vst.msk [vmem:[#allocation2 + $0x7c] sm:$0xf] %vm334_vm8, %v5469_v55  ;;  %5696 = vst [vmem:[#allocation2 + $0x80] sm:$0x1] %v5695_v21  ;;  %v5688_v37 = vsel %vm22036_vm1, %v5453_v60, %v5687_v17  ;;  %v5100_v34 = vmul.f32 0.70710677, %v22234_v61  ;;  %v18767_v24 = vadd.f32 %v22151_v44, %v22160_v50  ;;  %v18768_v31 = vadd.f32 %v22162_v16, %v22169_v36 }
 0x264   : > { %5686 = vst.msk [vmem:[#allocation2 + $0x70] sm:$0xf] %vm334_vm8, %v5452_v10  ;;  %5689 = vst [vmem:[#allocation2 + $0x74] sm:$0x1] %v5688_v37  ;;  %v5705_v8 = vsel %vm22021_vm15, %v5494_v18, %v5704_v22  ;;  %v18769_v19 = vadd.f32 %v22171_v4, %v22175_v53  ;;  %v5813_v6 = vshrl.u32 %v5741_v27, 16  ;;  %v5816_v38 = vshll.u32 %v5741_v27, 16 }
 0x265   : > { %5706 = vst [vmem:[#allocation2 + $0x90] sm:$0xf] %v5705_v8  ;;  %v5477_v3 = vor.u32 %v5475_v47, %v22295_v9  ;;  %v5478_v61 = vrot.slane %v22295_v9, 4  ;;  %v5161_v51 = vadd.f32 1.0, %v19731_v48  ;;  %19734 = verf.f32 %v5100_v34  ;;  %v22322_v21 = vld [vmem:[#allocation2 + $0x1c] sm:$0xf] }
 0x266   : > { %v5034_v44 = vadd.f32 %v18767_v24, %v21975_v46  ;;  %v5037_v50 = vadd.f32 %v18768_v31, %v21975_v46  ;;  %v5035_v16 = vadd.f32 %v18769_v19, %v21975_v46  ;;  %v5815_v36 = vrot.slane %v5813_v6, 4  ;;  %v5708_v34 = vld [vmem:[#allocation2 + $0x98] sm:$0x1]  ;;  %v5774_v6 = vld [vmem:[#allocation2 + $0x20] sm:$0x1] }
 0x267   : > { %v5698_v23 = vsel %vm22021_vm15, %v5477_v3, %v5697_v57  ;;  %v5193_v4 = vmul.f32 %v5161_v51, %v22237_v63  ;;  %v5818_v53 = vrot.slane %v5816_v38, 5  ;;  %v5822_v45 = vshll.u32 %v5742_v62, 16 }
 0x268   : > { %5699 = vst [vmem:[#allocation2 + $0x84] sm:$0xf] %v5698_v23  ;;  %v22314_v5 = vmul.f32 0.5, %v5034_v44  ;;  %v5098_v58 = vmul.f32 0.70710677, %v5034_v44  ;;  %v22316_v20 = vmul.f32 0.5, %v5037_v50 }
 0x269   : > { %v5101_v33 = vmul.f32 0.70710677, %v5037_v50  ;;  %v19733_v54 = vpop.eup %19732  ;;  %v17322_v39 = vpack.c.bf16 %v5193_v4, %v5193_v4  ;;  %v22318_v49 = vmul.f32 0.5, %v5035_v16  ;;  %v5099_v46 = vmul.f32 0.70710677, %v5035_v16 }
 0x26a   : > { %v5819_v28 = vor.u32 %v5818_v53, %v5815_v36  ;;  %v5159_v12 = vadd.f32 1.0, %v19733_v54  ;;  %19736 = verf.f32 %v5098_v58  ;;  %v5824_v17 = vrot.slane %v5822_v45, 5  ;;  %v5701_v54 = vld [vmem:[#allocation2 + $0x8c] sm:$0x1] }
 0x26b   : > { %v5826_v63 = vshrl.u32 %v5742_v62, 16  ;;  %v5497_v60 = vshrl.u32 %v17322_v39, 16  ;;  %v5500_v25 = vshll.u32 %v17322_v39, 16  ;;  %19738 = verf.f32 %v5101_v33 }
 0x26c   : > { %v5820_v55 = vrot.slane %v5819_v28, 4  ;;  %v5191_v22 = vmul.f32 %v5159_v12, %v22272_v15  ;;  %19740 = verf.f32 %v5099_v46  ;;  %v5832_v27 = vshll.u32 %v5773_v29, 16 }
 0x26d   : > { %v5828_v47 = vrot.slane %v5826_v63, 4  ;;  %v5499_v10 = vrot.slane %v5497_v60, 7  ;;  %v5837_v18 = vshrl.u32 %v22320_v42, 16  ;;  %v5840_v57 = vshll.u32 %v22320_v42, 16 }
 0x26e   : > { %v5825_v37 = vsel %vm20078_vm4, %v5820_v55, %v5824_v17  ;;  %v17320_v24 = vpack.c.bf16 %v5191_v22, %v5191_v22  ;;  %v5834_v62 = vrot.slane %v5832_v27, 5  ;;  %v5846_v48 = vshll.u32 %v22322_v21, 16 }
 0x26f   : > { %v5829_v31 = vor.u32 %v5828_v47, %v5824_v17  ;;  %v19735_v8 = vpop.eup %19734  ;;  %v5502_v19 = vor.u32 %v5500_v25, %v5499_v10  ;;  %v5504_v15 = vrot.slane %v5499_v10, 4  ;;  %v5839_v38 = vrot.slane %v5837_v18, 4 }
 0x270   : > { %v5842_v3 = vrot.slane %v5840_v57, 5  ;;  %v5480_v51 = vshrl.u32 %v17320_v24, 16  ;;  %v5483_v44 = vshll.u32 %v17320_v24, 16  ;;  %v5164_v50 = vadd.f32 1.0, %v19735_v8 }
 0x271   : > { %v5830_v16 = vrot.slane %v5829_v31, 4  ;;  %v5503_v36 = vsel %vm22029_vm0, %v5495_v43, %v5502_v19  ;;  %v5709_v23 = vsel %vm22036_vm1, %v5504_v15, %v5708_v34  ;;  %v22336_v53 = vrot.slane %v5846_v48, 5 }
 0x272   : > { %v5843_v4 = vor.u32 %v5842_v3, %v5839_v38  ;;  %5707 = vst.msk [vmem:[#allocation2 + $0x94] sm:$0xf] %vm334_vm8, %v5503_v36  ;;  %5710 = vst [vmem:[#allocation2 + $0x98] sm:$0x1] %v5709_v23  ;;  %v5482_v45 = vrot.slane %v5480_v51, 7  ;;  %v5196_v58 = vmul.f32 %v5164_v50, %v22285_v2  ;;  %v5850_v7 = vshrl.u32 %v22322_v21, 16 }
 0x273   : > { %v5835_v33 = vsel %vm20078_vm4, %v5830_v16, %v5834_v62  ;;  %v5856_v46 = vshll.u32 %v5774_v6, 16  ;;  %v18770_v29 = vadd.f32 %v22187_v59, %v22191_v40  ;;  %v22348_v2 = vld [vmem:[%s26226_s3 + $0x8] sm:$0xf]  ;;  %v22357_v59 = vld [vmem:[%s26225_s2] ss:$0 sm:$0xff]  ;;  %v18771_v8 = vadd.f32 %v22193_v30, %v22198_v11 }
 0x274   : > { %v16574_v39 = vcombine.low %v5825_v37, %v5835_v33  ;;  %v5844_v43 = vrot.slane %v5843_v4, 4  ;;  %v19737_v28 = vpop.eup %19736  ;;  %v5485_v12 = vor.u32 %v5483_v44, %v5482_v45  ;;  %v5487_v17 = vrot.slane %v5482_v45, 4  ;;  %v5711_v33 = vld [vmem:[#allocation2 + $0x9c] sm:$0xf] }
 0x275   : > { %v17325_v63 = vpack.c.bf16 %v5196_v58, %v5196_v58  ;;  %v5852_v60 = vrot.slane %v5850_v7, 4  ;;  %v19739_v25 = vpop.eup %19738  ;;  %v5162_v55 = vadd.f32 1.0, %v19737_v28  ;;  %v5858_v47 = vrot.slane %v5856_v46, 5  ;;  %v22385_v58 = vld [vmem:[#allocation2 + $0x24] sm:$0xf] }
 0x276   : > { %18131 = vmatmul.mubr.msk.bf16.vlgmr.msra.gmra.mrb[32].mxu1 %vm6222_vm11, %v16574_v39  ;;  %v5849_v22 = vsel %vm20078_vm4, %v5844_v43, %v22336_v53  ;;  %v5040_v40 = vadd.f32 %v22357_v59, %v18770_v29  ;;  %v19741_v27 = vpop.eup %19740  ;;  %v5486_v10 = vsel %vm22029_vm0, %v5478_v61, %v5485_v12  ;;  %v5702_v37 = vsel %vm22036_vm1, %v5487_v17, %v5701_v54  ;;  %v5722_v7 = vld [vmem:[#allocation2 + $0xb0] sm:$0x1] }
 0x277   : > { %v5523_v18 = vshrl.u32 %v17325_v63, 16  ;;  %v5526_v57 = vshll.u32 %v17325_v63, 16  ;;  %18163 = vmatpush3.bf16.msra.mxu1 %v21986_v41  ;;  %5700 = vst.msk [vmem:[#allocation2 + $0x88] sm:$0xf] %vm334_vm8, %v5486_v10  ;;  %5703 = vst [vmem:[#allocation2 + $0x8c] sm:$0x1] %v5702_v37  ;;  %v5194_v34 = vmul.f32 %v5162_v55, %v22314_v5  ;;  %v5853_v62 = vor.u32 %v5852_v60, %v22336_v53 }
 0x278   : > { %v5165_v24 = vadd.f32 1.0, %v19739_v25  ;;  %v5163_v31 = vadd.f32 1.0, %v19741_v27  ;;  %19522 = vmatprep.subr.msk.bf16.mxu1 %vm6271_vm10, %v22348_v2  ;;  %v22372_v61 = vmul.f32 0.5, %v5040_v40  ;;  %v5104_v48 = vmul.f32 0.70710677, %v5040_v40 }
 0x279   : > { %v5525_v9 = vrot.slane %v5523_v18, 7  ;;  %v5718_v41 = vld [vmem:[#allocation2 + $0xa8] sm:$0xf]  ;;  %v17323_v19 = vpack.c.bf16 %v5194_v34, %v5194_v34  ;;  %v5854_v6 = vrot.slane %v5853_v62, 4  ;;  %v5038_v51 = vadd.f32 %v22357_v59, %v18771_v8  ;;  %v22408_v34 = vld [vmem:[#allocation2 + $0x2c] sm:$0x1] }
 0x27a   : > { %v5197_v15 = vmul.f32 %v5165_v24, %v22316_v20  ;;  %v5195_v5 = vmul.f32 %v5163_v31, %v22318_v49  ;;  %19742 = verf.f32 %v5104_v48  ;;  %v18772_v43 = vadd.f32 %v22200_v14, %v22203_v0  ;;  %v22400_v18 = vld [vmem:[#allocation2 + $0x28] sm:$0xf]  ;;  %v22410_v31 = vld [vmem:[#allocation2 + $0x30] sm:$0xf] }
 0x27b   : > { %v5528_v38 = vor.u32 %v5526_v57, %v5525_v9  ;;  %v5529_v3 = vrot.slane %v5525_v9, 4  ;;  %v5506_v44 = vshrl.u32 %v17323_v19, 16  ;;  %v5509_v50 = vshll.u32 %v17323_v19, 16 }
 0x27c   : > { %v17326_v16 = vpack.c.bf16 %v5197_v15, %v5197_v15  ;;  %v17324_v36 = vpack.c.bf16 %v5195_v5, %v5195_v5  ;;  %v5859_v30 = vsel %vm20078_vm4, %v5854_v6, %v5858_v47  ;;  %v22383_v11 = vmul.f32 0.5, %v5038_v51  ;;  %v5715_v47 = vld [vmem:[#allocation2 + $0xa4] sm:$0x1]  ;;  %v22420_v5 = vld [vmem:[#allocation2 + $0x34] sm:$0xf] }
 0x27d   : > { %v5719_v23 = vsel %vm22021_vm15, %v5528_v38, %v5718_v41  ;;  %v5102_v20 = vmul.f32 0.70710677, %v5038_v51  ;;  %v5508_v49 = vrot.slane %v5506_v44, 7  ;;  %v16575_v39 = vcombine.low %v5849_v22, %v5859_v30 }
 0x27e   : > { %5720 = vst [vmem:[#allocation2 + $0xa8] sm:$0xf] %v5719_v23  ;;  %v5531_v4 = vshrl.u32 %v17326_v16, 16  ;;  %v5534_v53 = vshll.u32 %v17326_v16, 16  ;;  %v5514_v45 = vshrl.u32 %v17324_v36, 16  ;;  %v5517_v54 = vshll.u32 %v17324_v36, 16 }
 0x27f   : > { %19744 = verf.f32 %v5102_v20  ;;  %v5511_v46 = vor.u32 %v5509_v50, %v5508_v49  ;;  %v5512_v29 = vrot.slane %v5508_v49, 4  ;;  %18134 = vmatprep.mubr.msk.bf16.mxu1 %vm6222_vm11, %v16575_v39  ;;  %v5041_v17 = vadd.f32 %v22357_v59, %v18772_v43  ;;  %v22426_v36 = vld [vmem:[#allocation2 + $0x38] sm:$0x1] }
 0x280   : > { %v5533_v28 = vrot.slane %v5531_v4, 7  ;;  %v5516_v12 = vrot.slane %v5514_v45, 7  ;;  %v18773_v63 = vadd.f32 %v22205_v56, %v22210_v35  ;;  %v5861_v60 = vshrl.u32 %v22385_v58, 16 }
 0x281   : > { %v5864_v25 = vshll.u32 %v22385_v58, 16  ;;  %v5712_v55 = vsel %vm22021_vm15, %v5511_v46, %v5711_v33  ;;  %v22397_v27 = vmul.f32 0.5, %v5041_v17  ;;  %v5105_v10 = vmul.f32 0.70710677, %v5041_v17 }
 0x282   : > { %v5536_v22 = vor.u32 %v5534_v53, %v5533_v28  ;;  %v5538_v14 = vrot.slane %v5533_v28, 4  ;;  %v5519_v0 = vor.u32 %v5517_v54, %v5516_v12  ;;  %5713 = vst [vmem:[#allocation2 + $0x9c] sm:$0xf] %v5712_v55  ;;  %v5521_v40 = vrot.slane %v5516_v12, 4  ;;  %v22429_v54 = vld [vmem:[#allocation2 + $0x3c] sm:$0xf] }
 0x283   : > { %v5039_v37 = vadd.f32 %v22357_v59, %v18773_v63  ;;  %v5863_v24 = vrot.slane %v5861_v60, 4  ;;  %19746 = verf.f32 %v5105_v10  ;;  %v5866_v41 = vrot.slane %v5864_v25, 5  ;;  %v22436_v63 = vld [vmem:[#allocation2 + $0x40] sm:$0xf] }
 0x284   : > { %v5537_v56 = vsel %vm22029_vm0, %v5529_v3, %v5536_v22  ;;  %v5723_v35 = vsel %vm22036_vm1, %v5538_v14, %v5722_v7  ;;  %v5520_v57 = vsel %vm22029_vm0, %v5512_v29, %v5519_v0  ;;  %v19743_v62 = vpop.eup %19742  ;;  %v5716_v59 = vsel %vm22036_vm1, %v5521_v40, %v5715_v47 }
 0x285   : > { %5721 = vst.msk [vmem:[#allocation2 + $0xac] sm:$0xf] %vm334_vm8, %v5537_v56  ;;  %5724 = vst [vmem:[#allocation2 + $0xb0] sm:$0x1] %v5723_v35  ;;  %v22416_v9 = vmul.f32 0.5, %v5039_v37  ;;  %v5168_v8 = vadd.f32 1.0, %v19743_v62  ;;  %v5867_v44 = vor.u32 %v5866_v41, %v5863_v24 }
 0x286   : > { %5714 = vst.msk [vmem:[#allocation2 + $0xa0] sm:$0xf] %vm334_vm8, %v5520_v57  ;;  %v5103_v48 = vmul.f32 0.70710677, %v5039_v37  ;;  %5717 = vst [vmem:[#allocation2 + $0xa4] sm:$0x1] %v5716_v59 }
 0x287   : > { %v5870_v19 = vshll.u32 %v22400_v18, 16  ;;  %v5874_v15 = vshrl.u32 %v22400_v18, 16  ;;  %v5880_v6 = vshll.u32 %v22408_v34, 16  ;;  %v5885_v38 = vshrl.u32 %v22410_v31, 16  ;;  %v5732_v37 = vld [vmem:[#allocation2 + $0xc0] sm:$0xf] }
 0x288   : > { %19748 = verf.f32 %v5103_v48  ;;  %v5888_v3 = vshll.u32 %v22410_v31, 16  ;;  %v5200_v51 = vmul.f32 %v5168_v8, %v22372_v61  ;;  %v5894_v4 = vshll.u32 %v22420_v5, 16 }
 0x289   : > { %v5872_v50 = vrot.slane %v5870_v19, 5  ;;  %v5876_v16 = vrot.slane %v5874_v15, 4  ;;  %v19745_v23 = vpop.eup %19744  ;;  %v5882_v30 = vrot.slane %v5880_v6, 5  ;;  %v5887_v20 = vrot.slane %v5885_v38, 4 }
 0x28a   : > { %v5890_v49 = vrot.slane %v5888_v3, 5  ;;  %v17329_v53 = vpack.c.bf16 %v5200_v51, %v5200_v51  ;;  %v5166_v45 = vadd.f32 1.0, %v19745_v23  ;;  %v5868_v33 = vrot.slane %v5867_v44, 4  ;;  %v22453_v44 = vld [vmem:[#allocation2 + $0x44] sm:$0x1] }
 0x28b   : > { %v5877_v7 = vor.u32 %v5876_v16, %v5872_v50  ;;  %v5896_v43 = vrot.slane %v5894_v4, 5  ;;  %v5898_v61 = vshrl.u32 %v22420_v5, 16  ;;  %v5904_v46 = vshll.u32 %v22426_v36, 16  ;;  %26487 = vst [vmem:[#allocation15_spill] sm:$0xff] %v22453_v44  ;;  %v5725_v16 = vld [vmem:[#allocation2 + $0xb4] sm:$0xf] }
 0x28c   : > { %v5891_v39 = vor.u32 %v5890_v49, %v5887_v20  ;;  %v5557_v29 = vshrl.u32 %v17329_v53, 16  ;;  %v5560_v28 = vshll.u32 %v17329_v53, 16  ;;  %v5198_v12 = vmul.f32 %v5166_v45, %v22383_v11  ;;  %v22460_v4 = vld [vmem:[#allocation2 + $0x48] sm:$0xf] }
 0x28d   : > { %v5873_v17 = vsel %vm20078_vm4, %v5868_v33, %v5872_v50  ;;  %v5878_v60 = vrot.slane %v5877_v7, 4  ;;  %v5900_v55 = vrot.slane %v5898_v61, 4  ;;  %v5906_v22 = vrot.slane %v5904_v46, 5  ;;  %v19747_v10 = vpop.eup %19746 }
 0x28e   : > { %v5892_v25 = vrot.slane %v5891_v39, 4  ;;  %v22438_v14 = vrot.slane %v5557_v29, 7  ;;  %v17327_v0 = vpack.c.bf16 %v5198_v12, %v5198_v12  ;;  %v5909_v47 = vshrl.u32 %v22429_v54, 16 }
 0x28f   : > { %v5912_v40 = vshll.u32 %v22429_v54, 16  ;;  %v5883_v11 = vsel %vm20078_vm4, %v5878_v60, %v5882_v30  ;;  %v5901_v35 = vor.u32 %v5900_v55, %v5896_v43  ;;  %v5918_v57 = vshll.u32 %v22436_v63, 16 }
 0x290   : > { %v5897_v56 = vsel %vm20078_vm4, %v5892_v25, %v5896_v43  ;;  %v5562_v24 = vor.u32 %v5560_v28, %v22438_v14  ;;  %v5563_v62 = vrot.slane %v22438_v14, 4  ;;  %v5540_v59 = vshrl.u32 %v17327_v0, 16  ;;  %v22469_v28 = vld [vmem:[#allocation2 + $0x4c] sm:$0xf] }
 0x291   : > { %v5543_v48 = vshll.u32 %v17327_v0, 16  ;;  %v5169_v41 = vadd.f32 1.0, %v19747_v10  ;;  %v16576_v19 = vcombine.low %v5873_v17, %v5883_v11  ;;  %v5902_v15 = vrot.slane %v5901_v35, 4  ;;  %v5736_v0 = vld [vmem:[#allocation2 + $0xc8] sm:$0x1] }
 0x292   : > { %v19749_v8 = vpop.eup %19748  ;;  %v5911_v6 = vrot.slane %v5909_v47, 4  ;;  %v5733_v38 = vsel %vm22021_vm15, %v5562_v24, %v5732_v37  ;;  %v22451_v3 = vrot.slane %v5540_v59, 7  ;;  %v5914_v50 = vrot.slane %v5912_v40, 5  ;;  %v22477_v59 = vld [vmem:[#allocation2 + $0x54] sm:$0xf] }
 0x293   : > { %v5167_v51 = vadd.f32 1.0, %v19749_v8  ;;  %5734 = vst [vmem:[#allocation2 + $0xc0] sm:$0xf] %v5733_v38  ;;  %v5201_v23 = vmul.f32 %v5169_v41, %v22397_v27  ;;  %18135 = vmatmul.mubr.msk.bf16.gmra.mrb[36].mxu1 %vm6222_vm11, %v16576_v19  ;;  %v5907_v30 = vsel %vm20078_vm4, %v5902_v15, %v5906_v22  ;;  %v5920_v20 = vrot.slane %v5918_v57, 5  ;;  %v22473_v22 = vld [vmem:[#allocation2 + $0x50] sm:$0x1] }
 0x294   : > { %v5922_v49 = vshrl.u32 %v22436_v63, 16  ;;  %v5545_v53 = vor.u32 %v5543_v48, %v22451_v3  ;;  %v5546_v45 = vrot.slane %v22451_v3, 4  ;;  %v16577_v7 = vcombine.low %v5897_v56, %v5907_v30  ;;  %v5729_v56 = vld [vmem:[#allocation2 + $0xbc] sm:$0x1] }
 0x295   : > { %v5199_v33 = vmul.f32 %v5167_v51, %v22416_v9  ;;  %v17330_v39 = vpack.c.bf16 %v5201_v23, %v5201_v23  ;;  %v5915_v43 = vor.u32 %v5914_v50, %v5911_v6  ;;  %v5928_v61 = vshll.u32 %v22453_v44, 16  ;;  %v22484_v51 = vld [vmem:[#allocation2 + $0x60] sm:$0xf] }
 0x296   : > { %v5924_v27 = vrot.slane %v5922_v49, 4  ;;  %v5726_v46 = vsel %vm22021_vm15, %v5545_v53, %v5725_v16  ;;  %18138 = vmatprep.mubr.msk.bf16.mxu1 %vm6222_vm11, %v16577_v7  ;;  %v5933_v12 = vshrl.u32 %v22460_v4, 16  ;;  %v5936_v17 = vshll.u32 %v22460_v4, 16 }
 0x297   : > { %v17328_v29 = vpack.c.bf16 %v5199_v33, %v5199_v33  ;;  %5727 = vst [vmem:[#allocation2 + $0xb4] sm:$0xf] %v5726_v46  ;;  %v5565_v9 = vshrl.u32 %v17330_v39, 16  ;;  %v5568_v60 = vshll.u32 %v17330_v39, 16  ;;  %v5916_v25 = vrot.slane %v5915_v43, 4 }
 0x298   : > { %v5925_v55 = vor.u32 %v5924_v27, %v5920_v20  ;;  %v5930_v10 = vrot.slane %v5928_v61, 5  ;;  %v5935_v37 = vrot.slane %v5933_v12, 4  ;;  %v5938_v24 = vrot.slane %v5936_v17, 5  ;;  %v22494_v39 = vld [vmem:[#allocation2 + $0x5c] sm:$0x1] }
 0x299   : > { %v5548_v47 = vshrl.u32 %v17328_v29, 16  ;;  %v5551_v40 = vshll.u32 %v17328_v29, 16  ;;  %v5567_v11 = vrot.slane %v5565_v9, 7  ;;  %v5921_v35 = vsel %vm20078_vm4, %v5916_v25, %v5920_v20  ;;  %v22486_v20 = vld [vmem:[#allocation2 + $0x58] sm:$0xf] }
 0x29a   : > { %v5926_v57 = vrot.slane %v5925_v55, 4  ;;  %v5942_v8 = vshll.u32 %v22469_v28, 16  ;;  %v5946_v41 = vshrl.u32 %v22469_v28, 16  ;;  %v5952_v19 = vshll.u32 %v22473_v22, 16  ;;  %v22512_v25 = vld [vmem:[#allocation2 + $0x68] sm:$0x1] }
 0x29b   : > { %v5550_v48 = vrot.slane %v5548_v47, 7  ;;  %v5570_v15 = vor.u32 %v5568_v60, %v5567_v11  ;;  %v5572_v6 = vrot.slane %v5567_v11, 4  ;;  %v5939_v3 = vor.u32 %v5938_v24, %v5935_v37  ;;  %v22516_v37 = vld [vmem:[#allocation2 + $0x6c] sm:$0xf]  ;;  %v22519_v24 = vld [vmem:[#allocation2 + $0x70] sm:$0xf] }
 0x29c   : > { %v5931_v38 = vsel %vm20078_vm4, %v5926_v57, %v5930_v10  ;;  %v5944_v30 = vrot.slane %v5942_v8, 5  ;;  %v5948_v7 = vrot.slane %v5946_v41, 4  ;;  %v5954_v14 = vrot.slane %v5952_v19, 5 }
 0x29d   : > { %v5553_v50 = vor.u32 %v5551_v40, %v5550_v48  ;;  %v5555_v16 = vrot.slane %v5550_v48, 4  ;;  %v16578_v23 = vcombine.low %v5921_v35, %v5931_v38  ;;  %v5571_v49 = vsel %vm22029_vm0, %v5563_v62, %v5570_v15 }
 0x29e   : > { %v5737_v53 = vsel %vm22036_vm1, %v5572_v6, %v5736_v0  ;;  %v5940_v33 = vrot.slane %v5939_v3, 4  ;;  %5735 = vst.msk [vmem:[#allocation2 + $0xc4] sm:$0xf] %vm334_vm8, %v5571_v49  ;;  %v5957_v62 = vshrl.u32 %v22477_v59, 16  ;;  %v5949_v46 = vor.u32 %v5948_v7, %v5944_v30 }
 0x29f   : > { %5738 = vst [vmem:[#allocation2 + $0xc8] sm:$0x1] %v5737_v53  ;;  %v5554_v43 = vsel %vm22029_vm0, %v5546_v45, %v5553_v50  ;;  %v5730_v27 = vsel %vm22036_vm1, %v5555_v16, %v5729_v56  ;;  %18139 = vmatmul.mubr.msk.bf16.gmra.mrb[40].mxu1 %vm6222_vm11, %v16578_v23  ;;  %v5960_v29 = vshll.u32 %v22477_v59, 16  ;;  %v5966_v12 = vshll.u32 %v22486_v20, 16  ;;  %v22508_v45 = vld [vmem:[#allocation2 + $0x64] sm:$0xf] }
 0x2a0   : > { %5728 = vst.msk [vmem:[#allocation2 + $0xb8] sm:$0xf] %vm334_vm8, %v5554_v43  ;;  %5731 = vst [vmem:[#allocation2 + $0xbc] sm:$0x1] %v5730_v27  ;;  %v5945_v61 = vsel %vm20078_vm4, %v5940_v33, %v5944_v30  ;;  %v5959_v17 = vrot.slane %v5957_v62, 4  ;;  %v5970_v9 = vshrl.u32 %v22486_v20, 16 }
 0x2a1   : > { %v5976_v60 = vshll.u32 %v22494_v39, 16  ;;  %v5981_v55 = vshrl.u32 %v22484_v51, 16  ;;  %v5950_v0 = vrot.slane %v5949_v46, 4  ;;  %v5962_v47 = vrot.slane %v5960_v29, 5  ;;  %v22527_v33 = vld [vmem:[#allocation2 + $0x74] sm:$0x1] }
 0x2a2   : > { %v5968_v40 = vrot.slane %v5966_v12, 5  ;;  %v5984_v10 = vshll.u32 %v22484_v51, 16  ;;  %v5972_v11 = vrot.slane %v5970_v9, 4  ;;  %v5990_v57 = vshll.u32 %v22508_v45, 16  ;;  %v22533_v46 = vld [vmem:[#allocation2 + $0x78] sm:$0xf] }
 0x2a3   : > { %v5978_v56 = vrot.slane %v5976_v60, 5  ;;  %v5983_v35 = vrot.slane %v5981_v55, 4  ;;  %v5955_v48 = vsel %vm20078_vm4, %v5950_v0, %v5954_v14  ;;  %v5963_v8 = vor.u32 %v5962_v47, %v5959_v17  ;;  %v22538_v60 = vld [vmem:[#allocation2 + $0x7c] sm:$0xf] }
 0x2a4   : > { %v5986_v41 = vrot.slane %v5984_v10, 5  ;;  %v5994_v19 = vshrl.u32 %v22508_v45, 16  ;;  %v16579_v15 = vcombine.low %v5945_v61, %v5955_v48  ;;  %v5973_v6 = vor.u32 %v5972_v11, %v5968_v40 }
 0x2a5   : > { %v5992_v38 = vrot.slane %v5990_v57, 5  ;;  %v6000_v3 = vshll.u32 %v22512_v25, 16  ;;  %v5964_v50 = vrot.slane %v5963_v8, 4  ;;  %v6005_v30 = vshrl.u32 %v22516_v37, 16 }
 0x2a6   : > { %v5987_v16 = vor.u32 %v5986_v41, %v5983_v35  ;;  %v5996_v23 = vrot.slane %v5994_v19, 4  ;;  %18142 = vmatprep.mubr.msk.bf16.mxu1 %vm6222_vm11, %v16579_v15  ;;  %v5974_v49 = vrot.slane %v5973_v6, 4  ;;  %v6008_v7 = vshll.u32 %v22516_v37, 16  ;;  %v22543_v35 = vld [vmem:[#allocation2 + $0x80] sm:$0x1] }
 0x2a7   : > { %v6002_v53 = vrot.slane %v6000_v3, 5  ;;  %v6014_v43 = vshll.u32 %v22519_v24, 16  ;;  %v5969_v27 = vsel %vm20078_vm4, %v5964_v50, %v5968_v40  ;;  %v6007_v61 = vrot.slane %v6005_v30, 4  ;;  %v22552_v15 = vld [vmem:[#allocation2 + $0x84] sm:$0xf] }
 0x2a8   : > { %v5988_v14 = vrot.slane %v5987_v16, 4  ;;  %v5997_v62 = vor.u32 %v5996_v23, %v5992_v38  ;;  %v5979_v29 = vsel %vm20078_vm4, %v5974_v49, %v5978_v56  ;;  %v6010_v12 = vrot.slane %v6008_v7, 5  ;;  %v22554_v16 = vld [vmem:[#allocation2 + $0x88] sm:$0xf] }
 0x2a9   : > { %v6016_v17 = vrot.slane %v6014_v43, 5  ;;  %v6018_v9 = vshrl.u32 %v22519_v24, 16  ;;  %v16580_v55 = vcombine.low %v5969_v27, %v5979_v29  ;;  %v6024_v40 = vshll.u32 %v22527_v33, 16  ;;  %v22557_v43 = vld [vmem:[#allocation2 + $0x8c] sm:$0x1] }
 0x2aa   : > { %v5993_v0 = vsel %vm20078_vm4, %v5988_v14, %v5992_v38  ;;  %v5998_v47 = vrot.slane %v5997_v62, 4  ;;  %v6011_v10 = vor.u32 %v6010_v12, %v6007_v61  ;;  %v6029_v57 = vshrl.u32 %v22533_v46, 16  ;;  %v22566_v29 = vld [vmem:[#allocation2 + $0x94] sm:$0xf] }
 0x2ab   : > { %v6020_v11 = vrot.slane %v6018_v9, 4  ;;  %v6032_v56 = vshll.u32 %v22533_v46, 16  ;;  %18143 = vmatmul.mubr.msk.bf16.gmra.mrb[44].mxu1 %vm6222_vm11, %v16580_v55  ;;  %v6026_v8 = vrot.slane %v6024_v40, 5  ;;  %v6038_v41 = vshll.u32 %v22538_v60, 16 }
 0x2ac   : > { %v6003_v48 = vsel %vm20078_vm4, %v5998_v47, %v6002_v53  ;;  %v6042_v19 = vshrl.u32 %v22538_v60, 16  ;;  %v6012_v38 = vrot.slane %v6011_v10, 4  ;;  %v6031_v50 = vrot.slane %v6029_v57, 4  ;;  %v22559_v53 = vld [vmem:[#allocation2 + $0x90] sm:$0xf] }
 0x2ad   : > { %v16581_v6 = vcombine.low %v5993_v0, %v6003_v48  ;;  %v6021_v3 = vor.u32 %v6020_v11, %v6016_v17  ;;  %v6034_v23 = vrot.slane %v6032_v56, 5  ;;  %v6040_v30 = vrot.slane %v6038_v41, 5 }
 0x2ae   : > { %v6044_v49 = vrot.slane %v6042_v19, 4  ;;  %v6048_v7 = vshll.u32 %v22543_v35, 16  ;;  %v6017_v27 = vsel %vm20078_vm4, %v6012_v38, %v6016_v17  ;;  %v6053_v62 = vshrl.u32 %v22552_v15, 16  ;;  %v22573_v38 = vld [vmem:[#allocation2 + $0x98] sm:$0x1] }
 0x2af   : > { %18146 = vmatprep.mubr.msk.bf16.mxu1 %vm6222_vm11, %v16581_v6  ;;  %v6022_v14 = vrot.slane %v6021_v3, 4  ;;  %v6056_v61 = vshll.u32 %v22552_v15, 16  ;;  %v6035_v12 = vor.u32 %v6034_v23, %v6031_v50  ;;  %v6062_v0 = vshll.u32 %v22554_v16, 16 }
 0x2b0   : > { %v6045_v9 = vor.u32 %v6044_v49, %v6040_v30  ;;  %v6050_v55 = vrot.slane %v6048_v7, 5  ;;  %v6055_v40 = vrot.slane %v6053_v62, 4  ;;  %v6066_v11 = vshrl.u32 %v22554_v16, 16  ;;  %v22583_v7 = vld [vmem:[#allocation2 + $0x9c] sm:$0xf] }
 0x2b1   : > { %v6027_v47 = vsel %vm20078_vm4, %v6022_v14, %v6026_v8  ;;  %v6058_v10 = vrot.slane %v6056_v61, 5  ;;  %v6036_v57 = vrot.slane %v6035_v12, 4  ;;  %v6064_v48 = vrot.slane %v6062_v0, 5  ;;  %v22585_v61 = vld [vmem:[#allocation2 + $0xa0] sm:$0xf] }
 0x2b2   : > { %v16582_v17 = vcombine.low %v6017_v27, %v6027_v47  ;;  %v6046_v56 = vrot.slane %v6045_v9, 4  ;;  %v6068_v19 = vrot.slane %v6066_v11, 4  ;;  %v6072_v6 = vshll.u32 %v22557_v43, 16  ;;  %v22591_v11 = vld [vmem:[#allocation2 + $0xa8] sm:$0xf] }
 0x2b3   : > { %v6059_v41 = vor.u32 %v6058_v10, %v6055_v40  ;;  %v6077_v3 = vshrl.u32 %v22559_v53, 16  ;;  %v6041_v8 = vsel %vm20078_vm4, %v6036_v57, %v6040_v30  ;;  %v6080_v23 = vshll.u32 %v22559_v53, 16 }
 0x2b4   : > { %18147 = vmatmul.mubr.msk.bf16.gmra.mrb[48].mxu1 %vm6222_vm11, %v16582_v17  ;;  %v6051_v50 = vsel %vm20078_vm4, %v6046_v56, %v6050_v55  ;;  %v6086_v49 = vshll.u32 %v22566_v29, 16  ;;  %v6069_v62 = vor.u32 %v6068_v19, %v6064_v48  ;;  %v6090_v47 = vshrl.u32 %v22566_v29, 16  ;;  %v22593_v56 = vld [vmem:[#allocation2 + $0xa4] sm:$0x1] }
 0x2b5   : > { %v16583_v27 = vcombine.low %v6041_v8, %v6051_v50  ;;  %v6060_v14 = vrot.slane %v6059_v41, 4  ;;  %v6079_v12 = vrot.slane %v6077_v3, 4  ;;  %v6082_v9 = vrot.slane %v6080_v23, 5 }
 0x2b6   : > { %v6088_v0 = vrot.slane %v6086_v49, 5  ;;  %v6070_v30 = vrot.slane %v6069_v62, 4  ;;  %v6074_v55 = vrot.slane %v6072_v6, 5  ;;  %v6096_v40 = vshll.u32 %v22573_v38, 16 }
 0x2b7   : > { %18150 = vmatprep.mubr.msk.bf16.mxu1 %vm6222_vm11, %v16583_v27  ;;  %v6101_v10 = vshrl.u32 %v22583_v7, 16  ;;  %v6083_v17 = vor.u32 %v6082_v9, %v6079_v12  ;;  %v6092_v57 = vrot.slane %v6090_v47, 4  ;;  %v6104_v41 = vshll.u32 %v22583_v7, 16  ;;  %v22602_v12 = vld [vmem:[#allocation2 + $0xac] sm:$0xf] }
 0x2b8   : > { %v6110_v19 = vshll.u32 %v22585_v61, 16  ;;  %v6065_v3 = vsel %vm20078_vm4, %v6060_v14, %v6064_v48  ;;  %v6075_v6 = vsel %vm20078_vm4, %v6070_v30, %v6074_v55  ;;  %v6114_v50 = vshrl.u32 %v22585_v61, 16 }
 0x2b9   : > { %v6103_v8 = vrot.slane %v6101_v10, 4  ;;  %v16584_v23 = vcombine.low %v6065_v3, %v6075_v6  ;;  %v6084_v49 = vrot.slane %v6083_v17, 4  ;;  %v6093_v27 = vor.u32 %v6092_v57, %v6088_v0  ;;  %v22610_v57 = vld [vmem:[#allocation2 + $0xb0] sm:$0x1]  ;;  %v22613_v3 = vld [vmem:[#allocation2 + $0xb4] sm:$0xf] }
 0x2ba   : > { %v6106_v62 = vrot.slane %v6104_v41, 5  ;;  %v6112_v9 = vrot.slane %v6110_v19, 5  ;;  %v6116_v47 = vrot.slane %v6114_v50, 4  ;;  %v6120_v1 = vshll.u32 %v22593_v56, 16 }
 0x2bb   : > { %v6125_v26 = vshrl.u32 %v22591_v11, 16  ;;  %v6094_v48 = vrot.slane %v6093_v27, 4  ;;  %v6098_v14 = vrot.slane %v6096_v40, 5  ;;  %v6128_v55 = vshll.u32 %v22591_v11, 16 }
 0x2bc   : > { %18151 = vmatmul.mubr.msk.bf16.gmra.mrb[52].mxu1 %vm6222_vm11, %v16584_v23  ;;  %v6107_v30 = vor.u32 %v6106_v62, %v6103_v8  ;;  %v6089_v10 = vsel %vm20078_vm4, %v6084_v49, %v6088_v0  ;;  %v6117_v17 = vor.u32 %v6116_v47, %v6112_v9  ;;  %v6134_v19 = vshll.u32 %v22602_v12, 16  ;;  %v22618_v8 = vld [vmem:[#allocation2 + $0xb8] sm:$0xf] }
 0x2bd   : > { %v6127_v41 = vrot.slane %v6125_v26, 4  ;;  %v6099_v6 = vsel %vm20078_vm4, %v6094_v48, %v6098_v14  ;;  %v6130_v23 = vrot.slane %v6128_v55, 5  ;;  %v6138_v40 = vshrl.u32 %v22602_v12, 16 }
 0x2be   : > { %v6108_v50 = vrot.slane %v6107_v30, 4  ;;  %v16585_v27 = vcombine.low %v6089_v10, %v6099_v6  ;;  %v6118_v62 = vrot.slane %v6117_v17, 4  ;;  %v6122_v0 = vrot.slane %v6120_v1, 5 }
 0x2bf   : > { %v6136_v49 = vrot.slane %v6134_v19, 5  ;;  %v6131_v47 = vor.u32 %v6130_v23, %v6127_v41  ;;  %v6140_v52 = vrot.slane %v6138_v40, 4  ;;  %v6144_v26 = vshll.u32 %v22610_v57, 16  ;;  %v22629_v41 = vld [vmem:[#allocation2 + $0xbc] sm:$0x1] }
 0x2c0   : > { %v6149_v44 = vshrl.u32 %v22613_v3, 16  ;;  %18154 = vmatprep.mubr.msk.bf16.mxu1 %vm6222_vm11, %v16585_v27  ;;  %v6113_v48 = vsel %vm20078_vm4, %v6108_v50, %v6112_v9  ;;  %v6123_v14 = vsel %vm20078_vm4, %v6118_v62, %v6122_v0  ;;  %v6152_v30 = vshll.u32 %v22613_v3, 16 }
 0x2c1   : > { %v6158_v55 = vshll.u32 %v22618_v8, 16  ;;  %v16586_v1 = vcombine.low %v6113_v48, %v6123_v14  ;;  %v6132_v10 = vrot.slane %v6131_v47, 4  ;;  %v6141_v17 = vor.u32 %v6140_v52, %v6136_v49 }
 0x2c2   : > { %v6151_v19 = vrot.slane %v6149_v44, 4  ;;  %v6154_v6 = vrot.slane %v6152_v30, 5  ;;  %v6162_v40 = vshrl.u32 %v22618_v8, 16  ;;  %v6146_v50 = vrot.slane %v6144_v26, 5 }
 0x2c3   : > { %v6160_v23 = vrot.slane %v6158_v55, 5  ;;  %v6142_v9 = vrot.slane %v6141_v17, 4  ;;  %v6168_v0 = vshll.u32 %v22629_v41, 16  ;;  %v6137_v48 = vsel %vm20078_vm4, %v6132_v10, %v6136_v49 }
 0x2c4   : > { %18155 = vmatmul.mubr.msk.bf16.gmra.mrb[56].mxu1 %vm6222_vm11, %v16586_v1  ;;  %v6155_v27 = vor.u32 %v6154_v6, %v6151_v19  ;;  %v6164_v62 = vrot.slane %v6162_v40, 4  ;;  %v16611_v30 = vcombine.low %v22460_v4, %v22469_v28  ;;  %v22668_v40 = vld [vmem:[#allocation2 + $0x10] sm:$0xf]  ;;  %v6738_v6 = vld [vmem:[#allocation2 + $0x78] sm:$0xe]  ;;  %v6872_v26 = vrot.slane %v22593_v56, 5 }
 0x2c5   : > { %v6147_v52 = vsel %vm20078_vm4, %v6142_v9, %v6146_v50  ;;  %v6170_v10 = vrot.slane %v6168_v0, 5  ;;  %v19936_v0 = vld [vmem:[#allocation2] sm:$0xf]  ;;  %v19938_v9 = vld [vmem:[#allocation2 + $0xc] sm:$0xf]  ;;  %v16647_v1 = vrot.slane %v6738_v6, 9 }
 0x2c6   : > { %v16587_v47 = vcombine.low %v6137_v48, %v6147_v52  ;;  %v6156_v44 = vrot.slane %v6155_v27, 4  ;;  %v6165_v14 = vor.u32 %v6164_v62, %v6160_v23  ;;  %v22663_v48 = vld [vmem:[#allocation2 + $0x4] sm:$0xf]  ;;  %v16606_v50 = vcombine.low %v19938_v9, %v22668_v40  ;;  %v6736_v9 = vld [vmem:[#allocation2 + $0x60] sm:$0xe] }
 0x2c7   : > { %v16605_v52 = vcombine.low %v19936_v0, %v22663_v48  ;;  %v6827_v0 = vrot.slane %v22486_v20, 5  ;;  %v6739_v19 = vld [vmem:[#allocation2 + $0x84] sm:$0xe]  ;;  %v6879_v55 = vrot.slane %v22610_v57, 5 }
 0x2c8   : > { %18158 = vmatprep.mubr.msk.bf16.mxu1 %vm6222_vm11, %v16587_v47  ;;  %v6166_v49 = vrot.slane %v6165_v14, 4  ;;  %v6161_v27 = vsel %vm20078_vm4, %v6156_v44, %v6160_v23  ;;  %v6734_v14 = vld [vmem:[#allocation2 + $0x48] sm:$0xe]  ;;  %v6987_v23 = vsel %vm6271_vm10, %v22348_v2, 0  ;;  %v6735_v44 = vld [vmem:[#allocation2 + $0x54] sm:$0xe]  ;;  %v16608_v2 = vcombine.low %v22385_v58, %v22400_v18 }
 0x2ca   : > { %v6171_v62 = vsel %vm20078_vm4, %v6166_v49, %v6170_v10  ;;  %v16607_v49 = vcombine.low %v22320_v42, %v22322_v21  ;;  %v22678_v10 = vld [vmem:[%s26226_s3 + $0xc] sm:$0xf]  ;;  %v6823_v21 = vrot.slane %v22473_v22, 5 }
 0x2cb   : > { %v16588_v47 = vcombine.low %v6161_v27, %v6171_v62  ;;  %v6820_v27 = vrot.slane %v22469_v28, 5  ;;  %v16643_v62 = vrot.slane %v6734_v14, 9  ;;  %v6829_v14 = vrot.slane %v6827_v0, 4 }
 0x2cd   : > { %18159 = vmatmul.mubr.msk.bf16.gmra.mrb[60].mxu1 %vm6222_vm11, %v16588_v47  ;;  %v6822_v42 = vrot.slane %v6820_v27, 4  ;;  %v16609_v47 = vcombine.low %v22410_v31, %v22420_v5  ;;  %v16645_v31 = vrot.slane %v6736_v9, 9  ;;  %v6844_v9 = vrot.slane %v22527_v33, 5 }
 0x2ce   : > { %18164 = vmatprep.mubr.msk.bf16.mxu1 %vm6222_vm11, %v16605_v52  ;;  %v16644_v52 = vrot.slane %v6735_v44, 9  ;;  %v6834_v44 = vrot.slane %v22508_v45, 5  ;;  %v6855_v33 = vrot.slane %v22554_v16, 5 }
 0x2cf   : > { %v22698_v58 = vsel %vm20304_vm7, %v6822_v42, %v6823_v21  ;;  %v6841_v42 = vrot.slane %v22519_v24, 5  ;;  %v6741_v21 = vld [vmem:[#allocation2 + $0x9c] sm:$0xe] }
 0x2d0   : > { %v22702_v22 = vsel %vm20304_vm7, %v16644_v52, %v6827_v0  ;;  %v6836_v0 = vrot.slane %v6834_v44, 4  ;;  %v22718_v17 = vsel %vm20304_vm7, %v16645_v31, %v6834_v44 }
 0x2d5   : > { %18165 = vmatmul.mubr.msk.bf16.vlgmr.msra.gmra.mrb[32].mxu1 %vm6222_vm11, %v16606_v50  ;;  %v22693_v50 = vsel %vm20304_vm7, %v16643_v62, %v6820_v27  ;;  %v6843_v27 = vrot.slane %v6841_v42, 4 }
 0x2d6   : > { %18197 = vmatpush3.bf16.msra.mxu1 %v6987_v23  ;;  %18168 = vmatprep.mubr.msk.bf16.mxu1 %vm6222_vm11, %v16607_v49  ;;  %v6830_v23 = vrot.slane %v22494_v39, 5  ;;  %v6737_v49 = vld [vmem:[#allocation2 + $0x6c] sm:$0xe]  ;;  %v6837_v39 = vrot.slane %v22512_v25, 5 }
 0x2d7   : > { %19523 = vmatprep.subr.msk.bf16.mxu1 %vm6271_vm10, %v22678_v10  ;;  %v16646_v52 = vrot.slane %v6737_v49, 9  ;;  %v6851_v49 = vrot.slane %v22543_v35, 5  ;;  %v22736_v6 = vsel %vm20304_vm7, %v6843_v27, %v6844_v9 }
 0x2d8   : > { %v22709_v62 = vsel %vm20304_vm7, %v6829_v14, %v6830_v23  ;;  %v6848_v14 = vrot.slane %v22538_v60, 5  ;;  %v22723_v25 = vsel %vm20304_vm7, %v6836_v0, %v6837_v39  ;;  %v16648_v39 = vrot.slane %v6739_v19, 9  ;;  %v6740_v0 = vld [vmem:[#allocation2 + $0x90] sm:$0xe] }
 0x2d9   : > { %v22727_v23 = vsel %vm20304_vm7, %v16646_v52, %v6841_v42  ;;  %v16610_v42 = vcombine.low %v22429_v54, %v22436_v63  ;;  %v6857_v52 = vrot.slane %v6855_v33, 4  ;;  %v6862_v54 = vrot.slane %v22566_v29, 5 }
 0x2da   : > { %v6850_v44 = vrot.slane %v6848_v14, 4  ;;  %v22746_v31 = vsel %vm20304_vm7, %v16647_v1, %v6848_v14  ;;  %v16649_v9 = vrot.slane %v6740_v0, 9  ;;  %v6869_v1 = vrot.slane %v22585_v61, 5  ;;  %v6742_v14 = vld [vmem:[#allocation2 + $0xa8] sm:$0xe] }
 0x2db   : > { %v6743_v0 = vld [vmem:[#allocation2 + $0xb4] sm:$0xe] }
 0x2dc   : > { %v22750_v19 = vsel %vm20304_vm7, %v6850_v44, %v6851_v49  ;;  %v6864_v44 = vrot.slane %v6862_v54, 4  ;;  %v22769_v35 = vsel %vm20304_vm7, %v16649_v9, %v6862_v54  ;;  %v6871_v27 = vrot.slane %v6869_v1, 4  ;;  %v23057_v54 = vld [vmem:[#allocation2 + $0xac] sm:$0xf] }
 0x2dd   : > { %18169 = vmatmul.mubr.msk.bf16.gmra.mrb[36].mxu1 %vm6222_vm11, %v16608_v2  ;;  %v6858_v2 = vrot.slane %v22557_v43, 5 }
 0x2de   : > { %18172 = vmatprep.mubr.msk.bf16.mxu1 %vm6222_vm11, %v16609_v47  ;;  %v22754_v47 = vsel %vm20304_vm7, %v16648_v39, %v6855_v33  ;;  %v6865_v33 = vrot.slane %v22573_v38, 5  ;;  %v16650_v39 = vrot.slane %v6741_v21, 9  ;;  %v16651_v38 = vrot.slane %v6742_v14, 9 }
 0x2df   : > { %v22761_v43 = vsel %vm20304_vm7, %v6857_v52, %v6858_v2  ;;  %v6876_v52 = vrot.slane %v22602_v12, 5  ;;  %v6883_v21 = vrot.slane %v22618_v8, 5  ;;  %v22786_v56 = vsel %vm20304_vm7, %v6871_v27, %v6872_v26 }
 0x2e0   : > { %v22775_v2 = vsel %vm20304_vm7, %v6864_v44, %v6865_v33  ;;  %v22779_v49 = vsel %vm20304_vm7, %v16650_v39, %v6869_v1  ;;  %v16652_v1 = vrot.slane %v6743_v0, 9  ;;  %v6886_v14 = vrot.slane %v22629_v41, 5  ;;  %v23039_v44 = vld [vmem:[#allocation2 + $0xa0] sm:$0xf] }
 0x2e1   : > { %v6878_v9 = vrot.slane %v6876_v52, 4  ;;  %v6885_v33 = vrot.slane %v6883_v21, 4  ;;  %v22799_v26 = vsel %vm20304_vm7, %v16651_v38, %v6876_v52  ;;  %v26488_v41 = vcombine.low %v22477_v59, %v22486_v20  ;;  %v19940_v52 = vld [vmem:[#allocation2 + $0x8] sm:$0x1] }
 0x2e2   : > { %v22809_v27 = vsel %vm20304_vm7, %v16652_v1, %v6883_v21  ;;  %v26491_v39 = vcombine.low %v22533_v46, %v22538_v60  ;;  %v26492_v59 = vcombine.low %v22552_v15, %v22554_v16  ;;  %v6778_v20 = vrot.slane %v22663_v48, 5  ;;  %v6730_v1 = vld [vmem:[#allocation2 + $0x18] sm:$0xe] }
 0x2e3   : > { %v22803_v57 = vsel %vm20304_vm7, %v6878_v9, %v6879_v55  ;;  %v22813_v4 = vsel %vm20304_vm7, %v6885_v33, %v6886_v14  ;;  %v26490_v55 = vcombine.low %v22516_v37, %v22519_v24  ;;  %v6781_v0 = vrot.slane %v19940_v52, 5  ;;  %v19943_v33 = vld [vmem:[#allocation2 + $0x20] sm:$0x1] }
 0x2e4   : > { %v6780_v24 = vrot.slane %v6778_v20, 4  ;;  %v26494_v46 = vcombine.low %v22583_v7, %v22585_v61  ;;  %v26495_v60 = vcombine.low %v22591_v11, %v22602_v12  ;;  %v26496_v7 = vcombine.low %v22613_v3, %v22618_v8  ;;  %v6729_v61 = vld [vmem:[#allocation2 + $0xc] sm:$0xe]  ;;  %v19942_v12 = vld [vmem:[#allocation2 + $0x14] sm:$0x1] }
 0x2e5   : > { %18173 = vmatmul.mubr.msk.bf16.gmra.mrb[40].mxu1 %vm6222_vm11, %v16610_v42  ;;  %v6788_v9 = vrot.slane %v19942_v12, 5  ;;  %v6795_v14 = vrot.slane %v19943_v33, 5  ;;  %v6806_v8 = vrot.slane %v22420_v5, 5  ;;  %v6731_v5 = vld [vmem:[#allocation2 + $0x24] sm:$0xe]  ;;  %v6802_v52 = vrot.slane %v22408_v34, 5 }
 0x2e6   : > { %18176 = vmatprep.mubr.msk.bf16.mxu1 %vm6222_vm11, %v16611_v30  ;;  %v26489_v30 = vcombine.low %v22484_v51, %v22508_v45  ;;  %v26493_v51 = vcombine.low %v22559_v53, %v22566_v29  ;;  %v6728_v45 = vld [vmem:[#allocation2] sm:$0xe]  ;;  %v6782_v16 = vsel %vm20304_vm7, %v6780_v24, %v6781_v0  ;;  %v6785_v53 = vrot.slane %v22668_v40, 5  ;;  %v19941_v29 = vld [vmem:[#allocation2 + $0x1c] sm:$0xf] }
 0x2e7   : > { %v16637_v37 = vrot.slane %v6728_v45, 9  ;;  %v6792_v48 = vrot.slane %v19941_v29, 5  ;;  %v6808_v24 = vrot.slane %v6806_v8, 4  ;;  %v6809_v0 = vrot.slane %v22426_v36, 5  ;;  %v22904_v33 = vld [vmem:[#allocation2 + $0x28] sm:$0xf] }
 0x2e8   : > { %v6787_v21 = vrot.slane %v6785_v53, 4  ;;  %v8277_v42 = vld [vmem:[#allocation2 + $0x90] sm:$0xe] }
 0x2e9   : > { %v6779_v15 = vsel %vm20304_vm7, %v16637_v37, %v6778_v20  ;;  %v6794_v11 = vrot.slane %v6792_v48, 4 }
 0x2ea   : > { %v16654_v38 = vcombine.low %v6779_v15, %v6782_v16  ;;  %v6789_v40 = vsel %vm20304_vm7, %v6787_v21, %v6788_v9  ;;  %v6813_v15 = vrot.slane %v22436_v63, 5  ;;  %v6733_v21 = vld [vmem:[#allocation2 + $0x3c] sm:$0xe] }
 0x2eb   : > { %v6796_v3 = vsel %vm20304_vm7, %v6794_v11, %v6795_v14  ;;  %v8268_v14 = vld [vmem:[#allocation2 + $0x24] sm:$0xe] }
 0x2ed   : > { %18177 = vmatmul.mubr.msk.bf16.gmra.mrb[44].mxu1 %vm6222_vm11, %v26488_v41  ;;  %v16638_v41 = vrot.slane %v6729_v61, 9  ;;  %v16642_v61 = vrot.slane %v6733_v21, 9 }
 0x2ee   : > { %18180 = vmatprep.mubr.msk.bf16.mxu1 %vm6222_vm11, %v26489_v30  ;;  %v6799_v30 = vrot.slane %v22400_v18, 5  ;;  %v22875_v18 = vld [vmem:[%s26226_s3 + $0x10] sm:$0xf] }
 0x2ef   : > { %v6814_v12 = vsel %vm20304_vm7, %v16642_v61, %v6813_v15 }
 0x2f0   : > { %v6801_v37 = vrot.slane %v6799_v30, 4 }
 0x2f5   : > { %18181 = vmatmul.mubr.msk.bf16.gmra.mrb[48].mxu1 %vm6222_vm11, %v26490_v55  ;;  %v16639_v55 = vrot.slane %v6730_v1, 9  ;;  %v26498_v1 = vcombine.low %v22693_v50, %v22698_v58  ;;  %v26500_v50 = vcombine.low %v22718_v17, %v22723_v25  ;;  %v22921_v58 = vld [vmem:[#allocation2 + $0x40] sm:$0xf] }
 0x2f6   : > { %18184 = vmatprep.mubr.msk.bf16.mxu1 %vm6222_vm11, %v26491_v39  ;;  %v6786_v39 = vsel %vm20304_vm7, %v16638_v41, %v6785_v53  ;;  %v6810_v53 = vsel %vm20304_vm7, %v6808_v24, %v6809_v0  ;;  %v22906_v41 = vld [vmem:[#allocation2 + $0x2c] sm:$0x1]  ;;  %v22935_v24 = vld [vmem:[#allocation2 + $0x58] sm:$0xf] }
 0x2f7   : > { %v6793_v20 = vsel %vm20304_vm7, %v16639_v55, %v6792_v48  ;;  %v22914_v55 = vld [vmem:[#allocation2 + $0x38] sm:$0x1] }
 0x2f8   : > { %v16656_v45 = vcombine.low %v6793_v20, %v6796_v3  ;;  %v8346_v3 = vrot.slane %v22904_v33, 5  ;;  %v22925_v20 = vld [vmem:[#allocation2 + $0x4c] sm:$0xf] }
 0x2fd   : > { %18185 = vmatmul.mubr.msk.bf16.gmra.mrb[52].mxu1 %vm6222_vm11, %v26492_v59  ;;  %v16655_v59 = vcombine.low %v6786_v39, %v6789_v40  ;;  %v22908_v40 = vld [vmem:[#allocation2 + $0x34] sm:$0xf]  ;;  %v16754_v39 = vrot.slane %v8268_v14, 9  ;;  %v8273_v14 = vld [vmem:[#allocation2 + $0x60] sm:$0xe] }
 0x2fe   : > { %18188 = vmatprep.mubr.msk.bf16.mxu1 %vm6222_vm11, %v26493_v51  ;;  %v7345_v51 = vsel %vm6271_vm10, %v22678_v10, 0  ;;  %v6732_v10 = vld [vmem:[#allocation2 + $0x30] sm:$0xe]  ;;  %v8353_v25 = vrot.slane %v22908_v40, 5 }
 0x2ff   : > { %v16641_v16 = vrot.slane %v6732_v10, 9  ;;  %v8356_v10 = vrot.slane %v22914_v55, 5 }
 0x301   : > { %v6807_v36 = vsel %vm20304_vm7, %v16641_v16, %v6806_v8  ;;  %v8269_v8 = vld [vmem:[#allocation2 + $0x30] sm:$0xe]  ;;  %v8355_v16 = vrot.slane %v8353_v25, 4 }
 0x302   : > { %v16658_v48 = vcombine.low %v6807_v36, %v6810_v53  ;;  %v16755_v17 = vrot.slane %v8269_v8, 9  ;;  %v22949_v36 = vld [vmem:[#allocation2 + $0x5c] sm:$0x1] }
 0x304   : > { %v22957_v21 = vsel %vm20304_vm7, %v16755_v17, %v8353_v25 }
 0x305   : > { %18189 = vmatmul.mubr.msk.bf16.gmra.mrb[56].mxu1 %vm6222_vm11, %v26494_v46  ;;  %v16640_v46 = vrot.slane %v6731_v5, 9  ;;  %v8271_v5 = vld [vmem:[#allocation2 + $0x48] sm:$0xe]  ;;  %26503 = vst [vmem:[#allocation7_spill] sm:$0xff] %v22957_v21  ;;  %v19616_v21 = vld [vmem:[#allocation2 + $0x60] sm:$0xff]  }
 0x306   : > { %18192 = vmatprep.mubr.msk.bf16.mxu1 %vm6222_vm11, %v26495_v60  ;;  %v6803_v60 = vsel %vm20304_vm7, %v6801_v37, %v6802_v52  ;;  %v22932_v37 = vsel %vm20304_vm7, %v16754_v39, %v8346_v3  ;;  %v16757_v61 = vrot.slane %v8271_v5, 9 }
 0x307   : > { %v6800_v29 = vsel %vm20304_vm7, %v16640_v46, %v6799_v30  ;;  %v26499_v30 = vcombine.low %v22702_v22, %v22709_v62  ;;  %v8348_v22 = vrot.slane %v8346_v3, 4  ;;  %v8349_v62 = vrot.slane %v22906_v41, 5  ;;  %26501 = vst [vmem:[#allocation16_spill] sm:$0xff] %v22932_v37  ;;  %v22973_v3 = vld [vmem:[#allocation2 + $0x74] sm:$0x1] }
 0x308   : > { %v16657_v34 = vcombine.low %v6800_v29, %v6803_v60  ;;  %v8360_v46 = vrot.slane %v22921_v58, 5  ;;  %v22943_v60 = vld [vmem:[#allocation2 + $0x64] sm:$0xf]  ;;  %v8367_v29 = vrot.slane %v22925_v20, 5 }
 0x309   : > { %v22939_v52 = vsel %vm20304_vm7, %v8348_v22, %v8349_v62  ;;  %v8274_v22 = vld [vmem:[#allocation2 + $0x6c] sm:$0xe]  ;;  %v22991_v62 = vld [vmem:[#allocation2 + $0x80] sm:$0x1] }
 0x30a   : > { %26502 = vst [vmem:[#allocation19_spill] sm:$0xff] %v22939_v52  ;;  %v22983_v39 = vsel %vm20304_vm7, %v16757_v61, %v8367_v29  ;;  %v16760_v61 = vrot.slane %v8274_v22, 9  ;;  %v7656_v52 = vshll.u32 %v22906_v41, 16 }
 0x30b   : > { %26508 = vst [vmem:[#allocation5_spill] sm:$0xff] %v22983_v39  ;;  %v7646_v39 = vshll.u32 %v22904_v33, 16 }
 0x30d   : > { %18193 = vmatmul.mubr.msk.bf16.gmra.mrb[60].mxu1 %vm6222_vm11, %v26496_v7  ;;  %v26497_v7 = vld [vmem:[#allocation15_spill] sm:$0xff] }
 0x30e   : > { %18198 = vmatprep.mubr.msk.bf16.mxu1 %vm6222_vm11, %v16654_v38  ;;  %v6815_v38 = vrot.slane %v6813_v15, 4  ;;  %v6816_v63 = vrot.slane %v26497_v7, 5  ;;  %v8398_v15 = vrot.slane %v22991_v62, 5 }
 0x310   : > { %v6817_v11 = vsel %vm20304_vm7, %v6815_v38, %v6816_v63  ;;  %v22953_v38 = vld [vmem:[#allocation2 + $0x70] sm:$0xf]  ;;  %v8362_v63 = vrot.slane %v8360_v46, 4 }
 0x311   : > { %v16659_v9 = vcombine.low %v6814_v12, %v6817_v11  ;;  %v22965_v11 = vsel %vm20304_vm7, %v8355_v16, %v8356_v10  ;;  %v8369_v12 = vrot.slane %v8367_v29, 4  ;;  %v8377_v10 = vrot.slane %v22949_v36, 5  ;;  %v23009_v29 = vld [vmem:[#allocation2 + $0x8c] sm:$0x1] }
 0x312   : > { %26505 = vst [vmem:[#allocation17_spill] sm:$0xff] %v22965_v11  ;;  %v8381_v16 = vrot.slane %v22943_v60, 5 }
 0x315   : > { %18199 = vmatmul.mubr.msk.bf16.vlgmr.msra.gmra.mrb[32].mxu1 %vm6222_vm11, %v16655_v59  ;;  %v8270_v59 = vld [vmem:[#allocation2 + $0x3c] sm:$0xe] }
 0x316   : > { %18231 = vmatpush3.bf16.msra.mxu1 %v7345_v51  ;;  %18202 = vmatprep.mubr.msk.bf16.mxu1 %vm6222_vm11, %v16656_v45  ;;  %v22923_v51 = vld [vmem:[#allocation2 + $0x44] sm:$0x1]  ;;  %v22928_v45 = vld [vmem:[#allocation2 + $0x50] sm:$0x1]  ;;  %v16756_v0 = vrot.slane %v8270_v59, 9 }
 0x317   : > { %19524 = vmatprep.subr.msk.bf16.mxu1 %vm6271_vm10, %v22875_v18  ;;  %v8363_v53 = vrot.slane %v22923_v51, 5 }
 0x318   : > { %v22961_v7 = vsel %vm20304_vm7, %v16756_v0, %v8360_v46  ;;  %v23000_v0 = vld [vmem:[#allocation2 + $0x88] sm:$0xf]  ;;  %v16759_v46 = vrot.slane %v8273_v14, 9  ;;  %v8391_v14 = vrot.slane %v22973_v3, 5 }
 0x319   : > { %26504 = vst [vmem:[#allocation8_spill] sm:$0xff] %v22961_v7  ;;  %v8402_v28 = vrot.slane %v23000_v0, 5 }
 0x31d   : > { %18203 = vmatmul.mubr.msk.bf16.gmra.mrb[36].mxu1 %vm6222_vm11, %v16657_v34  ;;  %v8272_v34 = vld [vmem:[#allocation2 + $0x54] sm:$0xe] }
 0x31e   : > { %18206 = vmatprep.mubr.msk.bf16.mxu1 %vm6222_vm11, %v16658_v48  ;;  %v22951_v48 = vld [vmem:[#allocation2 + $0x68] sm:$0x1]  ;;  %v16758_v59 = vrot.slane %v8272_v34, 9 }
 0x325   : > { %18207 = vmatmul.mubr.msk.bf16.gmra.mrb[40].mxu1 %vm6222_vm11, %v16659_v9  ;;  %v8370_v9 = vrot.slane %v22928_v45, 5 }
 0x326   : > { %18210 = vmatprep.mubr.msk.bf16.mxu1 %vm6222_vm11, %v26498_v1  ;;  %v8374_v1 = vrot.slane %v22935_v24, 5 }
 0x327   : > { %v22997_v25 = vsel %vm20304_vm7, %v8369_v12, %v8370_v9  ;;  %v8388_v12 = vrot.slane %v22953_v38, 5 }
 0x328   : > { %26510 = vst [vmem:[#allocation6_spill] sm:$0xff] %v22997_v25  ;;  %v8376_v5 = vrot.slane %v8374_v1, 4 }
 0x329   : > { %v23031_v22 = vsel %vm20304_vm7, %v16760_v61, %v8388_v12  ;;  %v8278_v61 = vld [vmem:[#allocation2 + $0x9c] sm:$0xe] }
 0x32a   : > { %v23013_v34 = vsel %vm20304_vm7, %v8376_v5, %v8377_v10  ;;  %v23027_v5 = vsel %vm20304_vm7, %v16759_v46, %v8381_v16  ;;  %26514 = vst [vmem:[#allocation15_spill] sm:$0xff] %v23031_v22  ;;  %v8390_v10 = vrot.slane %v8388_v12, 4  ;;  %v26518_v12 = vcombine.low %v22754_v47, %v22761_v43  ;;  %v23070_v47 = vld [vmem:[#allocation2 + $0xb0] sm:$0x1]  ;;  %v23079_v46 = vld [vmem:[#allocation2 + $0xb8] sm:$0xf] }
 0x32b   : > { %26512 = vst [vmem:[#allocation10_spill] sm:$0xff] %v23013_v34  ;;  %26513 = vst [vmem:[#allocation11_spill] sm:$0xff] %v23027_v5  ;;  %v8430_v5 = vrot.slane %v23079_v46, 5 }
 0x32d   : > { %18211 = vmatmul.mubr.msk.bf16.gmra.mrb[44].mxu1 %vm6222_vm11, %v26499_v30  ;;  %v26506_v30 = vcombine.low %v22727_v23, %v22736_v6  ;;  %v26509_v23 = vcombine.low %v22746_v31, %v22750_v19  ;;  %v22989_v6 = vld [vmem:[#allocation2 + $0x7c] sm:$0xf]  ;;  %v23006_v19 = vsel %vm20304_vm7, %v16758_v59, %v8374_v1  ;;  %v8383_v1 = vrot.slane %v8381_v16, 4  ;;  %v8276_v59 = vld [vmem:[#allocation2 + $0x84] sm:$0xe] }
 0x32e   : > { %18214 = vmatprep.mubr.msk.bf16.mxu1 %vm6222_vm11, %v26500_v50  ;;  %v22979_v50 = vsel %vm20304_vm7, %v8362_v63, %v8363_v53  ;;  %26511 = vst [vmem:[#allocation9_spill] sm:$0xff] %v23006_v19  ;;  %v8275_v53 = vld [vmem:[#allocation2 + $0x78] sm:$0xe]  ;;  %v8384_v63 = vrot.slane %v22951_v48, 5  ;;  %v23023_v31 = vld [vmem:[#allocation2 + $0x98] sm:$0x1]  ;;  %v23045_v16 = vsel %vm20304_vm7, %v8390_v10, %v8391_v14 }
 0x32f   : > { %26507 = vst [vmem:[#allocation18_spill] sm:$0xff] %v22979_v50  ;;  %v16761_v9 = vrot.slane %v8275_v53, 9  ;;  %26516 = vst [vmem:[#allocation21_spill] sm:$0xff] %v23045_v16  ;;  %v8416_v16 = vrot.slane %v23039_v44, 5  ;;  %v8432_v34 = vrot.slane %v8430_v5, 4 }
 0x330   : > { %v23035_v17 = vsel %vm20304_vm7, %v8383_v1, %v8384_v63  ;;  %v16762_v63 = vrot.slane %v8276_v59, 9  ;;  %v23055_v1 = vld [vmem:[#allocation2 + $0xa4] sm:$0x1]  ;;  %v26520_v59 = vcombine.low %v22769_v35, %v22775_v2  ;;  %v8412_v2 = vrot.slane %v23023_v31, 5 }
 0x331   : > { %26515 = vst [vmem:[#allocation20_spill] sm:$0xff] %v23035_v17  ;;  %v23101_v17 = vld [vmem:[#allocation2 + $0xc4] sm:$0xf] }
 0x332   : > { %v23076_v10 = vsel %vm20304_vm7, %v16762_v63, %v8402_v28  ;;  %v8423_v63 = vrot.slane %v23057_v54, 5 }
 0x333   : > { %26521 = vst [vmem:[#allocation24_spill] sm:$0xff] %v23076_v10  ;;  %v8426_v10 = vrot.slane %v23070_v47, 5 }
 0x335   : > { %18215 = vmatmul.mubr.msk.bf16.gmra.mrb[48].mxu1 %vm6222_vm11, %v26506_v30  ;;  %v8395_v30 = vrot.slane %v22989_v6, 5 }
 0x336   : > { %18218 = vmatprep.mubr.msk.bf16.mxu1 %vm6222_vm11, %v26509_v23  ;;  %v23021_v23 = vld [vmem:[#allocation2 + $0x94] sm:$0xf] }
 0x337   : > { %v8397_v8 = vrot.slane %v8395_v30, 4  ;;  %v23049_v53 = vsel %vm20304_vm7, %v16761_v9, %v8395_v30  ;;  %v8404_v9 = vrot.slane %v8402_v28, 4  ;;  %v8405_v30 = vrot.slane %v23009_v29, 5 }
 0x338   : > { %26517 = vst [vmem:[#allocation22_spill] sm:$0xff] %v23049_v53  ;;  %v23091_v53 = vld [vmem:[#allocation2 + $0xbc] sm:$0x1] }
 0x339   : > { %v23063_v14 = vsel %vm20304_vm7, %v8397_v8, %v8398_v15  ;;  %v8409_v15 = vrot.slane %v23021_v23, 5  ;;  %v8279_v8 = vld [vmem:[#allocation2 + $0xa8] sm:$0xe]  ;;  %v23083_v35 = vsel %vm20304_vm7, %v8404_v9, %v8405_v30  ;;  %v8418_v30 = vrot.slane %v8416_v16, 4 }
 0x33a   : > { %26519 = vst [vmem:[#allocation23_spill] sm:$0xff] %v23063_v14  ;;  %26522 = vst [vmem:[#allocation25_spill] sm:$0xff] %v23083_v35  ;;  %v8280_v14 = vld [vmem:[#allocation2 + $0xb4] sm:$0xe]  ;;  %v16765_v22 = vrot.slane %v8279_v8, 9  ;;  %v8425_v35 = vrot.slane %v8423_v63, 4 }
 0x33b   : > { %v8411_v28 = vrot.slane %v8409_v15, 4  ;;  %v16766_v8 = vrot.slane %v8280_v14, 9  ;;  %v8437_v14 = vrot.slane %v23101_v17, 5 }
 0x33d   : > { %18219 = vmatmul.mubr.msk.bf16.gmra.mrb[52].mxu1 %vm6222_vm11, %v26518_v12  ;;  %v16763_v12 = vrot.slane %v8277_v42, 9  ;;  %v8419_v42 = vrot.slane %v23055_v1, 5  ;;  %v23105_v43 = vsel %vm20304_vm7, %v8411_v28, %v8412_v2  ;;  %v23125_v28 = vsel %vm20304_vm7, %v8425_v35, %v8426_v10 }
 0x33e   : > { %18222 = vmatprep.mubr.msk.bf16.mxu1 %vm6222_vm11, %v26520_v59  ;;  %v16764_v59 = vrot.slane %v8278_v61, 9  ;;  %26525 = vst [vmem:[#allocation28_spill] sm:$0xff] %v23105_v43  ;;  %26529 = vst [vmem:[#allocation32_spill] sm:$0xff] %v23125_v28  ;;  %v8281_v43 = vld [vmem:[#allocation2 + $0xc0] sm:$0xe]  ;;  %v23141_v10 = vsel %vm20304_vm7, %v16766_v8, %v8430_v5  ;;  %v8071_v8 = vsel %vm6271_vm10, %v22875_v18, 0 }
 0x33f   : > { %v23095_v9 = vsel %vm20304_vm7, %v16763_v12, %v8409_v15  ;;  %v23113_v15 = vsel %vm20304_vm7, %v8418_v30, %v8419_v42  ;;  %v8433_v12 = vrot.slane %v23091_v53, 5  ;;  %v26530_v42 = vcombine.low %v22779_v49, %v22786_v56  ;;  %26532 = vst [vmem:[#allocation33_spill] sm:$0xff] %v23141_v10  ;;  %v19612_v18 = vld [vmem:[#allocation2 + $0x30] sm:$0xff]   ;;  %v7543_v5 = vld [vmem:[#allocation2 + $0x18] sm:$0xf]  ;;  %v19614_v10 = vld [vmem:[#allocation2 + $0x48] sm:$0xff]  }
 0x340   : > { %26523 = vst [vmem:[#allocation26_spill] sm:$0xff] %v23095_v9  ;;  %v23099_v61 = vsel %vm20304_vm7, %v16764_v59, %v8416_v16  ;;  %26526 = vst [vmem:[#allocation29_spill] sm:$0xff] %v23113_v15  ;;  %v23117_v16 = vsel %vm20304_vm7, %v16765_v22, %v8423_v63  ;;  %v23119_v59 = vld [vmem:[#allocation2 + $0xc8] sm:$0x1]  ;;  %v26531_v63 = vcombine.low %v22799_v26, %v22803_v57  ;;  %v16767_v56 = vrot.slane %v8281_v43, 9  ;;  %v19610_v43 = vld [vmem:[#allocation2 + $0x18] sm:$0xff]  }
 0x341   : > { %26524 = vst [vmem:[#allocation27_spill] sm:$0xff] %v23099_v61  ;;  %26527 = vst [vmem:[#allocation30_spill] sm:$0xff] %v23117_v16  ;;  %v23145_v35 = vsel %vm20304_vm7, %v8432_v34, %v8433_v12  ;;  %v8439_v30 = vrot.slane %v8437_v14, 4  ;;  %v19609_v34 = vld [vmem:[#allocation2 + $0xc] sm:$0xff]   ;;  %v26536_v12 = vcombine.low %v22809_v27, %v22813_v4  ;;  %v7613_v2 = vshrl.u32 %v7543_v5, 16 }
 0x342   : > { %26528 = vst [vmem:[#allocation31_spill] sm:$0xff] %v23119_v59  ;;  %26533 = vst [vmem:[#allocation34_spill] sm:$0xff] %v23145_v35  ;;  %v23152_v26 = vsel %vm20304_vm7, %v16767_v56, %v8437_v14  ;;  %v19611_v14 = vld [vmem:[#allocation2 + $0x24] sm:$0xff]   ;;  %v7540_v27 = vld [vmem:[#allocation2 + $0xc] sm:$0xf] }
 0x343   : > { %26534 = vst [vmem:[#allocation35_spill] sm:$0xff] %v23152_v26  ;;  %v23176_v4 = vld [vmem:[#allocation2 + $0x10] sm:$0xf]  ;;  %v7589_v56 = vshrl.u32 %v7540_v27, 16  ;;  %v23186_v35 = vld [vmem:[#allocation2 + $0x14] sm:$0x1] }
 0x344   : > { %26537 = vst [vmem:[#allocation37_spill] sm:$0xff] %v23176_v4  ;;  %26539 = vst [vmem:[#allocation39_spill] sm:$0xff] %v23186_v35  ;;  %v7615_v15 = vrot.slane %v7613_v2, 4 }
 0x345   : > { %18223 = vmatmul.mubr.msk.bf16.gmra.mrb[56].mxu1 %vm6222_vm11, %v26530_v42  ;;  %v8440_v42 = vrot.slane %v23119_v59, 5 }
 0x346   : > { %18226 = vmatprep.mubr.msk.bf16.mxu1 %vm6222_vm11, %v26531_v63  ;;  %v23170_v63 = vld [vmem:[%s26226_s3 + $0x14] sm:$0xf] }
 0x347   : > { %v23156_v57 = vsel %vm20304_vm7, %v8439_v30, %v8440_v42  ;;  %v7592_v30 = vshll.u32 %v7540_v27, 16  ;;  %v7598_v42 = vshll.u32 %v23176_v4, 16 }
 0x348   : > { %26535 = vst [vmem:[#allocation36_spill] sm:$0xff] %v23156_v57  ;;  %v7616_v57 = vshll.u32 %v7543_v5, 16 }
 0x349   : > { %v7600_v49 = vrot.slane %v7598_v42, 5 }
 0x34a   : > { %v7618_v61 = vrot.slane %v7616_v57, 5 }
 0x34c   : > { %v7619_v19 = vor.u32 %v7618_v61, %v7615_v15 }
 0x34d   : > { %18227 = vmatmul.mubr.msk.bf16.gmra.mrb[60].mxu1 %vm6222_vm11, %v26536_v12  ;;  %v19613_v12 = vld [vmem:[#allocation2 + $0x3c] sm:$0xff]  }
 0x34e   : > { %18232 = vmatprep.mubr.msk.bf16.mxu1 %vm6222_vm11, %v19609_v34  ;;  %v7602_v34 = vshrl.u32 %v23176_v4, 16  ;;  %v23361_v4 = vld [vmem:[#allocation2 + $0x58] sm:$0xf] }
 0x34f   : > { %26552 = vst [vmem:[#allocation52_spill] sm:$0xff] %v23361_v4 }
 0x350   : > { %v7604_v22 = vrot.slane %v7602_v34, 4 }
 0x352   : > { %v7605_v16 = vor.u32 %v7604_v22, %v7600_v49 }
 0x355   : > { %18233 = vmatmul.mubr.msk.bf16.vlgmr.msra.gmra.mrb[32].mxu1 %vm6222_vm11, %v19610_v43  ;;  %v23181_v43 = vld [vmem:[#allocation2 + $0x1c] sm:$0xf] }
 0x356   : > { %18265 = vmatpush3.bf16.msra.mxu1 %v8071_v8  ;;  %18236 = vmatprep.mubr.msk.bf16.mxu1 %vm6222_vm11, %v19611_v14  ;;  %26538 = vst [vmem:[#allocation38_spill] sm:$0xff] %v23181_v43  ;;  %v7591_v8 = vrot.slane %v7589_v56, 4  ;;  %v7594_v14 = vrot.slane %v7592_v30, 5  ;;  %v7622_v27 = vshll.u32 %v23181_v43, 16  ;;  %v7626_v26 = vshrl.u32 %v23181_v43, 16  ;;  %v19615_v56 = vld [vmem:[#allocation2 + $0x54] sm:$0xff]  }
 0x357   : > { %19525 = vmatprep.subr.msk.bf16.mxu1 %vm6271_vm10, %v23170_v63  ;;  %v7608_v30 = vshll.u32 %v23186_v35, 16 }
 0x358   : > { %v7595_v28 = vor.u32 %v7594_v14, %v7591_v8  ;;  %v23191_v42 = vrot.slane %v7622_v27, 5  ;;  %v7628_v5 = vrot.slane %v7626_v26, 4  ;;  %v7549_v8 = vld [vmem:[#allocation2 + $0x30] sm:$0xf]  ;;  %v7606_v14 = vrot.slane %v7605_v16, 4 }
 0x359   : > { %v7610_v57 = vrot.slane %v7608_v30, 5  ;;  %v7650_v27 = vshrl.u32 %v22904_v33, 16  ;;  %v7661_v26 = vshrl.u32 %v7549_v8, 16  ;;  %v7664_v50 = vshll.u32 %v7549_v8, 16  ;;  %v7552_v30 = vld [vmem:[#allocation2 + $0x3c] sm:$0xf] }
 0x35a   : > { %v7596_v22 = vrot.slane %v7595_v28, 4  ;;  %v7629_v25 = vor.u32 %v7628_v5, %v23191_v42  ;;  %v19617_v28 = vld [vmem:[#allocation2 + $0x6c] sm:$0xff]   ;;  %v7620_v16 = vrot.slane %v7619_v19, 4  ;;  %v23205_v5 = vrot.slane %v7646_v39, 5 }
 0x35b   : > { %v7611_v15 = vsel %vm20078_vm4, %v7606_v14, %v7610_v57  ;;  %v7652_v8 = vrot.slane %v7650_v27, 4  ;;  %v7688_v19 = vshll.u32 %v7552_v30, 16  ;;  %v7694_v14 = vshll.u32 %v22921_v58, 16 }
 0x35c   : > { %v7601_v61 = vsel %vm20078_vm4, %v7596_v22, %v7600_v49  ;;  %v7630_v33 = vrot.slane %v7629_v25, 4  ;;  %v7685_v22 = vshrl.u32 %v7552_v30, 16  ;;  %v7698_v39 = vshrl.u32 %v22921_v58, 16 }
 0x35d   : > { %18237 = vmatmul.mubr.msk.bf16.gmra.mrb[36].mxu1 %vm6222_vm11, %v19612_v18  ;;  %v23188_v18 = vld [vmem:[#allocation2 + $0x20] sm:$0x1]  ;;  %v23214_v25 = vcombine.low %v7601_v61, %v7611_v15  ;;  %v7625_v41 = vsel %vm20078_vm4, %v7620_v16, %v23191_v42  ;;  %v7718_v27 = vshll.u32 %v22925_v20, 16  ;;  %v7680_v61 = vshll.u32 %v22914_v55, 16 }
 0x35e   : > { %18240 = vmatprep.mubr.msk.bf16.mxu1 %vm6222_vm11, %v19613_v12  ;;  %26540 = vst [vmem:[#allocation40_spill] sm:$0xff] %v23188_v18  ;;  %v7546_v12 = vld [vmem:[#allocation2 + $0x24] sm:$0xf]  ;;  %v7632_v34 = vshll.u32 %v23188_v18, 16  ;;  %v7687_v15 = vrot.slane %v7685_v22, 4  ;;  %v7690_v42 = vrot.slane %v7688_v19, 5 }
 0x35f   : > { %v7637_v9 = vshrl.u32 %v7546_v12, 16  ;;  %v7640_v2 = vshll.u32 %v7546_v12, 16  ;;  %v23226_v16 = vrot.slane %v7694_v14, 5  ;;  %v7700_v30 = vrot.slane %v7698_v39, 4  ;;  %v19619_v18 = vld [vmem:[#allocation2 + $0x84] sm:$0xff]  }
 0x360   : > { %v7634_v7 = vrot.slane %v7632_v34, 5  ;;  %v7666_v34 = vrot.slane %v7664_v50, 5  ;;  %v7658_v22 = vrot.slane %v7656_v52, 5  ;;  %v7682_v14 = vrot.slane %v7680_v61, 5 }
 0x361   : > { %v7639_v11 = vrot.slane %v7637_v9, 4  ;;  %v7642_v12 = vrot.slane %v7640_v2, 5  ;;  %v7663_v9 = vrot.slane %v7661_v26, 4  ;;  %v7722_v26 = vshrl.u32 %v22925_v20, 16 }
 0x362   : > { %v7635_v50 = vsel %vm20078_vm4, %v7630_v33, %v7634_v7  ;;  %v23228_v20 = vrot.slane %v7718_v27, 5  ;;  %v7701_v39 = vor.u32 %v7700_v30, %v23226_v16 }
 0x363   : > { %v7643_v57 = vor.u32 %v7642_v12, %v7639_v11  ;;  %v7667_v58 = vor.u32 %v7666_v34, %v7663_v9  ;;  %v7724_v43 = vrot.slane %v7722_v26, 4  ;;  %v7746_v9 = vshrl.u32 %v22935_v24, 16 }
 0x364   : > { %v23233_v55 = vcombine.low %v7625_v41, %v7635_v50  ;;  %v7691_v26 = vor.u32 %v7690_v42, %v7687_v15  ;;  %v7702_v61 = vrot.slane %v7701_v39, 4  ;;  %v7728_v15 = vshll.u32 %v22928_v45, 16 }
 0x365   : > { %18241 = vmatmul.mubr.msk.bf16.gmra.mrb[40].mxu1 %vm6222_vm11, %v19614_v10  ;;  %v7670_v10 = vshll.u32 %v22908_v40, 16  ;;  %v7644_v34 = vrot.slane %v7643_v57, 4  ;;  %v7668_v19 = vrot.slane %v7667_v58, 4  ;;  %v7725_v41 = vor.u32 %v7724_v43, %v23228_v20  ;;  %v19620_v43 = vld [vmem:[#allocation2 + $0x90] sm:$0xff]  }
 0x366   : > { %18244 = vmatprep.mubr.msk.bf16.mxu1 %vm6222_vm11, %v19615_v56  ;;  %v7674_v56 = vshrl.u32 %v22908_v40, 16  ;;  %v7555_v40 = vld [vmem:[#allocation2 + $0x48] sm:$0xf]  ;;  %v7748_v57 = vrot.slane %v7746_v9, 4  ;;  %v7770_v58 = vshrl.u32 %v22943_v60, 16 }
 0x367   : > { %v23209_v37 = vrot.slane %v7670_v10, 5  ;;  %v7712_v2 = vshll.u32 %v7555_v40, 16  ;;  %v7558_v10 = vld [vmem:[#allocation2 + $0x54] sm:$0xf] }
 0x368   : > { %v7676_v49 = vrot.slane %v7674_v56, 4  ;;  %v7653_v56 = vor.u32 %v7652_v8, %v23205_v5  ;;  %v7733_v12 = vshrl.u32 %v7558_v10, 16  ;;  %v7736_v33 = vshll.u32 %v7558_v10, 16 }
 0x369   : > { %v7714_v11 = vrot.slane %v7712_v2, 5  ;;  %v7742_v8 = vshll.u32 %v22935_v24, 16  ;;  %v7561_v2 = vld [vmem:[#allocation2 + $0x60] sm:$0xf]  ;;  %v7673_v42 = vsel %vm20078_vm4, %v7668_v19, %v23209_v37 }
 0x36a   : > { %v7735_v10 = vrot.slane %v7733_v12, 4  ;;  %v7738_v24 = vrot.slane %v7736_v33, 5  ;;  %v7757_v52 = vshrl.u32 %v7561_v2, 16  ;;  %v7692_v12 = vrot.slane %v7691_v26, 4 }
 0x36b   : > { %v23239_v50 = vrot.slane %v7742_v8, 5  ;;  %v7726_v33 = vrot.slane %v7725_v41, 4  ;;  %v7794_v41 = vshrl.u32 %v22953_v38, 16 }
 0x36c   : > { %v7759_v45 = vrot.slane %v7757_v52, 4  ;;  %v7697_v26 = vsel %vm20078_vm4, %v7692_v12, %v23226_v16 }
 0x36d   : > { %18245 = vmatmul.mubr.msk.bf16.gmra.mrb[44].mxu1 %vm6222_vm11, %v19616_v21  ;;  %v7709_v21 = vshrl.u32 %v7555_v40, 16  ;;  %v19618_v40 = vld [vmem:[#allocation2 + $0x78] sm:$0xff]   ;;  %v7749_v8 = vor.u32 %v7748_v57, %v23239_v50  ;;  %v19622_v57 = vld [vmem:[#allocation2 + $0xa8] sm:$0xff]   ;;  %v23304_v12 = vrot.slane %v7794_v41, 4 }
 0x36e   : > { %18248 = vmatprep.mubr.msk.bf16.mxu1 %vm6222_vm11, %v19617_v28  ;;  %v7677_v28 = vor.u32 %v7676_v49, %v23209_v37  ;;  %v7654_v49 = vrot.slane %v7653_v56, 4  ;;  %v7760_v56 = vshll.u32 %v7561_v2, 16  ;;  %v7752_v2 = vshll.u32 %v22949_v36, 16 }
 0x36f   : > { %v7711_v7 = vrot.slane %v7709_v21, 4  ;;  %v7704_v21 = vshll.u32 %v22923_v51, 16  ;;  %v7649_v51 = vsel %vm20078_vm4, %v7644_v34, %v23205_v5 }
 0x370   : > { %v7678_v27 = vrot.slane %v7677_v28, 4  ;;  %v7659_v28 = vsel %vm20078_vm4, %v7654_v49, %v7658_v22  ;;  %v7762_v9 = vrot.slane %v7760_v56, 5  ;;  %v7772_v49 = vrot.slane %v7770_v58, 4  ;;  %v23280_v58 = vld [vmem:[#allocation2 + $0x1c] sm:$0xf] }
 0x371   : > { %v7715_v35 = vor.u32 %v7714_v11, %v7711_v7  ;;  %v7564_v7 = vld [vmem:[#allocation2 + $0x6c] sm:$0xf]  ;;  %v19621_v11 = vld [vmem:[#allocation2 + $0x9c] sm:$0xff]   ;;  %v7730_v22 = vrot.slane %v7728_v15, 5  ;;  %v23261_v39 = vcombine.low %v7649_v51, %v7659_v28  ;;  %v23277_v56 = vrot.slane %v7749_v8, 4  ;;  %26541 = vst [vmem:[#allocation41_spill] sm:$0xff] %v23280_v58 }
 0x372   : > { %v7683_v30 = vsel %vm20078_vm4, %v7678_v27, %v7682_v14  ;;  %v7781_v19 = vshrl.u32 %v7564_v7, 16  ;;  %v7784_v14 = vshll.u32 %v7564_v7, 16  ;;  %v7567_v27 = vld [vmem:[#allocation2 + $0x78] sm:$0xf]  ;;  %v23289_v15 = vld [vmem:[#allocation2 + $0x20] sm:$0x1] }
 0x373   : > { %v7716_v5 = vrot.slane %v7715_v35, 4  ;;  %v23263_v35 = vcombine.low %v7673_v42, %v7683_v30  ;;  %v19623_v51 = vld [vmem:[#allocation2 + $0xb4] sm:$0xff]   ;;  %26542 = vst [vmem:[#allocation42_spill] sm:$0xff] %v23289_v15  ;;  %v23297_v30 = vrot.slane %v7752_v2, 5  ;;  %v23339_v7 = vld [vmem:[#allocation2 + $0x40] sm:$0xf] }
 0x374   : > { %v23285_v28 = vrot.slane %v7781_v19, 4  ;;  %v23309_v8 = vld [vmem:[#allocation2 + $0x34] sm:$0xf]  ;;  %v9822_v19 = vld [vmem:[#allocation2 + $0x24] sm:$0xe] }
 0x375   : > { %18249 = vmatmul.mubr.msk.bf16.gmra.mrb[48].mxu1 %vm6222_vm11, %v19618_v40  ;;  %v7706_v40 = vrot.slane %v7704_v21, 5  ;;  %v7721_v16 = vsel %vm20078_vm4, %v7716_v5, %v23228_v20  ;;  %v9821_v20 = vld [vmem:[#allocation2 + $0x18] sm:$0xe]  ;;  %v7814_v5 = vshll.u32 %v22989_v6, 16  ;;  %26545 = vst [vmem:[#allocation45_spill] sm:$0xff] %v23309_v8 }
 0x376   : > { %18252 = vmatprep.mubr.msk.bf16.mxu1 %vm6222_vm11, %v19619_v18  ;;  %v7766_v18 = vshll.u32 %v22943_v60, 16  ;;  %v7739_v60 = vor.u32 %v7738_v24, %v7735_v10  ;;  %v7731_v10 = vsel %vm20078_vm4, %v7726_v33, %v7730_v22  ;;  %v7790_v24 = vshll.u32 %v22953_v38, 16  ;;  %v23307_v33 = vld [vmem:[#allocation2 + $0x2c] sm:$0x1]  ;;  %v23349_v42 = vld [vmem:[#allocation2 + $0x50] sm:$0x1] }
 0x377   : > { %v7707_v37 = vsel %vm20078_vm4, %v7702_v61, %v7706_v40  ;;  %v23287_v61 = vrot.slane %v7784_v14, 5  ;;  %v7805_v38 = vshrl.u32 %v7567_v27, 16  ;;  %v7808_v40 = vshll.u32 %v7567_v27, 16  ;;  %26544 = vst [vmem:[#allocation44_spill] sm:$0xff] %v23307_v33  ;;  %v23343_v2 = vld [vmem:[#allocation2 + $0x4c] sm:$0xf] }
 0x378   : > { %v23256_v34 = vrot.slane %v7766_v18, 5  ;;  %v23265_v21 = vrot.slane %v7739_v60, 4  ;;  %v23275_v52 = vcombine.low %v7697_v26, %v7707_v37  ;;  %v7763_v18 = vor.u32 %v7762_v9, %v7759_v45  ;;  %v23299_v60 = vld [vmem:[#allocation2 + $0x28] sm:$0xf]  ;;  %v23320_v37 = vld [vmem:[#allocation2 + $0x84] sm:$0xf] }
 0x379   : > { %26543 = vst [vmem:[#allocation43_spill] sm:$0xff] %v23299_v60  ;;  %v9887_v22 = vrot.slane %v23280_v58, 5  ;;  %v23327_v27 = vrot.slane %v7805_v38, 4  ;;  %v23329_v26 = vld [vmem:[#allocation2 + $0x38] sm:$0x1]  ;;  %26548 = vst [vmem:[#allocation48_spill] sm:$0xff] %v23343_v2 }
 0x37a   : > { %v7773_v36 = vor.u32 %v7772_v49, %v23256_v34  ;;  %v23316_v9 = vrot.slane %v7763_v18, 4  ;;  %26546 = vst [vmem:[#allocation46_spill] sm:$0xff] %v23329_v26  ;;  %v9894_v18 = vrot.slane %v23299_v60, 5  ;;  %v23341_v38 = vld [vmem:[#allocation2 + $0x44] sm:$0x1]  ;;  %26550 = vst [vmem:[#allocation50_spill] sm:$0xff] %v23349_v42 }
 0x37b   : > { %v9889_v41 = vrot.slane %v9887_v22, 4  ;;  %26547 = vst [vmem:[#allocation47_spill] sm:$0xff] %v23341_v38  ;;  %v9901_v14 = vrot.slane %v23309_v8, 5  ;;  %v19624_v60 = vld [vmem:[#allocation2 + $0xc0] sm:$0xff]   ;;  %v9904_v59 = vrot.slane %v23329_v26, 5 }
 0x37c   : > { %v23318_v49 = vrot.slane %v7773_v36, 4  ;;  %v9823_v36 = vld [vmem:[#allocation2 + $0x30] sm:$0xe]  ;;  %v23374_v8 = vld [vmem:[#allocation2 + $0x5c] sm:$0x1] }
 0x37d   : > { %18253 = vmatmul.mubr.msk.bf16.gmra.mrb[52].mxu1 %vm6222_vm11, %v19620_v43  ;;  %v23291_v43 = vcombine.low %v7721_v16, %v7731_v10  ;;  %v16867_v10 = vrot.slane %v9821_v20, 9  ;;  %v23337_v16 = vrot.slane %v7814_v5, 5  ;;  %v16868_v20 = vrot.slane %v9822_v19, 9  ;;  %26556 = vst [vmem:[#allocation56_spill] sm:$0xff] %v23374_v8 }
 0x37e   : > { %18256 = vmatprep.mubr.msk.bf16.mxu1 %vm6222_vm11, %v19621_v11  ;;  %v23302_v11 = vrot.slane %v7790_v24, 5  ;;  %v23331_v24 = vrot.slane %v7808_v40, 5  ;;  %v9897_v5 = vrot.slane %v23307_v33, 5  ;;  %v16869_v19 = vrot.slane %v9823_v36, 9 }
 0x37f   : > { %v23347_v40 = vsel %vm20304_vm7, %v16867_v10, %v9887_v22  ;;  %v9825_v10 = vld [vmem:[#allocation2 + $0x48] sm:$0xe]  ;;  %v9903_v58 = vrot.slane %v9901_v14, 4  ;;  %v9915_v36 = vrot.slane %v23343_v2, 5  ;;  %v23416_v2 = vld [vmem:[#allocation2 + $0x74] sm:$0x1] }
 0x380   : > { %26549 = vst [vmem:[#allocation49_spill] sm:$0xff] %v23347_v40  ;;  %v23380_v22 = vsel %vm20304_vm7, %v16869_v19, %v9901_v14  ;;  %v9911_v40 = vrot.slane %v23341_v38, 5  ;;  %v16871_v26 = vrot.slane %v9825_v10, 9  ;;  %v9922_v19 = vrot.slane %v23361_v4, 5  ;;  %v9828_v4 = vld [vmem:[#allocation2 + $0x6c] sm:$0xe] }
 0x381   : > { %26557 = vst [vmem:[#allocation57_spill] sm:$0xff] %v23380_v22  ;;  %v9917_v10 = vrot.slane %v9915_v36, 4  ;;  %26565 = vst [vmem:[#allocation65_spill] sm:$0xff] %v23416_v2 }
 0x382   : > { %v9924_v22 = vrot.slane %v9922_v19, 4 }
 0x385   : > { %18257 = vmatmul.mubr.msk.bf16.gmra.mrb[56].mxu1 %vm6222_vm11, %v19622_v57  ;;  %v9890_v57 = vrot.slane %v23289_v15, 5  ;;  %v9824_v15 = vld [vmem:[#allocation2 + $0x3c] sm:$0xe] }
 0x386   : > { %18260 = vmatprep.mubr.msk.bf16.mxu1 %vm6222_vm11, %v19623_v51  ;;  %v9896_v51 = vrot.slane %v9894_v18, 4 }
 0x387   : > { %v23353_v45 = vsel %vm20304_vm7, %v9889_v41, %v9890_v57  ;;  %v23363_v41 = vld [vmem:[#allocation2 + $0x64] sm:$0xf]  ;;  %v23367_v57 = vsel %vm20304_vm7, %v16868_v20, %v9894_v18  ;;  %v9908_v18 = vrot.slane %v23339_v7, 5  ;;  %v9826_v20 = vld [vmem:[#allocation2 + $0x54] sm:$0xe] }
 0x388   : > { %26551 = vst [vmem:[#allocation51_spill] sm:$0xff] %v23353_v45  ;;  %26553 = vst [vmem:[#allocation53_spill] sm:$0xff] %v23363_v41  ;;  %v23371_v33 = vsel %vm20304_vm7, %v9896_v51, %v9897_v5  ;;  %v16870_v45 = vrot.slane %v9824_v15, 9  ;;  %v23384_v51 = vld [vmem:[#allocation2 + $0x68] sm:$0x1]  ;;  %v23388_v5 = vsel %vm20304_vm7, %v9903_v58, %v9904_v59  ;;  %v16872_v15 = vrot.slane %v9826_v20, 9 }
 0x389   : > { %26554 = vst [vmem:[#allocation54_spill] sm:$0xff] %v23367_v57  ;;  %26555 = vst [vmem:[#allocation55_spill] sm:$0xff] %v23371_v33  ;;  %v9910_v14 = vrot.slane %v9908_v18, 4  ;;  %v9827_v33 = vld [vmem:[#allocation2 + $0x60] sm:$0xe]  ;;  %v9929_v38 = vrot.slane %v23363_v41, 5 }
 0x38a   : > { %26558 = vst [vmem:[#allocation58_spill] sm:$0xff] %v23384_v51  ;;  %26559 = vst [vmem:[#allocation59_spill] sm:$0xff] %v23388_v5  ;;  %v23398_v57 = vld [vmem:[#allocation2 + $0x70] sm:$0xf]  ;;  %v23400_v59 = vld [vmem:[#allocation2 + $0x7c] sm:$0xf]  ;;  %v23404_v58 = vsel %vm20304_vm7, %v16870_v45, %v9908_v18 }
 0x38b   : > { %26560 = vst [vmem:[#allocation60_spill] sm:$0xff] %v23398_v57  ;;  %26561 = vst [vmem:[#allocation61_spill] sm:$0xff] %v23400_v59  ;;  %v23412_v5 = vsel %vm20304_vm7, %v9910_v14, %v9911_v40  ;;  %v23418_v45 = vld [vmem:[#allocation2 + $0x80] sm:$0x1]  ;;  %v23428_v40 = vsel %vm20304_vm7, %v16872_v15, %v9922_v19  ;;  %v16873_v18 = vrot.slane %v9827_v33, 9  ;;  %v8541_v15 = vsel %vm6271_vm10, %v23170_v63, 0 }
 0x38c   : > { %26562 = vst [vmem:[#allocation62_spill] sm:$0xff] %v23404_v58  ;;  %26564 = vst [vmem:[#allocation64_spill] sm:$0xff] %v23412_v5  ;;  %v23430_v20 = vld [vmem:[#allocation2 + $0x88] sm:$0xf]  ;;  %v23432_v14 = vld [vmem:[#allocation2 + $0x94] sm:$0xf] }
 0x38d   : > { %18261 = vmatmul.mubr.msk.bf16.gmra.mrb[60].mxu1 %vm6222_vm11, %v19624_v60  ;;  %v9918_v60 = vrot.slane %v23349_v42, 5  ;;  %v9925_v42 = vrot.slane %v23374_v8, 5  ;;  %26566 = vst [vmem:[#allocation66_spill] sm:$0xff] %v23418_v45  ;;  %26568 = vst [vmem:[#allocation68_spill] sm:$0xff] %v23428_v40  ;;  %v16874_v19 = vrot.slane %v9828_v4, 9  ;;  %v9936_v5 = vrot.slane %v23398_v57, 5 }
 0x38e   : > { %18266 = vmatprep.mubr.msk.bf16.mxu1 %vm6222_vm11, %v23214_v25  ;;  %v23408_v25 = vsel %vm20304_vm7, %v16871_v26, %v9915_v36  ;;  %26569 = vst [vmem:[#allocation69_spill] sm:$0xff] %v23430_v20  ;;  %26570 = vst [vmem:[#allocation70_spill] sm:$0xff] %v23432_v14  ;;  %v9931_v26 = vrot.slane %v9929_v38, 4  ;;  %v9830_v58 = vld [vmem:[#allocation2 + $0x84] sm:$0xe]  ;;  %v9939_v4 = vrot.slane %v23416_v2, 5 }
 0x38f   : > { %26563 = vst [vmem:[#allocation63_spill] sm:$0xff] %v23408_v25  ;;  %v23424_v36 = vsel %vm20304_vm7, %v9917_v10, %v9918_v60  ;;  %v23438_v41 = vsel %vm20304_vm7, %v9924_v22, %v9925_v42  ;;  %v9932_v60 = vrot.slane %v23384_v51, 5  ;;  %v9829_v10 = vld [vmem:[#allocation2 + $0x78] sm:$0xe]  ;;  %v23451_v42 = vld [vmem:[#allocation2 + $0x8c] sm:$0x1] }
 0x390   : > { %26567 = vst [vmem:[#allocation67_spill] sm:$0xff] %v23424_v36  ;;  %26571 = vst [vmem:[#allocation71_spill] sm:$0xff] %v23438_v41  ;;  %v23449_v8 = vld [vmem:[%s26226_s3 + $0x18] sm:$0xf]  ;;  %v23457_v36 = vsel %vm20304_vm7, %v16873_v18, %v9929_v38  ;;  %v9943_v33 = vrot.slane %v23400_v59, 5  ;;  %v9938_v40 = vrot.slane %v9936_v5, 4  ;;  %v23476_v18 = vsel %vm20304_vm7, %v16874_v19, %v9936_v5 }
 0x391   : > { %26572 = vst [vmem:[#allocation72_spill] sm:$0xff] %v23451_v42  ;;  %v23453_v22 = vld [vmem:[#allocation2 + $0x98] sm:$0x1]  ;;  %26573 = vst [vmem:[#allocation73_spill] sm:$0xff] %v23457_v36  ;;  %v23461_v63 = vsel %vm20304_vm7, %v9931_v26, %v9932_v60  ;;  %v16875_v25 = vrot.slane %v9829_v10, 9  ;;  %v9946_v51 = vrot.slane %v23418_v45, 5 }
 0x392   : > { %26574 = vst [vmem:[#allocation74_spill] sm:$0xff] %v23461_v63  ;;  %v9831_v38 = vld [vmem:[#allocation2 + $0x90] sm:$0xe]  ;;  %v23472_v26 = vld [vmem:[#allocation2 + $0xac] sm:$0xf]  ;;  %v9945_v60 = vrot.slane %v9943_v33, 4 }
 0x393   : > { %v9950_v2 = vrot.slane %v23430_v20, 5  ;;  %v23481_v10 = vld [vmem:[#allocation2 + $0xa0] sm:$0xf]  ;;  %v23483_v41 = vld [vmem:[#allocation2 + $0xa4] sm:$0x1]  ;;  %v9953_v5 = vrot.slane %v23451_v42, 5 }
 0x394   : > { %v9133_v19 = vld [vmem:[#allocation2 + $0xb0] sm:$0x1]  ;;  %v23499_v36 = vsel %vm20304_vm7, %v9945_v60, %v9946_v51  ;;  %v16877_v20 = vrot.slane %v9831_v38, 9  ;;  %v9960_v42 = vrot.slane %v23453_v22, 5  ;;  %v23508_v57 = vld [vmem:[#allocation2 + $0xb8] sm:$0xf] }
 0x395   : > { %18267 = vmatmul.mubr.msk.bf16.vlgmr.msra.gmra.mrb[32].mxu1 %vm6222_vm11, %v23233_v55  ;;  %v16876_v55 = vrot.slane %v9830_v58, 9  ;;  %v9957_v58 = vrot.slane %v23432_v14, 5  ;;  %26577 = vst [vmem:[#allocation77_spill] sm:$0xff] %v23499_v36  ;;  %v9952_v45 = vrot.slane %v9950_v2, 4  ;;  %v9833_v14 = vld [vmem:[#allocation2 + $0xa8] sm:$0xe] }
 0x396   : > { %18299 = vmatpush3.bf16.msra.mxu1 %v8541_v15  ;;  %18270 = vmatprep.mubr.msk.bf16.mxu1 %vm6222_vm11, %v23261_v39  ;;  %v23487_v39 = vsel %vm20304_vm7, %v9938_v40, %v9939_v4  ;;  %v23491_v15 = vsel %vm20304_vm7, %v16875_v25, %v9943_v33  ;;  %v9832_v40 = vld [vmem:[#allocation2 + $0x9c] sm:$0xe]  ;;  %v26578_v4 = vshrl.u32 %v22989_v6, 16  ;;  %v23510_v63 = vld [vmem:[#allocation2 + $0xc4] sm:$0xf]  ;;  %v9964_v60 = vrot.slane %v23481_v10, 5 }
 0x397   : > { %19526 = vmatprep.subr.msk.bf16.mxu1 %vm6271_vm10, %v23449_v8  ;;  %26575 = vst [vmem:[#allocation75_spill] sm:$0xff] %v23487_v39  ;;  %26576 = vst [vmem:[#allocation76_spill] sm:$0xff] %v23491_v15  ;;  %v9959_v33 = vrot.slane %v9957_v58, 4  ;;  %v23514_v51 = vsel %vm20304_vm7, %v16876_v55, %v9950_v2  ;;  %v23518_v6 = vsel %vm20304_vm7, %v9952_v45, %v9953_v5  ;;  %v16878_v2 = vrot.slane %v9832_v40, 9  ;;  %v9834_v15 = vld [vmem:[#allocation2 + $0xb4] sm:$0xe] }
 0x398   : > { %v23503_v59 = vrot.slane %v26578_v4, 4  ;;  %26579 = vst [vmem:[#allocation78_spill] sm:$0xff] %v23514_v51  ;;  %26580 = vst [vmem:[#allocation79_spill] sm:$0xff] %v23518_v6  ;;  %v23522_v38 = vsel %vm20304_vm7, %v16877_v20, %v9957_v58  ;;  %v9136_v4 = vld [vmem:[#allocation2 + $0xbc] sm:$0x1]  ;;  %v9971_v55 = vrot.slane %v23472_v26, 5 }
 0x399   : > { %26581 = vst [vmem:[#allocation80_spill] sm:$0xff] %v23522_v38  ;;  %v23529_v36 = vsel %vm20304_vm7, %v9959_v33, %v9960_v42  ;;  %v9139_v45 = vld [vmem:[#allocation2 + $0xc8] sm:$0x1]  ;;  %v9966_v20 = vrot.slane %v9964_v60, 4  ;;  %v9967_v58 = vrot.slane %v23483_v41, 5  ;;  %v16879_v39 = vrot.slane %v9833_v14, 9 }
 0x39a   : > { %26582 = vst [vmem:[#allocation81_spill] sm:$0xff] %v23529_v36  ;;  %v23539_v25 = vsel %vm20304_vm7, %v16878_v2, %v9964_v60  ;;  %v9973_v42 = vrot.slane %v9971_v55, 4  ;;  %v9974_v40 = vrot.slane %v9133_v19, 5  ;;  %v9978_v33 = vrot.slane %v23508_v57, 5  ;;  %v9835_v6 = vld [vmem:[#allocation2 + $0xc0] sm:$0xe] }
 0x39b   : > { %v23546_v5 = vsel %vm20304_vm7, %v9966_v20, %v9967_v58  ;;  %v23550_v14 = vsel %vm20304_vm7, %v16879_v39, %v9971_v55  ;;  %v9985_v60 = vrot.slane %v23510_v63, 5  ;;  %v16881_v58 = vrot.slane %v9835_v6, 9 }
 0x39c   : > { %v16895_v19 = vcombine.low %v23539_v25, %v23546_v5  ;;  %v23557_v2 = vsel %vm20304_vm7, %v9973_v42, %v9974_v40  ;;  %v9980_v36 = vrot.slane %v9978_v33, 4  ;;  %v9988_v51 = vrot.slane %v9139_v45, 5  ;;  %v11019_v25 = vld [vmem:[#allocation3] sm:$0xf]  ;;  %v11020_v5 = vld [vmem:[#allocation3 + $0x4] sm:$0xf] }
 0x39d   : > { %18271 = vmatmul.mubr.msk.bf16.gmra.mrb[36].mxu1 %vm6222_vm11, %v23263_v35  ;;  %v16880_v35 = vrot.slane %v9834_v15, 9  ;;  %v16896_v20 = vcombine.low %v23550_v14, %v23557_v2  ;;  %v9987_v38 = vrot.slane %v9985_v60, 4  ;;  %v7838_v39 = vshll.u32 %v23000_v0, 16  ;;  %v11052_v14 = vld [vmem:[#allocation3 + $0x8] sm:$0x1] }
 0x39e   : > { %18274 = vmatprep.mubr.msk.bf16.mxu1 %vm6222_vm11, %v23275_v52  ;;  %v9981_v52 = vrot.slane %v9136_v4, 5  ;;  %v7842_v15 = vshrl.u32 %v23000_v0, 16  ;;  %v7832_v4 = vshll.u32 %v23320_v37, 16  ;;  %v23576_v6 = vsel %vm20304_vm7, %v16881_v58, %v9985_v60 }
 0x39f   : > { %v23565_v55 = vsel %vm20304_vm7, %v16880_v35, %v9978_v33  ;;  %v23580_v0 = vsel %vm20304_vm7, %v9987_v38, %v9988_v51  ;;  %v26583_v45 = vor.u32 %v23287_v61, %v23285_v28  ;;  %v26585_v51 = vsel %vm20078_vm4, %v23277_v56, %v23297_v30  ;;  %v7573_v30 = vld [vmem:[#allocation2 + $0x90] sm:$0xf] }
 0x3a0   : > { %v23569_v42 = vsel %vm20304_vm7, %v9980_v36, %v9981_v52  ;;  %v26584_v36 = vor.u32 %v23304_v12, %v23302_v11  ;;  %v7821_v52 = vor.u32 %v23503_v59, %v23337_v16  ;;  %v16898_v40 = vcombine.low %v23576_v6, %v23580_v0 }
 0x3a1   : > { %v7788_v33 = vrot.slane %v26583_v45, 4  ;;  %v26586_v28 = vsel %vm20078_vm4, %v23265_v21, %v23239_v50  ;;  %v26587_v12 = vshll.u32 %v22951_v48, 16  ;;  %v26588_v59 = vshll.u32 %v22973_v3, 16 }
 0x3a2   : > { %v7798_v35 = vrot.slane %v26584_v36, 4  ;;  %v16726_v61 = vcombine.low %v26586_v28, %v26585_v51  ;;  %v7824_v58 = vshll.u32 %v22991_v62, 16  ;;  %v23609_v45 = vrot.slane %v7838_v39, 5 }
 0x3a3   : > { %v7778_v38 = vrot.slane %v26587_v12, 5  ;;  %v7802_v60 = vrot.slane %v26588_v59, 5  ;;  %v7844_v56 = vrot.slane %v7842_v15, 4  ;;  %v7769_v48 = vsel %vm20078_vm4, %v23316_v9, %v23256_v34 }
 0x3a4   : > { %v7811_v50 = vor.u32 %v23331_v24, %v23327_v27  ;;  %v26589_v21 = vshrl.u32 %v23320_v37, 16  ;;  %v7793_v39 = vsel %vm20078_vm4, %v7788_v33, %v23302_v11  ;;  %v7822_v36 = vrot.slane %v7821_v52, 4  ;;  %v7576_v24 = vld [vmem:[#allocation2 + $0x9c] sm:$0xf] }
 0x3a5   : > { %18275 = vmatmul.mubr.msk.bf16.gmra.mrb[40].mxu1 %vm6222_vm11, %v23291_v43  ;;  %v7834_v43 = vrot.slane %v7832_v4, 5  ;;  %v7779_v62 = vsel %vm20078_vm4, %v23318_v49, %v7778_v38  ;;  %v7803_v15 = vsel %vm20078_vm4, %v7798_v35, %v7802_v60  ;;  %v7853_v34 = vshrl.u32 %v7573_v30, 16 }
 0x3a6   : > { %18278 = vmatprep.mubr.msk.bf16.mxu1 %vm6222_vm11, %v16726_v61  ;;  %v7831_v3 = vrot.slane %v26589_v21, 4  ;;  %v7856_v9 = vshll.u32 %v7573_v30, 16  ;;  %v7862_v27 = vshll.u32 %v23021_v23, 16  ;;  %v7866_v37 = vshrl.u32 %v23021_v23, 16 }
 0x3a7   : > { %v7826_v4 = vrot.slane %v7824_v58, 5  ;;  %v7845_v51 = vor.u32 %v7844_v56, %v23609_v45  ;;  %v7886_v49 = vshll.u32 %v23039_v44, 16  ;;  %v7890_v28 = vshrl.u32 %v23039_v44, 16 }
 0x3a8   : > { %v16727_v61 = vcombine.low %v7769_v48, %v7779_v62  ;;  %v16728_v11 = vcombine.low %v7793_v39, %v7803_v15  ;;  %v7812_v33 = vrot.slane %v7811_v50, 4  ;;  %v7835_v12 = vor.u32 %v7834_v43, %v7831_v3  ;;  %v7579_v39 = vld [vmem:[#allocation2 + $0xa8] sm:$0xf] }
 0x3a9   : > { %v7827_v35 = vsel %vm20078_vm4, %v7822_v36, %v7826_v4  ;;  %v7848_v52 = vshll.u32 %v23009_v29, 16  ;;  %v7877_v38 = vshrl.u32 %v7576_v24, 16  ;;  %v7880_v59 = vshll.u32 %v7576_v24, 16 }
 0x3aa   : > { %v7855_v23 = vrot.slane %v7853_v34, 4  ;;  %v7858_v60 = vrot.slane %v7856_v9, 5  ;;  %v7864_v58 = vrot.slane %v7862_v27, 5  ;;  %v7868_v30 = vrot.slane %v7866_v37, 4  ;;  %v7582_v27 = vld [vmem:[#allocation2 + $0xb4] sm:$0xf] }
 0x3ab   : > { %v7846_v56 = vrot.slane %v7845_v51, 4  ;;  %v7888_v21 = vrot.slane %v7886_v49, 5  ;;  %v7892_v44 = vrot.slane %v7890_v28, 4  ;;  %v7817_v48 = vsel %vm20078_vm4, %v7812_v33, %v23337_v16 }
 0x3ac   : > { %v7836_v50 = vrot.slane %v7835_v12, 4  ;;  %v16729_v3 = vcombine.low %v7817_v48, %v7827_v35  ;;  %v7850_v29 = vrot.slane %v7848_v52, 5  ;;  %v7879_v43 = vrot.slane %v7877_v38, 4 }
 0x3ad   : > { %18279 = vmatmul.mubr.msk.bf16.gmra.mrb[44].mxu1 %vm6222_vm11, %v16727_v61  ;;  %v7882_v62 = vrot.slane %v7880_v59, 5  ;;  %v7859_v15 = vor.u32 %v7858_v60, %v7855_v23  ;;  %v7869_v36 = vor.u32 %v7868_v30, %v7864_v58  ;;  %v7910_v34 = vshll.u32 %v23057_v54, 16 }
 0x3ae   : > { %18282 = vmatprep.mubr.msk.bf16.mxu1 %vm6222_vm11, %v16728_v11  ;;  %v7914_v9 = vshrl.u32 %v23057_v54, 16  ;;  %v7851_v37 = vsel %vm20078_vm4, %v7846_v56, %v7850_v29  ;;  %v7893_v24 = vor.u32 %v7892_v44, %v7888_v21  ;;  %v7934_v4 = vshll.u32 %v23079_v46, 16  ;;  %v7585_v29 = vld [vmem:[#allocation2 + $0xc0] sm:$0xf] }
 0x3af   : > { %v7938_v16 = vshrl.u32 %v23079_v46, 16  ;;  %v7841_v51 = vsel %vm20078_vm4, %v7836_v50, %v23609_v45  ;;  %v7872_v49 = vshll.u32 %v23023_v31, 16  ;;  %v7901_v28 = vshrl.u32 %v7579_v39, 16 }
 0x3b0   : > { %v7904_v61 = vshll.u32 %v7579_v39, 16  ;;  %v7883_v11 = vor.u32 %v7882_v62, %v7879_v43  ;;  %v7896_v54 = vshll.u32 %v23055_v1, 16  ;;  %v7925_v33 = vshrl.u32 %v7582_v27, 16 }
 0x3b1   : > { %v7928_v12 = vshll.u32 %v7582_v27, 16  ;;  %v16730_v35 = vcombine.low %v7841_v51, %v7851_v37  ;;  %v7870_v52 = vrot.slane %v7869_v36, 4  ;;  %v7912_v38 = vrot.slane %v7910_v34, 5 }
 0x3b2   : > { %v7916_v59 = vrot.slane %v7914_v9, 4  ;;  %v7860_v46 = vrot.slane %v7859_v15, 4  ;;  %v7894_v23 = vrot.slane %v7893_v24, 4  ;;  %v7936_v60 = vrot.slane %v7934_v4, 5 }
 0x3b3   : > { %v7940_v30 = vrot.slane %v7938_v16, 4  ;;  %v7874_v31 = vrot.slane %v7872_v49, 5  ;;  %v7903_v45 = vrot.slane %v7901_v28, 4  ;;  %v7906_v56 = vrot.slane %v7904_v61, 5 }
 0x3b4   : > { %v7884_v44 = vrot.slane %v7883_v11, 4  ;;  %v7898_v48 = vrot.slane %v7896_v54, 5  ;;  %v7927_v1 = vrot.slane %v7925_v33, 4  ;;  %v7930_v50 = vrot.slane %v7928_v12, 5 }
 0x3b5   : > { %18283 = vmatmul.mubr.msk.bf16.gmra.mrb[48].mxu1 %vm6222_vm11, %v16729_v3  ;;  %v7875_v43 = vsel %vm20078_vm4, %v7870_v52, %v7874_v31  ;;  %v7917_v62 = vor.u32 %v7916_v59, %v7912_v38  ;;  %v7958_v3 = vshll.u32 %v23101_v17, 16  ;;  %v7962_v39 = vshrl.u32 %v23101_v17, 16 }
 0x3b6   : > { %18286 = vmatprep.mubr.msk.bf16.mxu1 %vm6222_vm11, %v16730_v35  ;;  %v7865_v15 = vsel %vm20078_vm4, %v7860_v46, %v7864_v58  ;;  %v7899_v36 = vsel %vm20078_vm4, %v7894_v23, %v7898_v48  ;;  %v7941_v34 = vor.u32 %v7940_v30, %v7936_v60  ;;  %v7907_v9 = vor.u32 %v7906_v56, %v7903_v45  ;;  %v26590_v46 = vld [vmem:[#allocation37_spill] sm:$0xff]  ;;  %v26591_v45 = vld [vmem:[#allocation31_spill] sm:$0xff] }
 0x3b7   : > { %v7920_v27 = vshll.u32 %v23070_v47, 16  ;;  %v7949_v37 = vshrl.u32 %v7585_v29, 16  ;;  %v7952_v24 = vshll.u32 %v7585_v29, 16  ;;  %v16731_v4 = vcombine.low %v7865_v15, %v7875_v43 }
 0x3b8   : > { %v7889_v16 = vsel %vm20078_vm4, %v7884_v44, %v7888_v21  ;;  %v7931_v51 = vor.u32 %v7930_v50, %v7927_v1  ;;  %v7944_v49 = vshll.u32 %v23091_v53, 16  ;;  %v7918_v28 = vrot.slane %v7917_v62, 4 }
 0x3b9   : > { %v16732_v17 = vcombine.low %v7889_v16, %v7899_v36  ;;  %v7960_v61 = vrot.slane %v7958_v3, 5  ;;  %v7964_v58 = vrot.slane %v7962_v39, 4  ;;  %v7942_v11 = vrot.slane %v7941_v34, 4  ;;  %v8266_v3 = vld [vmem:[#allocation2 + $0xc] sm:$0xe]  ;;  %v26592_v39 = vld [vmem:[#allocation39_spill] sm:$0xff] }
 0x3ba   : > { %v7908_v54 = vrot.slane %v7907_v9, 4  ;;  %v7922_v47 = vrot.slane %v7920_v27, 5  ;;  %v7951_v33 = vrot.slane %v7949_v37, 4  ;;  %v7954_v12 = vrot.slane %v7952_v24, 5  ;;  %v26593_v36 = vld [vmem:[#allocation38_spill] sm:$0xff] }
 0x3bb   : > { %v7932_v35 = vrot.slane %v7931_v51, 4  ;;  %v7946_v52 = vrot.slane %v7944_v49, 5  ;;  %v7965_v59 = vor.u32 %v7964_v58, %v7960_v61  ;;  %v8332_v23 = vrot.slane %v26590_v46, 5  ;;  %v8267_v51 = vld [vmem:[#allocation2 + $0x18] sm:$0xe]  ;;  %v26594_v49 = vld [vmem:[#allocation40_spill] sm:$0xff] }
 0x3bc   : > { %v7923_v21 = vsel %vm20078_vm4, %v7918_v28, %v7922_v47  ;;  %v7913_v30 = vsel %vm20078_vm4, %v7908_v54, %v7912_v38  ;;  %v7955_v31 = vor.u32 %v7954_v12, %v7951_v33  ;;  %v7968_v56 = vshll.u32 %v26591_v45, 16  ;;  %v16834_v47 = vld [vmem:[%s26226_s3 + $0x1c] sm:$0xf]  ;;  %v26595_v33 = vld [vmem:[#allocation16_spill] sm:$0xff]  ;;  %v26596_v12 = vld [vmem:[#allocation19_spill] sm:$0xff] }
 0x3bd   : > { %18287 = vmatmul.mubr.msk.bf16.gmra.mrb[52].mxu1 %vm6222_vm11, %v16731_v4  ;;  %v7947_v53 = vsel %vm20078_vm4, %v7942_v11, %v7946_v52  ;;  %v16733_v44 = vcombine.low %v7913_v30, %v7923_v21  ;;  %v7937_v48 = vsel %vm20078_vm4, %v7932_v35, %v7936_v60  ;;  %v7966_v50 = vrot.slane %v7965_v59, 4  ;;  %v26598_v52 = vld [vmem:[#allocation7_spill] sm:$0xff]  ;;  %v26599_v21 = vld [vmem:[#allocation17_spill] sm:$0xff]  ;;  %v26605_v30 = vld [vmem:[#allocation6_spill] sm:$0xff] }
 0x3be   : > { %18290 = vmatprep.mubr.msk.bf16.mxu1 %vm6222_vm11, %v16732_v17  ;;  %v16734_v1 = vcombine.low %v7937_v48, %v7947_v53  ;;  %v8334_v29 = vrot.slane %v8332_v23, 4  ;;  %v7956_v43 = vrot.slane %v7955_v31, 4  ;;  %v7970_v62 = vrot.slane %v7968_v56, 5  ;;  %v26602_v53 = vld [vmem:[#allocation18_spill] sm:$0xff]  ;;  %v26607_v45 = vld [vmem:[#allocation9_spill] sm:$0xff]  ;;  %v26610_v48 = vld [vmem:[#allocation11_spill] sm:$0xff] }
 0x3bf   : > { %v8335_v15 = vrot.slane %v26592_v39, 5  ;;  %v8339_v34 = vrot.slane %v26593_v36, 5  ;;  %v16752_v9 = vrot.slane %v8266_v3, 9  ;;  %v8342_v17 = vrot.slane %v26594_v49, 5  ;;  %v26608_v56 = vld [vmem:[#allocation10_spill] sm:$0xff]  ;;  %v26617_v39 = vld [vmem:[#allocation23_spill] sm:$0xff] }
 0x3c0   : > { %v7971_v38 = vsel %vm20078_vm4, %v7966_v50, %v7970_v62  ;;  %v7961_v27 = vsel %vm20078_vm4, %v7956_v43, %v7960_v61  ;;  %v16753_v28 = vrot.slane %v8267_v51, 9  ;;  %v8900_v54 = vsel %vm6271_vm10, %v23449_v8, 0  ;;  %v26601_v8 = vld [vmem:[#allocation8_spill] sm:$0xff]  ;;  %v26614_v43 = vld [vmem:[#allocation21_spill] sm:$0xff]  ;;  %v26616_v3 = vld [vmem:[#allocation22_spill] sm:$0xff] }
 0x3c1   : > { %v8336_v60 = vsel %vm20304_vm7, %v8334_v29, %v8335_v15  ;;  %v16735_v37 = vcombine.low %v7961_v27, %v7971_v38  ;;  %v8333_v24 = vsel %vm20304_vm7, %v16752_v9, %v8332_v23  ;;  %v8341_v16 = vrot.slane %v8339_v34, 4  ;;  %v26604_v23 = vld [vmem:[#allocation5_spill] sm:$0xff]  ;;  %v26613_v29 = vld [vmem:[#allocation15_spill] sm:$0xff]  ;;  %v26619_v38 = vld [vmem:[#allocation24_spill] sm:$0xff] }
 0x3c2   : > { %v16769_v4 = vcombine.low %v8333_v24, %v8336_v60  ;;  %v8340_v61 = vsel %vm20304_vm7, %v16753_v28, %v8339_v34  ;;  %v26597_v35 = vcombine.low %v26595_v33, %v26596_v12  ;;  %v26600_v59 = vcombine.low %v26598_v52, %v26599_v21  ;;  %v26620_v36 = vld [vmem:[#allocation25_spill] sm:$0xff]  ;;  %v26622_v9 = vld [vmem:[#allocation26_spill] sm:$0xff]  ;;  %v26623_v60 = vld [vmem:[#allocation28_spill] sm:$0xff] }
 0x3c3   : > { %v8343_v58 = vsel %vm20304_vm7, %v8341_v16, %v8342_v17  ;;  %v26603_v46 = vcombine.low %v26601_v8, %v26602_v53  ;;  %v26606_v31 = vcombine.low %v26604_v23, %v26605_v30  ;;  %v26615_v62 = vcombine.low %v26613_v29, %v26614_v43  ;;  %v26626_v24 = vld [vmem:[#allocation29_spill] sm:$0xff]  ;;  %v26628_v16 = vld [vmem:[#allocation30_spill] sm:$0xff]  ;;  %v26629_v51 = vld [vmem:[#allocation32_spill] sm:$0xff] }
 0x3c4   : > { %v16770_v11 = vcombine.low %v8340_v61, %v8343_v58  ;;  %v26618_v15 = vcombine.low %v26616_v3, %v26617_v39  ;;  %v26621_v34 = vcombine.low %v26619_v38, %v26620_v36  ;;  %v26624_v27 = vcombine.low %v26622_v9, %v26623_v60  ;;  %v26631_v17 = vld [vmem:[#allocation33_spill] sm:$0xff]  ;;  %v26632_v28 = vld [vmem:[#allocation34_spill] sm:$0xff]  ;;  %v19626_v12 = vld [vmem:[#allocation2 + $0x24] sm:$0xff]  }
 0x3c5   : > { %18291 = vmatmul.mubr.msk.bf16.gmra.mrb[56].mxu1 %vm6222_vm11, %v16733_v44  ;;  %v26609_v44 = vcombine.low %v26607_v45, %v26608_v56  ;;  %v26630_v49 = vcombine.low %v26628_v16, %v26629_v51  ;;  %v26633_v58 = vcombine.low %v26631_v17, %v26632_v28  ;;  %v19625_v61 = vld [vmem:[#allocation2 + $0x18] sm:$0xff]   ;;  %v19627_v52 = vld [vmem:[#allocation2 + $0x30] sm:$0xff]   ;;  %v23765_v21 = vld [vmem:[%s26226_s3 + $0x20] sm:$0xf]  ;;  %v11072_v2 = vshll.u32 %v11019_v25, 16 }
 0x3c6   : > { %18294 = vmatprep.mubr.msk.bf16.mxu1 %vm6222_vm11, %v16734_v1  ;;  %v26611_v1 = vld [vmem:[#allocation20_spill] sm:$0xff]  ;;  %v19631_v53 = vld [vmem:[#allocation2 + $0x60] sm:$0xff]   ;;  %v19633_v23 = vld [vmem:[#allocation2 + $0x78] sm:$0xff]  }
 0x3c7   : > { %v26612_v50 = vcombine.low %v26610_v48, %v26611_v1  ;;  %v19629_v8 = vld [vmem:[#allocation2 + $0x48] sm:$0xff]   ;;  %v9095_v30 = vld [vmem:[#allocation2 + $0x18] sm:$0xf]  ;;  %v9098_v1 = vld [vmem:[#allocation2 + $0x24] sm:$0xf]  ;;  %v11074_v0 = vrot.slane %v11072_v2, 5 }
 0x3c8   : > { %v9147_v48 = vshll.u32 %v9095_v30, 16  ;;  %v19635_v29 = vld [vmem:[#allocation2 + $0x90] sm:$0xff]   ;;  %v9168_v3 = vshrl.u32 %v9098_v1, 16  ;;  %v9171_v39 = vshll.u32 %v9098_v1, 16  ;;  %v19637_v17 = vld [vmem:[#allocation2 + $0xa8] sm:$0xff]  }
 0x3c9   : > { %v9101_v51 = vld [vmem:[#allocation2 + $0x30] sm:$0xf] }
 0x3ca   : > { %v9149_v38 = vrot.slane %v9147_v48, 5 }
 0x3cd   : > { %18295 = vmatmul.mubr.msk.bf16.gmra.mrb[60].mxu1 %vm6222_vm11, %v16735_v37  ;;  %v26625_v37 = vld [vmem:[#allocation27_spill] sm:$0xff] }
 0x3ce   : > { %18300 = vmatprep.mubr.msk.bf16.mxu1 %vm6222_vm11, %v16769_v4  ;;  %v26627_v4 = vcombine.low %v26625_v37, %v26626_v24  ;;  %v9173_v37 = vrot.slane %v9171_v39, 5 }
 0x3d5   : > { %18301 = vmatmul.mubr.msk.bf16.vlgmr.msra.gmra.mrb[32].mxu1 %vm6222_vm11, %v16770_v11  ;;  %v26634_v11 = vld [vmem:[#allocation35_spill] sm:$0xff] }
 0x3d6   : > { %18333 = vmatpush3.bf16.msra.mxu1 %v8900_v54  ;;  %18304 = vmatprep.mubr.msk.bf16.mxu1 %vm6222_vm11, %v26597_v35  ;;  %v26635_v54 = vld [vmem:[#allocation36_spill] sm:$0xff]  ;;  %v9626_v35 = vsel %vm6271_vm10, %v16834_v47, 0 }
 0x3d7   : > { %19527 = vmatprep.subr.msk.bf16.mxu1 %vm6271_vm10, %v16834_v47  ;;  %v26636_v33 = vcombine.low %v26634_v11, %v26635_v54  ;;  %v19630_v47 = vld [vmem:[#allocation2 + $0x54] sm:$0xff]   ;;  %v9192_v54 = vshrl.u32 %v9101_v51, 16 }
 0x3dd   : > { %18305 = vmatmul.mubr.msk.bf16.gmra.mrb[36].mxu1 %vm6222_vm11, %v26600_v59  ;;  %v19628_v59 = vld [vmem:[#allocation2 + $0x3c] sm:$0xff]  }
 0x3de   : > { %18308 = vmatprep.mubr.msk.bf16.mxu1 %vm6222_vm11, %v26603_v46  ;;  %v19632_v46 = vld [vmem:[#allocation2 + $0x6c] sm:$0xff]  }
 0x3e5   : > { %18309 = vmatmul.mubr.msk.bf16.gmra.mrb[40].mxu1 %vm6222_vm11, %v26606_v31  ;;  %v26637_v31 = vld [vmem:[#allocation41_spill] sm:$0xff] }
 0x3e6   : > { %18312 = vmatprep.mubr.msk.bf16.mxu1 %vm6222_vm11, %v26609_v44  ;;  %v9153_v45 = vshll.u32 %v26637_v31, 16  ;;  %v9157_v56 = vshrl.u32 %v26637_v31, 16  ;;  %v9144_v44 = vshrl.u32 %v9095_v30, 16 }
 0x3e8   : > { %v9155_v43 = vrot.slane %v9153_v45, 5 }
 0x3ed   : > { %18313 = vmatmul.mubr.msk.bf16.gmra.mrb[44].mxu1 %vm6222_vm11, %v26612_v50  ;;  %v19634_v50 = vld [vmem:[#allocation2 + $0x84] sm:$0xff]  }
 0x3ee   : > { %18316 = vmatprep.mubr.msk.bf16.mxu1 %vm6222_vm11, %v26615_v62  ;;  %v9159_v62 = vrot.slane %v9157_v56, 4  ;;  %v9194_v56 = vrot.slane %v9192_v54, 4 }
 0x3f0   : > { %v9160_v36 = vor.u32 %v9159_v62, %v9155_v43  ;;  %v19638_v62 = vld [vmem:[#allocation2 + $0xb4] sm:$0xff]  }
 0x3f2   : > { %v9161_v28 = vrot.slane %v9160_v36, 4  ;;  %v19639_v36 = vld [vmem:[#allocation2 + $0xc0] sm:$0xff]  }
 0x3f5   : > { %18317 = vmatmul.mubr.msk.bf16.gmra.mrb[48].mxu1 %vm6222_vm11, %v26618_v15  ;;  %v9146_v15 = vrot.slane %v9144_v44, 4 }
 0x3f6   : > { %18320 = vmatprep.mubr.msk.bf16.mxu1 %vm6222_vm11, %v26621_v34  ;;  %v26638_v34 = vld [vmem:[#allocation43_spill] sm:$0xff] }
 0x3f7   : > { %v9177_v9 = vshll.u32 %v26638_v34, 16  ;;  %v9181_v60 = vshrl.u32 %v26638_v34, 16  ;;  %v9150_v24 = vor.u32 %v9149_v38, %v9146_v15  ;;  %v9225_v15 = vshll.u32 %v23339_v7, 16  ;;  %v9107_v38 = vld [vmem:[#allocation2 + $0x48] sm:$0xf] }
 0x3fd   : > { %18321 = vmatmul.mubr.msk.bf16.gmra.mrb[52].mxu1 %vm6222_vm11, %v26624_v27  ;;  %v9170_v27 = vrot.slane %v9168_v3, 4 }
 0x3fe   : > { %18324 = vmatprep.mubr.msk.bf16.mxu1 %vm6222_vm11, %v26627_v4  ;;  %v26639_v4 = vld [vmem:[#allocation42_spill] sm:$0xff] }
 0x3ff   : > { %v9163_v16 = vshll.u32 %v26639_v4, 16  ;;  %v9174_v11 = vor.u32 %v9173_v37, %v9170_v27  ;;  %v9229_v37 = vshrl.u32 %v23339_v7, 16 }
 0x401   : > { %v23794_v45 = vrot.slane %v9174_v11, 4  ;;  %v9836_v11 = vld [vmem:[#allocation2 + $0xcc] sm:$0xe] }
 0x405   : > { %18325 = vmatmul.mubr.msk.bf16.gmra.mrb[56].mxu1 %vm6222_vm11, %v26630_v49  ;;  %v19636_v49 = vld [vmem:[#allocation2 + $0x9c] sm:$0xff]  }
 0x406   : > { %18328 = vmatprep.mubr.msk.bf16.mxu1 %vm6222_vm11, %v26633_v58  ;;  %v23784_v58 = vrot.slane %v9177_v9, 5  ;;  %v26642_v9 = vld [vmem:[#allocation46_spill] sm:$0xff] }
 0x40d   : > { %18329 = vmatmul.mubr.msk.bf16.gmra.mrb[60].mxu1 %vm6222_vm11, %v26636_v33  ;;  %v9195_v33 = vshll.u32 %v9101_v51, 16 }
 0x40e   : > { %18334 = vmatprep.mubr.msk.bf16.mxu1 %vm6222_vm11, %v19625_v61  ;;  %v9183_v61 = vrot.slane %v9181_v60, 4  ;;  %v9211_v60 = vshll.u32 %v26642_v9, 16 }
 0x40f   : > { %v9197_v44 = vrot.slane %v9195_v33, 5 }
 0x410   : > { %v9184_v30 = vor.u32 %v9183_v61, %v23784_v58 }
 0x411   : > { %v9198_v4 = vor.u32 %v9197_v44, %v9194_v56 }
 0x412   : > { %v9185_v34 = vrot.slane %v9184_v30, 4 }
 0x415   : > { %18335 = vmatmul.mubr.msk.bf16.vlgmr.msra.gmra.mrb[32].mxu1 %vm6222_vm11, %v19626_v12  ;;  %v9104_v12 = vld [vmem:[#allocation2 + $0x3c] sm:$0xf] }
 0x416   : > { %18367 = vmatpush3.bf16.msra.mxu1 %v9626_v35  ;;  %18338 = vmatprep.mubr.msk.bf16.mxu1 %vm6222_vm11, %v19627_v52  ;;  %v9151_v35 = vrot.slane %v9150_v24, 4  ;;  %v9165_v52 = vrot.slane %v9163_v16, 5  ;;  %v9216_v31 = vshrl.u32 %v9104_v12, 16  ;;  %v9110_v24 = vld [vmem:[#allocation2 + $0x54] sm:$0xf]  ;;  %v26643_v16 = vld [vmem:[#allocation48_spill] sm:$0xff] }
 0x417   : > { %19528 = vmatprep.subr.msk.bf16.mxu1 %vm6271_vm10, %v23765_v21  ;;  %v9249_v51 = vshll.u32 %v26643_v16, 16 }
 0x418   : > { %v9156_v48 = vsel %vm20078_vm4, %v9151_v35, %v9155_v43  ;;  %v9218_v27 = vrot.slane %v9216_v31, 4  ;;  %v9180_v43 = vsel %vm20078_vm4, %v23794_v45, %v23784_v58  ;;  %v23818_v58 = vrot.slane %v9225_v15, 5 }
 0x419   : > { %v23822_v30 = vrot.slane %v9249_v51, 5  ;;  %v9264_v45 = vshrl.u32 %v9110_v24, 16 }
 0x41d   : > { %18339 = vmatmul.mubr.msk.bf16.gmra.mrb[36].mxu1 %vm6222_vm11, %v19628_v59  ;;  %v26640_v59 = vld [vmem:[#allocation45_spill] sm:$0xff] }
 0x41e   : > { %18342 = vmatprep.mubr.msk.bf16.mxu1 %vm6222_vm11, %v19629_v8  ;;  %v9201_v8 = vshll.u32 %v26640_v59, 16 }
 0x420   : > { %v23798_v1 = vrot.slane %v9201_v8, 5  ;;  %v9231_v8 = vrot.slane %v9229_v37, 4 }
 0x422   : > { %v9232_v51 = vor.u32 %v9231_v8, %v23818_v58 }
 0x425   : > { %18343 = vmatmul.mubr.msk.bf16.gmra.mrb[40].mxu1 %vm6222_vm11, %v19630_v47  ;;  %v9205_v47 = vshrl.u32 %v26640_v59, 16  ;;  %v16882_v59 = vrot.slane %v9836_v11, 9  ;;  %v16949_v11 = vld [vmem:[%s26228_s5 + $0x4] sm:$0xf] }
 0x426   : > { %18346 = vmatprep.mubr.msk.bf16.mxu1 %vm6222_vm11, %v19631_v53  ;;  %v26641_v53 = vld [vmem:[#allocation44_spill] sm:$0xff]  ;;  %19529 = vmatprep.subr.msk.bf16.mxu0 %vm6271_vm10, %v16949_v11 }
 0x42d   : > { %18347 = vmatmul.mubr.msk.bf16.gmra.mrb[44].mxu1 %vm6222_vm11, %v19632_v46  ;;  %v9187_v46 = vshll.u32 %v26641_v53, 16  ;;  %v9243_v53 = vshll.u32 %v9107_v38, 16 }
 0x42e   : > { %18350 = vmatprep.mubr.msk.bf16.mxu1 %vm6222_vm11, %v19633_v23  ;;  %v9166_v23 = vsel %vm20078_vm4, %v9161_v28, %v9165_v52  ;;  %v23812_v28 = vld [vmem:[#allocation2 + $0xd4] sm:$0x1] }
 0x42f   : > { %v16835_v3 = vcombine.low %v9156_v48, %v9166_v23  ;;  %v9189_v39 = vrot.slane %v9187_v46, 5  ;;  %v9995_v33 = vrot.slane %v23812_v28, 5  ;;  %v19640_v23 = vld [vmem:[#allocation2 + $0xcc] sm:$0xff]   ;;  %v9213_v48 = vrot.slane %v9211_v60, 5 }
 0x430   : > { %v9245_v60 = vrot.slane %v9243_v53, 5  ;;  %v26647_v53 = vld [vmem:[#allocation50_spill] sm:$0xff] }
 0x431   : > { %v9190_v44 = vsel %vm20078_vm4, %v9185_v34, %v9189_v39 }
 0x435   : > { %18351 = vmatmul.mubr.msk.bf16.gmra.mrb[48].mxu1 %vm6222_vm11, %v19634_v50  ;;  %v9207_v50 = vrot.slane %v9205_v47, 4  ;;  %v9240_v47 = vshrl.u32 %v9107_v38, 16 }
 0x436   : > { %18354 = vmatprep.mubr.msk.bf16.mxu1 %vm6222_vm11, %v19635_v29  ;;  %v9219_v29 = vshll.u32 %v9104_v12, 16  ;;  %v26644_v12 = vld [vmem:[#allocation52_spill] sm:$0xff] }
 0x437   : > { %v9208_v7 = vor.u32 %v9207_v50, %v23798_v1  ;;  %v9273_v35 = vshll.u32 %v26644_v12, 16  ;;  %v9277_v52 = vshrl.u32 %v26644_v12, 16  ;;  %v9267_v50 = vshll.u32 %v9110_v24, 16 }
 0x438   : > { %v9221_v61 = vrot.slane %v9219_v29, 5  ;;  %v9242_v34 = vrot.slane %v9240_v47, 4 }
 0x439   : > { %v23834_v15 = vrot.slane %v9273_v35, 5  ;;  %v9279_v38 = vrot.slane %v9277_v52, 4  ;;  %v9209_v37 = vrot.slane %v9208_v7, 4  ;;  %v26646_v35 = vld [vmem:[#allocation53_spill] sm:$0xff] }
 0x43a   : > { %v9297_v52 = vshll.u32 %v26646_v35, 16 }
 0x43b   : > { %v9280_v12 = vor.u32 %v9279_v38, %v23834_v15 }
 0x43d   : > { %18355 = vmatmul.mubr.msk.bf16.gmra.mrb[52].mxu1 %vm6222_vm11, %v19636_v49  ;;  %v9253_v49 = vshrl.u32 %v26643_v16, 16  ;;  %v9222_v16 = vor.u32 %v9221_v61, %v9218_v27  ;;  %v11551_v61 = vsel %vm6271_vm10, %v16949_v11, 0  ;;  %v9116_v11 = vld [vmem:[#allocation2 + $0x6c] sm:$0xf] }
 0x43e   : > { %18358 = vmatprep.mubr.msk.bf16.mxu1 %vm6222_vm11, %v19637_v17  ;;  %v23810_v17 = vld [vmem:[#allocation2 + $0xd0] sm:$0xf]  ;;  %18435 = vmatpush3.bf16.msra.mxu0 %v11551_v61  ;;  %v10096_v61 = vsel %vm6271_vm10, %v23765_v21, 0  ;;  %v9119_v21 = vld [vmem:[#allocation2 + $0x78] sm:$0xf] }
 0x43f   : > { %v9992_v54 = vrot.slane %v23810_v17, 5  ;;  %v9255_v31 = vrot.slane %v9253_v49, 4  ;;  %v26645_v49 = vld [vmem:[#allocation47_spill] sm:$0xff] }
 0x440   : > { %v9235_v39 = vshll.u32 %v26645_v49, 16 }
 0x441   : > { %v9994_v46 = vrot.slane %v9992_v54, 4  ;;  %v23826_v56 = vsel %vm20304_vm7, %v16882_v59, %v9992_v54  ;;  %v9256_v24 = vor.u32 %v9255_v31, %v23822_v30  ;;  %v9269_v54 = vrot.slane %v9267_v50, 5 }
 0x442   : > { %v9301_v59 = vshrl.u32 %v26646_v35, 16  ;;  %v9237_v47 = vrot.slane %v9235_v39, 5  ;;  %v9233_v31 = vrot.slane %v9232_v51, 4 }
 0x443   : > { %v23832_v29 = vsel %vm20304_vm7, %v9994_v46, %v9995_v33  ;;  %v16836_v33 = vcombine.low %v9180_v43, %v9190_v44  ;;  %v9259_v46 = vshll.u32 %v26647_v53, 16  ;;  %v9246_v43 = vor.u32 %v9245_v60, %v9242_v34  ;;  %v26649_v53 = vld [vmem:[#allocation60_spill] sm:$0xff] }
 0x444   : > { %v16899_v9 = vcombine.low %v23826_v56, %v23832_v29  ;;  %v9257_v50 = vrot.slane %v9256_v24, 4  ;;  %v9312_v60 = vshrl.u32 %v9116_v11, 16  ;;  %v9315_v24 = vshll.u32 %v9116_v11, 16 }
 0x445   : > { %18359 = vmatmul.mubr.msk.bf16.gmra.mrb[56].mxu1 %vm6222_vm11, %v19638_v62  ;;  %v9199_v62 = vrot.slane %v9198_v4, 4  ;;  %v9266_v4 = vrot.slane %v9264_v45, 4  ;;  %v26648_v45 = vld [vmem:[#allocation56_spill] sm:$0xff]  ;;  %v9261_v35 = vrot.slane %v9259_v46, 5  ;;  %v9336_v46 = vshrl.u32 %v9119_v21, 16 }
 0x446   : > { %18362 = vmatprep.mubr.msk.bf16.mxu1 %vm6222_vm11, %v19639_v36  ;;  %v9113_v36 = vld [vmem:[#allocation2 + $0x60] sm:$0xf]  ;;  %v9283_v44 = vshll.u32 %v26648_v45, 16  ;;  %v9314_v45 = vrot.slane %v9312_v60, 4 }
 0x447   : > { %v9288_v7 = vshrl.u32 %v9113_v36, 16  ;;  %v9291_v27 = vshll.u32 %v9113_v36, 16  ;;  %v9204_v8 = vsel %vm20078_vm4, %v9199_v62, %v23798_v1  ;;  %v9270_v38 = vor.u32 %v9269_v54, %v9266_v4 }
 0x448   : > { %v9281_v1 = vrot.slane %v9280_v12, 4  ;;  %v23860_v62 = vrot.slane %v9297_v52, 5  ;;  %v9285_v34 = vrot.slane %v9283_v44, 5  ;;  %v9238_v4 = vsel %vm20078_vm4, %v9233_v31, %v9237_v47  ;;  %v26650_v52 = vld [vmem:[#allocation58_spill] sm:$0xff]  ;;  %v26651_v31 = vld [vmem:[#allocation61_spill] sm:$0xff] }
 0x449   : > { %v9290_v36 = vrot.slane %v9288_v7, 4  ;;  %v9293_v49 = vrot.slane %v9291_v27, 5  ;;  %v9247_v54 = vrot.slane %v9246_v43, 4  ;;  %v9262_v7 = vsel %vm20078_vm4, %v9257_v50, %v9261_v35 }
 0x44a   : > { %v9271_v27 = vrot.slane %v9270_v38, 4  ;;  %v9317_v47 = vrot.slane %v9315_v24, 5  ;;  %v9345_v43 = vshll.u32 %v26651_v31, 16  ;;  %v9349_v44 = vshrl.u32 %v26651_v31, 16 }
 0x44b   : > { %v9294_v12 = vor.u32 %v9293_v49, %v9290_v36  ;;  %v9252_v38 = vsel %vm20078_vm4, %v9247_v54, %v23822_v30 }
 0x44c   : > { %v9276_v36 = vsel %vm20078_vm4, %v9271_v27, %v23834_v15  ;;  %v16839_v49 = vcombine.low %v9252_v38, %v9262_v7  ;;  %v9347_v60 = vrot.slane %v9345_v43, 5  ;;  %v9351_v24 = vrot.slane %v9349_v44, 4  ;;  %v26655_v43 = vld [vmem:[#allocation66_spill] sm:$0xff] }
 0x44d   : > { %18363 = vmatmul.mubr.msk.bf16.gmra.mrb[60].mxu1 %vm6222_vm11, %v19640_v23  ;;  %v9214_v23 = vsel %vm20078_vm4, %v9209_v37, %v9213_v48  ;;  %v9321_v48 = vshll.u32 %v26649_v53, 16  ;;  %v9325_v37 = vshrl.u32 %v26649_v53, 16  ;;  %v9338_v53 = vrot.slane %v9336_v46, 4 }
 0x44e   : > { %18368 = vmatprep.mubr.msk.bf16.mxu1 %vm6222_vm11, %v16835_v3  ;;  %v9223_v3 = vrot.slane %v9222_v16, 4  ;;  %v9303_v16 = vrot.slane %v9301_v59, 4  ;;  %v16837_v39 = vcombine.low %v9204_v8, %v9214_v23  ;;  %v9307_v59 = vshll.u32 %v26650_v52, 16 }
 0x44f   : > { %v23877_v8 = vrot.slane %v9321_v48, 5  ;;  %v9339_v23 = vshll.u32 %v9119_v21, 16  ;;  %v9352_v31 = vor.u32 %v9351_v24, %v9347_v60  ;;  %v9355_v44 = vshll.u32 %v26655_v43, 16 }
 0x450   : > { %v9228_v51 = vsel %vm20078_vm4, %v9223_v3, %v23818_v58  ;;  %v9304_v58 = vor.u32 %v9303_v16, %v23860_v62  ;;  %v9327_v3 = vrot.slane %v9325_v37, 4  ;;  %v9122_v16 = vld [vmem:[#allocation2 + $0x84] sm:$0xf]  ;;  %v9125_v37 = vld [vmem:[#allocation2 + $0x90] sm:$0xf] }
 0x451   : > { %v16838_v50 = vcombine.low %v9228_v51, %v9238_v4  ;;  %v9341_v48 = vrot.slane %v9339_v23, 5  ;;  %v9318_v51 = vor.u32 %v9317_v47, %v9314_v45  ;;  %v9360_v15 = vshrl.u32 %v9122_v16, 16  ;;  %v26653_v4 = vld [vmem:[#allocation69_spill] sm:$0xff] }
 0x452   : > { %v9328_v35 = vor.u32 %v9327_v3, %v23877_v8  ;;  %v9363_v21 = vshll.u32 %v9122_v16, 16  ;;  %v9369_v54 = vshll.u32 %v26653_v4, 16  ;;  %v9373_v7 = vshrl.u32 %v26653_v4, 16 }
 0x453   : > { %v9384_v27 = vshrl.u32 %v9125_v37, 16  ;;  %v9342_v23 = vor.u32 %v9341_v48, %v9338_v53  ;;  %v9319_v45 = vrot.slane %v9318_v51, 4  ;;  %v9353_v53 = vrot.slane %v9352_v31, 4 }
 0x454   : > { %v9329_v46 = vrot.slane %v9328_v35, 4  ;;  %v9365_v38 = vrot.slane %v9363_v21, 5  ;;  %v9357_v21 = vrot.slane %v9355_v44, 5 }
 0x455   : > { %18369 = vmatmul.mubr.msk.bf16.vlgmr.msra.gmra.mrb[32].mxu1 %vm6222_vm11, %v16836_v33  ;;  %v9286_v33 = vsel %vm20078_vm4, %v9281_v1, %v9285_v34  ;;  %v9309_v1 = vrot.slane %v9307_v59, 5  ;;  %v26652_v34 = vld [vmem:[#allocation65_spill] sm:$0xff]  ;;  %v9386_v16 = vrot.slane %v9384_v27, 4  ;;  %v9324_v35 = vsel %vm20078_vm4, %v9319_v45, %v23877_v8  ;;  %v26656_v27 = vld [vmem:[#allocation72_spill] sm:$0xff] }
 0x456   : > { %18401 = vmatpush3.bf16.msra.mxu1 %v10096_v61  ;;  %18372 = vmatprep.mubr.msk.bf16.mxu1 %vm6222_vm11, %v16837_v39  ;;  %v16840_v11 = vcombine.low %v9276_v36, %v9286_v33  ;;  %v9295_v61 = vrot.slane %v9294_v12, 4  ;;  %v9305_v39 = vrot.slane %v9304_v58, 4  ;;  %v9331_v30 = vshll.u32 %v26652_v34, 16  ;;  %v26654_v12 = vld [vmem:[#allocation70_spill] sm:$0xff] }
 0x457   : > { %v9387_v33 = vshll.u32 %v9125_v37, 16  ;;  %v9393_v58 = vshll.u32 %v26654_v12, 16  ;;  %v9397_v52 = vshrl.u32 %v26654_v12, 16  ;;  %v23901_v36 = vrot.slane %v9369_v54, 5 }
 0x458   : > { %v9300_v59 = vsel %vm20078_vm4, %v9295_v61, %v23860_v62  ;;  %v9310_v3 = vsel %vm20078_vm4, %v9305_v39, %v9309_v1  ;;  %v9333_v47 = vrot.slane %v9331_v30, 5  ;;  %v9128_v61 = vld [vmem:[#allocation2 + $0x9c] sm:$0xf]  ;;  %v9343_v39 = vrot.slane %v9342_v23, 4 }
 0x459   : > { %v9389_v37 = vrot.slane %v9387_v33, 5  ;;  %v23903_v34 = vrot.slane %v9393_v58, 5  ;;  %v9399_v62 = vrot.slane %v9397_v52, 4  ;;  %v16841_v4 = vcombine.low %v9300_v59, %v9310_v3  ;;  %v9131_v58 = vld [vmem:[#allocation2 + $0xa8] sm:$0xf] }
 0x45a   : > { %v9334_v1 = vsel %vm20078_vm4, %v9329_v46, %v9333_v47  ;;  %v9408_v30 = vshrl.u32 %v9128_v61, 16  ;;  %v9411_v24 = vshll.u32 %v9128_v61, 16  ;;  %v9379_v33 = vshll.u32 %v26656_v27, 16 }
 0x45b   : > { %v9390_v54 = vor.u32 %v9389_v37, %v9386_v16  ;;  %v9417_v8 = vshll.u32 %v23481_v10, 16  ;;  %v9421_v12 = vshrl.u32 %v23481_v10, 16  ;;  %v9358_v52 = vsel %vm20078_vm4, %v9353_v53, %v9357_v21  ;;  %v9137_v21 = vld [vmem:[#allocation2 + $0xc0] sm:$0xf] }
 0x45c   : > { %v9403_v59 = vshll.u32 %v23453_v22, 16  ;;  %v9441_v3 = vshll.u32 %v23472_v26, 16  ;;  %v9445_v46 = vshrl.u32 %v23472_v26, 16  ;;  %v9410_v47 = vrot.slane %v9408_v30, 4  ;;  %v9134_v26 = vld [vmem:[#allocation2 + $0xb4] sm:$0xf] }
 0x45d   : > { %18373 = vmatmul.mubr.msk.bf16.gmra.mrb[36].mxu1 %vm6222_vm11, %v16838_v50  ;;  %v9362_v50 = vrot.slane %v9360_v15, 4  ;;  %v16842_v15 = vcombine.low %v9324_v35, %v9334_v1  ;;  %v9391_v31 = vrot.slane %v9390_v54, 4  ;;  %v9432_v44 = vshrl.u32 %v9131_v58, 16 }
 0x45e   : > { %18376 = vmatprep.mubr.msk.bf16.mxu1 %vm6222_vm11, %v16839_v49  ;;  %v9375_v49 = vrot.slane %v9373_v7, 4  ;;  %v9400_v7 = vor.u32 %v9399_v62, %v23903_v34  ;;  %v9381_v10 = vrot.slane %v9379_v33, 5  ;;  %v9423_v16 = vrot.slane %v9421_v12, 4 }
 0x45f   : > { %v9366_v48 = vor.u32 %v9365_v38, %v9362_v50  ;;  %v9435_v50 = vshll.u32 %v9131_v58, 16  ;;  %v9405_v22 = vrot.slane %v9403_v59, 5  ;;  %v23927_v37 = vrot.slane %v9441_v3, 5  ;;  %v19944_v58 = vld [vmem:[#allocation2 + $0xb0] sm:$0x1] }
 0x460   : > { %v9376_v51 = vor.u32 %v9375_v49, %v23901_v36  ;;  %v9401_v43 = vrot.slane %v9400_v7, 4  ;;  %v23924_v49 = vrot.slane %v9417_v8, 5  ;;  %v9447_v62 = vrot.slane %v9445_v46, 4  ;;  %v9140_v46 = vld [vmem:[#allocation2 + $0xcc] sm:$0xf] }
 0x461   : > { %v9367_v23 = vrot.slane %v9366_v48, 4  ;;  %v9396_v35 = vsel %vm20078_vm4, %v9391_v31, %v23903_v34  ;;  %v9434_v48 = vrot.slane %v9432_v44, 4  ;;  %v9489_v7 = vshll.u32 %v23510_v63, 16 }
 0x462   : > { %v9377_v45 = vrot.slane %v9376_v51, 4  ;;  %v9406_v53 = vsel %vm20078_vm4, %v9401_v43, %v9405_v22  ;;  %v9437_v51 = vrot.slane %v9435_v50, 5  ;;  %v9424_v30 = vor.u32 %v9423_v16, %v23924_v49 }
 0x463   : > { %v9372_v61 = vsel %vm20078_vm4, %v9367_v23, %v23901_v36  ;;  %v9465_v36 = vshll.u32 %v23508_v57, 16  ;;  %v9448_v54 = vor.u32 %v9447_v62, %v23927_v37  ;;  %v9493_v34 = vshrl.u32 %v23510_v63, 16 }
 0x464   : > { %v16845_v27 = vcombine.low %v9396_v35, %v9406_v53  ;;  %v9438_v12 = vor.u32 %v9437_v51, %v9434_v48  ;;  %v9480_v59 = vshrl.u32 %v9137_v21, 16  ;;  %v9483_v3 = vshll.u32 %v9137_v21, 16  ;;  %v19945_v53 = vld [vmem:[#allocation2 + $0xbc] sm:$0x1] }
 0x465   : > { %18377 = vmatmul.mubr.msk.bf16.gmra.mrb[40].mxu1 %vm6222_vm11, %v16840_v11  ;;  %v9348_v11 = vsel %vm20078_vm4, %v9343_v39, %v9347_v60  ;;  %v9413_v60 = vrot.slane %v9411_v24, 5  ;;  %v9427_v39 = vshll.u32 %v23483_v41, 16  ;;  %v9456_v24 = vshrl.u32 %v9134_v26, 16 }
 0x466   : > { %18380 = vmatprep.mubr.msk.bf16.mxu1 %vm6222_vm11, %v16841_v4  ;;  %v16843_v38 = vcombine.low %v9348_v11, %v9358_v52  ;;  %v9382_v4 = vsel %vm20078_vm4, %v9377_v45, %v9381_v10  ;;  %v9459_v41 = vshll.u32 %v9134_v26, 16  ;;  %v9451_v52 = vshll.u32 %v19944_v58, 16 }
 0x467   : > { %v9414_v1 = vor.u32 %v9413_v60, %v9410_v47  ;;  %v16844_v11 = vcombine.low %v9372_v61, %v9382_v4  ;;  %v9429_v8 = vrot.slane %v9427_v39, 5  ;;  %v9425_v23 = vrot.slane %v9424_v30, 4 }
 0x468   : > { %v9467_v45 = vrot.slane %v9465_v36, 5  ;;  %v9449_v60 = vrot.slane %v9448_v54, 4  ;;  %v9461_v31 = vrot.slane %v9459_v41, 5  ;;  %v9491_v43 = vrot.slane %v9489_v7, 5  ;;  %v19946_v54 = vld [vmem:[#allocation2 + $0xc8] sm:$0x1] }
 0x469   : > { %v9415_v33 = vrot.slane %v9414_v1, 4  ;;  %v9495_v63 = vrot.slane %v9493_v34, 4  ;;  %v9504_v44 = vshrl.u32 %v9140_v46, 16  ;;  %v9507_v50 = vshll.u32 %v9140_v46, 16 }
 0x46a   : > { %v9517_v10 = vshrl.u32 %v23810_v17, 16  ;;  %v9439_v16 = vrot.slane %v9438_v12, 4  ;;  %v9453_v22 = vrot.slane %v9451_v52, 5  ;;  %v9482_v62 = vrot.slane %v9480_v59, 4 }
 0x46b   : > { %v9485_v26 = vrot.slane %v9483_v3, 5  ;;  %v9420_v61 = vsel %vm20078_vm4, %v9415_v33, %v23924_v49  ;;  %v9430_v4 = vsel %vm20078_vm4, %v9425_v23, %v9429_v8  ;;  %v9475_v48 = vshll.u32 %v19945_v53, 16  ;;  %v26670_v53 = vld [vmem:[#allocation67_spill] sm:$0xff] }
 0x46c   : > { %v9454_v39 = vsel %vm20078_vm4, %v9449_v60, %v9453_v22  ;;  %v9496_v51 = vor.u32 %v9495_v63, %v9491_v43  ;;  %v9509_v30 = vrot.slane %v9507_v50, 5  ;;  %v9519_v36 = vrot.slane %v9517_v10, 4 }
 0x46d   : > { %18381 = vmatmul.mubr.msk.bf16.gmra.mrb[44].mxu1 %vm6222_vm11, %v16842_v15  ;;  %v9469_v15 = vshrl.u32 %v23508_v57, 16  ;;  %v9458_v57 = vrot.slane %v9456_v24, 4  ;;  %v9444_v49 = vsel %vm20078_vm4, %v9439_v16, %v23927_v37  ;;  %v9486_v21 = vor.u32 %v9485_v26, %v9482_v62  ;;  %v26661_v16 = vld [vmem:[#allocation55_spill] sm:$0xff]  ;;  %v26663_v62 = vld [vmem:[#allocation57_spill] sm:$0xff] }
 0x46e   : > { %18384 = vmatprep.mubr.msk.bf16.mxu1 %vm6222_vm11, %v16843_v38  ;;  %v9513_v38 = vshll.u32 %v23810_v17, 16  ;;  %v9506_v17 = vrot.slane %v9504_v44, 4  ;;  %v9499_v41 = vshll.u32 %v19946_v54, 16  ;;  %v16847_v7 = vcombine.low %v9444_v49, %v9454_v39  ;;  %v26664_v26 = vld [vmem:[#allocation59_spill] sm:$0xff]  ;;  %v26680_v54 = vld [vmem:[#allocation76_spill] sm:$0xff] }
 0x46f   : > { %v9471_v47 = vrot.slane %v9469_v15, 4  ;;  %v9462_v35 = vor.u32 %v9461_v31, %v9458_v57  ;;  %v16846_v15 = vcombine.low %v9420_v61, %v9430_v4  ;;  %v9523_v58 = vshll.u32 %v23812_v28, 16  ;;  %v26666_v4 = vld [vmem:[#allocation62_spill] sm:$0xff]  ;;  %v26678_v49 = vld [vmem:[#allocation75_spill] sm:$0xff] }
 0x470   : > { %v9515_v24 = vrot.slane %v9513_v38, 5  ;;  %v9510_v8 = vor.u32 %v9509_v30, %v9506_v17  ;;  %v9487_v52 = vrot.slane %v9486_v21, 4  ;;  %v9501_v59 = vrot.slane %v9499_v41, 5  ;;  %v26658_v38 = vld [vmem:[#allocation51_spill] sm:$0xff]  ;;  %v26681_v41 = vld [vmem:[#allocation77_spill] sm:$0xff] }
 0x471   : > { %v9472_v1 = vor.u32 %v9471_v47, %v9467_v45  ;;  %v9463_v33 = vrot.slane %v9462_v35, 4  ;;  %v9525_v47 = vrot.slane %v9523_v58, 5  ;;  %v26665_v61 = vcombine.low %v26663_v62, %v26664_v26  ;;  %v26669_v35 = vld [vmem:[#allocation63_spill] sm:$0xff] }
 0x472   : > { %v9520_v12 = vor.u32 %v9519_v36, %v9515_v24  ;;  %v9511_v23 = vrot.slane %v9510_v8, 4  ;;  %v9492_v31 = vsel %vm20078_vm4, %v9487_v52, %v9491_v43  ;;  %v26660_v43 = vld [vmem:[#allocation54_spill] sm:$0xff]  ;;  %v26673_v17 = vld [vmem:[#allocation71_spill] sm:$0xff]  ;;  %v26679_v21 = vcombine.low %v23476_v18, %v26678_v49  ;;  %v26687_v8 = vld [vmem:[#allocation81_spill] sm:$0xff] }
 0x473   : > { %v9473_v34 = vrot.slane %v9472_v1, 4  ;;  %v9468_v46 = vsel %vm20078_vm4, %v9463_v33, %v9467_v45  ;;  %v26657_v45 = vld [vmem:[#allocation49_spill] sm:$0xff]  ;;  %v26662_v22 = vcombine.low %v26660_v43, %v26661_v16  ;;  %v26667_v1 = vld [vmem:[#allocation64_spill] sm:$0xff]  ;;  %v26676_v36 = vld [vmem:[#allocation74_spill] sm:$0xff]  ;;  %v26689_v18 = vcombine.low %v23565_v55, %v23569_v42 }
 0x474   : > { %v9521_v57 = vrot.slane %v9520_v12, 4  ;;  %v9516_v28 = vsel %vm20078_vm4, %v9511_v23, %v9515_v24  ;;  %v26659_v10 = vcombine.low %v26657_v45, %v26658_v38  ;;  %v26668_v39 = vcombine.low %v26666_v4, %v26667_v1  ;;  %v26675_v24 = vld [vmem:[#allocation73_spill] sm:$0xff]  ;;  %v26686_v33 = vld [vmem:[#allocation80_spill] sm:$0xff]  ;;  %v11051_v42 = vld [vmem:[%s26228_s5] sm:$0xf] }
 0x475   : > { %18385 = vmatmul.mubr.msk.bf16.gmra.mrb[48].mxu1 %vm6222_vm11, %v16844_v11  ;;  %v9477_v11 = vrot.slane %v9475_v48, 5  ;;  %v26671_v48 = vcombine.low %v26669_v35, %v26670_v53  ;;  %v26688_v12 = vcombine.low %v26686_v33, %v26687_v8  ;;  %v11082_v58 = vshrl.u32 %v11020_v5, 16  ;;  %19530 = vmatprep.subr.msk.bf16.mxu0 %vm6271_vm10, %v11051_v42  ;;  %v24054_v23 = vld [vmem:[%s26227_s4] ss:$0 sm:$0xff] }
 0x476   : > { %18388 = vmatprep.mubr.msk.bf16.mxu1 %vm6222_vm11, %v16845_v27  ;;  %v9497_v27 = vrot.slane %v9496_v51, 4  ;;  %v9526_v44 = vsel %vm20078_vm4, %v9521_v57, %v9525_v47  ;;  %v26672_v51 = vld [vmem:[#allocation68_spill] sm:$0xff]  ;;  %v11088_v55 = vshll.u32 %v11052_v14, 16 }
 0x477   : > { %v9478_v37 = vsel %vm20078_vm4, %v9473_v34, %v9477_v11  ;;  %v16850_v50 = vcombine.low %v9516_v28, %v9526_v44  ;;  %v26674_v30 = vcombine.low %v26672_v51, %v26673_v17  ;;  %v26683_v34 = vld [vmem:[#allocation78_spill] sm:$0xff]  ;;  %v26684_v11 = vld [vmem:[#allocation79_spill] sm:$0xff]  ;;  %v11084_v52 = vrot.slane %v11082_v58, 4 }
 0x478   : > { %v9502_v3 = vsel %vm20078_vm4, %v9497_v27, %v9501_v59  ;;  %v16848_v60 = vcombine.low %v9468_v46, %v9478_v37  ;;  %v26685_v27 = vcombine.low %v26683_v34, %v26684_v11 }
 0x479   : > { %v16849_v63 = vcombine.low %v9492_v31, %v9502_v3 }
 0x47d   : > { %18389 = vmatmul.mubr.msk.bf16.gmra.mrb[52].mxu1 %vm6222_vm11, %v16846_v15  ;;  %v26677_v15 = vcombine.low %v26675_v24, %v26676_v36 }
 0x47e   : > { %18392 = vmatprep.mubr.msk.bf16.mxu1 %vm6222_vm11, %v16847_v7  ;;  %v26682_v7 = vcombine.low %v26680_v54, %v26681_v41 }
 0x485   : > { %18393 = vmatmul.mubr.msk.bf16.gmra.mrb[56].mxu1 %vm6222_vm11, %v16848_v60 }
 0x486   : > { %18396 = vmatprep.mubr.msk.bf16.mxu1 %vm6222_vm11, %v16849_v63 }
 0x48d   : > { %18397 = vmatmul.mubr.msk.bf16.gmra.mrb[60].mxu1 %vm6222_vm11, %v16850_v50 }
 0x48e   : > { %18402 = vmatprep.mubr.msk.bf16.mxu1 %vm6222_vm11, %v26659_v10 }
 0x495   : > { %18403 = vmatmul.mubr.msk.bf16.vlgmr.msra.gmra.mrb[32].mxu1 %vm6222_vm11, %v26662_v22 }
 0x496   : > { %18406 = vmatprep.mubr.msk.bf16.mxu1 %vm6222_vm11, %v26665_v61 }
 0x49d   : > { %18407 = vmatmul.mubr.msk.bf16.gmra.mrb[36].mxu1 %vm6222_vm11, %v26668_v39 }
 0x49e   : > { %18410 = vmatprep.mubr.msk.bf16.mxu1 %vm6222_vm11, %v26671_v48 }
 0x4a5   : > { %18411 = vmatmul.mubr.msk.bf16.gmra.mrb[40].mxu1 %vm6222_vm11, %v26674_v30  ;;  %v24066_v30 = vsel %vm6271_vm10, %v11051_v42, 0 }
 0x4a6   : > { %18414 = vmatprep.mubr.msk.bf16.mxu1 %vm6222_vm11, %v26677_v15 }
 0x4ad   : > { %18415 = vmatmul.mubr.msk.bf16.gmra.mrb[44].mxu1 %vm6222_vm11, %v26679_v21 }
 0x4ae   : > { %18418 = vmatprep.mubr.msk.bf16.mxu1 %vm6222_vm11, %v26682_v7 }
 0x4b5   : > { %18419 = vmatmul.mubr.msk.bf16.gmra.mrb[48].mxu1 %vm6222_vm11, %v26685_v27 }
 0x4b6   : > { %18422 = vmatprep.mubr.msk.bf16.mxu1 %vm6222_vm11, %v26688_v12 }
 0x4bd   : > { %18423 = vmatmul.mubr.msk.bf16.gmra.mrb[52].mxu1 %vm6222_vm11, %v16895_v19  ;;  %v11069_v19 = vshrl.u32 %v11019_v25, 16 }
 0x4be   : > { %18426 = vmatprep.mubr.msk.bf16.mxu1 %vm6222_vm11, %v16896_v20  ;;  %v11078_v20 = vshll.u32 %v11020_v5, 16 }
 0x4bf   : > { %v11071_v6 = vrot.slane %v11069_v19, 4 }
 0x4c1   : > { %v11075_v56 = vor.u32 %v11074_v0, %v11071_v6 }
 0x4c3   : > { %v11076_v59 = vrot.slane %v11075_v56, 4 }
 0x4c5   : > { %18427 = vmatmul.mubr.msk.bf16.gmra.mrb[56].mxu1 %vm6222_vm11, %v26689_v18 }
 0x4c6   : > { %18430 = vmatprep.mubr.msk.bf16.mxu1 %vm6222_vm11, %v16898_v40  ;;  %v11080_v40 = vrot.slane %v11078_v20, 5 }
 0x4c8   : > { %v11085_v29 = vor.u32 %v11084_v52, %v11080_v40  ;;  %v11081_v3 = vsel %vm20078_vm4, %v11076_v59, %v11080_v40 }
 0x4ca   : > { %v11086_v37 = vrot.slane %v11085_v29, 4 }
 0x4cd   : > { %18431 = vmatmul.mubr.msk.bf16.gmra.mrb[60].mxu1 %vm6222_vm11, %v16899_v9  ;;  %v11090_v9 = vrot.slane %v11088_v55, 5 }
 0x4cf   : > { %v11091_v46 = vsel %vm20078_vm4, %v11086_v37, %v11090_v9 }
 0x4d0   : > { %v16950_v57 = vcombine.low %v11081_v3, %v11091_v46 }
 0x4d2   : > { %18436 = vmatprep.mubr.msk.bf16.mxu0 %vm6222_vm11, %v16950_v57 }
 0x568   : > { %v18404_v47 = vpop.f32.mrb[32].mxu1 }
 0x569   : > { %v10300_v60 = vadd.f32 %v18404_v47, %v24054_v23  ;;  %v10132_v31 = vpop.f32.mrb[33].mxu1 }
 0x56a   : > { %v10298_v63 = vadd.f32 %v24054_v23, %v10132_v31  ;;  %v18405_v28 = vpop.f32.mrb[34].mxu1 }
 0x56b   : > { %v10364_v44 = vmul.f32 0.70710677, %v10300_v60  ;;  %v10301_v50 = vadd.f32 %v18405_v28, %v24054_v23  ;;  %v10135_v45 = vpop.f32.mrb[35].mxu1  ;;  %v10332_v36 = vmul.f32 0.5, %v10300_v60  ;;  %v10914_v60 = vld [vmem:[#allocation3 + $0x18] sm:$0xf] }
 0x56c   : > { %v10362_v38 = vmul.f32 0.70710677, %v10298_v63  ;;  %v10299_v10 = vadd.f32 %v24054_v23, %v10135_v45  ;;  %v10330_v15 = vmul.f32 0.5, %v10298_v63 }
 0x56d   : > { %19750 = verf.f32 %v10364_v44  ;;  %v10365_v43 = vmul.f32 0.70710677, %v10301_v50  ;;  %v10333_v49 = vmul.f32 0.5, %v10301_v50 }
 0x56e   : > { %19752 = verf.f32 %v10362_v38  ;;  %v10363_v16 = vmul.f32 0.70710677, %v10299_v10  ;;  %v10331_v21 = vmul.f32 0.5, %v10299_v10 }
 0x56f   : > { %19754 = verf.f32 %v10365_v43 }
 0x570   : > { %19756 = verf.f32 %v10363_v16  ;;  %v18408_v22 = vpop.f32.mrb[36].mxu1 }
 0x571   : > { %v10304_v62 = vadd.f32 %v18408_v22, %v24054_v23  ;;  %v10148_v26 = vpop.f32.mrb[37].mxu1 }
 0x572   : > { %v10302_v61 = vadd.f32 %v24054_v23, %v10148_v26  ;;  %v18409_v4 = vpop.f32.mrb[38].mxu1 }
 0x573   : > { %v10368_v1 = vmul.f32 0.70710677, %v10304_v62  ;;  %v10305_v39 = vadd.f32 %v18409_v4, %v24054_v23  ;;  %v10151_v35 = vpop.f32.mrb[39].mxu1  ;;  %v10336_v7 = vmul.f32 0.5, %v10304_v62 }
 0x574   : > { %v10366_v53 = vmul.f32 0.70710677, %v10302_v61  ;;  %v10303_v48 = vadd.f32 %v24054_v23, %v10151_v35  ;;  %v10334_v34 = vmul.f32 0.5, %v10302_v61  ;;  %v10907_v35 = vld [vmem:[#allocation3 + $0xc] sm:$0xf] }
 0x575   : > { %19758 = verf.f32 %v10368_v1  ;;  %v10369_v51 = vmul.f32 0.70710677, %v10305_v39  ;;  %v24068_v11 = vmul.f32 0.5, %v10305_v39 }
 0x576   : > { %19760 = verf.f32 %v10366_v53  ;;  %v10367_v17 = vmul.f32 0.70710677, %v10303_v48  ;;  %v24070_v12 = vmul.f32 0.5, %v10303_v48 }
 0x577   : > { %v19751_v24 = vpop.eup %19750  ;;  %19762 = verf.f32 %v10369_v51 }
 0x578   : > { %v19753_v54 = vpop.eup %19752  ;;  %v10428_v41 = vadd.f32 1.0, %v19751_v24  ;;  %v18412_v27 = vpop.f32.mrb[40].mxu1  ;;  %19764 = verf.f32 %v10367_v17 }
 0x579   : > { %v19755_v33 = vpop.eup %19754  ;;  %v10426_v8 = vadd.f32 1.0, %v19753_v54  ;;  %v10308_v18 = vadd.f32 %v18412_v27, %v24054_v23  ;;  %v10164_v25 = vpop.f32.mrb[41].mxu1 }
 0x57a   : > { %v19757_v5 = vpop.eup %19756  ;;  %v10460_v14 = vmul.f32 %v10428_v41, %v10332_v36  ;;  %v10429_v19 = vadd.f32 1.0, %v19755_v33  ;;  %v10306_v2 = vadd.f32 %v24054_v23, %v10164_v25  ;;  %v18413_v20 = vpop.f32.mrb[42].mxu1  ;;  %v10911_v25 = vld [vmem:[#allocation3 + $0x14] sm:$0x1] }
 0x57b   : > { %v10458_v58 = vmul.f32 %v10426_v8, %v10330_v15  ;;  %v10427_v55 = vadd.f32 1.0, %v19757_v5  ;;  %v24074_v42 = vmul.f32 0.5, %v10308_v18  ;;  %v10372_v6 = vmul.f32 0.70710677, %v10308_v18  ;;  %v24076_v0 = vpop.f32.mrb[43].mxu1 }
 0x57c   : > { %v17333_v40 = vpack.c.bf16 %v10460_v14, %v10460_v14  ;;  %v10461_v52 = vmul.f32 %v10429_v19, %v10333_v49  ;;  %v24078_v56 = vmul.f32 0.5, %v10306_v2  ;;  %v10370_v29 = vmul.f32 0.70710677, %v10306_v2  ;;  %v10918_v15 = vld [vmem:[#allocation3 + $0x20] sm:$0x1] }
 0x57d   : > { %v17331_v9 = vpack.c.bf16 %v10458_v58, %v10458_v58  ;;  %v10459_v59 = vmul.f32 %v10427_v55, %v10331_v21  ;;  %19766 = verf.f32 %v10372_v6  ;;  %v24081_v37 = vadd.f32 %v18413_v20, %v24054_v23 }
 0x57e   : > { %v10604_v3 = vshrl.u32 %v17333_v40, 16  ;;  %v10607_v46 = vshll.u32 %v17333_v40, 16  ;;  %v17334_v57 = vpack.c.bf16 %v10461_v52, %v10461_v52  ;;  %19768 = verf.f32 %v10370_v29 }
 0x57f   : > { %v19759_v47 = vpop.eup %19758  ;;  %v10587_v31 = vshrl.u32 %v17331_v9, 16  ;;  %v10590_v63 = vshll.u32 %v17331_v9, 16  ;;  %v17332_v28 = vpack.c.bf16 %v10459_v59, %v10459_v59  ;;  %v24084_v44 = vmul.f32 0.5, %v24081_v37  ;;  %v10928_v59 = vld [vmem:[#allocation3 + $0x30] sm:$0xf] }
 0x580   : > { %v19761_v50 = vpop.eup %19760  ;;  %v10606_v45 = vrot.slane %v10604_v3, 7  ;;  %v10612_v38 = vshrl.u32 %v17334_v57, 16  ;;  %v10615_v10 = vshll.u32 %v17334_v57, 16  ;;  %v10432_v43 = vadd.f32 1.0, %v19759_v47  ;;  %v24086_v16 = vpop.f32.mrb[44].mxu1 }
 0x581   : > { %v10589_v22 = vrot.slane %v10587_v31, 7  ;;  %v10595_v62 = vshrl.u32 %v17332_v28, 16  ;;  %v10598_v26 = vshll.u32 %v17332_v28, 16  ;;  %v10430_v61 = vadd.f32 1.0, %v19761_v50  ;;  %v24088_v4 = vpop.f32.mrb[45].mxu1  ;;  %v19763_v17 = vpop.eup %19762 }
 0x582   : > { %v10609_v1 = vor.u32 %v10607_v46, %v10606_v45  ;;  %v10610_v39 = vrot.slane %v10606_v45, 4  ;;  %v10614_v53 = vrot.slane %v10612_v38, 7  ;;  %v10464_v48 = vmul.f32 %v10432_v43, %v10336_v7  ;;  %v24090_v51 = vpop.f32.mrb[46].mxu1  ;;  %v19765_v41 = vpop.eup %19764 }
 0x583   : > { %v10592_v24 = vor.u32 %v10590_v63, %v10589_v22  ;;  %v10593_v36 = vrot.slane %v10589_v22, 4  ;;  %v10597_v49 = vrot.slane %v10595_v62, 7  ;;  %v10462_v21 = vmul.f32 %v10430_v61, %v10334_v34  ;;  %v24092_v54 = vpop.f32.mrb[47].mxu1 }
 0x584   : > { %v10915_v33 = vsel %vm22021_vm15, %v10609_v1, %v10914_v60  ;;  %v10617_v8 = vor.u32 %v10615_v10, %v10614_v53  ;;  %v10619_v18 = vrot.slane %v10614_v53, 4  ;;  %v17337_v5 = vpack.c.bf16 %v10464_v48, %v10464_v48 }
 0x585   : > { %10916 = vst [vmem:[#allocation3 + $0x18] sm:$0xf] %v10915_v33  ;;  %v10908_v7 = vsel %vm22021_vm15, %v10592_v24, %v10907_v35  ;;  %v10600_v14 = vor.u32 %v10598_v26, %v10597_v49  ;;  %v10602_v19 = vrot.slane %v10597_v49, 4  ;;  %v17335_v2 = vpack.c.bf16 %v10462_v21, %v10462_v21  ;;  %v10921_v26 = vld [vmem:[#allocation3 + $0x24] sm:$0xf] }
 0x586   : > { %10909 = vst [vmem:[#allocation3 + $0xc] sm:$0xf] %v10908_v7  ;;  %v10618_v34 = vsel %vm22029_vm0, %v10610_v39, %v10617_v8  ;;  %v10919_v55 = vsel %vm22036_vm1, %v10619_v18, %v10918_v15  ;;  %v10638_v6 = vshrl.u32 %v17337_v5, 16  ;;  %v10641_v40 = vshll.u32 %v17337_v5, 16  ;;  %v10932_v33 = vld [vmem:[#allocation3 + $0x38] sm:$0x1] }
 0x587   : > { %v19767_v52 = vpop.eup %19766  ;;  %10917 = vst.msk [vmem:[#allocation3 + $0x1c] sm:$0xf] %vm334_vm8, %v10618_v34  ;;  %10920 = vst [vmem:[#allocation3 + $0x20] sm:$0x1] %v10919_v55  ;;  %v10601_v29 = vsel %vm22029_vm0, %v10593_v36, %v10600_v14  ;;  %v10912_v9 = vsel %vm22036_vm1, %v10602_v19, %v10911_v25  ;;  %v10621_v3 = vshrl.u32 %v17335_v2, 16  ;;  %v10624_v46 = vshll.u32 %v17335_v2, 16 }
 0x588   : > { %v19769_v57 = vpop.eup %19768  ;;  %10910 = vst.msk [vmem:[#allocation3 + $0x10] sm:$0xf] %vm334_vm8, %v10601_v29  ;;  %10913 = vst [vmem:[#allocation3 + $0x14] sm:$0x1] %v10912_v9  ;;  %v24108_v47 = vrot.slane %v10638_v6, 7  ;;  %v10433_v60 = vadd.f32 1.0, %v19763_v17  ;;  %v10307_v10 = vadd.f32 %v24054_v23, %v24076_v0  ;;  %v10312_v34 = vadd.f32 %v24086_v16, %v24054_v23 }
 0x589   : > { %v10431_v31 = vadd.f32 1.0, %v19765_v41  ;;  %v10436_v63 = vadd.f32 1.0, %v19767_v52  ;;  %v24110_v28 = vpop.f32.mrb[48].mxu1  ;;  %v10623_v50 = vrot.slane %v10621_v3, 7  ;;  %v10434_v45 = vadd.f32 1.0, %v19769_v57 }
 0x58a   : > { %v10373_v38 = vmul.f32 0.70710677, %v24081_v37  ;;  %v24115_v43 = vpop.f32.mrb[49].mxu1  ;;  %v10643_v22 = vor.u32 %v10641_v40, %v24108_v47  ;;  %v10644_v62 = vrot.slane %v24108_v47, 4  ;;  %v10465_v61 = vmul.f32 %v10433_v60, %v24068_v11  ;;  %v10925_v8 = vld [vmem:[#allocation3 + $0x2c] sm:$0x1] }
 0x58b   : > { %v10463_v1 = vmul.f32 %v10431_v31, %v24070_v12  ;;  %v24121_v39 = vpop.f32.mrb[50].mxu1  ;;  %v10626_v35 = vor.u32 %v10624_v46, %v10623_v50  ;;  %v10627_v53 = vrot.slane %v10623_v50, 4  ;;  %v10468_v37 = vmul.f32 %v10436_v63, %v24074_v42  ;;  %v10942_v40 = vld [vmem:[#allocation3 + $0x48] sm:$0xf]  ;;  %v10935_v16 = vld [vmem:[#allocation3 + $0x3c] sm:$0xf] }
 0x58c   : > { %v10466_v48 = vmul.f32 %v10434_v45, %v24078_v56  ;;  %v24125_v0 = vpop.f32.mrb[51].mxu1  ;;  %v10929_v17 = vsel %vm22021_vm15, %v10643_v22, %v10928_v59  ;;  %v17338_v24 = vpack.c.bf16 %v10465_v61, %v10465_v61  ;;  %19770 = verf.f32 %v10373_v38 }
 0x58d   : > { %v17336_v36 = vpack.c.bf16 %v10463_v1, %v10463_v1  ;;  %10930 = vst [vmem:[#allocation3 + $0x30] sm:$0xf] %v10929_v17  ;;  %v10922_v11 = vsel %vm22021_vm15, %v10626_v35, %v10921_v26  ;;  %v17341_v12 = vpack.c.bf16 %v10468_v37, %v10468_v37  ;;  %v24131_v49 = vmul.f32 0.5, %v10307_v10 }
 0x58e   : > { %v17339_v15 = vpack.c.bf16 %v10466_v48, %v10466_v48  ;;  %10923 = vst [vmem:[#allocation3 + $0x24] sm:$0xf] %v10922_v11  ;;  %v10646_v42 = vshrl.u32 %v17338_v24, 16  ;;  %v10649_v21 = vshll.u32 %v17338_v24, 16  ;;  %v10371_v2 = vmul.f32 0.70710677, %v10307_v10 }
 0x58f   : > { %v10629_v56 = vshrl.u32 %v17336_v36, 16  ;;  %v10632_v41 = vshll.u32 %v17336_v36, 16  ;;  %v10672_v18 = vshrl.u32 %v17341_v12, 16  ;;  %v10675_v25 = vshll.u32 %v17341_v12, 16 }
 0x590   : > { %v10655_v5 = vshrl.u32 %v17339_v15, 16  ;;  %v10658_v7 = vshll.u32 %v17339_v15, 16  ;;  %v10648_v14 = vrot.slane %v10646_v42, 7  ;;  %v24135_v55 = vpop.f32.mrb[52].mxu1  ;;  %v10310_v29 = vadd.f32 %v24054_v23, %v24088_v4 }
 0x591   : > { %v10631_v19 = vrot.slane %v10629_v56, 7  ;;  %v24137_v6 = vrot.slane %v10672_v18, 7  ;;  %v10313_v9 = vadd.f32 %v24090_v51, %v24054_v23  ;;  %v24145_v59 = vpop.f32.mrb[53].mxu1  ;;  %19772 = verf.f32 %v10371_v2 }
 0x592   : > { %v24139_v52 = vrot.slane %v10655_v5, 7  ;;  %v10651_v3 = vor.u32 %v10649_v21, %v10648_v14  ;;  %v10653_v46 = vrot.slane %v10648_v14, 4  ;;  %v18425_v60 = vpop.f32.mrb[54].mxu1  ;;  %v24165_v61 = vmul.f32 0.5, %v10312_v34 }
 0x593   : > { %v10634_v57 = vor.u32 %v10632_v41, %v10631_v19  ;;  %v10636_v47 = vrot.slane %v10631_v19, 4  ;;  %v10677_v31 = vor.u32 %v10675_v25, %v24137_v6  ;;  %v10678_v63 = vrot.slane %v24137_v6, 4  ;;  %v10215_v4 = vpop.f32.mrb[55].mxu1 }
 0x594   : > { %v10660_v50 = vor.u32 %v10658_v7, %v24139_v52  ;;  %v10661_v45 = vrot.slane %v24139_v52, 4  ;;  %v10652_v51 = vsel %vm22029_vm0, %v10644_v62, %v10651_v3  ;;  %v10933_v38 = vsel %vm22036_vm1, %v10653_v46, %v10932_v33 }
 0x595   : > { %v10635_v10 = vsel %vm22029_vm0, %v10627_v53, %v10634_v57  ;;  %v10926_v22 = vsel %vm22036_vm1, %v10636_v47, %v10925_v8  ;;  %10931 = vst.msk [vmem:[#allocation3 + $0x34] sm:$0xf] %vm334_vm8, %v10652_v51  ;;  %10934 = vst [vmem:[#allocation3 + $0x38] sm:$0x1] %v10933_v38  ;;  %v10943_v26 = vsel %vm22021_vm15, %v10677_v31, %v10942_v40  ;;  %v10376_v35 = vmul.f32 0.70710677, %v10312_v34 }
 0x596   : > { %10924 = vst.msk [vmem:[#allocation3 + $0x28] sm:$0xf] %vm334_vm8, %v10635_v10  ;;  %10927 = vst [vmem:[#allocation3 + $0x2c] sm:$0x1] %v10926_v22  ;;  %v10936_v62 = vsel %vm22021_vm15, %v10660_v50, %v10935_v16  ;;  %v19771_v1 = vpop.eup %19770  ;;  %v24167_v53 = vmul.f32 0.5, %v10310_v29  ;;  %v24169_v48 = vmul.f32 0.5, %v10313_v9  ;;  %v10311_v36 = vadd.f32 %v24054_v23, %v24092_v54 }
 0x597   : > { %10944 = vst [vmem:[#allocation3 + $0x48] sm:$0xf] %v10943_v26  ;;  %10937 = vst [vmem:[#allocation3 + $0x3c] sm:$0xf] %v10936_v62  ;;  %v10374_v37 = vmul.f32 0.70710677, %v10310_v29  ;;  %v10316_v11 = vadd.f32 %v24110_v28, %v24054_v23  ;;  %19774 = verf.f32 %v10376_v35  ;;  %v10314_v12 = vadd.f32 %v24054_v23, %v24115_v43 }
 0x598   : > { %v10437_v17 = vadd.f32 1.0, %v19771_v1  ;;  %v10377_v24 = vmul.f32 0.70710677, %v10313_v9  ;;  %v10317_v15 = vadd.f32 %v24121_v39, %v24054_v23  ;;  %v10315_v42 = vadd.f32 %v24054_v23, %v24125_v0  ;;  %v18428_v21 = vpop.f32.mrb[56].mxu1  ;;  %v10946_v57 = vld [vmem:[#allocation3 + $0x50] sm:$0x1] }
 0x599   : > { %19776 = verf.f32 %v10374_v37  ;;  %v24182_v41 = vmul.f32 0.5, %v10311_v36  ;;  %v10375_v54 = vmul.f32 0.70710677, %v10311_v36  ;;  %v10228_v33 = vpop.f32.mrb[57].mxu1  ;;  %v24184_v28 = vmul.f32 0.5, %v10316_v11 }
 0x59a   : > { %v10469_v56 = vmul.f32 %v10437_v17, %v24084_v44  ;;  %19778 = verf.f32 %v10377_v24  ;;  %v10380_v8 = vmul.f32 0.70710677, %v10316_v11  ;;  %v24186_v18 = vmul.f32 0.5, %v10314_v12  ;;  %v18429_v43 = vpop.f32.mrb[58].mxu1 }
 0x59b   : > { %19780 = verf.f32 %v10375_v54  ;;  %v10378_v39 = vmul.f32 0.70710677, %v10314_v12  ;;  %v24188_v5 = vmul.f32 0.5, %v10317_v15  ;;  %v24190_v0 = vpop.f32.mrb[59].mxu1  ;;  %v10381_v44 = vmul.f32 0.70710677, %v10317_v15  ;;  %v19773_v3 = vpop.eup %19772 }
 0x59c   : > { %v17342_v25 = vpack.c.bf16 %v10469_v56, %v10469_v56  ;;  %19782 = verf.f32 %v10380_v8  ;;  %v24192_v7 = vmul.f32 0.5, %v10315_v42  ;;  %v10379_v14 = vmul.f32 0.70710677, %v10315_v42 }
 0x59d   : > { %19784 = verf.f32 %v10378_v39  ;;  %v10320_v34 = vadd.f32 %v24135_v55, %v24054_v23  ;;  %v10318_v40 = vadd.f32 %v24054_v23, %v24145_v59  ;;  %v10321_v29 = vadd.f32 %v18425_v60, %v24054_v23 }
 0x59e   : > { %v10680_v19 = vshrl.u32 %v17342_v25, 16  ;;  %v10683_v2 = vshll.u32 %v17342_v25, 16  ;;  %19786 = verf.f32 %v10381_v44  ;;  %v10319_v9 = vadd.f32 %v24054_v23, %v10215_v4 }
 0x59f   : > { %19788 = verf.f32 %v10379_v14  ;;  %v24200_v47 = vmul.f32 0.5, %v10320_v34  ;;  %v10384_v16 = vmul.f32 0.70710677, %v10320_v34  ;;  %v10435_v31 = vadd.f32 1.0, %v19773_v3 }
 0x5a0   : > { %v10682_v46 = vrot.slane %v10680_v19, 7  ;;  %v24202_v50 = vmul.f32 0.5, %v10318_v40  ;;  %v10382_v51 = vmul.f32 0.70710677, %v10318_v40  ;;  %v24204_v55 = vmul.f32 0.5, %v10321_v29  ;;  %v24206_v38 = vpop.f32.mrb[60].mxu1 }
 0x5a1   : > { %19790 = verf.f32 %v10384_v16  ;;  %v10385_v60 = vmul.f32 0.70710677, %v10321_v29  ;;  %v24208_v4 = vpop.f32.mrb[61].mxu1  ;;  %v19775_v22 = vpop.eup %19774  ;;  %v10467_v26 = vmul.f32 %v10435_v31, %v24131_v49  ;;  %v24211_v62 = vmul.f32 0.5, %v10319_v9 }
 0x5a2   : > { %v10685_v59 = vor.u32 %v10683_v2, %v10682_v46  ;;  %v10687_v10 = vrot.slane %v10682_v46, 4  ;;  %19792 = verf.f32 %v10382_v51  ;;  %v10383_v1 = vmul.f32 0.70710677, %v10319_v9  ;;  %v24213_v35 = vpop.f32.mrb[62].mxu1 }
 0x5a3   : > { %v19777_v37 = vpop.eup %19776  ;;  %v10440_v36 = vadd.f32 1.0, %v19775_v22  ;;  %19794 = verf.f32 %v10385_v60  ;;  %v24221_v11 = vpop.f32.mrb[63].mxu1  ;;  %v17340_v12 = vpack.c.bf16 %v10467_v26, %v10467_v26  ;;  %v24225_v42 = vadd.f32 %v18428_v21, %v24054_v23 }
 0x5a4   : > { %v10686_v17 = vsel %vm22029_vm0, %v10678_v63, %v10685_v59  ;;  %v10947_v24 = vsel %vm22036_vm1, %v10687_v10, %v10946_v57  ;;  %v19779_v49 = vpop.eup %19778  ;;  %v10438_v15 = vadd.f32 1.0, %v19777_v37  ;;  %19796 = verf.f32 %v10383_v1  ;;  %v10939_v57 = vld [vmem:[#allocation3 + $0x44] sm:$0x1]  ;;  %v10956_v1 = vld [vmem:[#allocation3 + $0x60] sm:$0xf] }
 0x5a5   : > { %10945 = vst.msk [vmem:[#allocation3 + $0x4c] sm:$0xf] %vm334_vm8, %v10686_v17  ;;  %10948 = vst [vmem:[#allocation3 + $0x50] sm:$0x1] %v10947_v24  ;;  %v19781_v6 = vpop.eup %19780  ;;  %v10472_v63 = vmul.f32 %v10440_v36, %v24165_v61  ;;  %v10441_v56 = vadd.f32 1.0, %v19779_v49  ;;  %v24229_v54 = vadd.f32 %v24054_v23, %v10228_v33  ;;  %v24232_v8 = vadd.f32 %v18429_v43, %v24054_v23 }
 0x5a6   : > { %v19783_v25 = vpop.eup %19782  ;;  %v10663_v39 = vshrl.u32 %v17340_v12, 16  ;;  %v10666_v44 = vshll.u32 %v17340_v12, 16  ;;  %v10470_v14 = vmul.f32 %v10438_v15, %v24167_v53  ;;  %v10439_v19 = vadd.f32 1.0, %v19781_v6  ;;  %v10949_v12 = vld [vmem:[#allocation3 + $0x54] sm:$0xf] }
 0x5a7   : > { %v19785_v2 = vpop.eup %19784  ;;  %v17345_v34 = vpack.c.bf16 %v10472_v63, %v10472_v63  ;;  %v10473_v21 = vmul.f32 %v10441_v56, %v24169_v48  ;;  %v10444_v40 = vadd.f32 1.0, %v19783_v25  ;;  %v24237_v61 = vmul.f32 0.5, %v24225_v42 }
 0x5a8   : > { %v19787_v29 = vpop.eup %19786  ;;  %v10665_v33 = vrot.slane %v10663_v39, 7  ;;  %v17343_v9 = vpack.c.bf16 %v10470_v14, %v10470_v14  ;;  %v10471_v43 = vmul.f32 %v10439_v19, %v24182_v41  ;;  %v10442_v3 = vadd.f32 1.0, %v19785_v2  ;;  %v10960_v19 = vld [vmem:[#allocation3 + $0x68] sm:$0x1] }
 0x5a9   : > { %v19789_v46 = vpop.eup %19788  ;;  %v10706_v16 = vshrl.u32 %v17345_v34, 16  ;;  %v10709_v31 = vshll.u32 %v17345_v34, 16  ;;  %v17346_v53 = vpack.c.bf16 %v10473_v21, %v10473_v21  ;;  %v10476_v51 = vmul.f32 %v10444_v40, %v24184_v28 }
 0x5aa   : > { %v10668_v59 = vor.u32 %v10666_v44, %v10665_v33  ;;  %v10670_v10 = vrot.slane %v10665_v33, 4  ;;  %v10689_v48 = vshrl.u32 %v17343_v9, 16  ;;  %v10692_v60 = vshll.u32 %v17343_v9, 16 }
 0x5ab   : > { %v19791_v22 = vpop.eup %19790  ;;  %v10708_v26 = vrot.slane %v10706_v16, 7  ;;  %v10714_v37 = vshrl.u32 %v17346_v53, 16  ;;  %v10717_v17 = vshll.u32 %v17346_v53, 16  ;;  %v17344_v24 = vpack.c.bf16 %v10471_v43, %v10471_v43  ;;  %v10953_v43 = vld [vmem:[#allocation3 + $0x5c] sm:$0x1] }
 0x5ac   : > { %v19793_v36 = vpop.eup %19792  ;;  %v10669_v41 = vsel %vm22029_vm0, %v10661_v45, %v10668_v59  ;;  %v10940_v49 = vsel %vm22036_vm1, %v10670_v10, %v10939_v57  ;;  %v10691_v28 = vrot.slane %v10689_v48, 7  ;;  %v17349_v15 = vpack.c.bf16 %v10476_v51, %v10476_v51  ;;  %v10970_v48 = vld [vmem:[#allocation3 + $0x78] sm:$0xf] }
 0x5ad   : > { %v19795_v6 = vpop.eup %19794  ;;  %10938 = vst.msk [vmem:[#allocation3 + $0x40] sm:$0xf] %vm334_vm8, %v10669_v41  ;;  %10941 = vst [vmem:[#allocation3 + $0x44] sm:$0x1] %v10940_v49  ;;  %v10711_v63 = vor.u32 %v10709_v31, %v10708_v26  ;;  %v10712_v56 = vrot.slane %v10708_v26, 4  ;;  %v10716_v25 = vrot.slane %v10714_v37, 7  ;;  %v10474_v31 = vmul.f32 %v10442_v3, %v24186_v18 }
 0x5ae   : > { %v10697_v39 = vshrl.u32 %v17344_v24, 16  ;;  %v19797_v44 = vpop.eup %19796  ;;  %v10694_v14 = vor.u32 %v10692_v60, %v10691_v28  ;;  %v10695_v52 = vrot.slane %v10691_v28, 4  ;;  %v10700_v2 = vshll.u32 %v17344_v24, 16 }
 0x5af   : > { %v10740_v45 = vshrl.u32 %v17349_v15, 16  ;;  %v10957_v34 = vsel %vm22021_vm15, %v10711_v63, %v10956_v1  ;;  %v10719_v21 = vor.u32 %v10717_v17, %v10716_v25  ;;  %v10721_v40 = vrot.slane %v10716_v25, 4 }
 0x5b0   : > { %v10699_v33 = vrot.slane %v10697_v39, 7  ;;  %10958 = vst [vmem:[#allocation3 + $0x60] sm:$0xf] %v10957_v34  ;;  %v10950_v9 = vsel %vm22021_vm15, %v10694_v14, %v10949_v12  ;;  %v10743_v16 = vshll.u32 %v17349_v15, 16  ;;  %v17347_v1 = vpack.c.bf16 %v10474_v31, %v10474_v31  ;;  %v10963_v14 = vld [vmem:[#allocation3 + $0x6c] sm:$0xf] }
 0x5b1   : > { %v24252_v57 = vrot.slane %v10740_v45, 7  ;;  %10951 = vst [vmem:[#allocation3 + $0x54] sm:$0xf] %v10950_v9  ;;  %v10720_v53 = vsel %vm22029_vm0, %v10712_v56, %v10719_v21  ;;  %v10961_v51 = vsel %vm22036_vm1, %v10721_v40, %v10960_v19  ;;  %v10445_v37 = vadd.f32 1.0, %v19787_v29 }
 0x5b2   : > { %v10702_v59 = vor.u32 %v10700_v2, %v10699_v33  ;;  %v10704_v10 = vrot.slane %v10699_v33, 4  ;;  %10959 = vst.msk [vmem:[#allocation3 + $0x64] sm:$0xf] %vm334_vm8, %v10720_v53  ;;  %10962 = vst [vmem:[#allocation3 + $0x68] sm:$0x1] %v10961_v51  ;;  %v10443_v17 = vadd.f32 1.0, %v19789_v46 }
 0x5b3   : > { %v10745_v60 = vor.u32 %v10743_v16, %v24252_v57  ;;  %v10746_v26 = vrot.slane %v24252_v57, 4  ;;  %v10448_v24 = vadd.f32 1.0, %v19791_v22  ;;  %v10723_v49 = vshrl.u32 %v17347_v1, 16  ;;  %v10984_v51 = vld [vmem:[#allocation3 + $0x90] sm:$0xf] }
 0x5b4   : > { %v10703_v18 = vsel %vm22029_vm0, %v10695_v52, %v10702_v59  ;;  %v10954_v3 = vsel %vm22036_vm1, %v10704_v10, %v10953_v43  ;;  %v10726_v28 = vshll.u32 %v17347_v1, 16  ;;  %v10477_v12 = vmul.f32 %v10445_v37, %v24188_v5  ;;  %v10974_v43 = vld [vmem:[#allocation3 + $0x80] sm:$0x1] }
 0x5b5   : > { %10952 = vst.msk [vmem:[#allocation3 + $0x58] sm:$0xf] %vm334_vm8, %v10703_v18  ;;  %10955 = vst [vmem:[#allocation3 + $0x5c] sm:$0x1] %v10954_v3  ;;  %v10971_v41 = vsel %vm22021_vm15, %v10745_v60, %v10970_v48  ;;  %v10475_v29 = vmul.f32 %v10443_v17, %v24192_v7  ;;  %v10480_v15 = vmul.f32 %v10448_v24, %v24200_v47  ;;  %v10446_v63 = vadd.f32 1.0, %v19793_v36 }
 0x5b6   : > { %10972 = vst [vmem:[#allocation3 + $0x78] sm:$0xf] %v10971_v41  ;;  %v10449_v56 = vadd.f32 1.0, %v19795_v6  ;;  %v10725_v25 = vrot.slane %v10723_v49, 7  ;;  %v17350_v46 = vpack.c.bf16 %v10477_v12, %v10477_v12  ;;  %v10447_v22 = vadd.f32 1.0, %v19797_v44 }
 0x5b7   : > { %v10388_v39 = vmul.f32 0.70710677, %v24225_v42  ;;  %v17348_v52 = vpack.c.bf16 %v10475_v29, %v10475_v29  ;;  %v17353_v19 = vpack.c.bf16 %v10480_v15, %v10480_v15  ;;  %v10478_v2 = vmul.f32 %v10446_v63, %v24202_v50  ;;  %v10967_v50 = vld [vmem:[#allocation3 + $0x74] sm:$0x1]  ;;  %v10977_v18 = vld [vmem:[#allocation3 + $0x84] sm:$0xf] }
 0x5b8   : > { %v10481_v45 = vmul.f32 %v10449_v56, %v24204_v55  ;;  %v10728_v5 = vor.u32 %v10726_v28, %v10725_v25  ;;  %v10729_v34 = vrot.slane %v10725_v25, 4  ;;  %v10748_v21 = vshrl.u32 %v17350_v46, 16  ;;  %v10988_v29 = vld [vmem:[#allocation3 + $0x98] sm:$0x1]  ;;  %v24290_v25 = vld [vmem:[#allocation3 + $0xc] sm:$0xf] }
 0x5b9   : > { %v10751_v7 = vshll.u32 %v17350_v46, 16  ;;  %v10731_v40 = vshrl.u32 %v17348_v52, 16  ;;  %v10734_v47 = vshll.u32 %v17348_v52, 16  ;;  %v10774_v36 = vshrl.u32 %v17353_v19, 16 }
 0x5ba   : > { %v10777_v6 = vshll.u32 %v17353_v19, 16  ;;  %v10964_v44 = vsel %vm22021_vm15, %v10728_v5, %v10963_v14  ;;  %v10750_v33 = vrot.slane %v10748_v21, 7  ;;  %v17351_v42 = vpack.c.bf16 %v10478_v2, %v10478_v2  ;;  %v24304_v21 = vld [vmem:[#allocation3 + $0x10] sm:$0xf] }
 0x5bb   : > { %v17354_v9 = vpack.c.bf16 %v10481_v45, %v10481_v45  ;;  %10965 = vst [vmem:[#allocation3 + $0x6c] sm:$0xf] %v10964_v44  ;;  %v10733_v57 = vrot.slane %v10731_v40, 7  ;;  %v10776_v16 = vrot.slane %v10774_v36, 7  ;;  %v10479_v55 = vmul.f32 %v10447_v22, %v24211_v62  ;;  %v11053_v36 = vld [vmem:[#allocation3 + $0x14] sm:$0x1] }
 0x5bc   : > { %19798 = verf.f32 %v10388_v39  ;;  %v10753_v31 = vor.u32 %v10751_v7, %v10750_v33  ;;  %v10755_v53 = vrot.slane %v10750_v33, 4  ;;  %v10757_v59 = vshrl.u32 %v17351_v42, 16 }
 0x5bd   : > { %v10760_v10 = vshll.u32 %v17351_v42, 16  ;;  %v10736_v48 = vor.u32 %v10734_v47, %v10733_v57  ;;  %v10738_v60 = vrot.slane %v10733_v57, 4  ;;  %v10779_v1 = vor.u32 %v10777_v6, %v10776_v16  ;;  %v10981_v47 = vld [vmem:[#allocation3 + $0x8c] sm:$0x1] }
 0x5be   : > { %v10780_v37 = vrot.slane %v10776_v16, 4  ;;  %v10754_v3 = vsel %vm22029_vm0, %v10746_v26, %v10753_v31  ;;  %v10975_v17 = vsel %vm22036_vm1, %v10755_v53, %v10974_v43  ;;  %v10759_v24 = vrot.slane %v10757_v59, 7  ;;  %v24319_v53 = vld [vmem:[#allocation3 + $0x1c] sm:$0xf] }
 0x5bf   : > { %v10782_v41 = vshrl.u32 %v17354_v9, 16  ;;  %10973 = vst.msk [vmem:[#allocation3 + $0x7c] sm:$0xf] %vm334_vm8, %v10754_v3  ;;  %10976 = vst [vmem:[#allocation3 + $0x80] sm:$0x1] %v10975_v17  ;;  %v10737_v62 = vsel %vm22029_vm0, %v10729_v34, %v10736_v48  ;;  %v10968_v49 = vsel %vm22036_vm1, %v10738_v60, %v10967_v50  ;;  %v10985_v28 = vsel %vm22021_vm15, %v10779_v1, %v10984_v51 }
 0x5c0   : > { %v10785_v12 = vshll.u32 %v17354_v9, 16  ;;  %10966 = vst.msk [vmem:[#allocation3 + $0x70] sm:$0xf] %vm334_vm8, %v10737_v62  ;;  %10969 = vst [vmem:[#allocation3 + $0x74] sm:$0x1] %v10968_v49  ;;  %v10762_v26 = vor.u32 %v10760_v10, %v10759_v24  ;;  %v10763_v15 = vrot.slane %v10759_v24, 4  ;;  %v17352_v56 = vpack.c.bf16 %v10479_v55, %v10479_v55 }
 0x5c1   : > { %10986 = vst [vmem:[#allocation3 + $0x90] sm:$0xf] %v10985_v28  ;;  %v10784_v63 = vrot.slane %v10782_v41, 7  ;;  %v24293_v46 = vmul.f32 0.5, %v24229_v54  ;;  %v10386_v22 = vmul.f32 0.70710677, %v24229_v54  ;;  %v10323_v34 = vadd.f32 %v24054_v23, %v24190_v0 }
 0x5c2   : > { %v24297_v39 = vmul.f32 0.5, %v24232_v8  ;;  %v10389_v14 = vmul.f32 0.70710677, %v24232_v8  ;;  %v10978_v52 = vsel %vm22021_vm15, %v10762_v26, %v10977_v18  ;;  %v10765_v45 = vshrl.u32 %v17352_v56, 16  ;;  %v24316_v50 = vld [vmem:[#allocation3 + $0x18] sm:$0xf] }
 0x5c3   : > { %v10787_v19 = vor.u32 %v10785_v12, %v10784_v63  ;;  %v10789_v2 = vrot.slane %v10784_v63, 4  ;;  %10979 = vst [vmem:[#allocation3 + $0x84] sm:$0xf] %v10978_v52  ;;  %v10768_v5 = vshll.u32 %v17352_v56, 16  ;;  %19800 = verf.f32 %v10386_v22  ;;  %v11054_v60 = vld [vmem:[#allocation3 + $0x20] sm:$0x1] }
 0x5c4   : > { %v11093_v54 = vshrl.u32 %v24290_v25, 16  ;;  %v10767_v40 = vrot.slane %v10765_v45, 7  ;;  %19802 = verf.f32 %v10389_v14  ;;  %v24312_v44 = vmul.f32 0.5, %v10323_v34  ;;  %v10998_v22 = vld [vmem:[#allocation3 + $0xa8] sm:$0xf] }
 0x5c5   : > { %v10788_v7 = vsel %vm22029_vm0, %v10780_v37, %v10787_v19  ;;  %v10989_v8 = vsel %vm22036_vm1, %v10789_v2, %v10988_v29  ;;  %v10387_v23 = vmul.f32 0.70710677, %v10323_v34  ;;  %v11096_v33 = vshll.u32 %v24290_v25, 16 }
 0x5c6   : > { %v19799_v6 = vpop.eup %19798  ;;  %10987 = vst.msk [vmem:[#allocation3 + $0x94] sm:$0xf] %vm334_vm8, %v10788_v7  ;;  %10990 = vst [vmem:[#allocation3 + $0x98] sm:$0x1] %v10989_v8  ;;  %v11095_v0 = vrot.slane %v11093_v54, 4  ;;  %v10770_v42 = vor.u32 %v10768_v5, %v10767_v40  ;;  %v10772_v9 = vrot.slane %v10767_v40, 4 }
 0x5c7   : > { %v10452_v43 = vadd.f32 1.0, %v19799_v6  ;;  %v11102_v57 = vshll.u32 %v24304_v21, 16  ;;  %19804 = verf.f32 %v10387_v23  ;;  %v11098_v16 = vrot.slane %v11096_v33, 5  ;;  %v19947_v7 = vld [vmem:[%s26227_s4] ss:$0 sm:$0xff] }
 0x5c8   : > { %v11106_v55 = vshrl.u32 %v24304_v21, 16  ;;  %v11112_v31 = vshll.u32 %v11053_v36, 16  ;;  %v10771_v51 = vsel %vm22029_vm0, %v10763_v15, %v10770_v42  ;;  %v10982_v59 = vsel %vm22036_vm1, %v10772_v9, %v10981_v47  ;;  %v24348_v9 = vld [vmem:[%s26228_s5 + $0x8] sm:$0xf] }
 0x5c9   : > { %v10484_v10 = vmul.f32 %v10452_v43, %v24237_v61  ;;  %v11104_v48 = vrot.slane %v11102_v57, 5  ;;  %10980 = vst.msk [vmem:[#allocation3 + $0x88] sm:$0xf] %vm334_vm8, %v10771_v51  ;;  %10983 = vst [vmem:[#allocation3 + $0x8c] sm:$0x1] %v10982_v59  ;;  %v11099_v1 = vor.u32 %v11098_v16, %v11095_v0  ;;  %v11117_v3 = vshrl.u32 %v24316_v50, 16 }
 0x5ca   : > { %v11108_v37 = vrot.slane %v11106_v55, 4  ;;  %v11114_v18 = vrot.slane %v11112_v31, 5  ;;  %v11120_v24 = vshll.u32 %v24316_v50, 16  ;;  %v11126_v41 = vshll.u32 %v24319_v53, 16  ;;  %v24356_v59 = vld [vmem:[#allocation3 + $0x24] sm:$0xf] }
 0x5cb   : > { %v17357_v17 = vpack.c.bf16 %v10484_v10, %v10484_v10  ;;  %v11130_v62 = vshrl.u32 %v24319_v53, 16  ;;  %v11100_v49 = vrot.slane %v11099_v1, 4  ;;  %v11119_v61 = vrot.slane %v11117_v3, 4 }
 0x5cc   : > { %v11109_v28 = vor.u32 %v11108_v37, %v11104_v48  ;;  %v11136_v12 = vshll.u32 %v11054_v60, 16  ;;  %v11122_v15 = vrot.slane %v11120_v24, 5  ;;  %v11128_v63 = vrot.slane %v11126_v41, 5 }
 0x5cd   : > { %v10808_v29 = vshrl.u32 %v17357_v17, 16  ;;  %v10811_v26 = vshll.u32 %v17357_v17, 16  ;;  %v19801_v56 = vpop.eup %19800  ;;  %v11105_v14 = vsel %vm20078_vm4, %v11100_v49, %v11104_v48  ;;  %v11132_v19 = vrot.slane %v11130_v62, 4  ;;  %v10991_v62 = vld [vmem:[#allocation3 + $0x9c] sm:$0xf] }
 0x5ce   : > { %v11110_v52 = vrot.slane %v11109_v28, 4  ;;  %v11138_v2 = vrot.slane %v11136_v12, 5  ;;  %v19803_v45 = vpop.eup %19802  ;;  %v10450_v34 = vadd.f32 1.0, %v19801_v56  ;;  %v11123_v54 = vor.u32 %v11122_v15, %v11119_v61 }
 0x5cf   : > { %v24333_v5 = vrot.slane %v10808_v29, 7  ;;  %v10328_v8 = vadd.f32 %v19947_v7, %v24206_v38  ;;  %v10453_v40 = vadd.f32 1.0, %v19803_v45  ;;  %v11133_v36 = vor.u32 %v11132_v19, %v11128_v63  ;;  %v11002_v29 = vld [vmem:[#allocation3 + $0xb0] sm:$0x1] }
 0x5d0   : > { %v11115_v47 = vsel %vm20078_vm4, %v11110_v52, %v11114_v18  ;;  %v10326_v6 = vadd.f32 %v19947_v7, %v24208_v4  ;;  %v10482_v33 = vmul.f32 %v10450_v34, %v24293_v46  ;;  %v11124_v57 = vrot.slane %v11123_v54, 4 }
 0x5d1   : > { %v10813_v23 = vor.u32 %v10811_v26, %v24333_v5  ;;  %v10814_v0 = vrot.slane %v24333_v5, 4  ;;  %v16951_v42 = vcombine.low %v11105_v14, %v11115_v47  ;;  %v19805_v38 = vpop.eup %19804  ;;  %v10485_v43 = vmul.f32 %v10453_v40, %v24297_v39  ;;  %v24373_v14 = vld [vmem:[#allocation3 + $0x30] sm:$0xf] }
 0x5d2   : > { %v11134_v16 = vrot.slane %v11133_v36, 4  ;;  %v24351_v55 = vmul.f32 0.5, %v10328_v8  ;;  %v17355_v31 = vpack.c.bf16 %v10482_v33, %v10482_v33  ;;  %v10451_v51 = vadd.f32 1.0, %v19805_v38 }
 0x5d3   : > { %v10999_v4 = vsel %vm22021_vm15, %v10813_v23, %v10998_v22  ;;  %18437 = vmatmul.mubr.msk.bf16.vlgmr.msra.gmra.mrb[32].mxu0 %vm6222_vm11, %v16951_v42  ;;  %v10392_v46 = vmul.f32 0.70710677, %v10328_v8  ;;  %v17358_v10 = vpack.c.bf16 %v10485_v43, %v10485_v43  ;;  %v11129_v39 = vsel %vm20078_vm4, %v11124_v57, %v11128_v63  ;;  %v24383_v8 = vld [vmem:[#allocation3 + $0x2c] sm:$0x1]  ;;  %v24393_v57 = vld [vmem:[#allocation3 + $0x34] sm:$0xf] }
 0x5d4   : > { %11000 = vst [vmem:[#allocation3 + $0xa8] sm:$0xf] %v10999_v4  ;;  %18469 = vmatpush3.bf16.msra.mxu0 %v24066_v30  ;;  %v11139_v48 = vsel %vm20078_vm4, %v11134_v16, %v11138_v2  ;;  %v24363_v60 = vmul.f32 0.5, %v10326_v6  ;;  %v10791_v1 = vshrl.u32 %v17355_v31, 16  ;;  %v10794_v37 = vshll.u32 %v17355_v31, 16  ;;  %26693 = vst [vmem:[#allocation37_spill] sm:$0xff] %v24383_v8 }
 0x5d5   : > { %v10483_v18 = vmul.f32 %v10451_v51, %v24312_v44  ;;  %v16952_v3 = vcombine.low %v11129_v39, %v11139_v48  ;;  %19531 = vmatprep.subr.msk.bf16.mxu0 %vm6271_vm10, %v24348_v9  ;;  %v10816_v17 = vshrl.u32 %v17358_v10, 16  ;;  %v10819_v24 = vshll.u32 %v17358_v10, 16  ;;  %v10995_v2 = vld [vmem:[#allocation3 + $0xa4] sm:$0x1]  ;;  %v24400_v51 = vld [vmem:[#allocation3 + $0x38] sm:$0x1] }
 0x5d6   : > { %19806 = verf.f32 %v10392_v46  ;;  %v10390_v30 = vmul.f32 0.70710677, %v10326_v6  ;;  %v10793_v41 = vrot.slane %v10791_v1, 7  ;;  %v10329_v28 = vadd.f32 %v19947_v7, %v24213_v35  ;;  %26694 = vst [vmem:[#allocation31_spill] sm:$0xff] %v24400_v51  ;;  %v24403_v10 = vld [vmem:[#allocation3 + $0x3c] sm:$0xf] }
 0x5d7   : > { %v17356_v49 = vpack.c.bf16 %v10483_v18, %v10483_v18  ;;  %18440 = vmatprep.mubr.msk.bf16.mxu0 %vm6222_vm11, %v16952_v3  ;;  %v10327_v61 = vadd.f32 %v19947_v7, %v24221_v11  ;;  %v10818_v12 = vrot.slane %v10816_v17, 7  ;;  %v11141_v44 = vshrl.u32 %v24356_v59, 16  ;;  %v24377_v11 = vld [vmem:[#allocation3 + $0x28] sm:$0xf] }
 0x5d8   : > { %19808 = verf.f32 %v10390_v30  ;;  %v11144_v26 = vshll.u32 %v24356_v59, 16  ;;  %v10796_v15 = vor.u32 %v10794_v37, %v10793_v41  ;;  %v10797_v63 = vrot.slane %v10793_v41, 4 }
 0x5d9   : > { %v10799_v56 = vshrl.u32 %v17356_v49, 16  ;;  %v10802_v22 = vshll.u32 %v17356_v49, 16  ;;  %v10821_v52 = vor.u32 %v10819_v24, %v10818_v12  ;;  %v10823_v19 = vrot.slane %v10818_v12, 4 }
 0x5da   : > { %v24375_v45 = vmul.f32 0.5, %v10329_v28  ;;  %v10393_v35 = vmul.f32 0.70710677, %v10329_v28  ;;  %v10992_v5 = vsel %vm22021_vm15, %v10796_v15, %v10991_v62  ;;  %v24381_v54 = vmul.f32 0.5, %v10327_v61  ;;  %v24413_v15 = vld [vmem:[#allocation3 + $0x40] sm:$0xf] }
 0x5db   : > { %v10801_v34 = vrot.slane %v10799_v56, 7  ;;  %v10391_v7 = vmul.f32 0.70710677, %v10327_v61  ;;  %10993 = vst [vmem:[#allocation3 + $0x9c] sm:$0xf] %v10992_v5  ;;  %v10822_v40 = vsel %vm22029_vm0, %v10814_v0, %v10821_v52  ;;  %v11003_v47 = vsel %vm22036_vm1, %v10823_v19, %v11002_v29 }
 0x5dc   : > { %19810 = verf.f32 %v10393_v35  ;;  %v11143_v36 = vrot.slane %v11141_v44, 4  ;;  %11001 = vst.msk [vmem:[#allocation3 + $0xac] sm:$0xf] %vm334_vm8, %v10822_v40  ;;  %11004 = vst [vmem:[#allocation3 + $0xb0] sm:$0x1] %v11003_v47  ;;  %v11146_v33 = vrot.slane %v11144_v26, 5 }
 0x5dd   : > { %v10804_v6 = vor.u32 %v10802_v22, %v10801_v34  ;;  %v10806_v23 = vrot.slane %v10801_v34, 4  ;;  %19812 = verf.f32 %v10391_v7  ;;  %v11150_v42 = vshll.u32 %v24377_v11, 16 }
 0x5de   : > { %v11154_v38 = vshrl.u32 %v24377_v11, 16  ;;  %v11160_v43 = vshll.u32 %v24383_v8, 16  ;;  %v11165_v0 = vshrl.u32 %v24373_v14, 16  ;;  %v11147_v31 = vor.u32 %v11146_v33, %v11143_v36 }
 0x5df   : > { %v10805_v16 = vsel %vm22029_vm0, %v10797_v63, %v10804_v6  ;;  %v10996_v4 = vsel %vm22036_vm1, %v10806_v23, %v10995_v2  ;;  %v11168_v46 = vshll.u32 %v24373_v14, 16  ;;  %v11152_v48 = vrot.slane %v11150_v42, 5 }
 0x5e0   : > { %v19807_v39 = vpop.eup %19806  ;;  %10994 = vst.msk [vmem:[#allocation3 + $0xa0] sm:$0xf] %vm334_vm8, %v10805_v16  ;;  %10997 = vst [vmem:[#allocation3 + $0xa4] sm:$0x1] %v10996_v4  ;;  %v11156_v1 = vrot.slane %v11154_v38, 4  ;;  %v11162_v37 = vrot.slane %v11160_v43, 5 }
 0x5e1   : > { %v11167_v18 = vrot.slane %v11165_v0, 4  ;;  %v10456_v3 = vadd.f32 1.0, %v19807_v39  ;;  %v11148_v17 = vrot.slane %v11147_v31, 4  ;;  %v11170_v24 = vrot.slane %v11168_v46, 5  ;;  %v11012_v38 = vld [vmem:[#allocation3 + $0xc0] sm:$0xf] }
 0x5e2   : > { %v11174_v30 = vshll.u32 %v24393_v57, 16  ;;  %v19809_v41 = vpop.eup %19808  ;;  %v11157_v62 = vor.u32 %v11156_v1, %v11152_v48  ;;  %v11178_v49 = vshrl.u32 %v24393_v57, 16  ;;  %v11184_v28 = vshll.u32 %v24400_v51, 16 }
 0x5e3   : > { %v11189_v61 = vshrl.u32 %v24403_v10, 16  ;;  %v10488_v12 = vmul.f32 %v10456_v3, %v24351_v55  ;;  %v10454_v29 = vadd.f32 1.0, %v19809_v41  ;;  %v11153_v44 = vsel %vm20078_vm4, %v11148_v17, %v11152_v48  ;;  %v11005_v41 = vld [vmem:[#allocation3 + $0xb4] sm:$0xf] }
 0x5e4   : > { %v11171_v26 = vor.u32 %v11170_v24, %v11167_v18  ;;  %v11158_v63 = vrot.slane %v11157_v62, 4  ;;  %v11176_v56 = vrot.slane %v11174_v30, 5  ;;  %v11180_v22 = vrot.slane %v11178_v49, 4 }
 0x5e5   : > { %v11186_v52 = vrot.slane %v11184_v28, 5  ;;  %v17361_v19 = vpack.c.bf16 %v10488_v12, %v10488_v12  ;;  %v10486_v2 = vmul.f32 %v10454_v29, %v24363_v60  ;;  %v11191_v5 = vrot.slane %v11189_v61, 4  ;;  %v24429_v28 = vld [vmem:[#allocation3 + $0x44] sm:$0x1] }
 0x5e6   : > { %v11172_v35 = vrot.slane %v11171_v26, 4  ;;  %v19811_v34 = vpop.eup %19810  ;;  %v11163_v55 = vsel %vm20078_vm4, %v11158_v63, %v11162_v37  ;;  %v11181_v7 = vor.u32 %v11180_v22, %v11176_v56  ;;  %v11192_v40 = vshll.u32 %v24403_v10, 16  ;;  %26695 = vst [vmem:[#allocation39_spill] sm:$0xff] %v24429_v28  ;;  %v24434_v26 = vld [vmem:[#allocation3 + $0x48] sm:$0xf] }
 0x5e7   : > { %v11198_v47 = vshll.u32 %v24413_v15, 16  ;;  %v19813_v36 = vpop.eup %19812  ;;  %v10842_v6 = vshrl.u32 %v17361_v19, 16  ;;  %v10845_v23 = vshll.u32 %v17361_v19, 16  ;;  %v17359_v33 = vpack.c.bf16 %v10486_v2, %v10486_v2 }
 0x5e8   : > { %v10457_v42 = vadd.f32 1.0, %v19811_v34  ;;  %v10455_v43 = vadd.f32 1.0, %v19813_v36  ;;  %v16953_v0 = vcombine.low %v11153_v44, %v11163_v55  ;;  %v11177_v60 = vsel %vm20078_vm4, %v11172_v35, %v11176_v56  ;;  %v11016_v35 = vld [vmem:[#allocation3 + $0xc8] sm:$0x1] }
 0x5e9   : > { %v11182_v16 = vrot.slane %v11181_v7, 4  ;;  %v10844_v4 = vrot.slane %v10842_v6, 7  ;;  %v10825_v31 = vshrl.u32 %v17359_v33, 16  ;;  %v10828_v46 = vshll.u32 %v17359_v33, 16 }
 0x5ea   : > { %v10489_v39 = vmul.f32 %v10457_v42, %v24375_v45  ;;  %v10487_v48 = vmul.f32 %v10455_v43, %v24381_v54  ;;  %18441 = vmatmul.mubr.msk.bf16.gmra.mrb[36].mxu0 %vm6222_vm11, %v16953_v0  ;;  %v11194_v37 = vrot.slane %v11192_v40, 5  ;;  %v24427_v18 = vrot.slane %v11198_v47, 5  ;;  %v24443_v40 = vld [vmem:[#allocation3 + $0x4c] sm:$0xf] }
 0x5eb   : > { %v11187_v1 = vsel %vm20078_vm4, %v11182_v16, %v11186_v52  ;;  %v10847_v3 = vor.u32 %v10845_v23, %v10844_v4  ;;  %v10848_v17 = vrot.slane %v10844_v4, 4  ;;  %v10827_v24 = vrot.slane %v10825_v31, 7  ;;  %v11009_v23 = vld [vmem:[#allocation3 + $0xbc] sm:$0x1]  ;;  %v24450_v4 = vld [vmem:[#allocation3 + $0x54] sm:$0xf] }
 0x5ec   : > { %v17362_v30 = vpack.c.bf16 %v10489_v39, %v10489_v39  ;;  %v17360_v62 = vpack.c.bf16 %v10487_v48, %v10487_v48  ;;  %v16954_v49 = vcombine.low %v11177_v60, %v11187_v1  ;;  %v11195_v45 = vor.u32 %v11194_v37, %v11191_v5 }
 0x5ed   : > { %v11202_v54 = vshrl.u32 %v24413_v15, 16  ;;  %v11013_v61 = vsel %vm22021_vm15, %v10847_v3, %v11012_v38  ;;  %v10830_v12 = vor.u32 %v10828_v46, %v10827_v24  ;;  %v10831_v29 = vrot.slane %v10827_v24, 4  ;;  %v24448_v38 = vld [vmem:[#allocation3 + $0x50] sm:$0x1]  ;;  %v24463_v24 = vld [vmem:[#allocation3 + $0x58] sm:$0xf] }
 0x5ee   : > { %v10850_v44 = vshrl.u32 %v17362_v30, 16  ;;  %11014 = vst [vmem:[#allocation3 + $0xc0] sm:$0xf] %v11013_v61  ;;  %v10853_v63 = vshll.u32 %v17362_v30, 16  ;;  %v10833_v56 = vshrl.u32 %v17360_v62, 16  ;;  %v10836_v22 = vshll.u32 %v17360_v62, 16  ;;  %18444 = vmatprep.mubr.msk.bf16.mxu0 %vm6222_vm11, %v16954_v49 }
 0x5ef   : > { %v11196_v52 = vrot.slane %v11195_v45, 4  ;;  %v11006_v19 = vsel %vm22021_vm15, %v10830_v12, %v11005_v41  ;;  %v11204_v5 = vrot.slane %v11202_v54, 4  ;;  %v11208_v34 = vshll.u32 %v24429_v28, 16  ;;  %v24471_v62 = vld [vmem:[#allocation3 + $0x5c] sm:$0x1] }
 0x5f0   : > { %v10852_v2 = vrot.slane %v10850_v44, 7  ;;  %11007 = vst [vmem:[#allocation3 + $0xb4] sm:$0xf] %v11006_v19  ;;  %v10835_v55 = vrot.slane %v10833_v56, 7  ;;  %v11213_v47 = vshrl.u32 %v24434_v26, 16  ;;  %v11216_v36 = vshll.u32 %v24434_v26, 16 }
 0x5f1   : > { %v11201_v7 = vsel %vm20078_vm4, %v11196_v52, %v24427_v18  ;;  %v11205_v33 = vor.u32 %v11204_v5, %v24427_v18  ;;  %v11210_v42 = vrot.slane %v11208_v34, 5  ;;  %v11222_v48 = vshll.u32 %v24443_v40, 16  ;;  %v24475_v12 = vld [vmem:[#allocation3 + $0x64] sm:$0xf] }
 0x5f2   : > { %v10855_v6 = vor.u32 %v10853_v63, %v10852_v2  ;;  %v10857_v27 = vrot.slane %v10852_v2, 4  ;;  %v10838_v43 = vor.u32 %v10836_v22, %v10835_v55  ;;  %v10840_v0 = vrot.slane %v10835_v55, 4  ;;  %v24479_v22 = vld [vmem:[#allocation3 + $0x68] sm:$0x1] }
 0x5f3   : > { %v11215_v60 = vrot.slane %v11213_v47, 4  ;;  %v11218_v16 = vrot.slane %v11216_v36, 5  ;;  %v11206_v39 = vrot.slane %v11205_v33, 4  ;;  %v11226_v3 = vshrl.u32 %v24443_v40, 16  ;;  %v24487_v47 = vld [vmem:[#allocation3 + $0x6c] sm:$0xf] }
 0x5f4   : > { %v10856_v31 = vsel %vm22029_vm0, %v10848_v17, %v10855_v6  ;;  %v11017_v46 = vsel %vm22036_vm1, %v10857_v27, %v11016_v35  ;;  %v10839_v1 = vsel %vm22029_vm0, %v10831_v29, %v10838_v43  ;;  %v11010_v37 = vsel %vm22036_vm1, %v10840_v0, %v11009_v23  ;;  %v24465_v17 = vld [vmem:[#allocation3 + $0x60] sm:$0xf] }
 0x5f5   : > { %11015 = vst.msk [vmem:[#allocation3 + $0xc4] sm:$0xf] %vm334_vm8, %v10856_v31  ;;  %11018 = vst [vmem:[#allocation3 + $0xc8] sm:$0x1] %v11017_v46  ;;  %v11219_v18 = vor.u32 %v11218_v16, %v11215_v60  ;;  %v11211_v30 = vsel %vm20078_vm4, %v11206_v39, %v11210_v42  ;;  %v11224_v41 = vrot.slane %v11222_v48, 5  ;;  %v11232_v20 = vshll.u32 %v24448_v38, 16 }
 0x5f6   : > { %11008 = vst.msk [vmem:[#allocation3 + $0xb8] sm:$0xf] %vm334_vm8, %v10839_v1  ;;  %11011 = vst [vmem:[#allocation3 + $0xbc] sm:$0x1] %v11010_v37  ;;  %v11237_v58 = vshrl.u32 %v24450_v4, 16  ;;  %v16955_v49 = vcombine.low %v11201_v7, %v11211_v30  ;;  %v11228_v54 = vrot.slane %v11226_v3, 4 }
 0x5f7   : > { %v11220_v45 = vrot.slane %v11219_v18, 4  ;;  %v11240_v61 = vshll.u32 %v24450_v4, 16  ;;  %v11234_v29 = vrot.slane %v11232_v20, 5  ;;  %v11246_v63 = vshll.u32 %v24463_v24, 16  ;;  %v24494_v39 = vld [vmem:[#allocation3 + $0x70] sm:$0xf] }
 0x5f8   : > { %v11239_v44 = vrot.slane %v11237_v58, 4  ;;  %v11250_v56 = vshrl.u32 %v24463_v24, 16  ;;  %18445 = vmatmul.mubr.msk.bf16.gmra.mrb[40].mxu0 %vm6222_vm11, %v16955_v49  ;;  %v11229_v19 = vor.u32 %v11228_v54, %v11224_v41  ;;  %v11256_v35 = vshll.u32 %v24471_v62, 16  ;;  %v24496_v3 = vld [vmem:[#allocation3 + $0x78] sm:$0xf] }
 0x5f9   : > { %v11225_v52 = vsel %vm20078_vm4, %v11220_v45, %v11224_v41  ;;  %v11242_v2 = vrot.slane %v11240_v61, 5  ;;  %v11248_v5 = vrot.slane %v11246_v63, 5  ;;  %v11261_v55 = vshrl.u32 %v24465_v17, 16  ;;  %v24500_v20 = vld [vmem:[#allocation3 + $0x74] sm:$0x1] }
 0x5fa   : > { %v11252_v34 = vrot.slane %v11250_v56, 4  ;;  %v11264_v7 = vshll.u32 %v24465_v17, 16  ;;  %v11230_v36 = vrot.slane %v11229_v19, 4  ;;  %v11258_v27 = vrot.slane %v11256_v35, 5  ;;  %v24504_v45 = vld [vmem:[#allocation3 + $0x7c] sm:$0xf] }
 0x5fb   : > { %v11243_v6 = vor.u32 %v11242_v2, %v11239_v44  ;;  %v11270_v23 = vshll.u32 %v24475_v12, 16  ;;  %v11263_v42 = vrot.slane %v11261_v55, 4  ;;  %v11274_v0 = vshrl.u32 %v24475_v12, 16 }
 0x5fc   : > { %v11253_v33 = vor.u32 %v11252_v34, %v11248_v5  ;;  %v11266_v43 = vrot.slane %v11264_v7, 5  ;;  %v11235_v60 = vsel %vm20078_vm4, %v11230_v36, %v11234_v29  ;;  %v11280_v46 = vshll.u32 %v24479_v22, 16  ;;  %v24515_v36 = vld [vmem:[#allocation3 + $0x80] sm:$0x1] }
 0x5fd   : > { %v11244_v16 = vrot.slane %v11243_v6, 4  ;;  %v11272_v31 = vrot.slane %v11270_v23, 5  ;;  %v16956_v48 = vcombine.low %v11225_v52, %v11235_v60  ;;  %v11276_v18 = vrot.slane %v11274_v0, 4  ;;  %v24523_v0 = vld [vmem:[#allocation3 + $0x84] sm:$0xf] }
 0x5fe   : > { %v11254_v1 = vrot.slane %v11253_v33, 4  ;;  %v11267_v37 = vor.u32 %v11266_v43, %v11263_v42  ;;  %v11282_v41 = vrot.slane %v11280_v46, 5  ;;  %v11285_v58 = vshrl.u32 %v24487_v47, 16 }
 0x5ff   : > { %v11249_v30 = vsel %vm20078_vm4, %v11244_v16, %v11248_v5  ;;  %v11288_v49 = vshll.u32 %v24487_v47, 16  ;;  %18448 = vmatprep.mubr.msk.bf16.mxu0 %vm6222_vm11, %v16956_v48  ;;  %v11277_v29 = vor.u32 %v11276_v18, %v11272_v31  ;;  %v11294_v44 = vshll.u32 %v24494_v39, 16  ;;  %v24525_v48 = vld [vmem:[#allocation3 + $0x88] sm:$0xf] }
 0x600   : > { %v11259_v54 = vsel %vm20078_vm4, %v11254_v1, %v11258_v27  ;;  %v11268_v61 = vrot.slane %v11267_v37, 4  ;;  %v11287_v56 = vrot.slane %v11285_v58, 4  ;;  %v11298_v19 = vshrl.u32 %v24494_v39, 16 }
 0x601   : > { %v16957_v63 = vcombine.low %v11249_v30, %v11259_v54  ;;  %v11290_v52 = vrot.slane %v11288_v49, 5  ;;  %v11278_v35 = vrot.slane %v11277_v29, 4  ;;  %v11296_v5 = vrot.slane %v11294_v44, 5 }
 0x602   : > { %v11273_v2 = vsel %vm20078_vm4, %v11268_v61, %v11272_v31  ;;  %v11304_v34 = vshll.u32 %v24500_v20, 16  ;;  %v11300_v7 = vrot.slane %v11298_v19, 4  ;;  %v11309_v6 = vshrl.u32 %v24496_v3, 16 }
 0x603   : > { %18449 = vmatmul.mubr.msk.bf16.gmra.mrb[44].mxu0 %vm6222_vm11, %v16957_v63  ;;  %v11291_v55 = vor.u32 %v11290_v52, %v11287_v56  ;;  %v11312_v27 = vshll.u32 %v24496_v3, 16  ;;  %v11283_v23 = vsel %vm20078_vm4, %v11278_v35, %v11282_v41  ;;  %v11318_v42 = vshll.u32 %v24504_v45, 16  ;;  %v24533_v63 = vld [vmem:[#allocation3 + $0x8c] sm:$0x1]  ;;  %v24536_v52 = vld [vmem:[#allocation3 + $0x90] sm:$0xf] }
 0x604   : > { %v11306_v33 = vrot.slane %v11304_v34, 5  ;;  %v11322_v43 = vshrl.u32 %v24504_v45, 16  ;;  %v16958_v60 = vcombine.low %v11273_v2, %v11283_v23  ;;  %v11301_v31 = vor.u32 %v11300_v7, %v11296_v5  ;;  %v24541_v34 = vld [vmem:[#allocation3 + $0x94] sm:$0xf] }
 0x605   : > { %v11292_v16 = vrot.slane %v11291_v55, 4  ;;  %v11311_v46 = vrot.slane %v11309_v6, 4  ;;  %v11314_v1 = vrot.slane %v11312_v27, 5  ;;  %v11320_v37 = vrot.slane %v11318_v42, 5 }
 0x606   : > { %v11324_v18 = vrot.slane %v11322_v43, 4  ;;  %v11328_v30 = vshll.u32 %v24515_v36, 16  ;;  %18452 = vmatprep.mubr.msk.bf16.mxu0 %vm6222_vm11, %v16958_v60  ;;  %v11302_v58 = vrot.slane %v11301_v31, 4  ;;  %v11333_v49 = vshrl.u32 %v24523_v0, 16  ;;  %v24550_v31 = vld [vmem:[#allocation3 + $0x98] sm:$0x1] }
 0x607   : > { %v11297_v41 = vsel %vm20078_vm4, %v11292_v16, %v11296_v5  ;;  %v11336_v54 = vshll.u32 %v24523_v0, 16  ;;  %v11315_v61 = vor.u32 %v11314_v1, %v11311_v46  ;;  %v11342_v56 = vshll.u32 %v24525_v48, 16 }
 0x608   : > { %v11325_v29 = vor.u32 %v11324_v18, %v11320_v37  ;;  %v11330_v44 = vrot.slane %v11328_v30, 5  ;;  %v11307_v19 = vsel %vm20078_vm4, %v11302_v58, %v11306_v33  ;;  %v11335_v2 = vrot.slane %v11333_v49, 4  ;;  %v24554_v18 = vld [vmem:[#allocation3 + $0x9c] sm:$0xf]  ;;  %v24556_v49 = vld [vmem:[#allocation3 + $0xa0] sm:$0xf] }
 0x609   : > { %v11338_v35 = vrot.slane %v11336_v54, 5  ;;  %v11346_v5 = vshrl.u32 %v24525_v48, 16  ;;  %v16959_v55 = vcombine.low %v11297_v41, %v11307_v19  ;;  %v11316_v7 = vrot.slane %v11315_v61, 4 }
 0x60a   : > { %v11326_v6 = vrot.slane %v11325_v29, 4  ;;  %v11344_v27 = vrot.slane %v11342_v56, 5  ;;  %v11352_v43 = vshll.u32 %v24533_v63, 16  ;;  %v11357_v60 = vshrl.u32 %v24536_v52, 16 }
 0x60b   : > { %v11339_v23 = vor.u32 %v11338_v35, %v11335_v2  ;;  %v11348_v42 = vrot.slane %v11346_v5, 4  ;;  %18453 = vmatmul.mubr.msk.bf16.gmra.mrb[48].mxu0 %vm6222_vm11, %v16959_v55  ;;  %v11321_v33 = vsel %vm20078_vm4, %v11316_v7, %v11320_v37  ;;  %v11360_v46 = vshll.u32 %v24536_v52, 16  ;;  %v24562_v35 = vld [vmem:[#allocation3 + $0xa8] sm:$0xf]  ;;  %v24564_v7 = vld [vmem:[#allocation3 + $0xa4] sm:$0x1] }
 0x60c   : > { %v11331_v16 = vsel %vm20078_vm4, %v11326_v6, %v11330_v44  ;;  %v11366_v1 = vshll.u32 %v24541_v34, 16  ;;  %v11359_v54 = vrot.slane %v11357_v60, 4  ;;  %v11370_v37 = vshrl.u32 %v24541_v34, 16 }
 0x60d   : > { %v16960_v30 = vcombine.low %v11321_v33, %v11331_v16  ;;  %v11340_v41 = vrot.slane %v11339_v23, 4  ;;  %v11349_v58 = vor.u32 %v11348_v42, %v11344_v27  ;;  %v11362_v61 = vrot.slane %v11360_v46, 5 }
 0x60e   : > { %v11368_v29 = vrot.slane %v11366_v1, 5  ;;  %v11354_v56 = vrot.slane %v11352_v43, 5  ;;  %v11376_v19 = vshll.u32 %v24550_v31, 16  ;;  %v11381_v2 = vshrl.u32 %v24554_v18, 16 }
 0x60f   : > { %18456 = vmatprep.mubr.msk.bf16.mxu0 %vm6222_vm11, %v16960_v30  ;;  %v11350_v44 = vrot.slane %v11349_v58, 4  ;;  %v11363_v5 = vor.u32 %v11362_v61, %v11359_v54  ;;  %v11372_v55 = vrot.slane %v11370_v37, 4  ;;  %v11384_v6 = vshll.u32 %v24554_v18, 16  ;;  %v24573_v58 = vld [vmem:[#allocation3 + $0xac] sm:$0xf] }
 0x610   : > { %v11390_v23 = vshll.u32 %v24556_v49, 16  ;;  %v11345_v42 = vsel %vm20078_vm4, %v11340_v41, %v11344_v27  ;;  %v11383_v60 = vrot.slane %v11381_v2, 4  ;;  %v11394_v33 = vshrl.u32 %v24556_v49, 16 }
 0x611   : > { %v11355_v43 = vsel %vm20078_vm4, %v11350_v44, %v11354_v56  ;;  %v11364_v46 = vrot.slane %v11363_v5, 4  ;;  %v11373_v1 = vor.u32 %v11372_v55, %v11368_v29  ;;  %v11386_v30 = vrot.slane %v11384_v6, 5  ;;  %v24581_v55 = vld [vmem:[#allocation3 + $0xb0] sm:$0x1] }
 0x612   : > { %v16961_v16 = vcombine.low %v11345_v42, %v11355_v43  ;;  %v11392_v54 = vrot.slane %v11390_v23, 5  ;;  %v11396_v61 = vrot.slane %v11394_v33, 4  ;;  %v11400_v37 = vshll.u32 %v24564_v7, 16  ;;  %v24584_v42 = vld [vmem:[#allocation3 + $0xb4] sm:$0xf] }
 0x613   : > { %v11405_v28 = vshrl.u32 %v24562_v35, 16  ;;  %v11374_v27 = vrot.slane %v11373_v1, 4  ;;  %v11378_v41 = vrot.slane %v11376_v19, 5  ;;  %v11387_v44 = vor.u32 %v11386_v30, %v11383_v60  ;;  %v24589_v60 = vld [vmem:[#allocation3 + $0xb8] sm:$0xf] }
 0x614   : > { %18457 = vmatmul.mubr.msk.bf16.gmra.mrb[52].mxu0 %vm6222_vm11, %v16961_v16  ;;  %v11408_v56 = vshll.u32 %v24562_v35, 16  ;;  %v11369_v2 = vsel %vm20078_vm4, %v11364_v46, %v11368_v29  ;;  %v11397_v5 = vor.u32 %v11396_v61, %v11392_v54  ;;  %v11414_v23 = vshll.u32 %v24573_v58, 16 }
 0x615   : > { %v11407_v6 = vrot.slane %v11405_v28, 4  ;;  %v11379_v43 = vsel %vm20078_vm4, %v11374_v27, %v11378_v41  ;;  %v11388_v33 = vrot.slane %v11387_v44, 4  ;;  %v11418_v19 = vshrl.u32 %v24573_v58, 16 }
 0x616   : > { %v11410_v16 = vrot.slane %v11408_v56, 5  ;;  %v16962_v1 = vcombine.low %v11369_v2, %v11379_v43  ;;  %v11398_v30 = vrot.slane %v11397_v5, 4  ;;  %v11402_v29 = vrot.slane %v11400_v37, 5 }
 0x617   : > { %v11416_v46 = vrot.slane %v11414_v23, 5  ;;  %v11420_v51 = vrot.slane %v11418_v19, 4  ;;  %v11424_v28 = vshll.u32 %v24581_v55, 16  ;;  %v11429_v8 = vshrl.u32 %v24584_v42, 16 }
 0x618   : > { %v11411_v61 = vor.u32 %v11410_v16, %v11407_v6  ;;  %18460 = vmatprep.mubr.msk.bf16.mxu0 %vm6222_vm11, %v16962_v1  ;;  %v11393_v27 = vsel %vm20078_vm4, %v11388_v33, %v11392_v54  ;;  %v11403_v41 = vsel %vm20078_vm4, %v11398_v30, %v11402_v29  ;;  %v11432_v44 = vshll.u32 %v24584_v42, 16  ;;  %v24600_v6 = vld [vmem:[#allocation3 + $0xbc] sm:$0x1] }
 0x619   : > { %v11438_v56 = vshll.u32 %v24589_v60, 16  ;;  %v16963_v37 = vcombine.low %v11393_v27, %v11403_v41  ;;  %v11421_v5 = vor.u32 %v11420_v51, %v11416_v46  ;;  %v11431_v23 = vrot.slane %v11429_v8, 4 }
 0x61a   : > { %v11412_v2 = vrot.slane %v11411_v61, 4  ;;  %v11434_v43 = vrot.slane %v11432_v44, 5  ;;  %v11442_v19 = vshrl.u32 %v24589_v60, 16  ;;  %v11426_v33 = vrot.slane %v11424_v28, 5 }
 0x61b   : > { %v11440_v16 = vrot.slane %v11438_v56, 5  ;;  %v11422_v54 = vrot.slane %v11421_v5, 4  ;;  %v11448_v29 = vshll.u32 %v24600_v6, 16  ;;  %v16988_v44 = vcombine.low %v24434_v26, %v24443_v40 }
 0x61c   : > { %18461 = vmatmul.mubr.msk.bf16.gmra.mrb[56].mxu0 %vm6222_vm11, %v16963_v37  ;;  %v11435_v1 = vor.u32 %v11434_v43, %v11431_v23  ;;  %v11444_v30 = vrot.slane %v11442_v19, 4  ;;  %v11417_v27 = vsel %vm20078_vm4, %v11412_v2, %v11416_v46  ;;  %v16989_v56 = vcombine.low %v24450_v4, %v24463_v24 }
 0x61d   : > { %v11427_v51 = vsel %vm20078_vm4, %v11422_v54, %v11426_v33  ;;  %v16990_v28 = vcombine.low %v24465_v17, %v24475_v12  ;;  %v16991_v37 = vcombine.low %v24487_v47, %v24494_v39  ;;  %v11450_v2 = vrot.slane %v11448_v29, 5  ;;  %v19948_v29 = vld [vmem:[#allocation3] sm:$0xf]  ;;  %v12017_v54 = vld [vmem:[#allocation3 + $0x84] sm:$0xe] }
 0x61e   : > { %v16964_v61 = vcombine.low %v11417_v27, %v11427_v51  ;;  %v11436_v8 = vrot.slane %v11435_v1, 4  ;;  %v11445_v41 = vor.u32 %v11444_v30, %v11440_v16  ;;  %v24634_v27 = vld [vmem:[#allocation3 + $0x4] sm:$0xf]  ;;  %v16983_v33 = vcombine.low %v24290_v25, %v24304_v21  ;;  %v12014_v25 = vld [vmem:[#allocation3 + $0x60] sm:$0xe] }
 0x61f   : > { %v16982_v51 = vcombine.low %v19948_v29, %v24634_v27  ;;  %v12105_v29 = vrot.slane %v24463_v24, 5  ;;  %v16985_v21 = vcombine.low %v24356_v59, %v24377_v11  ;;  %v12150_v23 = vrot.slane %v24564_v7, 5 }
 0x620   : > { %18464 = vmatprep.mubr.msk.bf16.mxu0 %vm6222_vm11, %v16964_v61  ;;  %v11446_v46 = vrot.slane %v11445_v41, 4  ;;  %v11441_v1 = vsel %vm20078_vm4, %v11436_v8, %v11440_v16  ;;  %v12012_v41 = vld [vmem:[#allocation3 + $0x48] sm:$0xe]  ;;  %v12265_v16 = vsel %vm6271_vm10, %v24348_v9, 0  ;;  %v12013_v8 = vld [vmem:[#allocation3 + $0x54] sm:$0xe]  ;;  %v26697_v4 = vcombine.low %v24523_v0, %v24525_v48 }
 0x621   : > { %v17021_v9 = vrot.slane %v12013_v8, 9  ;;  %v12112_v8 = vrot.slane %v24475_v12, 5  ;;  %v12157_v5 = vrot.slane %v24581_v55, 5  ;;  %v26698_v24 = vcombine.low %v24536_v52, %v24541_v34  ;;  %v12006_v12 = vld [vmem:[#allocation3] sm:$0xe] }
 0x622   : > { %v11451_v30 = vsel %vm20078_vm4, %v11446_v46, %v11450_v2  ;;  %v16984_v46 = vcombine.low %v24316_v50, %v24319_v53  ;;  %v24648_v2 = vld [vmem:[%s26228_s5 + $0xc] sm:$0xf]  ;;  %v12101_v53 = vrot.slane %v24448_v38, 5  ;;  %v12056_v17 = vrot.slane %v24634_v27, 5  ;;  %v19951_v52 = vld [vmem:[#allocation3 + $0x10] sm:$0xf] }
 0x623   : > { %v16965_v61 = vcombine.low %v11441_v1, %v11451_v30  ;;  %v12098_v1 = vrot.slane %v24443_v40, 5  ;;  %v17020_v30 = vrot.slane %v12012_v41, 9  ;;  %v12108_v41 = vrot.slane %v24471_v62, 5 }
 0x624   : > { %v24672_v38 = vsel %vm20304_vm7, %v17021_v9, %v12105_v29  ;;  %v12115_v62 = vrot.slane %v24479_v22, 5  ;;  %v17014_v47 = vrot.slane %v12006_v12, 9 }
 0x625   : > { %18465 = vmatmul.mubr.msk.bf16.gmra.mrb[60].mxu0 %vm6222_vm11, %v16965_v61  ;;  %v12100_v50 = vrot.slane %v12098_v1, 4  ;;  %v12107_v61 = vrot.slane %v12105_v29, 4  ;;  %v12114_v29 = vrot.slane %v12112_v8, 4 }
 0x626   : > { %18470 = vmatprep.mubr.msk.bf16.mxu0 %vm6222_vm11, %v16982_v51  ;;  %v16986_v51 = vcombine.low %v24373_v14, %v24393_v57  ;;  %v17022_v14 = vrot.slane %v12014_v25, 9  ;;  %v12122_v25 = vrot.slane %v24500_v20, 5  ;;  %v12133_v20 = vrot.slane %v24525_v48, 5 }
 0x627   : > { %v24668_v59 = vsel %vm20304_vm7, %v12100_v50, %v12101_v53  ;;  %v12119_v50 = vrot.slane %v24494_v39, 5  ;;  %v24693_v22 = vsel %vm20304_vm7, %v12114_v29, %v12115_v62  ;;  %v17025_v62 = vrot.slane %v12017_v54, 9  ;;  %v12018_v29 = vld [vmem:[#allocation3 + $0x90] sm:$0xe]  ;;  %v12019_v53 = vld [vmem:[#allocation3 + $0x9c] sm:$0xe] }
 0x628   : > { %v24688_v19 = vsel %vm20304_vm7, %v17022_v14, %v12112_v8  ;;  %v12058_v39 = vrot.slane %v12056_v17, 4  ;;  %v12057_v0 = vsel %vm20304_vm7, %v17014_v47, %v12056_v17 }
 0x62d   : > { %18471 = vmatmul.mubr.msk.bf16.vlgmr.msra.gmra.mrb[32].mxu0 %vm6222_vm11, %v16983_v33  ;;  %v24663_v33 = vsel %vm20304_vm7, %v17020_v30, %v12098_v1  ;;  %v24679_v30 = vsel %vm20304_vm7, %v12107_v61, %v12108_v41  ;;  %v12121_v1 = vrot.slane %v12119_v50, 4  ;;  %v12126_v61 = vrot.slane %v24504_v45, 5 }
 0x62e   : > { %18503 = vmatpush3.bf16.msra.mxu0 %v12265_v16  ;;  %18474 = vmatprep.mubr.msk.bf16.mxu0 %vm6222_vm11, %v16984_v46  ;;  %v12015_v16 = vld [vmem:[#allocation3 + $0x6c] sm:$0xe]  ;;  %v12016_v46 = vld [vmem:[#allocation3 + $0x78] sm:$0xe] }
 0x62f   : > { %19532 = vmatprep.subr.msk.bf16.mxu0 %vm6271_vm10, %v24648_v2  ;;  %v17023_v9 = vrot.slane %v12015_v16, 9  ;;  %v17024_v43 = vrot.slane %v12016_v46, 9  ;;  %v12129_v16 = vrot.slane %v24515_v36, 5  ;;  %v24706_v8 = vsel %vm20304_vm7, %v12121_v1, %v12122_v25 }
 0x630   : > { %v12128_v46 = vrot.slane %v12126_v61, 4  ;;  %v17026_v25 = vrot.slane %v12018_v29, 9  ;;  %v12021_v29 = vld [vmem:[#allocation3 + $0xb4] sm:$0xe] }
 0x631   : > { %v24697_v41 = vsel %vm20304_vm7, %v17023_v9, %v12119_v50  ;;  %v16987_v50 = vcombine.low %v24403_v10, %v24413_v15  ;;  %v12135_v9 = vrot.slane %v12133_v20, 4  ;;  %v24716_v14 = vsel %vm20304_vm7, %v17024_v43, %v12126_v61  ;;  %v12020_v61 = vld [vmem:[#allocation3 + $0xa8] sm:$0xe] }
 0x632   : > { %v24720_v54 = vsel %vm20304_vm7, %v12128_v46, %v12129_v16  ;;  %v12140_v10 = vrot.slane %v24541_v34, 5  ;;  %v12147_v43 = vrot.slane %v24556_v49, 5  ;;  %v12063_v34 = vrot.slane %v19951_v52, 5 }
 0x634   : > { %v12142_v46 = vrot.slane %v12140_v10, 4  ;;  %v24739_v36 = vsel %vm20304_vm7, %v17026_v25, %v12140_v10  ;;  %v12149_v1 = vrot.slane %v12147_v43, 4  ;;  %v12065_v27 = vrot.slane %v12063_v34, 4  ;;  %v25026_v10 = vld [vmem:[#allocation3 + $0xac] sm:$0xf] }
 0x635   : > { %18475 = vmatmul.mubr.msk.bf16.gmra.mrb[36].mxu0 %vm6222_vm11, %v16985_v21  ;;  %v12136_v21 = vrot.slane %v24533_v63, 5 }
 0x636   : > { %18478 = vmatprep.mubr.msk.bf16.mxu0 %vm6222_vm11, %v16986_v51  ;;  %v24724_v51 = vsel %vm20304_vm7, %v17025_v62, %v12133_v20  ;;  %v12143_v20 = vrot.slane %v24550_v31, 5  ;;  %v17027_v62 = vrot.slane %v12019_v53, 9  ;;  %v17028_v31 = vrot.slane %v12020_v61, 9 }
 0x637   : > { %v24731_v63 = vsel %vm20304_vm7, %v12135_v9, %v12136_v21  ;;  %v12154_v9 = vrot.slane %v24573_v58, 5  ;;  %v12161_v53 = vrot.slane %v24589_v60, 5  ;;  %v24756_v7 = vsel %vm20304_vm7, %v12149_v1, %v12150_v23 }
 0x638   : > { %v24745_v21 = vsel %vm20304_vm7, %v12142_v46, %v12143_v20  ;;  %v24749_v16 = vsel %vm20304_vm7, %v17027_v62, %v12147_v43  ;;  %v17029_v43 = vrot.slane %v12021_v29, 9  ;;  %v12164_v61 = vrot.slane %v24600_v6, 5  ;;  %v19954_v29 = vld [vmem:[#allocation3 + $0x20] sm:$0x1] }
 0x639   : > { %v12156_v25 = vrot.slane %v12154_v9, 4  ;;  %v12163_v20 = vrot.slane %v12161_v53, 4  ;;  %v24769_v23 = vsel %vm20304_vm7, %v17028_v31, %v12154_v9  ;;  %v26696_v6 = vcombine.low %v24496_v3, %v24504_v45  ;;  %v12008_v9 = vld [vmem:[#allocation3 + $0x18] sm:$0xe]  ;;  %v25008_v46 = vld [vmem:[#allocation3 + $0xa0] sm:$0xf] }
 0x63a   : > { %v24779_v1 = vsel %vm20304_vm7, %v17029_v43, %v12161_v53  ;;  %v26699_v3 = vcombine.low %v24554_v18, %v24556_v49  ;;  %v26700_v45 = vcombine.low %v24562_v35, %v24573_v58  ;;  %v26701_v18 = vcombine.low %v24584_v42, %v24589_v60  ;;  %v12007_v49 = vld [vmem:[#allocation3 + $0xc] sm:$0xe]  ;;  %v19953_v58 = vld [vmem:[#allocation3 + $0x14] sm:$0x1] }
 0x63b   : > { %v24773_v55 = vsel %vm20304_vm7, %v12156_v25, %v12157_v5  ;;  %v24783_v26 = vsel %vm20304_vm7, %v12163_v20, %v12164_v61  ;;  %v12066_v62 = vrot.slane %v19953_v58, 5  ;;  %v12073_v31 = vrot.slane %v19954_v29, 5 }
 0x63c   : > { %v17015_v53 = vrot.slane %v12007_v49, 9  ;;  %v12077_v43 = vrot.slane %v24377_v11, 5  ;;  %v17016_v20 = vrot.slane %v12008_v9, 9  ;;  %v12084_v60 = vrot.slane %v24393_v57, 5  ;;  %v24844_v11 = vld [vmem:[%s26228_s5 + $0x10] sm:$0xf] }
 0x63d   : > { %18479 = vmatmul.mubr.msk.bf16.gmra.mrb[40].mxu0 %vm6222_vm11, %v16987_v50  ;;  %v12067_v25 = vsel %vm20304_vm7, %v12065_v27, %v12066_v62  ;;  %v12009_v57 = vld [vmem:[#allocation3 + $0x24] sm:$0xe]  ;;  %v12011_v49 = vld [vmem:[#allocation3 + $0x3c] sm:$0xe] }
 0x63e   : > { %18482 = vmatprep.mubr.msk.bf16.mxu0 %vm6222_vm11, %v16988_v44  ;;  %v19950_v44 = vld [vmem:[#allocation3 + $0x8] sm:$0x1]  ;;  %v12064_v61 = vsel %vm20304_vm7, %v17015_v53, %v12063_v34  ;;  %v12079_v12 = vrot.slane %v12077_v43, 4  ;;  %v12086_v47 = vrot.slane %v12084_v60, 4  ;;  %v17019_v58 = vrot.slane %v12011_v49, 9 }
 0x63f   : > { %v24873_v53 = vld [vmem:[#allocation3 + $0x28] sm:$0xf] }
 0x645   : > { %18483 = vmatmul.mubr.msk.bf16.gmra.mrb[44].mxu0 %vm6222_vm11, %v16989_v56  ;;  %v12059_v56 = vrot.slane %v19950_v44, 5 }
 0x646   : > { %18486 = vmatprep.mubr.msk.bf16.mxu0 %vm6222_vm11, %v16990_v28  ;;  %v19952_v28 = vld [vmem:[#allocation3 + $0x1c] sm:$0xf] }
 0x647   : > { %v12060_v48 = vsel %vm20304_vm7, %v12058_v39, %v12059_v56  ;;  %v26702_v39 = vld [vmem:[#allocation37_spill] sm:$0xff]  ;;  %v26703_v56 = vld [vmem:[#allocation31_spill] sm:$0xff] }
 0x648   : > { %v17031_v5 = vcombine.low %v12057_v0, %v12060_v48  ;;  %v12080_v44 = vrot.slane %v26702_v39, 5  ;;  %v12091_v48 = vrot.slane %v24413_v15, 5  ;;  %v13549_v39 = vld [vmem:[#allocation3 + $0x48] sm:$0xe] }
 0x64a   : > { %v12081_v0 = vsel %vm20304_vm7, %v12079_v12, %v12080_v44  ;;  %v12092_v9 = vsel %vm20304_vm7, %v17019_v58, %v12091_v48  ;;  %v24894_v12 = vld [vmem:[#allocation3 + $0x4c] sm:$0xf]  ;;  %v24904_v44 = vld [vmem:[#allocation3 + $0x58] sm:$0xf] }
 0x64d   : > { %18487 = vmatmul.mubr.msk.bf16.gmra.mrb[48].mxu0 %vm6222_vm11, %v16991_v37  ;;  %v12070_v37 = vrot.slane %v19952_v28, 5 }
 0x64e   : > { %18490 = vmatprep.mubr.msk.bf16.mxu0 %vm6222_vm11, %v26696_v6  ;;  %v17032_v6 = vcombine.low %v12064_v61, %v12067_v25  ;;  %v13546_v25 = vld [vmem:[#allocation3 + $0x24] sm:$0xe]  ;;  %v13624_v61 = vrot.slane %v24873_v53, 5 }
 0x64f   : > { %v12072_v35 = vrot.slane %v12070_v37, 4 }
 0x651   : > { %v12074_v42 = vsel %vm20304_vm7, %v12072_v35, %v12073_v31  ;;  %v26704_v35 = vld [vmem:[#allocation39_spill] sm:$0xff]  ;;  %v26705_v31 = vcombine.low %v24663_v33, %v24668_v59  ;;  %v26707_v33 = vcombine.low %v24688_v19, %v24693_v22  ;;  %v24890_v59 = vld [vmem:[#allocation3 + $0x40] sm:$0xf] }
 0x652   : > { %v12094_v15 = vrot.slane %v26704_v35, 5 }
 0x655   : > { %18491 = vmatmul.mubr.msk.bf16.gmra.mrb[52].mxu0 %vm6222_vm11, %v26697_v4  ;;  %v12623_v4 = vsel %vm6271_vm10, %v24648_v2, 0  ;;  %v12010_v2 = vld [vmem:[#allocation3 + $0x30] sm:$0xe] }
 0x656   : > { %18494 = vmatprep.mubr.msk.bf16.mxu0 %vm6222_vm11, %v26698_v24  ;;  %v12071_v24 = vsel %vm20304_vm7, %v17016_v20, %v12070_v37  ;;  %v17018_v52 = vrot.slane %v12010_v2, 9  ;;  %v24877_v20 = vld [vmem:[#allocation3 + $0x34] sm:$0xf] }
 0x657   : > { %v17033_v17 = vcombine.low %v12071_v24, %v12074_v42  ;;  %v26706_v42 = vcombine.low %v24672_v38, %v24679_v30  ;;  %v13548_v24 = vld [vmem:[#allocation3 + $0x3c] sm:$0xe]  ;;  %v13626_v38 = vrot.slane %v13624_v61, 4  ;;  %v13631_v22 = vrot.slane %v24877_v20, 5 }
 0x65d   : > { %18495 = vmatmul.mubr.msk.bf16.gmra.mrb[56].mxu0 %vm6222_vm11, %v26699_v3  ;;  %v12087_v3 = vrot.slane %v26703_v56, 5 }
 0x65e   : > { %18498 = vmatprep.mubr.msk.bf16.mxu0 %vm6222_vm11, %v26700_v45  ;;  %v17017_v45 = vrot.slane %v12009_v57, 9  ;;  %v24897_v57 = vld [vmem:[#allocation3 + $0x50] sm:$0x1] }
 0x65f   : > { %v12088_v34 = vsel %vm20304_vm7, %v12086_v47, %v12087_v3  ;;  %v17133_v3 = vrot.slane %v13548_v24, 9  ;;  %v13552_v24 = vld [vmem:[#allocation3 + $0x6c] sm:$0xe] }
 0x660   : > { %v12078_v28 = vsel %vm20304_vm7, %v17017_v45, %v12077_v43  ;;  %v24875_v43 = vld [vmem:[#allocation3 + $0x2c] sm:$0x1]  ;;  %v13638_v45 = vrot.slane %v24890_v59, 5 }
 0x661   : > { %v17034_v37 = vcombine.low %v12078_v28, %v12081_v0  ;;  %v13627_v30 = vrot.slane %v24875_v43, 5  ;;  %v24912_v0 = vld [vmem:[#allocation3 + $0x64] sm:$0xf]  ;;  %v13645_v28 = vrot.slane %v24894_v12, 5 }
 0x662   : > { %v24928_v49 = vsel %vm20304_vm7, %v17133_v3, %v13638_v45  ;;  %v13640_v35 = vrot.slane %v13638_v45, 4  ;;  %v13659_v45 = vrot.slane %v24912_v0, 5 }
 0x663   : > { %v24908_v2 = vsel %vm20304_vm7, %v13626_v38, %v13627_v30  ;;  %26711 = vst [vmem:[#allocation19_spill] sm:$0xff] %v24928_v49  ;;  %v24958_v38 = vld [vmem:[#allocation3 + $0x7c] sm:$0xf]  ;;  %v25000_v30 = vld [vmem:[#allocation3 + $0x98] sm:$0x1] }
 0x664   : > { %26709 = vst [vmem:[#allocation40_spill] sm:$0xff] %v24908_v2 }
 0x665   : > { %18499 = vmatmul.mubr.msk.bf16.gmra.mrb[60].mxu0 %vm6222_vm11, %v26701_v18  ;;  %v12093_v18 = vrot.slane %v12091_v48, 4 }
 0x666   : > { %18504 = vmatprep.mubr.msk.bf16.mxu0 %vm6222_vm11, %v17031_v5  ;;  %v12085_v5 = vsel %vm20304_vm7, %v17018_v52, %v12084_v60  ;;  %v24883_v60 = vld [vmem:[#allocation3 + $0x38] sm:$0x1]  ;;  %v13633_v52 = vrot.slane %v13631_v22, 4 }
 0x667   : > { %v17035_v27 = vcombine.low %v12085_v5, %v12088_v34  ;;  %v12095_v62 = vsel %vm20304_vm7, %v12093_v18, %v12094_v15  ;;  %v13634_v56 = vrot.slane %v24883_v60, 5  ;;  %v24918_v5 = vld [vmem:[#allocation3 + $0x5c] sm:$0x1]  ;;  %v17134_v15 = vrot.slane %v13549_v39, 9 }
 0x668   : > { %v17036_v29 = vcombine.low %v12092_v9, %v12095_v62  ;;  %v13647_v62 = vrot.slane %v13645_v28, 4  ;;  %v13648_v9 = vrot.slane %v24897_v57, 5  ;;  %v13655_v39 = vrot.slane %v24918_v5, 5 }
 0x669   : > { %v24932_v58 = vsel %vm20304_vm7, %v13633_v52, %v13634_v56  ;;  %v24967_v56 = vld [vmem:[#allocation3 + $0x80] sm:$0x1]  ;;  %v13553_v52 = vld [vmem:[#allocation3 + $0x78] sm:$0xe] }
 0x66a   : > { %26712 = vst [vmem:[#allocation7_spill] sm:$0xff] %v24932_v58  ;;  %v13676_v40 = vrot.slane %v24967_v56, 5 }
 0x66d   : > { %18505 = vmatmul.mubr.msk.bf16.vlgmr.msra.gmra.mrb[32].mxu0 %vm6222_vm11, %v17032_v6  ;;  %v13547_v6 = vld [vmem:[#allocation3 + $0x30] sm:$0xe] }
 0x66e   : > { %18537 = vmatpush3.bf16.msra.mxu0 %v12623_v4  ;;  %18508 = vmatprep.mubr.msk.bf16.mxu0 %vm6222_vm11, %v17033_v17  ;;  %v17131_v4 = vrot.slane %v13546_v25, 9  ;;  %v24892_v17 = vld [vmem:[#allocation3 + $0x44] sm:$0x1]  ;;  %v17132_v19 = vrot.slane %v13547_v6, 9  ;;  %v26713_v25 = vcombine.low %v24697_v41, %v24706_v8  ;;  %v26716_v41 = vcombine.low %v24716_v14, %v24720_v54  ;;  %v24956_v8 = vld [vmem:[#allocation3 + $0x74] sm:$0x1] }
 0x66f   : > { %19533 = vmatprep.subr.msk.bf16.mxu0 %vm6271_vm10, %v24844_v11  ;;  %v13641_v34 = vrot.slane %v24892_v17, 5  ;;  %v24990_v14 = vld [vmem:[#allocation3 + $0x94] sm:$0xf] }
 0x670   : > { %v24901_v47 = vsel %vm20304_vm7, %v17131_v4, %v13624_v61  ;;  %v24924_v18 = vsel %vm20304_vm7, %v17132_v19, %v13631_v22  ;;  %v24964_v19 = vsel %vm20304_vm7, %v13647_v62, %v13648_v9  ;;  %v13661_v9 = vrot.slane %v13659_v45, 4 }
 0x671   : > { %26708 = vst [vmem:[#allocation38_spill] sm:$0xff] %v24901_v47  ;;  %26710 = vst [vmem:[#allocation16_spill] sm:$0xff] %v24924_v18  ;;  %v24946_v6 = vsel %vm20304_vm7, %v13640_v35, %v13641_v34  ;;  %v24976_v34 = vld [vmem:[#allocation3 + $0x88] sm:$0xf]  ;;  %v17137_v35 = vrot.slane %v13552_v24, 9  ;;  %v17138_v62 = vrot.slane %v13553_v52, 9 }
 0x672   : > { %26714 = vst [vmem:[#allocation17_spill] sm:$0xff] %v24946_v6  ;;  %26717 = vst [vmem:[#allocation18_spill] sm:$0xff] %v24964_v19  ;;  %v13680_v50 = vrot.slane %v24976_v34, 5  ;;  %v12833_v18 = vld [vmem:[#allocation3 + $0x48] sm:$0xf] }
 0x675   : > { %18509 = vmatmul.mubr.msk.bf16.gmra.mrb[36].mxu0 %vm6222_vm11, %v17034_v37  ;;  %v13550_v37 = vld [vmem:[#allocation3 + $0x54] sm:$0xe] }
 0x676   : > { %18512 = vmatprep.mubr.msk.bf16.mxu0 %vm6222_vm11, %v17035_v27  ;;  %v24920_v27 = vld [vmem:[#allocation3 + $0x68] sm:$0x1]  ;;  %v17135_v4 = vrot.slane %v13550_v37, 9 }
 0x677   : > { %v13662_v37 = vrot.slane %v24920_v27, 5 }
 0x679   : > { %v25004_v61 = vsel %vm20304_vm7, %v13661_v9, %v13662_v37  ;;  %v25024_v9 = vld [vmem:[#allocation3 + $0xa4] sm:$0x1] }
 0x67a   : > { %26722 = vst [vmem:[#allocation11_spill] sm:$0xff] %v25004_v61  ;;  %v25070_v61 = vld [vmem:[#allocation3 + $0xc4] sm:$0xf] }
 0x67d   : > { %18513 = vmatmul.mubr.msk.bf16.gmra.mrb[40].mxu0 %vm6222_vm11, %v17036_v29  ;;  %v13652_v29 = vrot.slane %v24904_v44, 5 }
 0x67e   : > { %18516 = vmatprep.mubr.msk.bf16.mxu0 %vm6222_vm11, %v26705_v31  ;;  %v13551_v31 = vld [vmem:[#allocation3 + $0x60] sm:$0xe] }
 0x67f   : > { %v13654_v22 = vrot.slane %v13652_v29, 4  ;;  %v24973_v54 = vsel %vm20304_vm7, %v17135_v4, %v13652_v29  ;;  %v17136_v3 = vrot.slane %v13551_v31, 9  ;;  %v13669_v29 = vrot.slane %v24956_v8, 5  ;;  %v13555_v4 = vld [vmem:[#allocation3 + $0x90] sm:$0xe] }
 0x680   : > { %26718 = vst [vmem:[#allocation5_spill] sm:$0xff] %v24973_v54  ;;  %v13673_v31 = vrot.slane %v24958_v38, 5  ;;  %v12827_v54 = vld [vmem:[#allocation3 + $0x30] sm:$0xf] }
 0x681   : > { %v12942_v6 = vshll.u32 %v12827_v54, 16 }
 0x682   : > { %v13675_v48 = vrot.slane %v13673_v31, 4  ;;  %v25018_v52 = vsel %vm20304_vm7, %v17138_v62, %v13673_v31  ;;  %v13682_v62 = vrot.slane %v13680_v50, 4 }
 0x683   : > { %26724 = vst [vmem:[#allocation15_spill] sm:$0xff] %v25018_v52  ;;  %v25060_v52 = vld [vmem:[#allocation3 + $0xbc] sm:$0x1] }
 0x685   : > { %18517 = vmatmul.mubr.msk.bf16.gmra.mrb[44].mxu0 %vm6222_vm11, %v26706_v42  ;;  %v24940_v42 = vld [vmem:[#allocation3 + $0x70] sm:$0xf] }
 0x686   : > { %18520 = vmatprep.mubr.msk.bf16.mxu0 %vm6222_vm11, %v26707_v33  ;;  %v24950_v33 = vsel %vm20304_vm7, %v17134_v15, %v13645_v28  ;;  %v24980_v28 = vsel %vm20304_vm7, %v13654_v22, %v13655_v39  ;;  %v13666_v15 = vrot.slane %v24940_v42, 5  ;;  %v24994_v22 = vsel %vm20304_vm7, %v17136_v3, %v13659_v45  ;;  %v25048_v3 = vld [vmem:[#allocation3 + $0xb8] sm:$0xf] }
 0x687   : > { %26715 = vst [vmem:[#allocation8_spill] sm:$0xff] %v24950_v33  ;;  %26719 = vst [vmem:[#allocation6_spill] sm:$0xff] %v24980_v28  ;;  %v12924_v33 = vshll.u32 %v24873_v53, 16 }
 0x688   : > { %26720 = vst [vmem:[#allocation9_spill] sm:$0xff] %v24994_v22  ;;  %v24998_v24 = vsel %vm20304_vm7, %v17137_v35, %v13666_v15  ;;  %v13668_v39 = vrot.slane %v13666_v15, 4  ;;  %v13556_v35 = vld [vmem:[#allocation3 + $0x9c] sm:$0xe]  ;;  %v26725_v15 = vcombine.low %v24724_v51, %v24731_v63  ;;  %v25039_v51 = vld [vmem:[#allocation3 + $0xb0] sm:$0x1] }
 0x689   : > { %26721 = vst [vmem:[#allocation10_spill] sm:$0xff] %v24998_v24  ;;  %v13708_v22 = vrot.slane %v25048_v3, 5 }
 0x68a   : > { %v25014_v45 = vsel %vm20304_vm7, %v13668_v39, %v13669_v29  ;;  %v25032_v29 = vsel %vm20304_vm7, %v13675_v48, %v13676_v40  ;;  %v13687_v40 = vrot.slane %v24990_v14, 5  ;;  %v13557_v48 = vld [vmem:[#allocation3 + $0xa8] sm:$0xe] }
 0x68b   : > { %26723 = vst [vmem:[#allocation20_spill] sm:$0xff] %v25014_v45  ;;  %26726 = vst [vmem:[#allocation21_spill] sm:$0xff] %v25032_v29  ;;  %v13694_v45 = vrot.slane %v25008_v46, 5  ;;  %v13558_v29 = vld [vmem:[#allocation3 + $0xb4] sm:$0xe]  ;;  %v17142_v24 = vrot.slane %v13557_v48, 9 }
 0x68c   : > { %v17143_v48 = vrot.slane %v13558_v29, 9  ;;  %v13710_v28 = vrot.slane %v13708_v22, 4  ;;  %v13715_v29 = vrot.slane %v25070_v61, 5 }
 0x68d   : > { %18521 = vmatmul.mubr.msk.bf16.gmra.mrb[48].mxu0 %vm6222_vm11, %v26713_v25  ;;  %v13554_v25 = vld [vmem:[#allocation3 + $0x84] sm:$0xe] }
 0x68e   : > { %18524 = vmatprep.mubr.msk.bf16.mxu0 %vm6222_vm11, %v26716_v41  ;;  %v24988_v41 = vld [vmem:[#allocation3 + $0x8c] sm:$0x1]  ;;  %v17139_v37 = vrot.slane %v13554_v25, 9  ;;  %v26727_v25 = vcombine.low %v24739_v36, %v24745_v21  ;;  %v13690_v21 = vrot.slane %v25000_v30, 5 }
 0x68f   : > { %v13683_v31 = vrot.slane %v24988_v41, 5 }
 0x690   : > { %v25045_v39 = vsel %vm20304_vm7, %v17139_v37, %v13680_v50  ;;  %v13689_v50 = vrot.slane %v13687_v40, 4  ;;  %v13701_v37 = vrot.slane %v25026_v10, 5 }
 0x691   : > { %26728 = vst [vmem:[#allocation22_spill] sm:$0xff] %v25045_v39  ;;  %v25052_v36 = vsel %vm20304_vm7, %v13682_v62, %v13683_v31  ;;  %v13696_v31 = vrot.slane %v13694_v45, 4  ;;  %v13704_v39 = vrot.slane %v25039_v51, 5 }
 0x692   : > { %26729 = vst [vmem:[#allocation23_spill] sm:$0xff] %v25052_v36  ;;  %v25074_v63 = vsel %vm20304_vm7, %v13689_v50, %v13690_v21  ;;  %v13703_v36 = vrot.slane %v13701_v37, 4 }
 0x693   : > { %26732 = vst [vmem:[#allocation26_spill] sm:$0xff] %v25074_v63  ;;  %v13559_v63 = vld [vmem:[#allocation3 + $0xc0] sm:$0xe] }
 0x694   : > { %v25094_v50 = vsel %vm20304_vm7, %v13703_v36, %v13704_v39  ;;  %v25110_v39 = vsel %vm20304_vm7, %v17143_v48, %v13708_v22  ;;  %v13349_v48 = vsel %vm6271_vm10, %v24844_v11, 0  ;;  %v19657_v11 = vld [vmem:[#allocation3 + $0x30] sm:$0xff]   ;;  %v12821_v22 = vld [vmem:[#allocation3 + $0x18] sm:$0xf] }
 0x695   : > { %18525 = vmatmul.mubr.msk.bf16.gmra.mrb[52].mxu0 %vm6222_vm11, %v26725_v15  ;;  %v17140_v15 = vrot.slane %v13555_v4, 9  ;;  %v13697_v4 = vrot.slane %v25024_v9, 5  ;;  %26736 = vst [vmem:[#allocation30_spill] sm:$0xff] %v25094_v50  ;;  %26739 = vst [vmem:[#allocation32_spill] sm:$0xff] %v25110_v39  ;;  %v12891_v21 = vshrl.u32 %v12821_v22, 16  ;;  %v19659_v50 = vld [vmem:[#allocation3 + $0x48] sm:$0xff]  }
 0x696   : > { %18528 = vmatprep.mubr.msk.bf16.mxu0 %vm6222_vm11, %v26727_v25  ;;  %v17141_v25 = vrot.slane %v13556_v35, 9  ;;  %v25157_v39 = vld [vmem:[#allocation3 + $0x20] sm:$0x1] }
 0x697   : > { %v25064_v62 = vsel %vm20304_vm7, %v17140_v15, %v13687_v40  ;;  %v25082_v40 = vsel %vm20304_vm7, %v13696_v31, %v13697_v4  ;;  %v13711_v15 = vrot.slane %v25060_v52, 5  ;;  %v26737_v4 = vcombine.low %v24749_v16, %v24756_v7  ;;  %26747 = vst [vmem:[#allocation42_spill] sm:$0xff] %v25157_v39 }
 0x698   : > { %26730 = vst [vmem:[#allocation24_spill] sm:$0xff] %v25064_v62  ;;  %v25068_v35 = vsel %vm20304_vm7, %v17141_v25, %v13694_v45  ;;  %26733 = vst [vmem:[#allocation28_spill] sm:$0xff] %v25082_v40  ;;  %v25086_v45 = vsel %vm20304_vm7, %v17142_v24, %v13701_v37  ;;  %v25088_v25 = vld [vmem:[#allocation3 + $0xc8] sm:$0x1]  ;;  %v26738_v37 = vcombine.low %v24769_v23, %v24773_v55  ;;  %v17144_v7 = vrot.slane %v13559_v63, 9  ;;  %v19655_v63 = vld [vmem:[#allocation3 + $0x18] sm:$0xff]  }
 0x699   : > { %26731 = vst [vmem:[#allocation25_spill] sm:$0xff] %v25068_v35  ;;  %26734 = vst [vmem:[#allocation27_spill] sm:$0xff] %v25086_v45  ;;  %v25114_v36 = vsel %vm20304_vm7, %v13710_v28, %v13711_v15  ;;  %v13717_v31 = vrot.slane %v13715_v29, 4  ;;  %v19654_v28 = vld [vmem:[#allocation3 + $0xc] sm:$0xff]   ;;  %v26743_v15 = vcombine.low %v24779_v1, %v24783_v26  ;;  %v12893_v40 = vrot.slane %v12891_v21, 4 }
 0x69a   : > { %26735 = vst [vmem:[#allocation29_spill] sm:$0xff] %v25088_v25  ;;  %26740 = vst [vmem:[#allocation33_spill] sm:$0xff] %v25114_v36  ;;  %v25121_v23 = vsel %vm20304_vm7, %v17144_v7, %v13715_v29  ;;  %v19656_v29 = vld [vmem:[#allocation3 + $0x24] sm:$0xff]   ;;  %v12818_v1 = vld [vmem:[#allocation3 + $0xc] sm:$0xf] }
 0x69b   : > { %26741 = vst [vmem:[#allocation34_spill] sm:$0xff] %v25121_v23  ;;  %v25145_v26 = vld [vmem:[#allocation3 + $0x10] sm:$0xf]  ;;  %v12867_v7 = vshrl.u32 %v12818_v1, 16  ;;  %v25155_v36 = vld [vmem:[#allocation3 + $0x14] sm:$0x1] }
 0x69c   : > { %26744 = vst [vmem:[#allocation36_spill] sm:$0xff] %v25145_v26  ;;  %26746 = vst [vmem:[#allocation43_spill] sm:$0xff] %v25155_v36 }
 0x69d   : > { %18529 = vmatmul.mubr.msk.bf16.gmra.mrb[56].mxu0 %vm6222_vm11, %v26737_v4  ;;  %v13718_v4 = vrot.slane %v25088_v25, 5 }
 0x69e   : > { %18532 = vmatprep.mubr.msk.bf16.mxu0 %vm6222_vm11, %v26738_v37  ;;  %v25139_v37 = vld [vmem:[%s26228_s5 + $0x14] sm:$0xf] }
 0x69f   : > { %v25125_v55 = vsel %vm20304_vm7, %v13717_v31, %v13718_v4  ;;  %v12870_v31 = vshll.u32 %v12818_v1, 16  ;;  %v12876_v4 = vshll.u32 %v25145_v26, 16 }
 0x6a0   : > { %26742 = vst [vmem:[#allocation35_spill] sm:$0xff] %v25125_v55  ;;  %v12894_v55 = vshll.u32 %v12821_v22, 16 }
 0x6a1   : > { %v12878_v16 = vrot.slane %v12876_v4, 5 }
 0x6a2   : > { %v12896_v35 = vrot.slane %v12894_v55, 5 }
 0x6a5   : > { %18533 = vmatmul.mubr.msk.bf16.gmra.mrb[60].mxu0 %vm6222_vm11, %v26743_v15  ;;  %v19658_v15 = vld [vmem:[#allocation3 + $0x3c] sm:$0xff]  }
 0x6a6   : > { %18538 = vmatprep.mubr.msk.bf16.mxu0 %vm6222_vm11, %v19654_v28  ;;  %v12880_v28 = vshrl.u32 %v25145_v26, 16  ;;  %v25330_v26 = vld [vmem:[#allocation3 + $0x58] sm:$0xf] }
 0x6a7   : > { %26760 = vst [vmem:[#allocation65_spill] sm:$0xff] %v25330_v26 }
 0x6a8   : > { %v12882_v24 = vrot.slane %v12880_v28, 4  ;;  %v12910_v28 = vshll.u32 %v25157_v39, 16  ;;  %v19664_v39 = vld [vmem:[#allocation3 + $0x84] sm:$0xff]  }
 0x6aa   : > { %v12883_v45 = vor.u32 %v12882_v24, %v12878_v16  ;;  %v12897_v24 = vor.u32 %v12896_v35, %v12893_v40  ;;  %v12912_v49 = vrot.slane %v12910_v28, 5  ;;  %v12944_v28 = vrot.slane %v12942_v6, 5 }
 0x6ad   : > { %18539 = vmatmul.mubr.msk.bf16.vlgmr.msra.gmra.mrb[32].mxu0 %vm6222_vm11, %v19655_v63  ;;  %v25150_v63 = vld [vmem:[#allocation3 + $0x1c] sm:$0xf] }
 0x6ae   : > { %18571 = vmatpush3.bf16.msra.mxu0 %v13349_v48  ;;  %18542 = vmatprep.mubr.msk.bf16.mxu0 %vm6222_vm11, %v19656_v29  ;;  %26745 = vst [vmem:[#allocation41_spill] sm:$0xff] %v25150_v63  ;;  %v12869_v48 = vrot.slane %v12867_v7, 4  ;;  %v12872_v29 = vrot.slane %v12870_v31, 5  ;;  %v12900_v1 = vshll.u32 %v25150_v63, 16  ;;  %v12904_v23 = vshrl.u32 %v25150_v63, 16  ;;  %v19660_v7 = vld [vmem:[#allocation3 + $0x54] sm:$0xff]  }
 0x6af   : > { %19534 = vmatprep.subr.msk.bf16.mxu0 %vm6271_vm10, %v25139_v37  ;;  %v12886_v31 = vshll.u32 %v25155_v36, 16 }
 0x6b0   : > { %v25160_v4 = vrot.slane %v12900_v1, 5  ;;  %v12906_v22 = vrot.slane %v12904_v23, 4  ;;  %v12928_v1 = vshrl.u32 %v24873_v53, 16  ;;  %v12939_v23 = vshrl.u32 %v12827_v54, 16  ;;  %v19662_v53 = vld [vmem:[#allocation3 + $0x6c] sm:$0xff]  }
 0x6b1   : > { %v12888_v55 = vrot.slane %v12886_v31, 5  ;;  %v12830_v31 = vld [vmem:[#allocation3 + $0x3c] sm:$0xf]  ;;  %v25174_v54 = vrot.slane %v12924_v33, 5 }
 0x6b2   : > { %v12930_v2 = vrot.slane %v12928_v1, 4 }
 0x6b5   : > { %18543 = vmatmul.mubr.msk.bf16.gmra.mrb[36].mxu0 %vm6222_vm11, %v19657_v11  ;;  %v12873_v11 = vor.u32 %v12872_v29, %v12869_v48  ;;  %v12884_v48 = vrot.slane %v12883_v45, 4  ;;  %v12907_v29 = vor.u32 %v12906_v22, %v25160_v4  ;;  %v12898_v45 = vrot.slane %v12897_v24, 4 }
 0x6b6   : > { %18546 = vmatprep.mubr.msk.bf16.mxu0 %vm6222_vm11, %v19658_v15  ;;  %v12824_v15 = vld [vmem:[#allocation3 + $0x24] sm:$0xf]  ;;  %v12972_v24 = vshll.u32 %v24890_v59, 16 }
 0x6b7   : > { %v12915_v62 = vshrl.u32 %v12824_v15, 16  ;;  %v12874_v19 = vrot.slane %v12873_v11, 4  ;;  %v12918_v21 = vshll.u32 %v12824_v15, 16  ;;  %v19661_v11 = vld [vmem:[#allocation3 + $0x60] sm:$0xff]   ;;  %v12889_v40 = vsel %vm20078_vm4, %v12884_v48, %v12888_v55 }
 0x6b8   : > { %v12908_v22 = vrot.slane %v12907_v29, 4  ;;  %v12966_v48 = vshll.u32 %v12830_v31, 16  ;;  %v12987_v55 = vshrl.u32 %v12833_v18, 16  ;;  %v12990_v29 = vshll.u32 %v12833_v18, 16 }
 0x6b9   : > { %v12917_v58 = vrot.slane %v12915_v62, 4  ;;  %v12879_v35 = vsel %vm20078_vm4, %v12874_v19, %v12878_v16  ;;  %v12920_v15 = vrot.slane %v12918_v21, 5  ;;  %v12941_v62 = vrot.slane %v12939_v23, 4 }
 0x6ba   : > { %v12963_v16 = vshrl.u32 %v12830_v31, 16  ;;  %v12976_v21 = vshrl.u32 %v24890_v59, 16  ;;  %v25183_v33 = vcombine.low %v12879_v35, %v12889_v40  ;;  %v12913_v6 = vsel %vm20078_vm4, %v12908_v22, %v12912_v49 }
 0x6bb   : > { %v12921_v1 = vor.u32 %v12920_v15, %v12917_v58  ;;  %v12996_v23 = vshll.u32 %v24894_v12, 16  ;;  %v12945_v59 = vor.u32 %v12944_v28, %v12941_v62  ;;  %v12958_v40 = vshll.u32 %v24883_v60, 16 }
 0x6bc   : > { %v12965_v31 = vrot.slane %v12963_v16, 4  ;;  %v12978_v18 = vrot.slane %v12976_v21, 4  ;;  %v12989_v49 = vrot.slane %v12987_v55, 4  ;;  %v12992_v58 = vrot.slane %v12990_v29, 5  ;;  %v12839_v29 = vld [vmem:[#allocation3 + $0x60] sm:$0xf] }
 0x6bd   : > { %18547 = vmatmul.mubr.msk.bf16.gmra.mrb[40].mxu0 %vm6222_vm11, %v19659_v50  ;;  %v12948_v50 = vshll.u32 %v24877_v20, 16  ;;  %v13024_v62 = vshrl.u32 %v24904_v44, 16  ;;  %v12922_v28 = vrot.slane %v12921_v1, 4  ;;  %v12982_v55 = vshll.u32 %v24892_v17, 16 }
 0x6be   : > { %18550 = vmatprep.mubr.msk.bf16.mxu0 %vm6222_vm11, %v19660_v7  ;;  %v12952_v7 = vshrl.u32 %v24877_v20, 16  ;;  %v12934_v20 = vshll.u32 %v24875_v43, 16  ;;  %v12903_v43 = vsel %vm20078_vm4, %v12898_v45, %v25160_v4  ;;  %v12968_v4 = vrot.slane %v12966_v48, 5 }
 0x6bf   : > { %v25178_v47 = vrot.slane %v12948_v50, 5  ;;  %v13000_v50 = vshrl.u32 %v24894_v12, 16  ;;  %v25195_v45 = vrot.slane %v12972_v24, 5  ;;  %v25197_v12 = vrot.slane %v12996_v23, 5 }
 0x6c0   : > { %v12954_v19 = vrot.slane %v12952_v7, 4  ;;  %v12836_v7 = vld [vmem:[#allocation3 + $0x54] sm:$0xf]  ;;  %v25202_v60 = vcombine.low %v12903_v43, %v12913_v6  ;;  %v12936_v16 = vrot.slane %v12934_v20, 5  ;;  %v12946_v48 = vrot.slane %v12945_v59, 4 }
 0x6c1   : > { %v13011_v15 = vshrl.u32 %v12836_v7, 16  ;;  %v13014_v22 = vshll.u32 %v12836_v7, 16  ;;  %v13002_v63 = vrot.slane %v13000_v50, 4  ;;  %v12960_v24 = vrot.slane %v12958_v40, 5 }
 0x6c2   : > { %v12955_v35 = vor.u32 %v12954_v19, %v25178_v47  ;;  %v12979_v21 = vor.u32 %v12978_v18, %v25195_v45  ;;  %v12969_v50 = vor.u32 %v12968_v4, %v12965_v31  ;;  %v12993_v36 = vor.u32 %v12992_v58, %v12989_v49  ;;  %v12842_v49 = vld [vmem:[#allocation3 + $0x6c] sm:$0xf]  ;;  %v19666_v58 = vld [vmem:[#allocation3 + $0x9c] sm:$0xff]  }
 0x6c3   : > { %v13013_v7 = vrot.slane %v13011_v15, 4  ;;  %v13003_v43 = vor.u32 %v13002_v63, %v25197_v12  ;;  %v13026_v1 = vrot.slane %v13024_v62, 4  ;;  %v13035_v20 = vshrl.u32 %v12839_v29, 16  ;;  %v19665_v63 = vld [vmem:[#allocation3 + $0x90] sm:$0xff]  }
 0x6c4   : > { %v12956_v23 = vrot.slane %v12955_v35, 4  ;;  %v13048_v59 = vshrl.u32 %v24912_v0, 16  ;;  %v12927_v17 = vsel %vm20078_vm4, %v12922_v28, %v25174_v54  ;;  %v12980_v40 = vrot.slane %v12979_v21, 4 }
 0x6c5   : > { %18551 = vmatmul.mubr.msk.bf16.gmra.mrb[44].mxu0 %vm6222_vm11, %v19661_v11  ;;  %v12931_v11 = vor.u32 %v12930_v2, %v25174_v54  ;;  %v13020_v2 = vshll.u32 %v24904_v44, 16  ;;  %v13016_v44 = vrot.slane %v13014_v22, 5  ;;  %v13006_v31 = vshll.u32 %v24897_v57, 16 }
 0x6c6   : > { %18554 = vmatprep.mubr.msk.bf16.mxu0 %vm6222_vm11, %v19662_v53  ;;  %v19663_v53 = vld [vmem:[#allocation3 + $0x78] sm:$0xff]   ;;  %v12951_v4 = vsel %vm20078_vm4, %v12946_v48, %v25178_v47  ;;  %v12961_v18 = vsel %vm20078_vm4, %v12956_v23, %v12960_v24  ;;  %v12970_v15 = vrot.slane %v12969_v50, 4  ;;  %v12994_v54 = vrot.slane %v12993_v36, 4 }
 0x6c7   : > { %v12932_v19 = vrot.slane %v12931_v11, 4  ;;  %v25208_v6 = vrot.slane %v13020_v2, 5  ;;  %v13038_v11 = vshll.u32 %v12839_v29, 16  ;;  %v13004_v22 = vrot.slane %v13003_v43, 4  ;;  %v12845_v23 = vld [vmem:[#allocation3 + $0x78] sm:$0xf] }
 0x6c8   : > { %v13037_v57 = vrot.slane %v13035_v20, 4  ;;  %v13059_v48 = vshrl.u32 %v12842_v49, 16  ;;  %v13062_v24 = vshll.u32 %v12842_v49, 16  ;;  %v25232_v36 = vcombine.low %v12951_v4, %v12961_v18  ;;  %v25318_v4 = vld [vmem:[#allocation3 + $0x50] sm:$0x1] }
 0x6c9   : > { %v12937_v35 = vsel %vm20078_vm4, %v12932_v19, %v12936_v16  ;;  %v13027_v2 = vor.u32 %v13026_v1, %v25208_v6  ;;  %v13040_v62 = vrot.slane %v13038_v11, 5  ;;  %v13050_v19 = vrot.slane %v13048_v59, 4  ;;  %26758 = vst [vmem:[#allocation58_spill] sm:$0xff] %v25318_v4 }
 0x6ca   : > { %v13008_v16 = vrot.slane %v13006_v31, 5  ;;  %v25230_v21 = vcombine.low %v12927_v17, %v12937_v35  ;;  %v13030_v29 = vshll.u32 %v24918_v5, 16  ;;  %v12975_v50 = vsel %vm20078_vm4, %v12970_v15, %v25195_v45  ;;  %v25249_v5 = vld [vmem:[#allocation3 + $0x1c] sm:$0xf]  ;;  %v19667_v31 = vld [vmem:[#allocation3 + $0xa8] sm:$0xff]  }
 0x6cb   : > { %v13072_v43 = vshrl.u32 %v24940_v42, 16  ;;  %v25246_v20 = vrot.slane %v13027_v2, 4  ;;  %v13041_v11 = vor.u32 %v13040_v62, %v13037_v57  ;;  %26748 = vst [vmem:[#allocation45_spill] sm:$0xff] %v25249_v5  ;;  %v12999_v45 = vsel %vm20078_vm4, %v12994_v54, %v25197_v12  ;;  %v25268_v12 = vld [vmem:[#allocation3 + $0x28] sm:$0xf] }
 0x6cc   : > { %v25254_v59 = vrot.slane %v13059_v48, 4  ;;  %v25256_v17 = vrot.slane %v13062_v24, 5  ;;  %v13083_v35 = vshrl.u32 %v12845_v23, 16  ;;  %v25266_v18 = vrot.slane %v13030_v29, 5  ;;  %26750 = vst [vmem:[#allocation46_spill] sm:$0xff] %v25268_v12 }
 0x6cd   : > { %18555 = vmatmul.mubr.msk.bf16.gmra.mrb[48].mxu0 %vm6222_vm11, %v19663_v53  ;;  %v12984_v53 = vrot.slane %v12982_v55, 5  ;;  %v25273_v15 = vrot.slane %v13072_v43, 4  ;;  %v13092_v54 = vshll.u32 %v24958_v38, 16  ;;  %v25278_v2 = vld [vmem:[#allocation3 + $0x34] sm:$0xf]  ;;  %v25285_v62 = vrot.slane %v13041_v11, 4 }
 0x6ce   : > { %18558 = vmatprep.mubr.msk.bf16.mxu0 %vm6222_vm11, %v19664_v39  ;;  %v13044_v39 = vshll.u32 %v24912_v0, 16  ;;  %v13017_v0 = vor.u32 %v13016_v44, %v13013_v7  ;;  %v13009_v7 = vsel %vm20078_vm4, %v13004_v22, %v13008_v16  ;;  %v13068_v44 = vshll.u32 %v24940_v42, 16  ;;  %v15099_v42 = vld [vmem:[#allocation3 + $0x18] sm:$0xe]  ;;  %v25276_v22 = vld [vmem:[#allocation3 + $0x2c] sm:$0x1] }
 0x6cf   : > { %v12985_v47 = vsel %vm20078_vm4, %v12980_v40, %v12984_v53  ;;  %v25258_v40 = vld [vmem:[#allocation3 + $0x20] sm:$0x1]  ;;  %v13086_v53 = vshll.u32 %v12845_v23, 16  ;;  %26751 = vst [vmem:[#allocation48_spill] sm:$0xff] %v25276_v22  ;;  %26752 = vst [vmem:[#allocation52_spill] sm:$0xff] %v25278_v2  ;;  %v15165_v16 = vrot.slane %v25249_v5, 5 }
 0x6d0   : > { %v25225_v28 = vrot.slane %v13044_v39, 5  ;;  %v25234_v55 = vrot.slane %v13017_v0, 4  ;;  %v25244_v1 = vcombine.low %v12975_v50, %v12985_v47  ;;  %26749 = vst [vmem:[#allocation44_spill] sm:$0xff] %v25258_v40  ;;  %v19668_v0 = vld [vmem:[#allocation3 + $0xb4] sm:$0xff]   ;;  %v25289_v47 = vld [vmem:[#allocation3 + $0x84] sm:$0xf] }
 0x6d1   : > { %v15100_v48 = vld [vmem:[#allocation3 + $0x24] sm:$0xe]  ;;  %v25296_v23 = vrot.slane %v13083_v35, 4  ;;  %v25298_v50 = vld [vmem:[#allocation3 + $0x38] sm:$0x1]  ;;  %v15167_v11 = vrot.slane %v15165_v16, 4 }
 0x6d2   : > { %v13051_v39 = vor.u32 %v13050_v19, %v25225_v28  ;;  %26753 = vst [vmem:[#allocation47_spill] sm:$0xff] %v25298_v50  ;;  %v25302_v43 = vld [vmem:[#allocation3 + $0x40] sm:$0xf]  ;;  %v25308_v49 = vrot.slane %v13092_v54, 5  ;;  %v25310_v35 = vld [vmem:[#allocation3 + $0x44] sm:$0x1] }
 0x6d3   : > { %26754 = vst [vmem:[#allocation53_spill] sm:$0xff] %v25302_v43  ;;  %26755 = vst [vmem:[#allocation50_spill] sm:$0xff] %v25310_v35  ;;  %v25312_v29 = vld [vmem:[#allocation3 + $0x4c] sm:$0xf]  ;;  %v15179_v54 = vrot.slane %v25278_v2, 5  ;;  %v15182_v25 = vrot.slane %v25298_v50, 5 }
 0x6d4   : > { %v25287_v19 = vrot.slane %v13051_v39, 4  ;;  %v15168_v39 = vrot.slane %v25258_v40, 5  ;;  %26756 = vst [vmem:[#allocation56_spill] sm:$0xff] %v25312_v29  ;;  %v15102_v40 = vld [vmem:[#allocation3 + $0x3c] sm:$0xe] }
 0x6d5   : > { %18559 = vmatmul.mubr.msk.bf16.gmra.mrb[52].mxu0 %vm6222_vm11, %v19665_v63  ;;  %v25260_v63 = vcombine.low %v12999_v45, %v13009_v7  ;;  %v17244_v7 = vrot.slane %v15099_v42, 9  ;;  %v15172_v45 = vrot.slane %v25268_v12, 5  ;;  %v19669_v12 = vld [vmem:[#allocation3 + $0xc0] sm:$0xff]   ;;  %v15181_v5 = vrot.slane %v15179_v54, 4 }
 0x6d6   : > { %18562 = vmatprep.mubr.msk.bf16.mxu0 %vm6222_vm11, %v19666_v58  ;;  %v25271_v58 = vrot.slane %v13068_v44, 5  ;;  %v25300_v44 = vrot.slane %v13086_v53, 5  ;;  %v17245_v53 = vrot.slane %v15100_v48, 9  ;;  %v25322_v57 = vsel %vm20304_vm7, %v15167_v11, %v15168_v39  ;;  %v25332_v11 = vld [vmem:[#allocation3 + $0x5c] sm:$0x1] }
 0x6d7   : > { %v25316_v42 = vsel %vm20304_vm7, %v17244_v7, %v15165_v16  ;;  %26759 = vst [vmem:[#allocation61_spill] sm:$0xff] %v25322_v57  ;;  %v15174_v24 = vrot.slane %v15172_v45, 4  ;;  %v15103_v7 = vld [vmem:[#allocation3 + $0x48] sm:$0xe]  ;;  %26761 = vst [vmem:[#allocation69_spill] sm:$0xff] %v25332_v11  ;;  %v17247_v57 = vrot.slane %v15102_v40, 9 }
 0x6d8   : > { %26757 = vst [vmem:[#allocation60_spill] sm:$0xff] %v25316_v42  ;;  %v25336_v39 = vsel %vm20304_vm7, %v17245_v53, %v15172_v45  ;;  %v15186_v45 = vrot.slane %v25302_v43, 5  ;;  %v15104_v53 = vld [vmem:[#allocation3 + $0x54] sm:$0xe]  ;;  %v15189_v42 = vrot.slane %v25310_v35, 5  ;;  %v17248_v50 = vrot.slane %v15103_v7, 9 }
 0x6d9   : > { %26762 = vst [vmem:[#allocation70_spill] sm:$0xff] %v25336_v39  ;;  %v25363_v40 = vld [vmem:[#allocation3 + $0x70] sm:$0xf]  ;;  %v25371_v39 = vld [vmem:[#allocation3 + $0x7c] sm:$0xf] }
 0x6da   : > { %26769 = vst [vmem:[#allocation57_spill] sm:$0xff] %v25371_v39  ;;  %v25375_v7 = vsel %vm20304_vm7, %v17247_v57, %v15186_v45  ;;  %v25387_v43 = vld [vmem:[#allocation3 + $0x80] sm:$0x1]  ;;  %v25389_v57 = vld [vmem:[#allocation3 + $0x88] sm:$0xf] }
 0x6db   : > { %26770 = vst [vmem:[#allocation59_spill] sm:$0xff] %v25375_v7  ;;  %26773 = vst [vmem:[#allocation63_spill] sm:$0xff] %v25387_v43  ;;  %v15108_v7 = vld [vmem:[#allocation3 + $0x84] sm:$0xe] }
 0x6dc   : > { %26774 = vst [vmem:[#allocation67_spill] sm:$0xff] %v25389_v57 }
 0x6dd   : > { %18563 = vmatmul.mubr.msk.bf16.gmra.mrb[56].mxu0 %vm6222_vm11, %v19667_v31  ;;  %v15101_v31 = vld [vmem:[#allocation3 + $0x30] sm:$0xe] }
 0x6de   : > { %18566 = vmatprep.mubr.msk.bf16.mxu0 %vm6222_vm11, %v19668_v0  ;;  %v15175_v0 = vrot.slane %v25276_v22, 5  ;;  %v17246_v48 = vrot.slane %v15101_v31, 9  ;;  %v25343_v22 = vld [vmem:[#allocation3 + $0x64] sm:$0xf]  ;;  %v15193_v31 = vrot.slane %v25312_v29, 5 }
 0x6df   : > { %26764 = vst [vmem:[#allocation72_spill] sm:$0xff] %v25343_v22  ;;  %v15106_v29 = vld [vmem:[#allocation3 + $0x6c] sm:$0xe] }
 0x6e0   : > { %v25340_v2 = vsel %vm20304_vm7, %v15174_v24, %v15175_v0  ;;  %v25349_v16 = vsel %vm20304_vm7, %v17246_v48, %v15179_v54  ;;  %v25353_v24 = vld [vmem:[#allocation3 + $0x68] sm:$0x1]  ;;  %v25357_v0 = vsel %vm20304_vm7, %v15181_v5, %v15182_v25  ;;  %v15196_v48 = vrot.slane %v25318_v4, 5  ;;  %v15105_v25 = vld [vmem:[#allocation3 + $0x60] sm:$0xe] }
 0x6e1   : > { %26763 = vst [vmem:[#allocation66_spill] sm:$0xff] %v25340_v2  ;;  %26765 = vst [vmem:[#allocation49_spill] sm:$0xff] %v25349_v16  ;;  %v15200_v2 = vrot.slane %v25330_v26, 5  ;;  %v25369_v5 = vld [vmem:[#allocation3 + $0x74] sm:$0x1]  ;;  %v15195_v35 = vrot.slane %v15193_v31, 4 }
 0x6e2   : > { %26766 = vst [vmem:[#allocation51_spill] sm:$0xff] %v25353_v24  ;;  %26767 = vst [vmem:[#allocation54_spill] sm:$0xff] %v25357_v0  ;;  %v17249_v54 = vrot.slane %v15104_v53, 9  ;;  %v15203_v4 = vrot.slane %v25332_v11, 5  ;;  %v15207_v26 = vrot.slane %v25343_v22, 5  ;;  %v26873_v32 = vld [vmem:[#allocation59_spill] sm:$0xff] }
 0x6e3   : > { %26768 = vst [vmem:[#allocation55_spill] sm:$0xff] %v25369_v5  ;;  %v15202_v16 = vrot.slane %v15200_v2, 4  ;;  %v25401_v53 = vld [vmem:[#allocation3 + $0x8c] sm:$0x1]  ;;  %v25420_v11 = vld [vmem:[%s26228_s5 + $0x18] sm:$0xf] }
 0x6e4   : > { %26777 = vst [vmem:[#allocation73_spill] sm:$0xff] %v25401_v53 }
 0x6e5   : > { %18567 = vmatmul.mubr.msk.bf16.gmra.mrb[60].mxu0 %vm6222_vm11, %v19669_v12  ;;  %v15188_v12 = vrot.slane %v15186_v45, 4  ;;  %v17250_v45 = vrot.slane %v15105_v25, 9  ;;  %v25409_v22 = vsel %vm20304_vm7, %v15202_v16, %v15203_v4  ;;  %v17251_v25 = vrot.slane %v15106_v29, 9  ;;  %v25422_v4 = vld [vmem:[#allocation3 + $0x98] sm:$0x1] }
 0x6e6   : > { %18572 = vmatprep.mubr.msk.bf16.mxu0 %vm6222_vm11, %v25183_v33  ;;  %v25379_v33 = vsel %vm20304_vm7, %v17248_v50, %v15193_v31  ;;  %v25395_v31 = vsel %vm20304_vm7, %v15195_v35, %v15196_v48  ;;  %26779 = vst [vmem:[#allocation75_spill] sm:$0xff] %v25409_v22  ;;  %v15209_v50 = vrot.slane %v15207_v26, 4  ;;  %v15210_v35 = vrot.slane %v25353_v24, 5  ;;  %v15107_v48 = vld [vmem:[#allocation3 + $0x78] sm:$0xe] }
 0x6e7   : > { %26771 = vst [vmem:[#allocation62_spill] sm:$0xff] %v25379_v33  ;;  %v25383_v0 = vsel %vm20304_vm7, %v15188_v12, %v15189_v42  ;;  %26775 = vst [vmem:[#allocation68_spill] sm:$0xff] %v25395_v31  ;;  %v25399_v42 = vsel %vm20304_vm7, %v17249_v54, %v15200_v2  ;;  %v25403_v12 = vld [vmem:[#allocation3 + $0x94] sm:$0xf]  ;;  %v13819_v2 = vsel %vm6271_vm10, %v25139_v37, 0  ;;  %v25426_v16 = vsel %vm20304_vm7, %v17250_v45, %v15207_v26 }
 0x6e8   : > { %26772 = vst [vmem:[#allocation64_spill] sm:$0xff] %v25383_v0  ;;  %26776 = vst [vmem:[#allocation71_spill] sm:$0xff] %v25399_v42  ;;  %v15214_v0 = vrot.slane %v25363_v40, 5  ;;  %v25430_v37 = vsel %vm20304_vm7, %v15209_v50, %v15210_v35  ;;  %v15217_v29 = vrot.slane %v25369_v5, 5  ;;  %v15221_v54 = vrot.slane %v25371_v39, 5 }
 0x6e9   : > { %26778 = vst [vmem:[#allocation74_spill] sm:$0xff] %v25403_v12  ;;  %26780 = vst [vmem:[#allocation76_spill] sm:$0xff] %v25426_v16  ;;  %v17252_v31 = vrot.slane %v15107_v48, 9  ;;  %v15224_v33 = vrot.slane %v25387_v43, 5  ;;  %v15109_v26 = vld [vmem:[#allocation3 + $0x90] sm:$0xe] }
 0x6ea   : > { %26781 = vst [vmem:[#allocation77_spill] sm:$0xff] %v25430_v37  ;;  %v15216_v42 = vrot.slane %v15214_v0, 4  ;;  %v25441_v50 = vld [vmem:[#allocation3 + $0xa0] sm:$0xf]  ;;  %v25445_v45 = vsel %vm20304_vm7, %v17251_v25, %v15214_v0  ;;  %v15223_v35 = vrot.slane %v15221_v54, 4  ;;  %v15228_v5 = vrot.slane %v25389_v57, 5 }
 0x6eb   : > { %v25450_v48 = vld [vmem:[#allocation3 + $0xa4] sm:$0x1]  ;;  %v25452_v22 = vld [vmem:[#allocation3 + $0xac] sm:$0xf]  ;;  %v15231_v0 = vrot.slane %v25401_v53, 5  ;;  %v17254_v57 = vrot.slane %v15109_v26, 9 }
 0x6ec   : > { %v14411_v25 = vld [vmem:[#allocation3 + $0xb0] sm:$0x1]  ;;  %v25468_v16 = vsel %vm20304_vm7, %v15223_v35, %v15224_v33  ;;  %v15230_v43 = vrot.slane %v15228_v5, 4  ;;  %v15238_v53 = vrot.slane %v25422_v4, 5  ;;  %v25477_v24 = vld [vmem:[#allocation3 + $0xb8] sm:$0xf] }
 0x6ed   : > { %18573 = vmatmul.mubr.msk.bf16.vlgmr.msra.gmra.mrb[32].mxu0 %vm6222_vm11, %v25202_v60  ;;  %v17253_v60 = vrot.slane %v15108_v7, 9  ;;  %v15235_v7 = vrot.slane %v25403_v12, 5  ;;  %26784 = vst [vmem:[#allocation80_spill] sm:$0xff] %v25468_v16  ;;  %v15111_v12 = vld [vmem:[#allocation3 + $0xa8] sm:$0xe]  ;;  %v15242_v35 = vrot.slane %v25441_v50, 5 }
 0x6ee   : > { %18605 = vmatpush3.bf16.msra.mxu0 %v13819_v2  ;;  %18576 = vmatprep.mubr.msk.bf16.mxu0 %vm6222_vm11, %v25230_v21  ;;  %v25456_v21 = vsel %vm20304_vm7, %v15216_v42, %v15217_v29  ;;  %v25460_v2 = vsel %vm20304_vm7, %v17252_v31, %v15221_v54  ;;  %v15110_v42 = vld [vmem:[#allocation3 + $0x9c] sm:$0xe]  ;;  %v26785_v29 = vshrl.u32 %v24958_v38, 16  ;;  %v14414_v37 = vld [vmem:[#allocation3 + $0xbc] sm:$0x1]  ;;  %v25485_v26 = vsel %vm20304_vm7, %v15230_v43, %v15231_v0 }
 0x6ef   : > { %19535 = vmatprep.subr.msk.bf16.mxu0 %vm6271_vm10, %v25420_v11  ;;  %26782 = vst [vmem:[#allocation78_spill] sm:$0xff] %v25456_v21  ;;  %26783 = vst [vmem:[#allocation79_spill] sm:$0xff] %v25460_v2  ;;  %v15237_v54 = vrot.slane %v15235_v7, 4  ;;  %v25481_v33 = vsel %vm20304_vm7, %v17253_v60, %v15228_v5  ;;  %v25489_v38 = vsel %vm20304_vm7, %v17254_v57, %v15235_v7  ;;  %v17255_v5 = vrot.slane %v15110_v42, 9  ;;  %v15112_v43 = vld [vmem:[#allocation3 + $0xb4] sm:$0xe] }
 0x6f0   : > { %v25472_v39 = vrot.slane %v26785_v29, 4  ;;  %26786 = vst [vmem:[#allocation81_spill] sm:$0xff] %v25481_v33  ;;  %26787 = vst [vmem:[#allocation14_spill] sm:$0xff] %v25485_v26  ;;  %v25492_v29 = vld [vmem:[#allocation3 + $0xc4] sm:$0xf]  ;;  %v15249_v60 = vrot.slane %v25452_v22, 5 }
 0x6f1   : > { %26788 = vst [vmem:[#allocation12_spill] sm:$0xff] %v25489_v38  ;;  %v25498_v16 = vsel %vm20304_vm7, %v15237_v54, %v15238_v53  ;;  %v14417_v0 = vld [vmem:[#allocation3 + $0xc8] sm:$0x1]  ;;  %v15244_v7 = vrot.slane %v15242_v35, 4  ;;  %v15245_v2 = vrot.slane %v25450_v48, 5  ;;  %v17256_v21 = vrot.slane %v15111_v12, 9 }
 0x6f2   : > { %26789 = vst [vmem:[#allocation13_spill] sm:$0xff] %v25498_v16  ;;  %v25508_v31 = vsel %vm20304_vm7, %v17255_v5, %v15242_v35  ;;  %v15251_v53 = vrot.slane %v15249_v60, 4  ;;  %v15252_v42 = vrot.slane %v14411_v25, 5  ;;  %v15256_v54 = vrot.slane %v25477_v24, 5  ;;  %v15113_v26 = vld [vmem:[#allocation3 + $0xc0] sm:$0xe] }
 0x6f3   : > { %v25515_v57 = vsel %vm20304_vm7, %v15244_v7, %v15245_v2  ;;  %v25519_v12 = vsel %vm20304_vm7, %v17256_v21, %v15249_v60  ;;  %v15263_v35 = vrot.slane %v25492_v29, 5  ;;  %v17258_v7 = vrot.slane %v15113_v26, 9 }
 0x6f4   : > { %v17272_v25 = vcombine.low %v25508_v31, %v25515_v57  ;;  %v25526_v5 = vsel %vm20304_vm7, %v15251_v53, %v15252_v42  ;;  %v15258_v16 = vrot.slane %v15256_v54, 4  ;;  %v15266_v33 = vrot.slane %v14417_v0, 5  ;;  %v26010_v31 = vld [vmem:[%s26229_s6] ss:$0 sm:$0xff] }
 0x6f5   : > { %18577 = vmatmul.mubr.msk.bf16.gmra.mrb[36].mxu0 %vm6222_vm11, %v25232_v36  ;;  %v17257_v36 = vrot.slane %v15112_v43, 9  ;;  %v17273_v2 = vcombine.low %v25519_v12, %v25526_v5  ;;  %v15265_v38 = vrot.slane %v15263_v35, 4  ;;  %v13116_v21 = vshll.u32 %v24976_v34, 16 }
 0x6f6   : > { %18580 = vmatprep.mubr.msk.bf16.mxu0 %vm6222_vm11, %v25244_v1  ;;  %v15259_v1 = vrot.slane %v14414_v37, 5  ;;  %v13120_v60 = vshrl.u32 %v24976_v34, 16  ;;  %v13110_v37 = vshll.u32 %v25289_v47, 16  ;;  %v25545_v26 = vsel %vm20304_vm7, %v17258_v7, %v15263_v35 }
 0x6f7   : > { %v25534_v43 = vsel %vm20304_vm7, %v17257_v36, %v15256_v54  ;;  %v25549_v34 = vsel %vm20304_vm7, %v15265_v38, %v15266_v33  ;;  %v26790_v0 = vor.u32 %v25256_v17, %v25254_v59  ;;  %v26792_v33 = vsel %vm20078_vm4, %v25246_v20, %v25266_v18  ;;  %v12851_v18 = vld [vmem:[#allocation3 + $0x90] sm:$0xf] }
 0x6f8   : > { %v25538_v53 = vsel %vm20304_vm7, %v15258_v16, %v15259_v1  ;;  %v26791_v16 = vor.u32 %v25273_v15, %v25271_v58  ;;  %v13099_v1 = vor.u32 %v25472_v39, %v25308_v49  ;;  %v17275_v42 = vcombine.low %v25545_v26, %v25549_v34 }
 0x6f9   : > { %v13066_v54 = vrot.slane %v26790_v0, 4  ;;  %v26793_v59 = vsel %vm20078_vm4, %v25234_v55, %v25208_v6  ;;  %v26794_v15 = vshll.u32 %v24920_v27, 16  ;;  %v26795_v39 = vshll.u32 %v24956_v8, 16 }
 0x6fa   : > { %v13076_v36 = vrot.slane %v26791_v16, 4  ;;  %v17103_v17 = vcombine.low %v26793_v59, %v26792_v33  ;;  %v13102_v7 = vshll.u32 %v24967_v56, 16  ;;  %v25578_v0 = vrot.slane %v13116_v21, 5 }
 0x6fb   : > { %v13056_v38 = vrot.slane %v26794_v15, 5  ;;  %v13080_v35 = vrot.slane %v26795_v39, 5  ;;  %v13122_v20 = vrot.slane %v13120_v60, 4  ;;  %v13047_v27 = vsel %vm20078_vm4, %v25285_v62, %v25225_v28 }
 0x6fc   : > { %v13089_v6 = vor.u32 %v25300_v44, %v25296_v23  ;;  %v26796_v55 = vshrl.u32 %v25289_v47, 16  ;;  %v13071_v21 = vsel %vm20078_vm4, %v13066_v54, %v25271_v58  ;;  %v13100_v16 = vrot.slane %v13099_v1, 4  ;;  %v12854_v44 = vld [vmem:[#allocation3 + $0x9c] sm:$0xf] }
 0x6fd   : > { %18581 = vmatmul.mubr.msk.bf16.gmra.mrb[40].mxu0 %vm6222_vm11, %v25260_v63  ;;  %v13112_v63 = vrot.slane %v13110_v37, 5  ;;  %v13057_v56 = vsel %vm20078_vm4, %v25287_v19, %v13056_v38  ;;  %v13081_v60 = vsel %vm20078_vm4, %v13076_v36, %v13080_v35  ;;  %v13131_v28 = vshrl.u32 %v12851_v18, 16 }
 0x6fe   : > { %18584 = vmatprep.mubr.msk.bf16.mxu0 %vm6222_vm11, %v17103_v17  ;;  %v13109_v8 = vrot.slane %v26796_v55, 4  ;;  %v13134_v62 = vshll.u32 %v12851_v18, 16  ;;  %v13140_v23 = vshll.u32 %v24990_v14, 16  ;;  %v13144_v47 = vshrl.u32 %v24990_v14, 16 }
 0x6ff   : > { %v13104_v37 = vrot.slane %v13102_v7, 5  ;;  %v13123_v33 = vor.u32 %v13122_v20, %v25578_v0  ;;  %v13164_v19 = vshll.u32 %v25008_v46, 16  ;;  %v13168_v59 = vshrl.u32 %v25008_v46, 16 }
 0x700   : > { %v17104_v17 = vcombine.low %v13047_v27, %v13057_v56  ;;  %v17105_v58 = vcombine.low %v13071_v21, %v13081_v60  ;;  %v13090_v54 = vrot.slane %v13089_v6, 4  ;;  %v13113_v15 = vor.u32 %v13112_v63, %v13109_v8  ;;  %v12857_v21 = vld [vmem:[#allocation3 + $0xa8] sm:$0xf] }
 0x701   : > { %v13105_v36 = vsel %vm20078_vm4, %v13100_v16, %v13104_v37  ;;  %v13126_v1 = vshll.u32 %v24988_v41, 16  ;;  %v13155_v38 = vshrl.u32 %v12854_v44, 16  ;;  %v13158_v39 = vshll.u32 %v12854_v44, 16 }
 0x702   : > { %v13133_v14 = vrot.slane %v13131_v28, 4  ;;  %v13136_v35 = vrot.slane %v13134_v62, 5  ;;  %v13142_v7 = vrot.slane %v13140_v23, 5  ;;  %v13146_v18 = vrot.slane %v13144_v47, 4  ;;  %v12860_v23 = vld [vmem:[#allocation3 + $0xb4] sm:$0xf] }
 0x703   : > { %v13124_v20 = vrot.slane %v13123_v33, 4  ;;  %v13166_v55 = vrot.slane %v13164_v19, 5  ;;  %v13170_v46 = vrot.slane %v13168_v59, 4  ;;  %v13095_v27 = vsel %vm20078_vm4, %v13090_v54, %v25308_v49 }
 0x704   : > { %v13114_v6 = vrot.slane %v13113_v15, 4  ;;  %v17106_v8 = vcombine.low %v13095_v27, %v13105_v36  ;;  %v13128_v41 = vrot.slane %v13126_v1, 5  ;;  %v13157_v63 = vrot.slane %v13155_v38, 4 }
 0x705   : > { %18585 = vmatmul.mubr.msk.bf16.gmra.mrb[44].mxu0 %vm6222_vm11, %v17104_v17  ;;  %v13160_v56 = vrot.slane %v13158_v39, 5  ;;  %v13137_v60 = vor.u32 %v13136_v35, %v13133_v14  ;;  %v13147_v16 = vor.u32 %v13146_v18, %v13142_v7  ;;  %v13188_v28 = vshll.u32 %v25026_v10, 16 }
 0x706   : > { %18588 = vmatprep.mubr.msk.bf16.mxu0 %vm6222_vm11, %v17105_v58  ;;  %v13192_v62 = vshrl.u32 %v25026_v10, 16  ;;  %v13129_v47 = vsel %vm20078_vm4, %v13124_v20, %v13128_v41  ;;  %v13171_v44 = vor.u32 %v13170_v46, %v13166_v55  ;;  %v13212_v37 = vshll.u32 %v25048_v3, 16  ;;  %v12863_v41 = vld [vmem:[#allocation3 + $0xc0] sm:$0xf] }
 0x707   : > { %v13216_v49 = vshrl.u32 %v25048_v3, 16  ;;  %v13119_v33 = vsel %vm20078_vm4, %v13114_v6, %v25578_v0  ;;  %v13150_v19 = vshll.u32 %v25000_v30, 16  ;;  %v13179_v59 = vshrl.u32 %v12857_v21, 16 }
 0x708   : > { %v13182_v17 = vshll.u32 %v12857_v21, 16  ;;  %v13161_v58 = vor.u32 %v13160_v56, %v13157_v63  ;;  %v13174_v10 = vshll.u32 %v25024_v9, 16  ;;  %v13203_v54 = vshrl.u32 %v12860_v23, 16 }
 0x709   : > { %v13206_v15 = vshll.u32 %v12860_v23, 16  ;;  %v17107_v36 = vcombine.low %v13119_v33, %v13129_v47  ;;  %v13148_v1 = vrot.slane %v13147_v16, 4  ;;  %v13190_v38 = vrot.slane %v13188_v28, 5 }
 0x70a   : > { %v13194_v39 = vrot.slane %v13192_v62, 4  ;;  %v13138_v3 = vrot.slane %v13137_v60, 4  ;;  %v13172_v14 = vrot.slane %v13171_v44, 4  ;;  %v13214_v35 = vrot.slane %v13212_v37, 5 }
 0x70b   : > { %v13218_v18 = vrot.slane %v13216_v49, 4  ;;  %v13152_v30 = vrot.slane %v13150_v19, 5  ;;  %v13181_v0 = vrot.slane %v13179_v59, 4  ;;  %v13184_v20 = vrot.slane %v13182_v17, 5 }
 0x70c   : > { %v13162_v46 = vrot.slane %v13161_v58, 4  ;;  %v13176_v27 = vrot.slane %v13174_v10, 5  ;;  %v13205_v9 = vrot.slane %v13203_v54, 4  ;;  %v13208_v6 = vrot.slane %v13206_v15, 5 }
 0x70d   : > { %18589 = vmatmul.mubr.msk.bf16.gmra.mrb[48].mxu0 %vm6222_vm11, %v17106_v8  ;;  %v13153_v63 = vsel %vm20078_vm4, %v13148_v1, %v13152_v30  ;;  %v13195_v56 = vor.u32 %v13194_v39, %v13190_v38  ;;  %v13236_v8 = vshll.u32 %v25070_v61, 16  ;;  %v13240_v21 = vshrl.u32 %v25070_v61, 16 }
 0x70e   : > { %18592 = vmatprep.mubr.msk.bf16.mxu0 %vm6222_vm11, %v17107_v36  ;;  %v13143_v60 = vsel %vm20078_vm4, %v13138_v3, %v13142_v7  ;;  %v13177_v16 = vsel %vm20078_vm4, %v13172_v14, %v13176_v27  ;;  %v13219_v28 = vor.u32 %v13218_v18, %v13214_v35  ;;  %v13185_v62 = vor.u32 %v13184_v20, %v13181_v0  ;;  %v26797_v3 = vld [vmem:[#allocation36_spill] sm:$0xff]  ;;  %v26798_v0 = vld [vmem:[#allocation29_spill] sm:$0xff] }
 0x70f   : > { %v13198_v23 = vshll.u32 %v25039_v51, 16  ;;  %v13227_v47 = vshrl.u32 %v12863_v41, 16  ;;  %v13230_v44 = vshll.u32 %v12863_v41, 16  ;;  %v17108_v37 = vcombine.low %v13143_v60, %v13153_v63 }
 0x710   : > { %v13167_v49 = vsel %vm20078_vm4, %v13162_v46, %v13166_v55  ;;  %v13209_v33 = vor.u32 %v13208_v6, %v13205_v9  ;;  %v13222_v19 = vshll.u32 %v25060_v52, 16  ;;  %v13196_v59 = vrot.slane %v13195_v56, 4 }
 0x711   : > { %v17109_v61 = vcombine.low %v13167_v49, %v13177_v16  ;;  %v13238_v17 = vrot.slane %v13236_v8, 5  ;;  %v13242_v7 = vrot.slane %v13240_v21, 4  ;;  %v13220_v58 = vrot.slane %v13219_v28, 4  ;;  %v13544_v8 = vld [vmem:[#allocation3 + $0xc] sm:$0xe]  ;;  %v26800_v16 = vld [vmem:[#allocation41_spill] sm:$0xff] }
 0x712   : > { %v13186_v10 = vrot.slane %v13185_v62, 4  ;;  %v13200_v51 = vrot.slane %v13198_v23, 5  ;;  %v13229_v54 = vrot.slane %v13227_v47, 4  ;;  %v13232_v15 = vrot.slane %v13230_v44, 5  ;;  %v26799_v21 = vld [vmem:[#allocation43_spill] sm:$0xff] }
 0x713   : > { %v13210_v36 = vrot.slane %v13209_v33, 4  ;;  %v13224_v1 = vrot.slane %v13222_v19, 5  ;;  %v13243_v39 = vor.u32 %v13242_v7, %v13238_v17  ;;  %v13610_v14 = vrot.slane %v26797_v3, 5  ;;  %v13545_v33 = vld [vmem:[#allocation3 + $0x18] sm:$0xe]  ;;  %v26801_v19 = vld [vmem:[#allocation42_spill] sm:$0xff] }
 0x714   : > { %v13201_v55 = vsel %vm20078_vm4, %v13196_v59, %v13200_v51  ;;  %v13191_v18 = vsel %vm20078_vm4, %v13186_v10, %v13190_v38  ;;  %v13233_v30 = vor.u32 %v13232_v15, %v13229_v54  ;;  %v13246_v20 = vshll.u32 %v26798_v0, 16  ;;  %v17211_v51 = vld [vmem:[%s26228_s5 + $0x1c] sm:$0xf]  ;;  %v26803_v15 = vld [vmem:[#allocation40_spill] sm:$0xff]  ;;  %v26814_v0 = vld [vmem:[#allocation5_spill] sm:$0xff] }
 0x715   : > { %18593 = vmatmul.mubr.msk.bf16.gmra.mrb[52].mxu0 %vm6222_vm11, %v17108_v37  ;;  %v13225_v52 = vsel %vm20078_vm4, %v13220_v58, %v13224_v1  ;;  %v17110_v46 = vcombine.low %v13191_v18, %v13201_v55  ;;  %v13215_v27 = vsel %vm20078_vm4, %v13210_v36, %v13214_v35  ;;  %v13244_v6 = vrot.slane %v13243_v39, 4  ;;  %v26802_v54 = vld [vmem:[#allocation38_spill] sm:$0xff]  ;;  %v26805_v1 = vld [vmem:[#allocation16_spill] sm:$0xff]  ;;  %v26806_v55 = vld [vmem:[#allocation7_spill] sm:$0xff] }
 0x716   : > { %18596 = vmatprep.mubr.msk.bf16.mxu0 %vm6222_vm11, %v17109_v61  ;;  %v17111_v9 = vcombine.low %v13215_v27, %v13225_v52  ;;  %v13612_v41 = vrot.slane %v13610_v14, 4  ;;  %v13234_v63 = vrot.slane %v13233_v30, 4  ;;  %v13248_v56 = vrot.slane %v13246_v20, 5  ;;  %v26809_v52 = vld [vmem:[#allocation17_spill] sm:$0xff]  ;;  %v26812_v18 = vld [vmem:[#allocation18_spill] sm:$0xff] }
 0x717   : > { %v13613_v60 = vrot.slane %v26799_v21, 5  ;;  %v13617_v28 = vrot.slane %v26800_v16, 5  ;;  %v17129_v62 = vrot.slane %v13544_v8, 9  ;;  %v13620_v61 = vrot.slane %v26801_v19, 5  ;;  %v26815_v20 = vld [vmem:[#allocation6_spill] sm:$0xff]  ;;  %v26817_v27 = vld [vmem:[#allocation9_spill] sm:$0xff] }
 0x718   : > { %v13249_v38 = vsel %vm20078_vm4, %v13244_v6, %v13248_v56  ;;  %v13239_v23 = vsel %vm20078_vm4, %v13234_v63, %v13238_v17  ;;  %v17130_v59 = vrot.slane %v13545_v33, 9  ;;  %v14178_v10 = vsel %vm6271_vm10, %v25420_v11, 0  ;;  %v26808_v11 = vld [vmem:[#allocation19_spill] sm:$0xff]  ;;  %v26821_v63 = vld [vmem:[#allocation20_spill] sm:$0xff]  ;;  %v26824_v21 = vld [vmem:[#allocation21_spill] sm:$0xff] }
 0x719   : > { %v13614_v35 = vsel %vm20304_vm7, %v13612_v41, %v13613_v60  ;;  %v17112_v47 = vcombine.low %v13239_v23, %v13249_v38  ;;  %v13611_v44 = vsel %vm20304_vm7, %v17129_v62, %v13610_v14  ;;  %v13619_v49 = vrot.slane %v13617_v28, 4  ;;  %v26811_v14 = vld [vmem:[#allocation8_spill] sm:$0xff]  ;;  %v26820_v41 = vld [vmem:[#allocation10_spill] sm:$0xff]  ;;  %v26823_v8 = vld [vmem:[#allocation15_spill] sm:$0xff] }
 0x71a   : > { %v17146_v37 = vcombine.low %v13611_v44, %v13614_v35  ;;  %v13618_v17 = vsel %vm20304_vm7, %v17130_v59, %v13617_v28  ;;  %v26804_v36 = vcombine.low %v26802_v54, %v26803_v15  ;;  %v26807_v39 = vcombine.low %v26805_v1, %v26806_v55  ;;  %v26826_v38 = vld [vmem:[#allocation22_spill] sm:$0xff]  ;;  %v26827_v16 = vld [vmem:[#allocation23_spill] sm:$0xff]  ;;  %v26829_v62 = vld [vmem:[#allocation24_spill] sm:$0xff] }
 0x71b   : > { %v13621_v7 = vsel %vm20304_vm7, %v13619_v49, %v13620_v61  ;;  %v26810_v3 = vcombine.low %v26808_v11, %v26809_v52  ;;  %v26813_v30 = vcombine.low %v26811_v14, %v26812_v18  ;;  %v26822_v56 = vcombine.low %v26820_v41, %v26821_v63  ;;  %v26830_v35 = vld [vmem:[#allocation26_spill] sm:$0xff]  ;;  %v26833_v44 = vld [vmem:[#allocation28_spill] sm:$0xff]  ;;  %v26835_v49 = vld [vmem:[#allocation27_spill] sm:$0xff] }
 0x71c   : > { %v17147_v58 = vcombine.low %v13618_v17, %v13621_v7  ;;  %v26825_v60 = vcombine.low %v26823_v8, %v26824_v21  ;;  %v26828_v28 = vcombine.low %v26826_v38, %v26827_v16  ;;  %v26831_v23 = vcombine.low %v26829_v62, %v26830_v35  ;;  %v26836_v33 = vld [vmem:[#allocation30_spill] sm:$0xff]  ;;  %v26838_v61 = vld [vmem:[#allocation32_spill] sm:$0xff]  ;;  %v26839_v59 = vld [vmem:[#allocation33_spill] sm:$0xff] }
 0x71d   : > { %18597 = vmatmul.mubr.msk.bf16.gmra.mrb[56].mxu0 %vm6222_vm11, %v17110_v46  ;;  %v26816_v46 = vcombine.low %v26814_v0, %v26815_v20  ;;  %v26837_v19 = vcombine.low %v26835_v49, %v26836_v33  ;;  %v26840_v7 = vcombine.low %v26838_v61, %v26839_v59  ;;  %v19670_v17 = vld [vmem:[#allocation3 + $0x18] sm:$0xff]   ;;  %v19671_v15 = vld [vmem:[#allocation3 + $0x24] sm:$0xff]   ;;  %v19672_v1 = vld [vmem:[#allocation3 + $0x30] sm:$0xff]  }
 0x71e   : > { %18600 = vmatprep.mubr.msk.bf16.mxu0 %vm6222_vm11, %v17111_v9  ;;  %v26818_v9 = vld [vmem:[#allocation11_spill] sm:$0xff]  ;;  %v19676_v52 = vld [vmem:[#allocation3 + $0x60] sm:$0xff]   ;;  %v19678_v14 = vld [vmem:[#allocation3 + $0x78] sm:$0xff]  }
 0x71f   : > { %v26819_v6 = vcombine.low %v26817_v27, %v26818_v9  ;;  %v25734_v55 = vld [vmem:[%s26228_s5 + $0x20] sm:$0xf]  ;;  %v14373_v18 = vld [vmem:[#allocation3 + $0x18] sm:$0xf]  ;;  %v14376_v9 = vld [vmem:[#allocation3 + $0x24] sm:$0xf] }
 0x720   : > { %v19674_v11 = vld [vmem:[#allocation3 + $0x48] sm:$0xff]   ;;  %v14425_v27 = vshll.u32 %v14373_v18, 16  ;;  %v19680_v41 = vld [vmem:[#allocation3 + $0x90] sm:$0xff]   ;;  %v14446_v8 = vshrl.u32 %v14376_v9, 16  ;;  %v14449_v21 = vshll.u32 %v14376_v9, 16 }
 0x721   : > { %v14379_v33 = vld [vmem:[#allocation3 + $0x30] sm:$0xf]  ;;  %v19682_v61 = vld [vmem:[#allocation3 + $0xa8] sm:$0xff]  }
 0x722   : > { %v14427_v38 = vrot.slane %v14425_v27, 5 }
 0x725   : > { %18601 = vmatmul.mubr.msk.bf16.gmra.mrb[60].mxu0 %vm6222_vm11, %v17112_v47  ;;  %v26832_v47 = vld [vmem:[#allocation25_spill] sm:$0xff] }
 0x726   : > { %18606 = vmatprep.mubr.msk.bf16.mxu0 %vm6222_vm11, %v17146_v37  ;;  %v26834_v37 = vcombine.low %v26832_v47, %v26833_v44  ;;  %v14451_v47 = vrot.slane %v14449_v21, 5 }
 0x72d   : > { %18607 = vmatmul.mubr.msk.bf16.vlgmr.msra.gmra.mrb[32].mxu0 %vm6222_vm11, %v17147_v58  ;;  %v26841_v58 = vld [vmem:[#allocation34_spill] sm:$0xff] }
 0x72e   : > { %18639 = vmatpush3.bf16.msra.mxu0 %v14178_v10  ;;  %18610 = vmatprep.mubr.msk.bf16.mxu0 %vm6222_vm11, %v26804_v36  ;;  %v26842_v10 = vld [vmem:[#allocation35_spill] sm:$0xff]  ;;  %v14904_v36 = vsel %vm6271_vm10, %v17211_v51, 0 }
 0x72f   : > { %19536 = vmatprep.subr.msk.bf16.mxu0 %vm6271_vm10, %v17211_v51  ;;  %v26843_v54 = vcombine.low %v26841_v58, %v26842_v10  ;;  %v19675_v51 = vld [vmem:[#allocation3 + $0x54] sm:$0xff]   ;;  %v14470_v10 = vshrl.u32 %v14379_v33, 16 }
 0x735   : > { %18611 = vmatmul.mubr.msk.bf16.gmra.mrb[36].mxu0 %vm6222_vm11, %v26807_v39  ;;  %v19673_v39 = vld [vmem:[#allocation3 + $0x3c] sm:$0xff]  }
 0x736   : > { %18614 = vmatprep.mubr.msk.bf16.mxu0 %vm6222_vm11, %v26810_v3  ;;  %v19677_v3 = vld [vmem:[#allocation3 + $0x6c] sm:$0xff]  }
 0x73d   : > { %18615 = vmatmul.mubr.msk.bf16.gmra.mrb[40].mxu0 %vm6222_vm11, %v26813_v30  ;;  %v26844_v30 = vld [vmem:[#allocation45_spill] sm:$0xff] }
 0x73e   : > { %18618 = vmatprep.mubr.msk.bf16.mxu0 %vm6222_vm11, %v26816_v46  ;;  %v14431_v0 = vshll.u32 %v26844_v30, 16  ;;  %v14435_v20 = vshrl.u32 %v26844_v30, 16  ;;  %v14422_v46 = vshrl.u32 %v14373_v18, 16 }
 0x740   : > { %v14433_v63 = vrot.slane %v14431_v0, 5  ;;  %v14472_v0 = vrot.slane %v14470_v10, 4 }
 0x745   : > { %18619 = vmatmul.mubr.msk.bf16.gmra.mrb[44].mxu0 %vm6222_vm11, %v26819_v6  ;;  %v19679_v6 = vld [vmem:[#allocation3 + $0x84] sm:$0xff]  }
 0x746   : > { %18622 = vmatprep.mubr.msk.bf16.mxu0 %vm6222_vm11, %v26822_v56  ;;  %v14437_v56 = vrot.slane %v14435_v20, 4 }
 0x748   : > { %v14438_v16 = vor.u32 %v14437_v56, %v14433_v63 }
 0x74a   : > { %v14439_v59 = vrot.slane %v14438_v16, 4 }
 0x74d   : > { %18623 = vmatmul.mubr.msk.bf16.gmra.mrb[48].mxu0 %vm6222_vm11, %v26825_v60  ;;  %v14424_v60 = vrot.slane %v14422_v46, 4 }
 0x74e   : > { %18626 = vmatprep.mubr.msk.bf16.mxu0 %vm6222_vm11, %v26828_v28  ;;  %v26845_v28 = vld [vmem:[#allocation46_spill] sm:$0xff] }
 0x74f   : > { %v14455_v62 = vshll.u32 %v26845_v28, 16  ;;  %v14459_v35 = vshrl.u32 %v26845_v28, 16  ;;  %v14428_v44 = vor.u32 %v14427_v38, %v14424_v60  ;;  %v14385_v60 = vld [vmem:[#allocation3 + $0x48] sm:$0xf]  ;;  %v19684_v38 = vld [vmem:[#allocation3 + $0xc0] sm:$0xff]  }
 0x750   : > { %v26849_v28 = vld [vmem:[#allocation47_spill] sm:$0xff] }
 0x755   : > { %18627 = vmatmul.mubr.msk.bf16.gmra.mrb[52].mxu0 %vm6222_vm11, %v26831_v23  ;;  %v14448_v23 = vrot.slane %v14446_v8, 4 }
 0x756   : > { %18630 = vmatprep.mubr.msk.bf16.mxu0 %vm6222_vm11, %v26834_v37  ;;  %v26846_v37 = vld [vmem:[#allocation44_spill] sm:$0xff] }
 0x757   : > { %v14441_v49 = vshll.u32 %v26846_v37, 16  ;;  %v14452_v58 = vor.u32 %v14451_v47, %v14448_v23  ;;  %v26851_v37 = vld [vmem:[#allocation56_spill] sm:$0xff] }
 0x759   : > { %v25763_v30 = vrot.slane %v14452_v58, 4  ;;  %v15114_v58 = vld [vmem:[#allocation3 + $0xcc] sm:$0xe] }
 0x75d   : > { %18631 = vmatmul.mubr.msk.bf16.gmra.mrb[56].mxu0 %vm6222_vm11, %v26837_v19  ;;  %v19681_v19 = vld [vmem:[#allocation3 + $0x9c] sm:$0xff]  }
 0x75e   : > { %18634 = vmatprep.mubr.msk.bf16.mxu0 %vm6222_vm11, %v26840_v7  ;;  %v25753_v7 = vrot.slane %v14455_v62, 5  ;;  %v14489_v62 = vshll.u32 %v26849_v28, 16 }
 0x765   : > { %18635 = vmatmul.mubr.msk.bf16.gmra.mrb[60].mxu0 %vm6222_vm11, %v26843_v54  ;;  %v14473_v54 = vshll.u32 %v14379_v33, 16  ;;  %v14531_v33 = vshrl.u32 %v26851_v37, 16 }
 0x766   : > { %18640 = vmatprep.mubr.msk.bf16.mxu0 %vm6222_vm11, %v19670_v17  ;;  %v14461_v17 = vrot.slane %v14459_v35, 4  ;;  %v26850_v35 = vld [vmem:[#allocation53_spill] sm:$0xff] }
 0x767   : > { %v14475_v20 = vrot.slane %v14473_v54, 5  ;;  %v14503_v23 = vshll.u32 %v26850_v35, 16  ;;  %v14507_v47 = vshrl.u32 %v26850_v35, 16  ;;  %v14391_v35 = vld [vmem:[#allocation3 + $0x60] sm:$0xf] }
 0x768   : > { %v14462_v18 = vor.u32 %v14461_v17, %v25753_v7 }
 0x76a   : > { %v14463_v16 = vrot.slane %v14462_v18, 4  ;;  %v19685_v18 = vld [vmem:[#allocation3 + $0xcc] sm:$0xff]  }
 0x76d   : > { %18641 = vmatmul.mubr.msk.bf16.vlgmr.msra.gmra.mrb[32].mxu0 %vm6222_vm11, %v19671_v15  ;;  %v14429_v15 = vrot.slane %v14428_v44, 4  ;;  %v14476_v44 = vor.u32 %v14475_v20, %v14472_v0  ;;  %v14533_v20 = vrot.slane %v14531_v33, 4 }
 0x76e   : > { %18673 = vmatpush3.bf16.msra.mxu0 %v14904_v36  ;;  %18644 = vmatprep.mubr.msk.bf16.mxu0 %vm6222_vm11, %v19672_v1  ;;  %v14443_v36 = vrot.slane %v14441_v49, 5  ;;  %v26847_v1 = vld [vmem:[#allocation48_spill] sm:$0xff]  ;;  %v14527_v49 = vshll.u32 %v26851_v37, 16 }
 0x76f   : > { %19537 = vmatprep.subr.msk.bf16.mxu0 %vm6271_vm10, %v25734_v55  ;;  %v14434_v46 = vsel %vm20078_vm4, %v14429_v15, %v14433_v63  ;;  %v14458_v63 = vsel %vm20078_vm4, %v25763_v30, %v25753_v7  ;;  %v14388_v15 = vld [vmem:[#allocation3 + $0x54] sm:$0xf]  ;;  %v14521_v30 = vshll.u32 %v14385_v60, 16 }
 0x770   : > { %v25791_v0 = vrot.slane %v14527_v49, 5 }
 0x775   : > { %18645 = vmatmul.mubr.msk.bf16.gmra.mrb[36].mxu0 %vm6222_vm11, %v19673_v39  ;;  %v14465_v39 = vshll.u32 %v26847_v1, 16 }
 0x776   : > { %18648 = vmatprep.mubr.msk.bf16.mxu0 %vm6222_vm11, %v19674_v11  ;;  %v26848_v11 = vld [vmem:[#allocation52_spill] sm:$0xff] }
 0x777   : > { %v14467_v56 = vrot.slane %v14465_v39, 5 }
 0x77d   : > { %18649 = vmatmul.mubr.msk.bf16.gmra.mrb[40].mxu0 %vm6222_vm11, %v19675_v51  ;;  %v14479_v51 = vshll.u32 %v26848_v11, 16 }
 0x77e   : > { %18652 = vmatprep.mubr.msk.bf16.mxu0 %vm6222_vm11, %v19676_v52  ;;  %v14483_v52 = vshrl.u32 %v26848_v11, 16  ;;  %v17259_v11 = vrot.slane %v15114_v58, 9 }
 0x77f   : > { %v25767_v8 = vrot.slane %v14479_v51, 5  ;;  %v25789_v51 = vrot.slane %v14503_v23, 5 }
 0x780   : > { %v14485_v21 = vrot.slane %v14483_v52, 4  ;;  %v14509_v52 = vrot.slane %v14507_v47, 4  ;;  %v14477_v47 = vrot.slane %v14476_v44, 4 }
 0x782   : > { %v14486_v7 = vor.u32 %v14485_v21, %v25767_v8  ;;  %v14510_v13 = vor.u32 %v14509_v52, %v25789_v51 }
 0x784   : > { %v14487_v37 = vrot.slane %v14486_v7, 4 }
 0x785   : > { %18653 = vmatmul.mubr.msk.bf16.gmra.mrb[44].mxu0 %vm6222_vm11, %v19677_v3  ;;  %v14382_v3 = vld [vmem:[#allocation3 + $0x3c] sm:$0xf] }
 0x786   : > { %18656 = vmatprep.mubr.msk.bf16.mxu0 %vm6222_vm11, %v19678_v14  ;;  %v14444_v14 = vsel %vm20078_vm4, %v14439_v59, %v14443_v36  ;;  %v14494_v27 = vshrl.u32 %v14382_v3, 16  ;;  %v14497_v9 = vshll.u32 %v14382_v3, 16  ;;  %v26852_v36 = vld [vmem:[#allocation65_spill] sm:$0xff]  ;;  %v14518_v3 = vshrl.u32 %v14385_v60, 16 }
 0x787   : > { %v14551_v1 = vshll.u32 %v26852_v36, 16  ;;  %v14555_v39 = vshrl.u32 %v26852_v36, 16  ;;  %v14569_v36 = vshll.u32 %v14391_v35, 16 }
 0x788   : > { %v14496_v59 = vrot.slane %v14494_v27, 4  ;;  %v14499_v17 = vrot.slane %v14497_v9, 5  ;;  %v14491_v27 = vrot.slane %v14489_v62, 5  ;;  %v14542_v9 = vshrl.u32 %v14388_v15, 16  ;;  %v26853_v62 = vld [vmem:[#allocation50_spill] sm:$0xff] }
 0x789   : > { %v25803_v28 = vrot.slane %v14551_v1, 5  ;;  %v14557_v60 = vrot.slane %v14555_v39, 4  ;;  %v14513_v33 = vshll.u32 %v26853_v62, 16  ;;  %v14520_v58 = vrot.slane %v14518_v3, 4  ;;  %v26855_v3 = vld [vmem:[#allocation58_spill] sm:$0xff] }
 0x78a   : > { %v14500_v49 = vor.u32 %v14499_v17, %v14496_v59  ;;  %v26854_v59 = vld [vmem:[#allocation72_spill] sm:$0xff]  ;;  %v14482_v39 = vsel %vm20078_vm4, %v14477_v47, %v25767_v8  ;;  %v15374_v62 = vsel %vm6271_vm10, %v25734_v55, 0  ;;  %v14397_v55 = vld [vmem:[#allocation3 + $0x78] sm:$0xf] }
 0x78b   : > { %v14558_v44 = vor.u32 %v14557_v60, %v25803_v28  ;;  %v14575_v17 = vshll.u32 %v26854_v59, 16  ;;  %v14579_v7 = vshrl.u32 %v26854_v59, 16  ;;  %v14515_v52 = vrot.slane %v14513_v33, 5 }
 0x78c   : > { %v14571_v60 = vrot.slane %v14569_v36, 5 }
 0x78d   : > { %18657 = vmatmul.mubr.msk.bf16.gmra.mrb[48].mxu0 %vm6222_vm11, %v19679_v6  ;;  %v19683_v6 = vld [vmem:[#allocation3 + $0xb4] sm:$0xff]   ;;  %v14559_v8 = vrot.slane %v14558_v44, 4  ;;  %v25824_v47 = vrot.slane %v14575_v17, 5  ;;  %v26857_v44 = vld [vmem:[#allocation51_spill] sm:$0xff] }
 0x78e   : > { %18660 = vmatprep.mubr.msk.bf16.mxu0 %vm6222_vm11, %v19680_v41  ;;  %v17212_v41 = vcombine.low %v14434_v46, %v14444_v14  ;;  %v14585_v17 = vshll.u32 %v26857_v44, 16 }
 0x795   : > { %18661 = vmatmul.mubr.msk.bf16.gmra.mrb[52].mxu0 %vm6222_vm11, %v19681_v19  ;;  %v25779_v19 = vld [vmem:[#allocation3 + $0xd0] sm:$0xf] }
 0x796   : > { %18664 = vmatprep.mubr.msk.bf16.mxu0 %vm6222_vm11, %v19682_v61  ;;  %v25781_v61 = vld [vmem:[#allocation3 + $0xd4] sm:$0x1]  ;;  %v15270_v10 = vrot.slane %v25779_v19, 5 }
 0x797   : > { %v15273_v54 = vrot.slane %v25781_v61, 5 }
 0x798   : > { %v15272_v14 = vrot.slane %v15270_v10, 4  ;;  %v25795_v46 = vsel %vm20304_vm7, %v17259_v11, %v15270_v10  ;;  %v14523_v10 = vrot.slane %v14521_v30, 5  ;;  %v14501_v11 = vrot.slane %v14500_v49, 4 }
 0x799   : > { %v14581_v49 = vrot.slane %v14579_v7, 4 }
 0x79a   : > { %v25799_v21 = vsel %vm20304_vm7, %v15272_v14, %v15273_v54  ;;  %v14537_v14 = vshll.u32 %v26855_v3, 16  ;;  %v14524_v30 = vor.u32 %v14523_v10, %v14520_v58  ;;  %v14617_v3 = vshll.u32 %v14397_v55, 16 }
 0x79b   : > { %v17276_v23 = vcombine.low %v25795_v46, %v25799_v21 }
 0x79c   : > { %v14539_v59 = vrot.slane %v14537_v14, 5 }
 0x79d   : > { %18665 = vmatmul.mubr.msk.bf16.gmra.mrb[56].mxu0 %vm6222_vm11, %v19683_v6  ;;  %v14545_v6 = vshll.u32 %v14388_v15, 16  ;;  %v14566_v15 = vshrl.u32 %v14391_v35, 16  ;;  %v14394_v35 = vld [vmem:[#allocation3 + $0x6c] sm:$0xf] }
 0x79e   : > { %18668 = vmatprep.mubr.msk.bf16.mxu0 %vm6222_vm11, %v19684_v38  ;;  %v14468_v38 = vsel %vm20078_vm4, %v14463_v16, %v14467_v56  ;;  %v14534_v56 = vor.u32 %v14533_v20, %v25791_v0  ;;  %v14544_v16 = vrot.slane %v14542_v9, 4  ;;  %v14590_v10 = vshrl.u32 %v14394_v35, 16 }
 0x79f   : > { %v14547_v54 = vrot.slane %v14545_v6, 5  ;;  %v17213_v1 = vcombine.low %v14458_v63, %v14468_v38  ;;  %v26856_v63 = vld [vmem:[#allocation69_spill] sm:$0xff]  ;;  %v14568_v38 = vrot.slane %v14566_v15, 4 }
 0x7a0   : > { %v14561_v20 = vshll.u32 %v26856_v63, 16  ;;  %v14535_v9 = vrot.slane %v14534_v56, 4  ;;  %v14593_v56 = vshll.u32 %v14394_v35, 16  ;;  %v14592_v14 = vrot.slane %v14590_v10, 4 }
 0x7a1   : > { %v14548_v6 = vor.u32 %v14547_v54, %v14544_v16  ;;  %v14525_v54 = vrot.slane %v14524_v30, 4  ;;  %v14587_v35 = vrot.slane %v14585_v17, 5 }
 0x7a2   : > { %v14563_v58 = vrot.slane %v14561_v20, 5 }
 0x7a3   : > { %v14549_v15 = vrot.slane %v14548_v6, 4  ;;  %v14530_v20 = vsel %vm20078_vm4, %v14525_v54, %v25791_v0 }
 0x7a4   : > { %v14564_v36 = vsel %vm20078_vm4, %v14559_v8, %v14563_v58 }
 0x7a5   : > { %18669 = vmatmul.mubr.msk.bf16.gmra.mrb[60].mxu0 %vm6222_vm11, %v19685_v18  ;;  %v14511_v18 = vrot.slane %v14510_v13, 4  ;;  %v14506_v13 = vsel %vm20078_vm4, %v14501_v11, %v25789_v51  ;;  %v14582_v51 = vor.u32 %v14581_v49, %v25824_v47  ;;  %v14614_v11 = vshrl.u32 %v14397_v55, 16  ;;  %v26860_v55 = vld [vmem:[#allocation67_spill] sm:$0xff] }
 0x7a6   : > { %18674 = vmatprep.mubr.msk.bf16.mxu0 %vm6222_vm11, %v17212_v41  ;;  %v14492_v41 = vsel %vm20078_vm4, %v14487_v37, %v14491_v27  ;;  %v14599_v27 = vshll.u32 %v25363_v40, 16  ;;  %v14603_v37 = vshrl.u32 %v25363_v40, 16  ;;  %v14540_v40 = vsel %vm20078_vm4, %v14535_v9, %v14539_v59 }
 0x7a7   : > { %v17214_v33 = vcombine.low %v14482_v39, %v14492_v41  ;;  %v14516_v16 = vsel %vm20078_vm4, %v14511_v18, %v14515_v52  ;;  %v14595_v52 = vrot.slane %v14593_v56, 5  ;;  %v26858_v41 = vld [vmem:[#allocation57_spill] sm:$0xff]  ;;  %v14554_v9 = vsel %vm20078_vm4, %v14549_v15, %v25803_v28 }
 0x7a8   : > { %v25841_v7 = vrot.slane %v14599_v27, 5  ;;  %v14605_v39 = vrot.slane %v14603_v37, 4  ;;  %v14623_v18 = vshll.u32 %v26858_v41, 16  ;;  %v14627_v30 = vshrl.u32 %v26858_v41, 16  ;;  %v14403_v27 = vld [vmem:[#allocation3 + $0x90] sm:$0xf] }
 0x7a9   : > { %v17215_v63 = vcombine.low %v14506_v13, %v14516_v16  ;;  %v17216_v6 = vcombine.low %v14530_v20, %v14540_v40  ;;  %v14583_v8 = vrot.slane %v14582_v51, 4  ;;  %v14619_v59 = vrot.slane %v14617_v3, 5  ;;  %v26859_v13 = vld [vmem:[#allocation55_spill] sm:$0xff] }
 0x7aa   : > { %v14606_v49 = vor.u32 %v14605_v39, %v25841_v7  ;;  %v14596_v37 = vor.u32 %v14595_v52, %v14592_v14  ;;  %v14609_v0 = vshll.u32 %v26859_v13, 16  ;;  %v14625_v58 = vrot.slane %v14623_v18, 5  ;;  %v26862_v41 = vld [vmem:[#allocation63_spill] sm:$0xff] }
 0x7ab   : > { %v14629_v10 = vrot.slane %v14627_v30, 4  ;;  %v14647_v16 = vshll.u32 %v26860_v55, 16  ;;  %v14651_v54 = vshrl.u32 %v26860_v55, 16  ;;  %v14662_v40 = vshrl.u32 %v14403_v27, 16 }
 0x7ac   : > { %v14665_v15 = vshll.u32 %v14403_v27, 16  ;;  %v14588_v17 = vsel %vm20078_vm4, %v14583_v8, %v14587_v35  ;;  %v14607_v39 = vrot.slane %v14606_v49, 4  ;;  %v14597_v3 = vrot.slane %v14596_v37, 4 }
 0x7ad   : > { %18675 = vmatmul.mubr.msk.bf16.vlgmr.msra.gmra.mrb[32].mxu0 %vm6222_vm11, %v17213_v1  ;;  %v14572_v1 = vor.u32 %v14571_v60, %v14568_v38  ;;  %v17217_v38 = vcombine.low %v14554_v9, %v14564_v36  ;;  %v26861_v36 = vld [vmem:[#allocation74_spill] sm:$0xff]  ;;  %v14611_v14 = vrot.slane %v14609_v0, 5  ;;  %v14630_v52 = vor.u32 %v14629_v10, %v14625_v58 }
 0x7ae   : > { %18707 = vmatpush3.bf16.msra.mxu0 %v15374_v62  ;;  %18678 = vmatprep.mubr.msk.bf16.mxu0 %vm6222_vm11, %v17214_v33  ;;  %v14400_v62 = vld [vmem:[#allocation3 + $0x84] sm:$0xf]  ;;  %v14616_v33 = vrot.slane %v14614_v11, 4  ;;  %v14675_v51 = vshrl.u32 %v26861_v36, 16  ;;  %v14633_v18 = vshll.u32 %v26862_v41, 16  ;;  %v25865_v20 = vrot.slane %v14647_v16, 5 }
 0x7af   : > { %v14573_v60 = vrot.slane %v14572_v1, 4  ;;  %v14638_v28 = vshrl.u32 %v14400_v62, 16  ;;  %v14641_v56 = vshll.u32 %v14400_v62, 16  ;;  %v14671_v1 = vshll.u32 %v26861_v36, 16  ;;  %v14409_v36 = vld [vmem:[#allocation3 + $0xa8] sm:$0xf] }
 0x7b0   : > { %v14620_v11 = vor.u32 %v14619_v59, %v14616_v33  ;;  %v14653_v9 = vrot.slane %v14651_v54, 4  ;;  %v14667_v62 = vrot.slane %v14665_v15, 5  ;;  %v14612_v35 = vsel %vm20078_vm4, %v14607_v39, %v14611_v14  ;;  %v26863_v54 = vld [vmem:[#allocation73_spill] sm:$0xff] }
 0x7b1   : > { %v14578_v44 = vsel %vm20078_vm4, %v14573_v60, %v25824_v47  ;;  %v14640_v30 = vrot.slane %v14638_v28, 4  ;;  %v25867_v27 = vrot.slane %v14671_v1, 5  ;;  %v14677_v47 = vrot.slane %v14675_v51, 4  ;;  %v14406_v60 = vld [vmem:[#allocation3 + $0x9c] sm:$0xf] }
 0x7b2   : > { %v17218_v13 = vcombine.low %v14578_v44, %v14588_v17  ;;  %v14621_v8 = vrot.slane %v14620_v11, 4  ;;  %v14602_v49 = vsel %vm20078_vm4, %v14597_v3, %v25841_v7  ;;  %v14631_v33 = vrot.slane %v14630_v52, 4 }
 0x7b3   : > { %v14654_v37 = vor.u32 %v14653_v9, %v25865_v20  ;;  %v14686_v0 = vshrl.u32 %v14406_v60, 16  ;;  %v14689_v10 = vshll.u32 %v14406_v60, 16  ;;  %v17219_v28 = vcombine.low %v14602_v49, %v14612_v35 }
 0x7b4   : > { %v14678_v16 = vor.u32 %v14677_v47, %v25867_v27  ;;  %v14695_v7 = vshll.u32 %v25441_v50, 16  ;;  %v14699_v15 = vshrl.u32 %v25441_v50, 16  ;;  %v14681_v51 = vshll.u32 %v25422_v4, 16 }
 0x7b5   : > { %18679 = vmatmul.mubr.msk.bf16.gmra.mrb[36].mxu0 %vm6222_vm11, %v17215_v63  ;;  %v14643_v63 = vrot.slane %v14641_v56, 5  ;;  %v14635_v56 = vrot.slane %v14633_v18, 5  ;;  %v14719_v44 = vshll.u32 %v25452_v22, 16  ;;  %v14723_v17 = vshrl.u32 %v25452_v22, 16  ;;  %v14412_v22 = vld [vmem:[#allocation3 + $0xb4] sm:$0xf] }
 0x7b6   : > { %18682 = vmatprep.mubr.msk.bf16.mxu0 %vm6222_vm11, %v17216_v6  ;;  %v14664_v6 = vrot.slane %v14662_v40, 4  ;;  %v14657_v40 = vshll.u32 %v26863_v54, 16  ;;  %v14655_v11 = vrot.slane %v14654_v37, 4  ;;  %v14688_v3 = vrot.slane %v14686_v0, 4 }
 0x7b7   : > { %v14644_v59 = vor.u32 %v14643_v63, %v14640_v30  ;;  %v14636_v1 = vsel %vm20078_vm4, %v14631_v33, %v14635_v56  ;;  %v14679_v52 = vrot.slane %v14678_v16, 4  ;;  %v14710_v41 = vshrl.u32 %v14409_v36, 16 }
 0x7b8   : > { %v14668_v55 = vor.u32 %v14667_v62, %v14664_v6  ;;  %v14713_v18 = vshll.u32 %v14409_v36, 16  ;;  %v14659_v50 = vrot.slane %v14657_v40, 5  ;;  %v25888_v63 = vrot.slane %v14695_v7, 5 }
 0x7b9   : > { %v14645_v39 = vrot.slane %v14644_v59, 4  ;;  %v14701_v9 = vrot.slane %v14699_v15, 4  ;;  %v14683_v4 = vrot.slane %v14681_v51, 5  ;;  %v25891_v6 = vrot.slane %v14719_v44, 5  ;;  %v19955_v15 = vld [vmem:[#allocation3 + $0xb0] sm:$0x1] }
 0x7ba   : > { %v14669_v14 = vrot.slane %v14668_v55, 4  ;;  %v14725_v62 = vrot.slane %v14723_v17, 4  ;;  %v14660_v60 = vsel %vm20078_vm4, %v14655_v11, %v14659_v50  ;;  %v14705_v35 = vshll.u32 %v25450_v48, 16  ;;  %v14418_v44 = vld [vmem:[#allocation3 + $0xcc] sm:$0xf] }
 0x7bb   : > { %v14650_v47 = vsel %vm20078_vm4, %v14645_v39, %v25865_v20  ;;  %v14684_v49 = vsel %vm20078_vm4, %v14679_v52, %v14683_v4  ;;  %v14712_v33 = vrot.slane %v14710_v41, 4  ;;  %v14715_v59 = vrot.slane %v14713_v18, 5 }
 0x7bc   : > { %v14702_v37 = vor.u32 %v14701_v9, %v25888_v63  ;;  %v14734_v0 = vshrl.u32 %v14412_v22, 16  ;;  %v14743_v20 = vshll.u32 %v25477_v24, 16  ;;  %v14726_v56 = vor.u32 %v14725_v62, %v25891_v6 }
 0x7bd   : > { %18683 = vmatmul.mubr.msk.bf16.gmra.mrb[40].mxu0 %vm6222_vm11, %v17217_v38  ;;  %v14626_v38 = vsel %vm20078_vm4, %v14621_v8, %v14625_v58  ;;  %v14691_v58 = vrot.slane %v14689_v10, 5  ;;  %v14674_v8 = vsel %vm20078_vm4, %v14669_v14, %v25867_v27  ;;  %v14747_v10 = vshrl.u32 %v25477_v24, 16 }
 0x7be   : > { %18686 = vmatprep.mubr.msk.bf16.mxu0 %vm6222_vm11, %v17218_v13  ;;  %v17220_v30 = vcombine.low %v14626_v38, %v14636_v1  ;;  %v14737_v48 = vshll.u32 %v14412_v22, 16  ;;  %v14767_v55 = vshll.u32 %v25492_v29, 16  ;;  %v14771_v27 = vshrl.u32 %v25492_v29, 16 }
 0x7bf   : > { %v14692_v13 = vor.u32 %v14691_v58, %v14688_v3  ;;  %v17221_v16 = vcombine.low %v14650_v47, %v14660_v60  ;;  %v17222_v38 = vcombine.low %v14674_v8, %v14684_v49  ;;  %v14707_v40 = vrot.slane %v14705_v35, 5  ;;  %v19956_v8 = vld [vmem:[#allocation3 + $0xbc] sm:$0x1] }
 0x7c0   : > { %v14716_v7 = vor.u32 %v14715_v59, %v14712_v33  ;;  %v14729_v36 = vshll.u32 %v19955_v15, 16  ;;  %v14703_v17 = vrot.slane %v14702_v37, 4  ;;  %v14736_v24 = vrot.slane %v14734_v0, 4 }
 0x7c1   : > { %v14693_v54 = vrot.slane %v14692_v13, 4  ;;  %v14745_v39 = vrot.slane %v14743_v20, 5  ;;  %v14749_v11 = vrot.slane %v14747_v10, 4  ;;  %v14727_v3 = vrot.slane %v14726_v56, 4 }
 0x7c2   : > { %v14739_v58 = vrot.slane %v14737_v48, 5  ;;  %v14769_v14 = vrot.slane %v14767_v55, 5  ;;  %v14773_v29 = vrot.slane %v14771_v27, 4  ;;  %v14782_v52 = vshrl.u32 %v14418_v44, 16 }
 0x7c3   : > { %v14785_v41 = vshll.u32 %v14418_v44, 16  ;;  %v14791_v18 = vshll.u32 %v25779_v19, 16  ;;  %v14717_v50 = vrot.slane %v14716_v7, 4  ;;  %v14731_v9 = vrot.slane %v14729_v36, 5 }
 0x7c4   : > { %v14698_v22 = vsel %vm20078_vm4, %v14693_v54, %v25888_v63  ;;  %v14708_v47 = vsel %vm20078_vm4, %v14703_v17, %v14707_v40  ;;  %v14750_v60 = vor.u32 %v14749_v11, %v14745_v39  ;;  %v14740_v35 = vor.u32 %v14739_v58, %v14736_v24 }
 0x7c5   : > { %18687 = vmatmul.mubr.msk.bf16.gmra.mrb[44].mxu0 %vm6222_vm11, %v17219_v28  ;;  %v14415_v28 = vld [vmem:[#allocation3 + $0xc0] sm:$0xf]  ;;  %v14732_v13 = vsel %vm20078_vm4, %v14727_v3, %v14731_v9  ;;  %v14753_v49 = vshll.u32 %v19956_v8, 16  ;;  %v14774_v33 = vor.u32 %v14773_v29, %v14769_v14  ;;  %v14787_v59 = vrot.slane %v14785_v41, 5  ;;  %v26865_v41 = vld [vmem:[#allocation61_spill] sm:$0xff]  ;;  %v26879_v8 = vld [vmem:[#allocation71_spill] sm:$0xff] }
 0x7c6   : > { %18690 = vmatprep.mubr.msk.bf16.mxu0 %vm6222_vm11, %v17220_v30  ;;  %v14758_v1 = vshrl.u32 %v14415_v28, 16  ;;  %v14761_v51 = vshll.u32 %v14415_v28, 16  ;;  %v14795_v30 = vshrl.u32 %v25779_v19, 16  ;;  %v14784_v19 = vrot.slane %v14782_v52, 4  ;;  %v19957_v28 = vld [vmem:[#allocation3 + $0xc8] sm:$0x1] }
 0x7c7   : > { %v14793_v37 = vrot.slane %v14791_v18, 5  ;;  %v17223_v20 = vcombine.low %v14698_v22, %v14708_v47  ;;  %v14722_v63 = vsel %vm20078_vm4, %v14717_v50, %v25891_v6  ;;  %v14777_v56 = vshll.u32 %v19957_v28, 16  ;;  %v26870_v9 = vld [vmem:[#allocation49_spill] sm:$0xff]  ;;  %v26874_v22 = vld [vmem:[#allocation64_spill] sm:$0xff] }
 0x7c8   : > { %v14760_v4 = vrot.slane %v14758_v1, 4  ;;  %v14763_v62 = vrot.slane %v14761_v51, 5  ;;  %v14797_v0 = vrot.slane %v14795_v30, 4  ;;  %v17224_v48 = vcombine.low %v14722_v63, %v14732_v13  ;;  %v26868_v30 = vld [vmem:[#allocation66_spill] sm:$0xff]  ;;  %v26877_v13 = vld [vmem:[#allocation68_spill] sm:$0xff]  ;;  %v26887_v63 = vld [vmem:[#allocation79_spill] sm:$0xff] }
 0x7c9   : > { %v14751_v55 = vrot.slane %v14750_v60, 4  ;;  %v14755_v27 = vrot.slane %v14753_v49, 5  ;;  %v14788_v54 = vor.u32 %v14787_v59, %v14784_v19  ;;  %v14801_v7 = vshll.u32 %v25781_v61, 16  ;;  %v26876_v60 = vld [vmem:[#allocation62_spill] sm:$0xff]  ;;  %v26880_v49 = vld [vmem:[#allocation75_spill] sm:$0xff]  ;;  %v26882_v19 = vld [vmem:[#allocation76_spill] sm:$0xff] }
 0x7ca   : > { %v14764_v10 = vor.u32 %v14763_v62, %v14760_v4  ;;  %v14798_v40 = vor.u32 %v14797_v0, %v14793_v37  ;;  %v14779_v36 = vrot.slane %v14777_v56, 5  ;;  %v26871_v4 = vld [vmem:[#allocation54_spill] sm:$0xff]  ;;  %v26875_v47 = vcombine.low %v26873_v32, %v26874_v22  ;;  %v26883_v59 = vld [vmem:[#allocation77_spill] sm:$0xff] }
 0x7cb   : > { %v14756_v6 = vsel %vm20078_vm4, %v14751_v55, %v14755_v27  ;;  %v14789_v44 = vrot.slane %v14788_v54, 4  ;;  %v14803_v24 = vrot.slane %v14801_v7, 5  ;;  %v26872_v62 = vcombine.low %v26870_v9, %v26871_v4  ;;  %v26885_v0 = vld [vmem:[#allocation78_spill] sm:$0xff]  ;;  %v26890_v56 = vld [vmem:[#allocation81_spill] sm:$0xff]  ;;  %v26893_v27 = vld [vmem:[#allocation12_spill] sm:$0xff] }
 0x7cc   : > { %v14765_v15 = vrot.slane %v14764_v10, 4  ;;  %v14799_v17 = vrot.slane %v14798_v40, 4  ;;  %v26888_v10 = vld [vmem:[#allocation80_spill] sm:$0xff] }
 0x7cd   : > { %18691 = vmatmul.mubr.msk.bf16.gmra.mrb[48].mxu0 %vm6222_vm11, %v17221_v16  ;;  %v14775_v16 = vrot.slane %v14774_v33, 4  ;;  %v14794_v61 = vsel %vm20078_vm4, %v14789_v44, %v14793_v37  ;;  %v26881_v33 = vcombine.low %v26879_v8, %v26880_v49  ;;  %v26884_v37 = vcombine.low %v26882_v19, %v26883_v59 }
 0x7ce   : > { %18694 = vmatprep.mubr.msk.bf16.mxu0 %vm6222_vm11, %v17222_v38  ;;  %v14741_v38 = vrot.slane %v14740_v35, 4  ;;  %v14770_v3 = vsel %vm20078_vm4, %v14765_v15, %v14769_v14  ;;  %v14804_v29 = vsel %vm20078_vm4, %v14799_v17, %v14803_v24  ;;  %v26867_v14 = vld [vmem:[#allocation70_spill] sm:$0xff]  ;;  %v26878_v35 = vcombine.low %v26876_v60, %v26877_v13 }
 0x7cf   : > { %v14780_v1 = vsel %vm20078_vm4, %v14775_v16, %v14779_v36  ;;  %v17227_v52 = vcombine.low %v14794_v61, %v14804_v29  ;;  %v26869_v50 = vcombine.low %v26867_v14, %v26868_v30  ;;  %v26889_v28 = vcombine.low %v26887_v63, %v26888_v10  ;;  %v26894_v16 = vld [vmem:[#allocation13_spill] sm:$0xff] }
 0x7d0   : > { %v14746_v51 = vsel %vm20078_vm4, %v14741_v38, %v14745_v39  ;;  %v17226_v58 = vcombine.low %v14770_v3, %v14780_v1  ;;  %v26864_v39 = vld [vmem:[#allocation60_spill] sm:$0xff]  ;;  %v26895_v38 = vcombine.low %v26893_v27, %v26894_v16 }
 0x7d1   : > { %v17225_v11 = vcombine.low %v14746_v51, %v14756_v6  ;;  %v26866_v18 = vcombine.low %v26864_v39, %v26865_v41 }
 0x7d5   : > { %18695 = vmatmul.mubr.msk.bf16.gmra.mrb[52].mxu0 %vm6222_vm11, %v17223_v20  ;;  %v26886_v20 = vcombine.low %v25445_v45, %v26885_v0  ;;  %v26896_v45 = vcombine.low %v25534_v43, %v25538_v53 }
 0x7d6   : > { %18698 = vmatprep.mubr.msk.bf16.mxu0 %vm6222_vm11, %v17224_v48  ;;  %v26891_v48 = vld [vmem:[#allocation14_spill] sm:$0xff] }
 0x7d7   : > { %v26892_v55 = vcombine.low %v26890_v56, %v26891_v48 }
 0x7dd   : > { %18699 = vmatmul.mubr.msk.bf16.gmra.mrb[56].mxu0 %vm6222_vm11, %v17225_v11 }
 0x7de   : > { %18702 = vmatprep.mubr.msk.bf16.mxu0 %vm6222_vm11, %v17226_v58 }
 0x7e5   : > { %18703 = vmatmul.mubr.msk.bf16.gmra.mrb[60].mxu0 %vm6222_vm11, %v17227_v52 }
 0x7e6   : > { %18708 = vmatprep.mubr.msk.bf16.mxu0 %vm6222_vm11, %v26866_v18 }
 0x7ed   : > { %18709 = vmatmul.mubr.msk.bf16.vlgmr.msra.gmra.mrb[32].mxu0 %vm6222_vm11, %v26869_v50 }
 0x7ee   : > { %18712 = vmatprep.mubr.msk.bf16.mxu0 %vm6222_vm11, %v26872_v62 }
 0x7f5   : > { %18713 = vmatmul.mubr.msk.bf16.gmra.mrb[36].mxu0 %vm6222_vm11, %v26875_v47 }
 0x7f6   : > { %18716 = vmatprep.mubr.msk.bf16.mxu0 %vm6222_vm11, %v26878_v35 }
 0x7fd   : > { %18717 = vmatmul.mubr.msk.bf16.gmra.mrb[40].mxu0 %vm6222_vm11, %v26881_v33 }
 0x7fe   : > { %18720 = vmatprep.mubr.msk.bf16.mxu0 %vm6222_vm11, %v26884_v37 }
 0x805   : > { %18721 = vmatmul.mubr.msk.bf16.gmra.mrb[44].mxu0 %vm6222_vm11, %v26886_v20 }
 0x806   : > { %18724 = vmatprep.mubr.msk.bf16.mxu0 %vm6222_vm11, %v26889_v28 }
 0x80d   : > { %18725 = vmatmul.mubr.msk.bf16.gmra.mrb[48].mxu0 %vm6222_vm11, %v26892_v55 }
 0x80e   : > { %18728 = vmatprep.mubr.msk.bf16.mxu0 %vm6222_vm11, %v26895_v38 }
 0x815   : > { %18729 = vmatmul.mubr.msk.bf16.gmra.mrb[52].mxu0 %vm6222_vm11, %v17272_v25 }
 0x816   : > { %18732 = vmatprep.mubr.msk.bf16.mxu0 %vm6222_vm11, %v17273_v2 }
 0x81d   : > { %18733 = vmatmul.mubr.msk.bf16.gmra.mrb[56].mxu0 %vm6222_vm11, %v26896_v45 }
 0x81e   : > { %18736 = vmatprep.mubr.msk.bf16.mxu0 %vm6222_vm11, %v17275_v42 }
 0x825   : > { %18737 = vmatmul.mubr.msk.bf16.gmra.mrb[60].mxu0 %vm6222_vm11, %v17276_v23 }
 0x8c0   : > { %v18710_v57 = vpop.f32.mrb[32].mxu0 }
 0x8c1   : > { %v15578_v12 = vadd.f32 %v18710_v57, %v26010_v31  ;;  %v15410_v25 = vpop.f32.mrb[33].mxu0 }
 0x8c2   : > { %v15576_v5 = vadd.f32 %v26010_v31, %v15410_v25  ;;  %v18711_v2 = vpop.f32.mrb[34].mxu0 }
 0x8c3   : > { %v15642_v43 = vmul.f32 0.70710677, %v15578_v12  ;;  %v15579_v53 = vadd.f32 %v18711_v2, %v26010_v31  ;;  %v15413_v42 = vpop.f32.mrb[35].mxu0  ;;  %v15610_v58 = vmul.f32 0.5, %v15578_v12 }
 0x8c4   : > { %v15640_v26 = vmul.f32 0.70710677, %v15576_v5  ;;  %v15577_v34 = vadd.f32 %v26010_v31, %v15413_v42  ;;  %v15608_v39 = vmul.f32 0.5, %v15576_v5 }
 0x8c5   : > { %19814 = verf.f32 %v15642_v43  ;;  %v15643_v46 = vmul.f32 0.70710677, %v15579_v53  ;;  %v15611_v9 = vmul.f32 0.5, %v15579_v53 }
 0x8c6   : > { %19816 = verf.f32 %v15640_v26  ;;  %v15641_v21 = vmul.f32 0.70710677, %v15577_v34  ;;  %v15609_v47 = vmul.f32 0.5, %v15577_v34 }
 0x8c7   : > { %19818 = verf.f32 %v15643_v46 }
 0x8c8   : > { %19820 = verf.f32 %v15641_v21  ;;  %v18714_v23 = vpop.f32.mrb[36].mxu0 }
 0x8c9   : > { %v15582_v54 = vadd.f32 %v18714_v23, %v26010_v31  ;;  %v15426_v40 = vpop.f32.mrb[37].mxu0 }
 0x8ca   : > { %v15580_v7 = vadd.f32 %v26010_v31, %v15426_v40  ;;  %v18715_v15 = vpop.f32.mrb[38].mxu0 }
 0x8cb   : > { %v15646_v36 = vmul.f32 0.70710677, %v15582_v54  ;;  %v15583_v6 = vadd.f32 %v18715_v15, %v26010_v31  ;;  %v15429_v1 = vpop.f32.mrb[39].mxu0  ;;  %v15614_v10 = vmul.f32 0.5, %v15582_v54 }
 0x8cc   : > { %v15644_v51 = vmul.f32 0.70710677, %v15580_v7  ;;  %v15581_v44 = vadd.f32 %v26010_v31, %v15429_v1  ;;  %v15612_v55 = vmul.f32 0.5, %v15580_v7 }
 0x8cd   : > { %19822 = verf.f32 %v15646_v36  ;;  %v15647_v17 = vmul.f32 0.70710677, %v15583_v6  ;;  %v15615_v12 = vmul.f32 0.5, %v15583_v6 }
 0x8ce   : > { %19824 = verf.f32 %v15644_v51  ;;  %v15645_v24 = vmul.f32 0.70710677, %v15581_v44  ;;  %v15613_v53 = vmul.f32 0.5, %v15581_v44 }
 0x8cf   : > { %v19815_v11 = vpop.eup %19814  ;;  %19826 = verf.f32 %v15647_v17 }
 0x8d0   : > { %v19817_v3 = vpop.eup %19816  ;;  %v15706_v61 = vadd.f32 1.0, %v19815_v11  ;;  %19828 = verf.f32 %v15645_v24  ;;  %v18718_v29 = vpop.f32.mrb[40].mxu0 }
 0x8d1   : > { %v19819_v52 = vpop.eup %19818  ;;  %v15704_v41 = vadd.f32 1.0, %v19817_v3  ;;  %v26021_v18 = vadd.f32 %v18718_v29, %v26010_v31  ;;  %v15442_v14 = vpop.f32.mrb[41].mxu0 }
 0x8d2   : > { %v19821_v30 = vpop.eup %19820  ;;  %v15738_v50 = vmul.f32 %v15706_v61, %v15610_v58  ;;  %v15707_v4 = vadd.f32 1.0, %v19819_v52  ;;  %v26024_v62 = vadd.f32 %v26010_v31, %v15442_v14  ;;  %v18719_v32 = vpop.f32.mrb[42].mxu0 }
 0x8d3   : > { %v15736_v22 = vmul.f32 %v15704_v41, %v15608_v39  ;;  %v15705_v60 = vadd.f32 1.0, %v19821_v30  ;;  %v15650_v13 = vmul.f32 0.70710677, %v26021_v18  ;;  %v15445_v35 = vpop.f32.mrb[43].mxu0  ;;  %v26030_v33 = vadd.f32 %v18719_v32, %v26010_v31  ;;  %v26068_v30 = vld [vmem:[%s26230_s7] ss:$0 sm:$0xff] }
 0x8d4   : > { %15770 = vst.msk [vmem:[#allocation4 + $0x10] sm:$0xff] %vm6222_vm11, %v15738_v50  ;;  %v15739_v8 = vmul.f32 %v15707_v4, %v15611_v9  ;;  %v15648_v49 = vmul.f32 0.70710677, %v26024_v62  ;;  %v26034_v59 = vadd.f32 %v26010_v31, %v15445_v35  ;;  %v15618_v24 = vmul.f32 0.5, %v26021_v18  ;;  %v26077_v32 = vld [vmem:[%s26231_s8] ss:$0 sm:$0xff] }
 0x8d5   : > { %15768 = vst.msk [vmem:[#allocation4] sm:$0xff] %vm6222_vm11, %v15736_v22  ;;  %v15737_v19 = vmul.f32 %v15705_v60, %v15609_v47  ;;  %19830 = verf.f32 %v15650_v13  ;;  %v15651_v37 = vmul.f32 0.70710677, %v26030_v33  ;;  %v15616_v3 = vmul.f32 0.5, %v26024_v62 }
 0x8d6   : > { %15771 = vst.msk [vmem:[#allocation4 + $0x18] sm:$0xff] %vm6222_vm11, %v15739_v8  ;;  %19832 = verf.f32 %v15648_v49  ;;  %v15649_v20 = vmul.f32 0.70710677, %v26034_v59  ;;  %v15619_v47 = vmul.f32 0.5, %v26030_v33  ;;  %v15617_v35 = vmul.f32 0.5, %v26034_v59 }
 0x8d7   : > { %v19823_v0 = vpop.eup %19822  ;;  %15769 = vst.msk [vmem:[#allocation4 + $0x8] sm:$0xff] %vm6222_vm11, %v15737_v19  ;;  %19834 = verf.f32 %v15651_v37 }
 0x8d8   : > { %v19825_v63 = vpop.eup %19824  ;;  %v15710_v28 = vadd.f32 1.0, %v19823_v0  ;;  %v18722_v56 = vpop.f32.mrb[44].mxu0  ;;  %19836 = verf.f32 %v15649_v20 }
 0x8d9   : > { %v19827_v48 = vpop.eup %19826  ;;  %v15708_v27 = vadd.f32 1.0, %v19825_v63  ;;  %v26041_v16 = vadd.f32 %v18722_v56, %v26010_v31  ;;  %v15458_v38 = vpop.f32.mrb[45].mxu0 }
 0x8da   : > { %v19829_v45 = vpop.eup %19828  ;;  %v15742_v57 = vmul.f32 %v15710_v28, %v15614_v10  ;;  %v15711_v25 = vadd.f32 1.0, %v19827_v48  ;;  %v26044_v5 = vadd.f32 %v26010_v31, %v15458_v38  ;;  %v18723_v2 = vpop.f32.mrb[46].mxu0 }
 0x8db   : > { %v15740_v43 = vmul.f32 %v15708_v27, %v15612_v55  ;;  %v15709_v42 = vadd.f32 1.0, %v19829_v45  ;;  %v15654_v26 = vmul.f32 0.70710677, %v26041_v16  ;;  %v15461_v34 = vpop.f32.mrb[47].mxu0  ;;  %v26050_v23 = vadd.f32 %v18723_v2, %v26010_v31 }
 0x8dc   : > { %15774 = vst.msk [vmem:[#allocation4 + $0x30] sm:$0xff] %vm6222_vm11, %v15742_v57  ;;  %v15743_v46 = vmul.f32 %v15711_v25, %v15615_v12  ;;  %v15652_v21 = vmul.f32 0.70710677, %v26044_v5  ;;  %v26054_v40 = vadd.f32 %v26010_v31, %v15461_v34  ;;  %v15622_v38 = vmul.f32 0.5, %v26041_v16 }
 0x8dd   : > { %15772 = vst.msk [vmem:[#allocation4 + $0x20] sm:$0xff] %vm6222_vm11, %v15740_v43  ;;  %v15741_v54 = vmul.f32 %v15709_v42, %v15613_v53  ;;  %19838 = verf.f32 %v15654_v26  ;;  %v15655_v1 = vmul.f32 0.70710677, %v26050_v23  ;;  %v15840_v17 = vld [vmem:[#allocation4 + $0x10] ss:$2 sm:$0xff]  ;;  %v15620_v2 = vmul.f32 0.5, %v26044_v5 }
 0x8de   : > { %v15800_v7 = vld [vmem:[#allocation4] ss:$2 sm:$0xff]  ;;  %v15816_v15 = vld [vmem:[#allocation4 + $0x1] ss:$2 sm:$0xff]  ;;  %15775 = vst.msk [vmem:[#allocation4 + $0x38] sm:$0xff] %vm6222_vm11, %v15743_v46  ;;  %19840 = verf.f32 %v15652_v21  ;;  %v15623_v5 = vmul.f32 0.5, %v26050_v23 }
 0x8df   : > { %v19831_v36 = vpop.eup %19830  ;;  %v15831_v6 = vmax.f32 %v15800_v7, %v15816_v15  ;;  %15773 = vst.msk [vmem:[#allocation4 + $0x28] sm:$0xff] %vm6222_vm11, %v15741_v54  ;;  %v15653_v51 = vmul.f32 0.70710677, %v26054_v40  ;;  %19842 = verf.f32 %v15655_v1  ;;  %v15864_v14 = vld [vmem:[#allocation4 + $0x11] ss:$2 sm:$0xff] }
 0x8e0   : > { %v19833_v44 = vpop.eup %19832  ;;  %v15714_v11 = vadd.f32 1.0, %v19831_v36  ;;  %v18726_v58 = vpop.f32.mrb[48].mxu0 }
 0x8e1   : > { %v15855_v61 = vmax.f32 %v15831_v6, %v15840_v17  ;;  %v15712_v29 = vadd.f32 1.0, %v19833_v44  ;;  %v26063_v52 = vadd.f32 %v18726_v58, %v26010_v31  ;;  %v15474_v39 = vpop.f32.mrb[49].mxu0  ;;  %v19835_v41 = vpop.eup %19834  ;;  %19844 = verf.f32 %v15653_v51 }
 0x8e2   : > { %v15746_v18 = vmul.f32 %v15714_v11, %v15618_v24  ;;  %v26071_v50 = vadd.f32 %v26010_v31, %v15474_v39  ;;  %v18727_v9 = vpop.f32.mrb[50].mxu0  ;;  %v19837_v4 = vpop.eup %19836  ;;  %v15715_v60 = vadd.f32 1.0, %v19835_v41  ;;  %v15621_v24 = vmul.f32 0.5, %v26054_v40 }
 0x8e3   : > { %v15879_v62 = vmax.f32 %v15855_v61, %v15864_v14  ;;  %v15744_v22 = vmul.f32 %v15712_v29, %v15616_v3  ;;  %v15477_v13 = vpop.f32.mrb[51].mxu0  ;;  %v15713_v8 = vadd.f32 1.0, %v19837_v4  ;;  %v15658_v49 = vmul.f32 0.70710677, %v26063_v52 }
 0x8e4   : > { %15778 = vst.msk [vmem:[#allocation4 + $0x50] sm:$0xff] %vm6222_vm11, %v15746_v18  ;;  %v15656_v19 = vmul.f32 0.70710677, %v26071_v50  ;;  %v15747_v0 = vmul.f32 %v15715_v60, %v15619_v47  ;;  %v26087_v20 = vadd.f32 %v18727_v9, %v26010_v31  ;;  %v26090_v33 = vadd.f32 %v26010_v31, %v15477_v13 }
 0x8e5   : > { %v15894_v37 = vmul.f32 %v26068_v30, %v15879_v62  ;;  %15776 = vst.msk [vmem:[#allocation4 + $0x40] sm:$0xff] %vm6222_vm11, %v15744_v22  ;;  %v15745_v10 = vmul.f32 %v15713_v8, %v15617_v35  ;;  %19846 = verf.f32 %v15658_v49  ;;  %v15842_v48 = vld [vmem:[#allocation4 + $0x30] ss:$2 sm:$0xff]  ;;  %v15866_v42 = vld [vmem:[#allocation4 + $0x31] ss:$2 sm:$0xff]  ;;  %v15626_v40 = vmul.f32 0.5, %v26063_v52 }
 0x8e6   : > { %v15802_v59 = vld [vmem:[#allocation4 + $0x20] ss:$2 sm:$0xff]  ;;  %v15818_v63 = vld [vmem:[#allocation4 + $0x21] ss:$2 sm:$0xff]  ;;  %15779 = vst.msk [vmem:[#allocation4 + $0x58] sm:$0xff] %vm6222_vm11, %v15747_v0  ;;  %19848 = verf.f32 %v15656_v19  ;;  %v15624_v13 = vmul.f32 0.5, %v26071_v50 }
 0x8e7   : > { %v19839_v28 = vpop.eup %19838  ;;  %v15909_v56 = vadd.f32 %v26077_v32, %v15894_v37  ;;  %v15832_v55 = vmax.f32 %v15802_v59, %v15818_v63  ;;  %15777 = vst.msk [vmem:[#allocation4 + $0x48] sm:$0xff] %vm6222_vm11, %v15745_v10  ;;  %v15659_v57 = vmul.f32 0.70710677, %v26087_v20  ;;  %v15657_v12 = vmul.f32 0.70710677, %v26090_v33 }
 0x8e8   : > { %v19841_v27 = vpop.eup %19840  ;;  %v15718_v45 = vadd.f32 1.0, %v19839_v28  ;;  %v18730_v53 = vpop.f32.mrb[52].mxu0 }
 0x8e9   : > { %15917 = vst.msk [vmem:[%s26095_s13] sm:$0xff] %vm6222_vm11, %v15909_v56  ;;  %v15856_v25 = vmax.f32 %v15832_v55, %v15842_v48  ;;  %v15716_v43 = vadd.f32 1.0, %v19841_v27  ;;  %19850 = verf.f32 %v15659_v57  ;;  %v26107_v34 = vadd.f32 %v18730_v53, %v26010_v31  ;;  %v15490_v46 = vpop.f32.mrb[53].mxu0  ;;  %v19843_v16 = vpop.eup %19842 }
 0x8ea   : > { %v15750_v26 = vmul.f32 %v15718_v45, %v15622_v38  ;;  %19852 = verf.f32 %v15657_v12  ;;  %v26110_v7 = vadd.f32 %v26010_v31, %v15490_v46  ;;  %v18731_v15 = vpop.f32.mrb[54].mxu0  ;;  %v15719_v6 = vadd.f32 1.0, %v19843_v16 }
 0x8eb   : > { %v15880_v21 = vmax.f32 %v15856_v25, %v15866_v42  ;;  %v15748_v54 = vmul.f32 %v15716_v43, %v15620_v2  ;;  %v19845_v36 = vpop.eup %19844  ;;  %v15662_v1 = vmul.f32 0.70710677, %v26107_v34  ;;  %v26116_v51 = vadd.f32 %v18731_v15, %v26010_v31  ;;  %v15493_v44 = vpop.f32.mrb[55].mxu0 }
 0x8ec   : > { %15782 = vst.msk [vmem:[#allocation4 + $0x70] sm:$0xff] %vm6222_vm11, %v15750_v26  ;;  %v15717_v11 = vadd.f32 1.0, %v19845_v36  ;;  %v15660_v3 = vmul.f32 0.70710677, %v26110_v7  ;;  %v15751_v58 = vmul.f32 %v15719_v6, %v15623_v5  ;;  %v26123_v23 = vadd.f32 %v26010_v31, %v15493_v44 }
 0x8ed   : > { %v15895_v17 = vmul.f32 %v26068_v30, %v15880_v21  ;;  %15780 = vst.msk [vmem:[#allocation4 + $0x60] sm:$0xff] %vm6222_vm11, %v15748_v54  ;;  %19854 = verf.f32 %v15662_v1  ;;  %v15663_v14 = vmul.f32 0.70710677, %v26116_v51  ;;  %v15844_v47 = vld [vmem:[#allocation4 + $0x50] ss:$2 sm:$0xff]  ;;  %v15627_v55 = vmul.f32 0.5, %v26087_v20 }
 0x8ee   : > { %v15804_v29 = vld [vmem:[#allocation4 + $0x40] ss:$2 sm:$0xff]  ;;  %v15820_v39 = vld [vmem:[#allocation4 + $0x41] ss:$2 sm:$0xff]  ;;  %v15749_v41 = vmul.f32 %v15717_v11, %v15621_v24  ;;  %19856 = verf.f32 %v15660_v3  ;;  %15783 = vst.msk [vmem:[#allocation4 + $0x78] sm:$0xff] %vm6222_vm11, %v15751_v58  ;;  %v15625_v57 = vmul.f32 0.5, %v26090_v33 }
 0x8ef   : > { %v15910_v61 = vadd.f32 %v26077_v32, %v15895_v17  ;;  %v19847_v18 = vpop.eup %19846  ;;  %v15833_v9 = vmax.f32 %v15804_v29, %v15820_v39  ;;  %v15661_v4 = vmul.f32 0.70710677, %v26123_v23  ;;  %19858 = verf.f32 %v15663_v14  ;;  %v15868_v0 = vld [vmem:[#allocation4 + $0x51] ss:$2 sm:$0xff] }
 0x8f0   : > { %v18734_v62 = vpop.f32.mrb[56].mxu0  ;;  %v19849_v22 = vpop.eup %19848  ;;  %15781 = vst.msk [vmem:[#allocation4 + $0x68] sm:$0xff] %vm6222_vm11, %v15749_v41  ;;  %v15722_v60 = vadd.f32 1.0, %v19847_v18  ;;  %v15630_v16 = vmul.f32 0.5, %v26107_v34  ;;  %v15628_v17 = vmul.f32 0.5, %v26110_v7  ;;  %v15631_v18 = vmul.f32 0.5, %v26116_v51 }
 0x8f1   : > { %15918 = vst.msk [vmem:[%s26095_s13 + $0x8] sm:$0xff] %vm6222_vm11, %v15910_v61  ;;  %v26135_v35 = vadd.f32 %v18734_v62, %v26010_v31  ;;  %v15506_v8 = vpop.f32.mrb[57].mxu0  ;;  %v15857_v49 = vmax.f32 %v15833_v9, %v15844_v47  ;;  %v15720_v19 = vadd.f32 1.0, %v19849_v22  ;;  %19860 = verf.f32 %v15661_v4 }
 0x8f2   : > { %v26138_v52 = vadd.f32 %v26010_v31, %v15506_v8  ;;  %v18735_v37 = vpop.f32.mrb[58].mxu0  ;;  %v15754_v59 = vmul.f32 %v15722_v60, %v15626_v40  ;;  %v15629_v7 = vmul.f32 0.5, %v26123_v23 }
 0x8f3   : > { %v15666_v63 = vmul.f32 0.70710677, %v26135_v35  ;;  %v26142_v10 = vadd.f32 %v18735_v37, %v26010_v31  ;;  %v15509_v50 = vpop.f32.mrb[59].mxu0  ;;  %v19851_v28 = vpop.eup %19850  ;;  %v15881_v56 = vmax.f32 %v15857_v49, %v15868_v0  ;;  %v15752_v48 = vmul.f32 %v15720_v19, %v15624_v13 }
 0x8f4   : > { %v15664_v27 = vmul.f32 0.70710677, %v26138_v52  ;;  %v19853_v38 = vpop.eup %19852  ;;  %15786 = vst.msk [vmem:[#allocation4 + $0x90] sm:$0xff] %vm6222_vm11, %v15754_v59  ;;  %v15723_v45 = vadd.f32 1.0, %v19851_v28  ;;  %v26152_v43 = vadd.f32 %v26010_v31, %v15509_v50  ;;  %v15634_v23 = vmul.f32 0.5, %v26135_v35 }
 0x8f5   : > { %19862 = verf.f32 %v15666_v63  ;;  %v15667_v12 = vmul.f32 0.70710677, %v26142_v10  ;;  %v15896_v25 = vmul.f32 %v26068_v30, %v15881_v56  ;;  %15784 = vst.msk [vmem:[#allocation4 + $0x80] sm:$0xff] %vm6222_vm11, %v15752_v48  ;;  %v15721_v2 = vadd.f32 1.0, %v19853_v38  ;;  %v15846_v44 = vld [vmem:[#allocation4 + $0x70] ss:$2 sm:$0xff] }
 0x8f6   : > { %19864 = verf.f32 %v15664_v27  ;;  %v15755_v20 = vmul.f32 %v15723_v45, %v15627_v55  ;;  %v15665_v5 = vmul.f32 0.70710677, %v26152_v43  ;;  %v15870_v41 = vld [vmem:[#allocation4 + $0x71] ss:$2 sm:$0xff]  ;;  %v15632_v0 = vmul.f32 0.5, %v26138_v52 }
 0x8f7   : > { %19866 = verf.f32 %v15667_v12  ;;  %v19855_v53 = vpop.eup %19854  ;;  %v15911_v42 = vadd.f32 %v26077_v32, %v15896_v25  ;;  %v15806_v26 = vld [vmem:[#allocation4 + $0x60] ss:$2 sm:$0xff]  ;;  %v15822_v33 = vld [vmem:[#allocation4 + $0x61] ss:$2 sm:$0xff]  ;;  %v15753_v46 = vmul.f32 %v15721_v2, %v15625_v57  ;;  %v15635_v56 = vmul.f32 0.5, %v26142_v10 }
 0x8f8   : > { %v18738_v21 = vpop.f32.mrb[60].mxu0  ;;  %v19857_v54 = vpop.eup %19856  ;;  %v15834_v15 = vmax.f32 %v15806_v26, %v15822_v33  ;;  %15787 = vst.msk [vmem:[#allocation4 + $0x98] sm:$0xff] %vm6222_vm11, %v15755_v20  ;;  %v15726_v36 = vadd.f32 1.0, %v19855_v53  ;;  %19868 = verf.f32 %v15665_v5  ;;  %v15633_v20 = vmul.f32 0.5, %v26152_v43 }
 0x8f9   : > { %v26159_v6 = vadd.f32 %v18738_v21, %v26010_v31  ;;  %v15522_v1 = vpop.f32.mrb[61].mxu0  ;;  %15919 = vst.msk [vmem:[%s26095_s13 + $0x10] sm:$0xff] %vm6222_vm11, %v15911_v42  ;;  %15785 = vst.msk [vmem:[#allocation4 + $0x88] sm:$0xff] %vm6222_vm11, %v15753_v46  ;;  %v15724_v34 = vadd.f32 1.0, %v19857_v54  ;;  %v19859_v3 = vpop.eup %19858 }
 0x8fa   : > { %v26166_v24 = vadd.f32 %v26010_v31, %v15522_v1  ;;  %v18739_v11 = vpop.f32.mrb[62].mxu0  ;;  %v15858_v58 = vmax.f32 %v15834_v15, %v15846_v44  ;;  %v15758_v61 = vmul.f32 %v15726_v36, %v15630_v16  ;;  %v15727_v9 = vadd.f32 1.0, %v19859_v3 }
 0x8fb   : > { %v15525_v29 = vpop.f32.mrb[63].mxu0  ;;  %v19861_v39 = vpop.eup %19860  ;;  %v15756_v14 = vmul.f32 %v15724_v34, %v15628_v17  ;;  %v15670_v40 = vmul.f32 0.70710677, %v26159_v6  ;;  %v26175_v60 = vadd.f32 %v18739_v11, %v26010_v31  ;;  %v15638_v15 = vmul.f32 0.5, %v26159_v6 }
 0x8fc   : > { %v15882_v4 = vmax.f32 %v15858_v58, %v15870_v41  ;;  %15790 = vst.msk [vmem:[#allocation4 + $0xb0] sm:$0xff] %vm6222_vm11, %v15758_v61  ;;  %v15725_v62 = vadd.f32 1.0, %v19861_v39  ;;  %v15668_v22 = vmul.f32 0.70710677, %v26166_v24  ;;  %v15759_v47 = vmul.f32 %v15727_v9, %v15631_v18 }
 0x8fd   : > { %15788 = vst.msk [vmem:[#allocation4 + $0xa0] sm:$0xff] %vm6222_vm11, %v15756_v14  ;;  %19870 = verf.f32 %v15670_v40  ;;  %v26178_v51 = vadd.f32 %v26010_v31, %v15525_v29  ;;  %v15671_v38 = vmul.f32 0.70710677, %v26175_v60  ;;  %v15636_v43 = vmul.f32 0.5, %v26166_v24 }
 0x8fe   : > { %v15897_v8 = vmul.f32 %v26068_v30, %v15882_v4  ;;  %v15757_v49 = vmul.f32 %v15725_v62, %v15629_v7  ;;  %19872 = verf.f32 %v15668_v22  ;;  %15791 = vst.msk [vmem:[#allocation4 + $0xb8] sm:$0xff] %vm6222_vm11, %v15759_v47  ;;  %v15639_v39 = vmul.f32 0.5, %v26175_v60 }
 0x8ff   : > { %v19863_v13 = vpop.eup %19862  ;;  %v15848_v35 = vld [vmem:[#allocation4 + $0x90] ss:$2 sm:$0xff]  ;;  %v15669_v52 = vmul.f32 0.70710677, %v26178_v51  ;;  %19874 = verf.f32 %v15671_v38  ;;  %v15872_v2 = vld [vmem:[#allocation4 + $0x91] ss:$2 sm:$0xff] }
 0x900   : > { %v19865_v19 = vpop.eup %19864  ;;  %v15730_v37 = vadd.f32 1.0, %v19863_v13  ;;  %v15912_v63 = vadd.f32 %v26077_v32, %v15897_v8  ;;  %v15808_v50 = vld [vmem:[#allocation4 + $0x80] ss:$2 sm:$0xff]  ;;  %v15824_v31 = vld [vmem:[#allocation4 + $0x81] ss:$2 sm:$0xff]  ;;  %15789 = vst.msk [vmem:[#allocation4 + $0xa8] sm:$0xff] %vm6222_vm11, %v15757_v49 }
 0x901   : > { %v19867_v59 = vpop.eup %19866  ;;  %v15728_v28 = vadd.f32 1.0, %v19865_v19  ;;  %v15835_v48 = vmax.f32 %v15808_v50, %v15824_v31  ;;  %19876 = verf.f32 %v15669_v52  ;;  %v15637_v41 = vmul.f32 0.5, %v26178_v51 }
 0x902   : > { %v15762_v55 = vmul.f32 %v15730_v37, %v15634_v23  ;;  %v15731_v27 = vadd.f32 1.0, %v19867_v59  ;;  %15920 = vst.msk [vmem:[%s26095_s13 + $0x18] sm:$0xff] %vm6222_vm11, %v15912_v63  ;;  %v19869_v25 = vpop.eup %19868 }
 0x903   : > { %v15760_v45 = vmul.f32 %v15728_v28, %v15632_v0  ;;  %v15859_v57 = vmax.f32 %v15835_v48, %v15848_v35  ;;  %v15729_v53 = vadd.f32 1.0, %v19869_v25 }
 0x904   : > { %15794 = vst.msk [vmem:[#allocation4 + $0xd0] sm:$0xff] %vm6222_vm11, %v15762_v55  ;;  %v15763_v12 = vmul.f32 %v15731_v27, %v15635_v56 }
 0x905   : > { %15792 = vst.msk [vmem:[#allocation4 + $0xc0] sm:$0xff] %vm6222_vm11, %v15760_v45  ;;  %v15883_v10 = vmax.f32 %v15859_v57, %v15872_v2  ;;  %v15761_v16 = vmul.f32 %v15729_v53, %v15633_v20  ;;  %v15850_v1 = vld [vmem:[#allocation4 + $0xb0] ss:$2 sm:$0xff]  ;;  %v15874_v11 = vld [vmem:[#allocation4 + $0xb1] ss:$2 sm:$0xff] }
 0x906   : > { %15795 = vst.msk [vmem:[#allocation4 + $0xd8] sm:$0xff] %vm6222_vm11, %v15763_v12 }
 0x907   : > { %v19871_v42 = vpop.eup %19870  ;;  %v15898_v26 = vmul.f32 %v26068_v30, %v15883_v10  ;;  %v15810_v33 = vld [vmem:[#allocation4 + $0xa0] ss:$2 sm:$0xff]  ;;  %v15826_v46 = vld [vmem:[#allocation4 + $0xa1] ss:$2 sm:$0xff]  ;;  %15793 = vst.msk [vmem:[#allocation4 + $0xc8] sm:$0xff] %vm6222_vm11, %v15761_v16 }
 0x908   : > { %v19873_v21 = vpop.eup %19872  ;;  %v15836_v54 = vmax.f32 %v15810_v33, %v15826_v46  ;;  %v15734_v36 = vadd.f32 1.0, %v19871_v42 }
 0x909   : > { %v15913_v5 = vadd.f32 %v26077_v32, %v15898_v26  ;;  %v15732_v44 = vadd.f32 1.0, %v19873_v21  ;;  %v19875_v6 = vpop.eup %19874 }
 0x90a   : > { %v15860_v17 = vmax.f32 %v15836_v54, %v15850_v1  ;;  %v15766_v34 = vmul.f32 %v15734_v36, %v15638_v15  ;;  %v15735_v24 = vadd.f32 1.0, %v19875_v6 }
 0x90b   : > { %15921 = vst.msk [vmem:[%s26095_s13 + $0x20] sm:$0xff] %vm6222_vm11, %v15913_v5  ;;  %v15764_v3 = vmul.f32 %v15732_v44, %v15636_v43  ;;  %v19877_v61 = vpop.eup %19876 }
 0x90c   : > { %v15884_v58 = vmax.f32 %v15860_v17, %v15874_v11  ;;  %15798 = vst.msk [vmem:[#allocation4 + $0xf0] sm:$0xff] %vm6222_vm11, %v15766_v34  ;;  %v15733_v14 = vadd.f32 1.0, %v19877_v61  ;;  %v15767_v4 = vmul.f32 %v15735_v24, %v15639_v39 }
 0x90d   : > { %15796 = vst.msk [vmem:[#allocation4 + $0xe0] sm:$0xff] %vm6222_vm11, %v15764_v3  ;;  %v15852_v22 = vld [vmem:[#allocation4 + $0xd0] ss:$2 sm:$0xff]  ;;  %v15876_v60 = vld [vmem:[#allocation4 + $0xd1] ss:$2 sm:$0xff] }
 0x90e   : > { %v15899_v29 = vmul.f32 %v26068_v30, %v15884_v58  ;;  %v15812_v9 = vld [vmem:[#allocation4 + $0xc0] ss:$2 sm:$0xff]  ;;  %v15828_v40 = vld [vmem:[#allocation4 + $0xc1] ss:$2 sm:$0xff]  ;;  %v15765_v62 = vmul.f32 %v15733_v14, %v15637_v41  ;;  %15799 = vst.msk [vmem:[#allocation4 + $0xf8] sm:$0xff] %vm6222_vm11, %v15767_v4 }
 0x90f   : > { %v15837_v7 = vmax.f32 %v15812_v9, %v15828_v40 }
 0x910   : > { %v15914_v18 = vadd.f32 %v26077_v32, %v15899_v29  ;;  %15797 = vst.msk [vmem:[#allocation4 + $0xe8] sm:$0xff] %vm6222_vm11, %v15765_v62 }
 0x911   : > { %v15861_v47 = vmax.f32 %v15837_v7, %v15852_v22 }
 0x912   : > { %15922 = vst.msk [vmem:[%s26095_s13 + $0x28] sm:$0xff] %vm6222_vm11, %v15914_v18 }
 0x913   : > { %v15885_v51 = vmax.f32 %v15861_v47, %v15876_v60 }
 0x915   : > { %v15900_v13 = vmul.f32 %v26068_v30, %v15885_v51  ;;  %v15854_v37 = vld [vmem:[#allocation4 + $0xf0] ss:$2 sm:$0xff]  ;;  %v15878_v59 = vld [vmem:[#allocation4 + $0xf1] ss:$2 sm:$0xff] }
 0x917   : > { %v15915_v8 = vadd.f32 %v26077_v32, %v15900_v13  ;;  %v15814_v49 = vld [vmem:[#allocation4 + $0xe0] ss:$2 sm:$0xff]  ;;  %v15830_v19 = vld [vmem:[#allocation4 + $0xe1] ss:$2 sm:$0xff] }
 0x918   : > { %v15838_v23 = vmax.f32 %v15814_v49, %v15830_v19 }
 0x919   : > { %15923 = vst.msk [vmem:[%s26095_s13 + $0x30] sm:$0xff] %vm6222_vm11, %v15915_v8 }
 0x91a   : > { %v15862_v0 = vmax.f32 %v15838_v23, %v15854_v37 }
 0x91c   : > { %v15886_v63 = vmax.f32 %v15862_v0, %v15878_v59 }
 0x91e   : > { %v15901_v50 = vmul.f32 %v26068_v30, %v15886_v63 }
 0x920   : > { %v15916_v31 = vadd.f32 %v26077_v32, %v15901_v50 }
 0x922   : > { %15924 = vst.msk [vmem:[%s26095_s13 + $0x38] sm:$0xff] %vm6222_vm11, %v15916_v31 }
 0x923 PF: > { %s19_s30 = sadd.s32 1, %s19964_s30  }
 0x924   : > { %p16_p4 = scmp.ge.s32.totalorder %s19_s30, 4  }
 0x926   :  { %18 = sbr.rel (!%p16_p4) target bundleno = 1 (0x1), region = 147 }

</bundles_post_ra>
